<compile_context>
chip_gen: v7x
topology: tpu7x:2x2x1
jax: 0.10.0
libtpu: 0.0.40
codegen_flags: <defaults>
</compile_context>

<pallas_src>
import functools

import jax
import jax.numpy as jnp
from jax.experimental import pallas as pl
from jax.experimental.pallas import tpu as pltpu


def _layer_norm(x, g, b, eps=1e-5):
    mu = jnp.mean(x, axis=-1, keepdims=True)
    var = jnp.mean((x - mu) ** 2, axis=-1, keepdims=True)
    return (x - mu) * jax.lax.rsqrt(var + eps) * g + b


def encoder_layer_kernel(x_ref, mask_ref, ln_g_ref, ln_b_ref,
                         w_qkvf_ref, b_qkvf_ref, wo_ref, bo_ref,
                         w2_ref, b2_ref, o_ref, *,
                         num_heads, normalize_before):
    T, Bb, E = x_ref.shape                         # (seq, batch_block, embed)
    F = w2_ref.shape[0]
    H = num_heads
    Dh = E // H
    scaling = Dh ** -0.5
    rows = T * Bb

    x3 = x_ref[...].astype(jnp.float32)            # (T, Bb, E)
    x2 = x3.reshape(rows, E)                       # row = t*Bb + b (t-major)

    g = ln_g_ref[...]                              # (1, E)
    beta = ln_b_ref[...]
    xn = _layer_norm(x2, g, beta) if normalize_before else x2
    xn_bf = xn.astype(jnp.bfloat16)

    # --- one fused wide bf16 matmul:  xn @ [Wq | Wk | Wv | W1] -> (rows, 3E+F) ---
    proj = jnp.dot(xn_bf, w_qkvf_ref[...],
                   preferred_element_type=jnp.float32) + b_qkvf_ref[...]
    q = proj[:, 0:E] * scaling
    k = proj[:, E:2 * E]
    v = proj[:, 2 * E:3 * E]
    h1 = jnp.maximum(proj[:, 3 * E:], 0.0)         # relu(fc1(xn))

    # --- FFN second projection on the full row block ---
    x_ffn = (jnp.dot(h1.astype(jnp.bfloat16), w2_ref[...],
                     preferred_element_type=jnp.float32) + b2_ref[...])
    x_ffn3 = x_ffn.reshape(T, Bb, E)

    # --- self-attention: heads batched into leading-batch einsums per column ---
    q3 = q.reshape(T, Bb, E).astype(jnp.bfloat16)
    k3 = k.reshape(T, Bb, E).astype(jnp.bfloat16)
    v3 = v.reshape(T, Bb, E).astype(jnp.bfloat16)
    bias = jnp.where(mask_ref[...] > 0,
                     jnp.float32(-1e30), jnp.float32(0.0))        # (Bb, T)

    attn_rows = []
    for b in range(Bb):                            # static, Bb is small
        qb = q3[:, b:b + 1, :].reshape(T, E)
        kb = k3[:, b:b + 1, :].reshape(T, E)
        vb = v3[:, b:b + 1, :].reshape(T, E)
        # head-major stacks (H, T, Dh) built from static slices (no transpose)
        qh = jnp.stack([qb[:, h * Dh:(h + 1) * Dh] for h in range(H)], axis=0)
        kh = jnp.stack([kb[:, h * Dh:(h + 1) * Dh] for h in range(H)], axis=0)
        vh = jnp.stack([vb[:, h * Dh:(h + 1) * Dh] for h in range(H)], axis=0)

        s = jnp.einsum('htd,hsd->hts', qh, kh,
                       preferred_element_type=jnp.float32)        # (H, T, T)
        s = s + bias[b:b + 1, :].reshape(1, 1, T)
        s = s - jnp.max(s, axis=-1, keepdims=True)
        p = jnp.exp(s)
        p = p * pl.reciprocal(jnp.sum(p, axis=-1, keepdims=True), approx=True)
        o = jnp.einsum('hts,hsd->htd', p.astype(jnp.bfloat16), vh,
                       preferred_element_type=jnp.float32)        # (H, T, Dh)
        attn_rows.append(jnp.concatenate([o[h] for h in range(H)], axis=-1))

    # batch-major (Bb*T, E) slab so the output projection also sees full rows
    attn_bm = jnp.stack(attn_rows, axis=0).reshape(Bb * T, E)
    x_att_bm = (jnp.dot(attn_bm.astype(jnp.bfloat16), wo_ref[...],
                        preferred_element_type=jnp.float32) + bo_ref[...])

    # --- combine branches + residual, (maybe) post-LN, store per batch column ---
    for b in range(Bb):
        y_b = (x_att_bm[b * T:(b + 1) * T, :]
               + x_ffn3[:, b:b + 1, :].reshape(T, E)
               + x3[:, b:b + 1, :].reshape(T, E))
        if not normalize_before:
            y_b = _layer_norm(y_b, g, beta)
        o_ref[:, b:b + 1, :] = y_b.reshape(T, 1, E).astype(o_ref.dtype)


def _choose_batch_block(B, T):
    """Batch-block size that (a) divides B, (b) keeps the block's second-minor
    dim either the full batch dim or a multiple of 8 (TPU (8,128) tiling rule
    for the (T, B, E) layout), (c) leaves >= 2 grid steps when possible, and
    (d) gives the matmuls enough rows to fill the MXU."""
    cands = [c for c in range(1, B + 1) if B % c == 0 and (c % 8 == 0 or c == B)]
    multi = [c for c in cands if B // c >= 2]
    pool = multi if multi else cands
    filled = [c for c in pool if c * T >= 128]
    return min(filled) if filled else max(pool)


def transformer_combine_encoder_layer(x_tbe, padding_mask, params, *,
                                      num_heads, normalize_before=False,
                                      batch_block=None):
    """x_tbe: (T, B, E); padding_mask: (B, T) with 1 for padding. Returns (T, B, E)."""
    T, B, E = x_tbe.shape
    F = params["w1"].shape[1]
    assert E % num_heads == 0

    if batch_block is None:
        batch_block = _choose_batch_block(B, T)
    assert B % batch_block == 0
    assert batch_block % 8 == 0 or batch_block == B
    n_blocks = B // batch_block

    # host-side weight prep: fused [Wq|Wk|Wv|W1] in bf16 (MXU fast path, halves
    # weight VMEM); biases / LN params stay f32.
    w_qkvf = jnp.concatenate(
        [params["wq"], params["wk"], params["wv"], params["w1"]],
        axis=1).astype(jnp.bfloat16)                                  # (E, 3E+F)
    b_qkvf = jnp.concatenate(
        [params["bq"], params["bk"], params["bv"], params["b1"]],
        axis=0).reshape(1, 3 * E + F).astype(jnp.float32)
    wo = params["wo"].astype(jnp.bfloat16)
    bo = params["bo"].reshape(1, E).astype(jnp.float32)
    w2 = params["w2"].astype(jnp.bfloat16)
    b2 = params["b2"].reshape(1, E).astype(jnp.float32)
    ln_g = params["ln_g"].reshape(1, E).astype(jnp.float32)
    ln_b = params["ln_b"].reshape(1, E).astype(jnp.float32)
    mask = padding_mask.astype(jnp.float32)                           # (B, T)

    # explicit scoped-VMEM budget: weights (double-buffered by the pipeline) +
    # a few activation slabs; floored at 16 MiB, capped below physical VMEM.
    def _nbytes(a):
        return a.size * a.dtype.itemsize
    weight_bytes = sum(_nbytes(a) for a in
                       (w_qkvf, b_qkvf, wo, bo, w2, b2, ln_g, ln_b))
    act_bytes = batch_block * T * (3 * E + F + 4 * E) * 4
    vmem_limit = int(min(max(2 * weight_bytes + 8 * act_bytes + (4 << 20),
                             16 << 20), 64 << 20))

    def const_spec(a):
        return pl.BlockSpec(a.shape, lambda i: (0,) * a.ndim)

    kernel = functools.partial(encoder_layer_kernel,
                               num_heads=num_heads,
                               normalize_before=normalize_before)

    out = pl.pallas_call(
        kernel,
        out_shape=jax.ShapeDtypeStruct((T, B, E), x_tbe.dtype),
        grid=(n_blocks,),
        in_specs=[
            pl.BlockSpec((T, batch_block, E), lambda i: (0, i, 0)),   # x, no transpose
            pl.BlockSpec((batch_block, T), lambda i: (i, 0)),         # padding mask
            const_spec(ln_g), const_spec(ln_b),
            const_spec(w_qkvf), const_spec(b_qkvf),
            const_spec(wo), const_spec(bo),
            const_spec(w2), const_spec(b2),
        ],
        out_specs=pl.BlockSpec((T, batch_block, E), lambda i: (0, i, 0)),
        compiler_params=pltpu.CompilerParams(
            dimension_semantics=("parallel",),    # batch blocks shard across TCs
            vmem_limit_bytes=vmem_limit),
    )(x_tbe, mask, ln_g, ln_b, w_qkvf, b_qkvf, wo, bo, w2, b2)
    return out


def reference(x_tbe, padding_mask, p, num_heads, normalize_before):
    """Pure-JAX f32 reference mirroring the PyTorch forward (eval mode)."""
    T, B, E = x_tbe.shape
    x = jnp.transpose(x_tbe, (1, 0, 2))

    def ln(v):
        mu = v.mean(-1, keepdims=True)
        var = ((v - mu) ** 2).mean(-1, keepdims=True)
        return (v - mu) / jnp.sqrt(var + 1e-5) * p["ln_g"] + p["ln_b"]

    res = x
    xn = ln(x) if normalize_before else x
    Dh = E // num_heads
    q = ((xn @ p["wq"] + p["bq"]) * (Dh ** -0.5)).reshape(B, T, num_heads, Dh)
    k = (xn @ p["wk"] + p["bk"]).reshape(B, T, num_heads, Dh)
    v = (xn @ p["wv"] + p["bv"]).reshape(B, T, num_heads, Dh)
    s = jnp.einsum("bthd,bshd->bhts", q, k)
    s = s + jnp.where(padding_mask[:, None, None, :] > 0, -1e30, 0.0)
    pr = jax.nn.softmax(s, axis=-1)
    a = jnp.einsum("bhts,bshd->bthd", pr, v).reshape(B, T, E)
    x1 = a @ p["wo"] + p["bo"]
    x2 = jax.nn.relu(xn @ p["w1"] + p["b1"]) @ p["w2"] + p["b2"]
    y = x1 + x2 + res
    if not normalize_before:
        y = ln(y)
    return jnp.transpose(y, (1, 0, 2))


if __name__ == "__main__":
    E, H, FF = 32, 4, 64

    key = jax.random.PRNGKey(0)
    ks = jax.random.split(key, 12)

    def w(k, shape, scale=0.1):
        return (scale * jax.random.normal(k, shape)).astype(jnp.float32)

    params = {
        "ln_g": jnp.ones((E,), jnp.float32),
        "ln_b": jnp.zeros((E,), jnp.float32),
        "wq": w(ks[0], (E, E)), "bq": w(ks[1], (E,), 0.02),
        "wk": w(ks[2], (E, E)), "bk": w(ks[3], (E,), 0.02),
        "wv": w(ks[4], (E, E)), "bv": w(ks[5], (E,), 0.02),
        "wo": w(ks[6], (E, E)), "bo": w(ks[7], (E,), 0.02),
        "w1": w(ks[8], (E, FF)), "b1": jnp.zeros((FF,), jnp.float32),
        "w2": w(ks[9], (FF, E)), "b2": jnp.zeros((E,), jnp.float32),
    }

    # config 1: B=16 -> batch_block=8, grid=(2,) "parallel"; post-norm (fairseq default)
    # config 2: B=2  -> batch_block=2 (full batch per step), grid=(1,); pre-norm branch
    for (T, B, normalize_before) in ((8, 16, False), (8, 2, True)):
        kx, km = jax.random.split(jax.random.fold_in(ks[10], B))
        x = jax.random.normal(kx, (T, B, E), jnp.float32)
        padding_mask = (jax.random.uniform(km, (B, T)) < 0.2).astype(jnp.float32)
        padding_mask = padding_mask.at[:, 0].set(0.0)  # keep >=1 valid key per row

        out = transformer_combine_encoder_layer(
            x, padding_mask, params,
            num_heads=H, normalize_before=normalize_before)
        out = jax.block_until_ready(out)

        ref = reference(x, padding_mask, params, H, normalize_before)
        assert out.shape == (T, B, E)
        err = float(jnp.max(jnp.abs(out - ref)))
        # kernel uses bf16 MXU inputs (f32 accumulation) -> loose tolerance vs f32 ref
        assert jnp.allclose(out, ref, rtol=5e-2, atol=5e-2), \
            f"mismatch vs reference (max abs err {err:.4g})"

    print("KERNEL_OK")
</pallas_src>

<mosaic_0001>
module attributes {stable_mosaic.version = 11 : i64} {
  func.func @encoder_layer_kernel(%arg0: i32, %arg1: memref<8x8x32xf32, #tpu.memory_space<vmem>>, %arg2: memref<8x8xf32, #tpu.memory_space<vmem>>, %arg3: memref<1x32xf32, #tpu.memory_space<vmem>>, %arg4: memref<1x32xf32, #tpu.memory_space<vmem>>, %arg5: memref<32x160xbf16, #tpu.memory_space<vmem>>, %arg6: memref<1x160xf32, #tpu.memory_space<vmem>>, %arg7: memref<32x32xbf16, #tpu.memory_space<vmem>>, %arg8: memref<1x32xf32, #tpu.memory_space<vmem>>, %arg9: memref<64x32xbf16, #tpu.memory_space<vmem>>, %arg10: memref<1x32xf32, #tpu.memory_space<vmem>>, %arg11: memref<8x8x32xf32, #tpu.memory_space<vmem>>) attributes {dimension_semantics = [#tpu.dimension_semantics<parallel>], iteration_bounds = array<i64: 2>, scalar_prefetch = 0 : i64, scratch_operands = 0 : i64, tpu.core_type = #tpu.core_type<tc>, window_params = [{transform_indices = @transform_0, window_bounds = array<i64: 8, 8, 32>}, {transform_indices = @transform_1, window_bounds = array<i64: 8, 8>}, {pipeline_mode = #tpu.pipeline_mode<synchronous>, transform_indices = @transform_2, window_bounds = array<i64: 1, 32>}, {pipeline_mode = #tpu.pipeline_mode<synchronous>, transform_indices = @transform_3, window_bounds = array<i64: 1, 32>}, {pipeline_mode = #tpu.pipeline_mode<synchronous>, transform_indices = @transform_4, window_bounds = array<i64: 32, 160>}, {pipeline_mode = #tpu.pipeline_mode<synchronous>, transform_indices = @transform_5, window_bounds = array<i64: 1, 160>}, {pipeline_mode = #tpu.pipeline_mode<synchronous>, transform_indices = @transform_6, window_bounds = array<i64: 32, 32>}, {pipeline_mode = #tpu.pipeline_mode<synchronous>, transform_indices = @transform_7, window_bounds = array<i64: 1, 32>}, {pipeline_mode = #tpu.pipeline_mode<synchronous>, transform_indices = @transform_8, window_bounds = array<i64: 64, 32>}, {pipeline_mode = #tpu.pipeline_mode<synchronous>, transform_indices = @transform_9, window_bounds = array<i64: 1, 32>}, {transform_indices = @transform_10, window_bounds = array<i64: 8, 8, 32>}]} {
    %c0 = arith.constant 0 : index
    %c0_0 = arith.constant 0 : index
    %c0_1 = arith.constant 0 : index
    %0 = vector.load %arg1[%c0, %c0_0, %c0_1] : memref<8x8x32xf32, #tpu.memory_space<vmem>>, vector<8x8x32xf32>
    %1 = vector.shape_cast %0 : vector<8x8x32xf32> to vector<64x32xf32>
    %c0_2 = arith.constant 0 : index
    %c0_3 = arith.constant 0 : index
    %2 = vector.load %arg3[%c0_2, %c0_3] : memref<1x32xf32, #tpu.memory_space<vmem>>, vector<1x32xf32>
    %c0_4 = arith.constant 0 : index
    %c0_5 = arith.constant 0 : index
    %3 = vector.load %arg4[%c0_4, %c0_5] : memref<1x32xf32, #tpu.memory_space<vmem>>, vector<1x32xf32>
    %4 = arith.truncf %1 : vector<64x32xf32> to vector<64x32xbf16>
    %c0_6 = arith.constant 0 : index
    %c0_7 = arith.constant 0 : index
    %5 = vector.load %arg5[%c0_6, %c0_7] : memref<32x160xbf16, #tpu.memory_space<vmem>>, vector<32x160xbf16>
    %cst = arith.constant dense<0.000000e+00> : vector<64x160xf32>
    %6 = tpu.matmul %4, %5, %cst {dimension_numbers = #tpu.dot_dimension_numbers<[1], [0], [0], [1], [0, 0, 1, 1], [], []>} : vector<64x32xbf16>, vector<32x160xbf16>, vector<64x160xf32> -> vector<64x160xf32>
    %c0_8 = arith.constant 0 : index
    %c0_9 = arith.constant 0 : index
    %7 = vector.load %arg6[%c0_8, %c0_9] : memref<1x160xf32, #tpu.memory_space<vmem>>, vector<1x160xf32>
    %8 = vector.broadcast %7 : vector<1x160xf32> to vector<64x160xf32>
    %9 = arith.addf %6, %8 : vector<64x160xf32>
    %10 = vector.extract_strided_slice %9 {offsets = [0, 0], sizes = [64, 32], strides = [1, 1]} : vector<64x160xf32> to vector<64x32xf32>
    %cst_10 = arith.constant 0.353553385 : f32
    %11 = vector.broadcast %cst_10 : f32 to vector<64x32xf32>
    %12 = arith.mulf %10, %11 : vector<64x32xf32>
    %13 = vector.extract_strided_slice %9 {offsets = [0, 32], sizes = [64, 32], strides = [1, 1]} : vector<64x160xf32> to vector<64x32xf32>
    %14 = vector.extract_strided_slice %9 {offsets = [0, 64], sizes = [64, 32], strides = [1, 1]} : vector<64x160xf32> to vector<64x32xf32>
    %15 = vector.extract_strided_slice %9 {offsets = [0, 96], sizes = [64, 64], strides = [1, 1]} : vector<64x160xf32> to vector<64x64xf32>
    %cst_11 = arith.constant 0.000000e+00 : f32
    %16 = vector.broadcast %cst_11 : f32 to vector<64x64xf32>
    %17 = arith.maximumf %15, %16 : vector<64x64xf32>
    %18 = arith.truncf %17 : vector<64x64xf32> to vector<64x64xbf16>
    %c0_12 = arith.constant 0 : index
    %c0_13 = arith.constant 0 : index
    %19 = vector.load %arg9[%c0_12, %c0_13] : memref<64x32xbf16, #tpu.memory_space<vmem>>, vector<64x32xbf16>
    %cst_14 = arith.constant dense<0.000000e+00> : vector<64x32xf32>
    %20 = tpu.matmul %18, %19, %cst_14 {dimension_numbers = #tpu.dot_dimension_numbers<[1], [0], [0], [1], [0, 0, 1, 1], [], []>} : vector<64x64xbf16>, vector<64x32xbf16>, vector<64x32xf32> -> vector<64x32xf32>
    %c0_15 = arith.constant 0 : index
    %c0_16 = arith.constant 0 : index
    %21 = vector.load %arg10[%c0_15, %c0_16] : memref<1x32xf32, #tpu.memory_space<vmem>>, vector<1x32xf32>
    %22 = vector.broadcast %21 : vector<1x32xf32> to vector<64x32xf32>
    %23 = arith.addf %20, %22 : vector<64x32xf32>
    %24 = vector.shape_cast %23 : vector<64x32xf32> to vector<8x8x32xf32>
    %25 = vector.shape_cast %12 : vector<64x32xf32> to vector<8x8x32xf32>
    %26 = arith.truncf %25 : vector<8x8x32xf32> to vector<8x8x32xbf16>
    %27 = vector.shape_cast %13 : vector<64x32xf32> to vector<8x8x32xf32>
    %28 = arith.truncf %27 : vector<8x8x32xf32> to vector<8x8x32xbf16>
    %29 = vector.shape_cast %14 : vector<64x32xf32> to vector<8x8x32xf32>
    %30 = arith.truncf %29 : vector<8x8x32xf32> to vector<8x8x32xbf16>
    %c0_17 = arith.constant 0 : index
    %c0_18 = arith.constant 0 : index
    %31 = vector.load %arg2[%c0_17, %c0_18] : memref<8x8xf32, #tpu.memory_space<vmem>>, vector<8x8xf32>
    %cst_19 = arith.constant 0.000000e+00 : f32
    %32 = vector.broadcast %cst_19 : f32 to vector<8x8xf32>
    %33 = arith.cmpf ogt, %31, %32 : vector<8x8xf32>
    %cst_20 = arith.constant -1.000000e+30 : f32
    %cst_21 = arith.constant 0.000000e+00 : f32
    %34 = vector.broadcast %cst_20 : f32 to vector<8x8xf32>
    %35 = vector.broadcast %cst_21 : f32 to vector<8x8xf32>
    %36 = arith.select %33, %34, %35 : vector<8x8xi1>, vector<8x8xf32>
    %37 = vector.extract_strided_slice %26 {offsets = [0, 0, 0], sizes = [8, 1, 32], strides = [1, 1, 1]} : vector<8x8x32xbf16> to vector<8x1x32xbf16>
    %38 = vector.shape_cast %37 : vector<8x1x32xbf16> to vector<8x32xbf16>
    %39 = vector.extract_strided_slice %28 {offsets = [0, 0, 0], sizes = [8, 1, 32], strides = [1, 1, 1]} : vector<8x8x32xbf16> to vector<8x1x32xbf16>
    %40 = vector.shape_cast %39 : vector<8x1x32xbf16> to vector<8x32xbf16>
    %41 = vector.extract_strided_slice %30 {offsets = [0, 0, 0], sizes = [8, 1, 32], strides = [1, 1, 1]} : vector<8x8x32xbf16> to vector<8x1x32xbf16>
    %42 = vector.shape_cast %41 : vector<8x1x32xbf16> to vector<8x32xbf16>
    %43 = vector.extract_strided_slice %38 {offsets = [0, 0], sizes = [8, 8], strides = [1, 1]} : vector<8x32xbf16> to vector<8x8xbf16>
    %44 = vector.extract_strided_slice %38 {offsets = [0, 8], sizes = [8, 8], strides = [1, 1]} : vector<8x32xbf16> to vector<8x8xbf16>
    %45 = vector.extract_strided_slice %38 {offsets = [0, 16], sizes = [8, 8], strides = [1, 1]} : vector<8x32xbf16> to vector<8x8xbf16>
    %46 = vector.extract_strided_slice %38 {offsets = [0, 24], sizes = [8, 8], strides = [1, 1]} : vector<8x32xbf16> to vector<8x8xbf16>
    %47 = vector.shape_cast %43 : vector<8x8xbf16> to vector<1x8x8xbf16>
    %48 = vector.shape_cast %44 : vector<8x8xbf16> to vector<1x8x8xbf16>
    %49 = vector.shape_cast %45 : vector<8x8xbf16> to vector<1x8x8xbf16>
    %50 = vector.shape_cast %46 : vector<8x8xbf16> to vector<1x8x8xbf16>
    %51 = tpu.concatenate %47, %48, %49, %50 in 0 : vector<1x8x8xbf16>, vector<1x8x8xbf16>, vector<1x8x8xbf16>, vector<1x8x8xbf16> -> vector<4x8x8xbf16>
    %52 = vector.extract_strided_slice %40 {offsets = [0, 0], sizes = [8, 8], strides = [1, 1]} : vector<8x32xbf16> to vector<8x8xbf16>
    %53 = vector.extract_strided_slice %40 {offsets = [0, 8], sizes = [8, 8], strides = [1, 1]} : vector<8x32xbf16> to vector<8x8xbf16>
    %54 = vector.extract_strided_slice %40 {offsets = [0, 16], sizes = [8, 8], strides = [1, 1]} : vector<8x32xbf16> to vector<8x8xbf16>
    %55 = vector.extract_strided_slice %40 {offsets = [0, 24], sizes = [8, 8], strides = [1, 1]} : vector<8x32xbf16> to vector<8x8xbf16>
    %56 = vector.shape_cast %52 : vector<8x8xbf16> to vector<1x8x8xbf16>
    %57 = vector.shape_cast %53 : vector<8x8xbf16> to vector<1x8x8xbf16>
    %58 = vector.shape_cast %54 : vector<8x8xbf16> to vector<1x8x8xbf16>
    %59 = vector.shape_cast %55 : vector<8x8xbf16> to vector<1x8x8xbf16>
    %60 = tpu.concatenate %56, %57, %58, %59 in 0 : vector<1x8x8xbf16>, vector<1x8x8xbf16>, vector<1x8x8xbf16>, vector<1x8x8xbf16> -> vector<4x8x8xbf16>
    %61 = vector.extract_strided_slice %42 {offsets = [0, 0], sizes = [8, 8], strides = [1, 1]} : vector<8x32xbf16> to vector<8x8xbf16>
    %62 = vector.extract_strided_slice %42 {offsets = [0, 8], sizes = [8, 8], strides = [1, 1]} : vector<8x32xbf16> to vector<8x8xbf16>
    %63 = vector.extract_strided_slice %42 {offsets = [0, 16], sizes = [8, 8], strides = [1, 1]} : vector<8x32xbf16> to vector<8x8xbf16>
    %64 = vector.extract_strided_slice %42 {offsets = [0, 24], sizes = [8, 8], strides = [1, 1]} : vector<8x32xbf16> to vector<8x8xbf16>
    %65 = vector.shape_cast %61 : vector<8x8xbf16> to vector<1x8x8xbf16>
    %66 = vector.shape_cast %62 : vector<8x8xbf16> to vector<1x8x8xbf16>
    %67 = vector.shape_cast %63 : vector<8x8xbf16> to vector<1x8x8xbf16>
    %68 = vector.shape_cast %64 : vector<8x8xbf16> to vector<1x8x8xbf16>
    %69 = tpu.concatenate %65, %66, %67, %68 in 0 : vector<1x8x8xbf16>, vector<1x8x8xbf16>, vector<1x8x8xbf16>, vector<1x8x8xbf16> -> vector<4x8x8xbf16>
    "tpu.trace_start"() <{level = 10 : i32, message = "htd,hsd->hts"}> : () -> ()
    %cst_22 = arith.constant dense<0.000000e+00> : vector<4x8x8xf32>
    %70 = tpu.matmul %51, %60, %cst_22 {dimension_numbers = #tpu.dot_dimension_numbers<[2], [2], [1], [1], [0, 0, 0, 1, 1, 1], [0], [0]>} : vector<4x8x8xbf16>, vector<4x8x8xbf16>, vector<4x8x8xf32> -> vector<4x8x8xf32>
    "tpu.trace_stop"() : () -> ()
    %71 = vector.extract_strided_slice %36 {offsets = [0, 0], sizes = [1, 8], strides = [1, 1]} : vector<8x8xf32> to vector<1x8xf32>
    %72 = vector.shape_cast %71 : vector<1x8xf32> to vector<1x1x8xf32>
    %73 = vector.broadcast %72 : vector<1x1x8xf32> to vector<4x8x8xf32>
    %74 = arith.addf %70, %73 : vector<4x8x8xf32>
    %cst_23 = arith.constant dense<0xFF800000> : vector<4x8xf32>
    %75 = vector.multi_reduction <maximumf>, %74, %cst_23 [2] : vector<4x8x8xf32> to vector<4x8xf32>
    %76 = vector.shape_cast %75 : vector<4x8xf32> to vector<4x8x1xf32>
    %77 = vector.broadcast %76 : vector<4x8x1xf32> to vector<4x8x8xf32>
    %78 = arith.subf %74, %77 : vector<4x8x8xf32>
    %79 = math.exp %78 : vector<4x8x8xf32>
    %cst_24 = arith.constant dense<0.000000e+00> : vector<4x8xf32>
    %80 = vector.multi_reduction <add>, %79, %cst_24 [2] : vector<4x8x8xf32> to vector<4x8xf32>
    %81 = vector.shape_cast %80 : vector<4x8xf32> to vector<4x8x1xf32>
    %82 = tpu.reciprocal %81 {approx = true} : vector<4x8x1xf32> -> vector<4x8x1xf32>
    %83 = vector.broadcast %82 : vector<4x8x1xf32> to vector<4x8x8xf32>
    %84 = arith.mulf %79, %83 : vector<4x8x8xf32>
    %85 = arith.truncf %84 : vector<4x8x8xf32> to vector<4x8x8xbf16>
    "tpu.trace_start"() <{level = 10 : i32, message = "hts,hsd->htd"}> : () -> ()
    %cst_25 = arith.constant dense<0.000000e+00> : vector<4x8x8xf32>
    %86 = tpu.matmul %85, %69, %cst_25 {dimension_numbers = #tpu.dot_dimension_numbers<[2], [1], [1], [2], [0, 0, 0, 1, 1, 2], [0], [0]>} : vector<4x8x8xbf16>, vector<4x8x8xbf16>, vector<4x8x8xf32> -> vector<4x8x8xf32>
    "tpu.trace_stop"() : () -> ()
    %87 = vector.extract_strided_slice %86 {offsets = [0, 0, 0], sizes = [1, 8, 8], strides = [1, 1, 1]} : vector<4x8x8xf32> to vector<1x8x8xf32>
    %88 = vector.shape_cast %87 : vector<1x8x8xf32> to vector<8x8xf32>
    %89 = vector.extract_strided_slice %86 {offsets = [1, 0, 0], sizes = [1, 8, 8], strides = [1, 1, 1]} : vector<4x8x8xf32> to vector<1x8x8xf32>
    %90 = vector.shape_cast %89 : vector<1x8x8xf32> to vector<8x8xf32>
    %91 = vector.extract_strided_slice %86 {offsets = [2, 0, 0], sizes = [1, 8, 8], strides = [1, 1, 1]} : vector<4x8x8xf32> to vector<1x8x8xf32>
    %92 = vector.shape_cast %91 : vector<1x8x8xf32> to vector<8x8xf32>
    %93 = vector.extract_strided_slice %86 {offsets = [3, 0, 0], sizes = [1, 8, 8], strides = [1, 1, 1]} : vector<4x8x8xf32> to vector<1x8x8xf32>
    %94 = vector.shape_cast %93 : vector<1x8x8xf32> to vector<8x8xf32>
    %95 = tpu.concatenate %88, %90, %92, %94 in 1 : vector<8x8xf32>, vector<8x8xf32>, vector<8x8xf32>, vector<8x8xf32> -> vector<8x32xf32>
    %96 = vector.extract_strided_slice %26 {offsets = [0, 1, 0], sizes = [8, 1, 32], strides = [1, 1, 1]} : vector<8x8x32xbf16> to vector<8x1x32xbf16>
    %97 = vector.shape_cast %96 : vector<8x1x32xbf16> to vector<8x32xbf16>
    %98 = vector.extract_strided_slice %28 {offsets = [0, 1, 0], sizes = [8, 1, 32], strides = [1, 1, 1]} : vector<8x8x32xbf16> to vector<8x1x32xbf16>
    %99 = vector.shape_cast %98 : vector<8x1x32xbf16> to vector<8x32xbf16>
    %100 = vector.extract_strided_slice %30 {offsets = [0, 1, 0], sizes = [8, 1, 32], strides = [1, 1, 1]} : vector<8x8x32xbf16> to vector<8x1x32xbf16>
    %101 = vector.shape_cast %100 : vector<8x1x32xbf16> to vector<8x32xbf16>
    %102 = vector.extract_strided_slice %97 {offsets = [0, 0], sizes = [8, 8], strides = [1, 1]} : vector<8x32xbf16> to vector<8x8xbf16>
    %103 = vector.extract_strided_slice %97 {offsets = [0, 8], sizes = [8, 8], strides = [1, 1]} : vector<8x32xbf16> to vector<8x8xbf16>
    %104 = vector.extract_strided_slice %97 {offsets = [0, 16], sizes = [8, 8], strides = [1, 1]} : vector<8x32xbf16> to vector<8x8xbf16>
    %105 = vector.extract_strided_slice %97 {offsets = [0, 24], sizes = [8, 8], strides = [1, 1]} : vector<8x32xbf16> to vector<8x8xbf16>
    %106 = vector.shape_cast %102 : vector<8x8xbf16> to vector<1x8x8xbf16>
    %107 = vector.shape_cast %103 : vector<8x8xbf16> to vector<1x8x8xbf16>
    %108 = vector.shape_cast %104 : vector<8x8xbf16> to vector<1x8x8xbf16>
    %109 = vector.shape_cast %105 : vector<8x8xbf16> to vector<1x8x8xbf16>
    %110 = tpu.concatenate %106, %107, %108, %109 in 0 : vector<1x8x8xbf16>, vector<1x8x8xbf16>, vector<1x8x8xbf16>, vector<1x8x8xbf16> -> vector<4x8x8xbf16>
    %111 = vector.extract_strided_slice %99 {offsets = [0, 0], sizes = [8, 8], strides = [1, 1]} : vector<8x32xbf16> to vector<8x8xbf16>
    %112 = vector.extract_strided_slice %99 {offsets = [0, 8], sizes = [8, 8], strides = [1, 1]} : vector<8x32xbf16> to vector<8x8xbf16>
    %113 = vector.extract_strided_slice %99 {offsets = [0, 16], sizes = [8, 8], strides = [1, 1]} : vector<8x32xbf16> to vector<8x8xbf16>
    %114 = vector.extract_strided_slice %99 {offsets = [0, 24], sizes = [8, 8], strides = [1, 1]} : vector<8x32xbf16> to vector<8x8xbf16>
    %115 = vector.shape_cast %111 : vector<8x8xbf16> to vector<1x8x8xbf16>
    %116 = vector.shape_cast %112 : vector<8x8xbf16> to vector<1x8x8xbf16>
    %117 = vector.shape_cast %113 : vector<8x8xbf16> to vector<1x8x8xbf16>
    %118 = vector.shape_cast %114 : vector<8x8xbf16> to vector<1x8x8xbf16>
    %119 = tpu.concatenate %115, %116, %117, %118 in 0 : vector<1x8x8xbf16>, vector<1x8x8xbf16>, vector<1x8x8xbf16>, vector<1x8x8xbf16> -> vector<4x8x8xbf16>
    %120 = vector.extract_strided_slice %101 {offsets = [0, 0], sizes = [8, 8], strides = [1, 1]} : vector<8x32xbf16> to vector<8x8xbf16>
    %121 = vector.extract_strided_slice %101 {offsets = [0, 8], sizes = [8, 8], strides = [1, 1]} : vector<8x32xbf16> to vector<8x8xbf16>
    %122 = vector.extract_strided_slice %101 {offsets = [0, 16], sizes = [8, 8], strides = [1, 1]} : vector<8x32xbf16> to vector<8x8xbf16>
    %123 = vector.extract_strided_slice %101 {offsets = [0, 24], sizes = [8, 8], strides = [1, 1]} : vector<8x32xbf16> to vector<8x8xbf16>
    %124 = vector.shape_cast %120 : vector<8x8xbf16> to vector<1x8x8xbf16>
    %125 = vector.shape_cast %121 : vector<8x8xbf16> to vector<1x8x8xbf16>
    %126 = vector.shape_cast %122 : vector<8x8xbf16> to vector<1x8x8xbf16>
    %127 = vector.shape_cast %123 : vector<8x8xbf16> to vector<1x8x8xbf16>
    %128 = tpu.concatenate %124, %125, %126, %127 in 0 : vector<1x8x8xbf16>, vector<1x8x8xbf16>, vector<1x8x8xbf16>, vector<1x8x8xbf16> -> vector<4x8x8xbf16>
    "tpu.trace_start"() <{level = 10 : i32, message = "htd,hsd->hts"}> : () -> ()
    %cst_26 = arith.constant dense<0.000000e+00> : vector<4x8x8xf32>
    %129 = tpu.matmul %110, %119, %cst_26 {dimension_numbers = #tpu.dot_dimension_numbers<[2], [2], [1], [1], [0, 0, 0, 1, 1, 1], [0], [0]>} : vector<4x8x8xbf16>, vector<4x8x8xbf16>, vector<4x8x8xf32> -> vector<4x8x8xf32>
    "tpu.trace_stop"() : () -> ()
    %130 = vector.extract_strided_slice %36 {offsets = [1, 0], sizes = [1, 8], strides = [1, 1]} : vector<8x8xf32> to vector<1x8xf32>
    %131 = vector.shape_cast %130 : vector<1x8xf32> to vector<1x1x8xf32>
    %132 = vector.broadcast %131 : vector<1x1x8xf32> to vector<4x8x8xf32>
    %133 = arith.addf %129, %132 : vector<4x8x8xf32>
    %cst_27 = arith.constant dense<0xFF800000> : vector<4x8xf32>
    %134 = vector.multi_reduction <maximumf>, %133, %cst_27 [2] : vector<4x8x8xf32> to vector<4x8xf32>
    %135 = vector.shape_cast %134 : vector<4x8xf32> to vector<4x8x1xf32>
    %136 = vector.broadcast %135 : vector<4x8x1xf32> to vector<4x8x8xf32>
    %137 = arith.subf %133, %136 : vector<4x8x8xf32>
    %138 = math.exp %137 : vector<4x8x8xf32>
    %cst_28 = arith.constant dense<0.000000e+00> : vector<4x8xf32>
    %139 = vector.multi_reduction <add>, %138, %cst_28 [2] : vector<4x8x8xf32> to vector<4x8xf32>
    %140 = vector.shape_cast %139 : vector<4x8xf32> to vector<4x8x1xf32>
    %141 = tpu.reciprocal %140 {approx = true} : vector<4x8x1xf32> -> vector<4x8x1xf32>
    %142 = vector.broadcast %141 : vector<4x8x1xf32> to vector<4x8x8xf32>
    %143 = arith.mulf %138, %142 : vector<4x8x8xf32>
    %144 = arith.truncf %143 : vector<4x8x8xf32> to vector<4x8x8xbf16>
    "tpu.trace_start"() <{level = 10 : i32, message = "hts,hsd->htd"}> : () -> ()
    %cst_29 = arith.constant dense<0.000000e+00> : vector<4x8x8xf32>
    %145 = tpu.matmul %144, %128, %cst_29 {dimension_numbers = #tpu.dot_dimension_numbers<[2], [1], [1], [2], [0, 0, 0, 1, 1, 2], [0], [0]>} : vector<4x8x8xbf16>, vector<4x8x8xbf16>, vector<4x8x8xf32> -> vector<4x8x8xf32>
    "tpu.trace_stop"() : () -> ()
    %146 = vector.extract_strided_slice %145 {offsets = [0, 0, 0], sizes = [1, 8, 8], strides = [1, 1, 1]} : vector<4x8x8xf32> to vector<1x8x8xf32>
    %147 = vector.shape_cast %146 : vector<1x8x8xf32> to vector<8x8xf32>
    %148 = vector.extract_strided_slice %145 {offsets = [1, 0, 0], sizes = [1, 8, 8], strides = [1, 1, 1]} : vector<4x8x8xf32> to vector<1x8x8xf32>
    %149 = vector.shape_cast %148 : vector<1x8x8xf32> to vector<8x8xf32>
    %150 = vector.extract_strided_slice %145 {offsets = [2, 0, 0], sizes = [1, 8, 8], strides = [1, 1, 1]} : vector<4x8x8xf32> to vector<1x8x8xf32>
    %151 = vector.shape_cast %150 : vector<1x8x8xf32> to vector<8x8xf32>
    %152 = vector.extract_strided_slice %145 {offsets = [3, 0, 0], sizes = [1, 8, 8], strides = [1, 1, 1]} : vector<4x8x8xf32> to vector<1x8x8xf32>
    %153 = vector.shape_cast %152 : vector<1x8x8xf32> to vector<8x8xf32>
    %154 = tpu.concatenate %147, %149, %151, %153 in 1 : vector<8x8xf32>, vector<8x8xf32>, vector<8x8xf32>, vector<8x8xf32> -> vector<8x32xf32>
    %155 = vector.extract_strided_slice %26 {offsets = [0, 2, 0], sizes = [8, 1, 32], strides = [1, 1, 1]} : vector<8x8x32xbf16> to vector<8x1x32xbf16>
    %156 = vector.shape_cast %155 : vector<8x1x32xbf16> to vector<8x32xbf16>
    %157 = vector.extract_strided_slice %28 {offsets = [0, 2, 0], sizes = [8, 1, 32], strides = [1, 1, 1]} : vector<8x8x32xbf16> to vector<8x1x32xbf16>
    %158 = vector.shape_cast %157 : vector<8x1x32xbf16> to vector<8x32xbf16>
    %159 = vector.extract_strided_slice %30 {offsets = [0, 2, 0], sizes = [8, 1, 32], strides = [1, 1, 1]} : vector<8x8x32xbf16> to vector<8x1x32xbf16>
    %160 = vector.shape_cast %159 : vector<8x1x32xbf16> to vector<8x32xbf16>
    %161 = vector.extract_strided_slice %156 {offsets = [0, 0], sizes = [8, 8], strides = [1, 1]} : vector<8x32xbf16> to vector<8x8xbf16>
    %162 = vector.extract_strided_slice %156 {offsets = [0, 8], sizes = [8, 8], strides = [1, 1]} : vector<8x32xbf16> to vector<8x8xbf16>
    %163 = vector.extract_strided_slice %156 {offsets = [0, 16], sizes = [8, 8], strides = [1, 1]} : vector<8x32xbf16> to vector<8x8xbf16>
    %164 = vector.extract_strided_slice %156 {offsets = [0, 24], sizes = [8, 8], strides = [1, 1]} : vector<8x32xbf16> to vector<8x8xbf16>
    %165 = vector.shape_cast %161 : vector<8x8xbf16> to vector<1x8x8xbf16>
    %166 = vector.shape_cast %162 : vector<8x8xbf16> to vector<1x8x8xbf16>
    %167 = vector.shape_cast %163 : vector<8x8xbf16> to vector<1x8x8xbf16>
    %168 = vector.shape_cast %164 : vector<8x8xbf16> to vector<1x8x8xbf16>
    %169 = tpu.concatenate %165, %166, %167, %168 in 0 : vector<1x8x8xbf16>, vector<1x8x8xbf16>, vector<1x8x8xbf16>, vector<1x8x8xbf16> -> vector<4x8x8xbf16>
    %170 = vector.extract_strided_slice %158 {offsets = [0, 0], sizes = [8, 8], strides = [1, 1]} : vector<8x32xbf16> to vector<8x8xbf16>
    %171 = vector.extract_strided_slice %158 {offsets = [0, 8], sizes = [8, 8], strides = [1, 1]} : vector<8x32xbf16> to vector<8x8xbf16>
    %172 = vector.extract_strided_slice %158 {offsets = [0, 16], sizes = [8, 8], strides = [1, 1]} : vector<8x32xbf16> to vector<8x8xbf16>
    %173 = vector.extract_strided_slice %158 {offsets = [0, 24], sizes = [8, 8], strides = [1, 1]} : vector<8x32xbf16> to vector<8x8xbf16>
    %174 = vector.shape_cast %170 : vector<8x8xbf16> to vector<1x8x8xbf16>
    %175 = vector.shape_cast %171 : vector<8x8xbf16> to vector<1x8x8xbf16>
    %176 = vector.shape_cast %172 : vector<8x8xbf16> to vector<1x8x8xbf16>
    %177 = vector.shape_cast %173 : vector<8x8xbf16> to vector<1x8x8xbf16>
    %178 = tpu.concatenate %174, %175, %176, %177 in 0 : vector<1x8x8xbf16>, vector<1x8x8xbf16>, vector<1x8x8xbf16>, vector<1x8x8xbf16> -> vector<4x8x8xbf16>
    %179 = vector.extract_strided_slice %160 {offsets = [0, 0], sizes = [8, 8], strides = [1, 1]} : vector<8x32xbf16> to vector<8x8xbf16>
    %180 = vector.extract_strided_slice %160 {offsets = [0, 8], sizes = [8, 8], strides = [1, 1]} : vector<8x32xbf16> to vector<8x8xbf16>
    %181 = vector.extract_strided_slice %160 {offsets = [0, 16], sizes = [8, 8], strides = [1, 1]} : vector<8x32xbf16> to vector<8x8xbf16>
    %182 = vector.extract_strided_slice %160 {offsets = [0, 24], sizes = [8, 8], strides = [1, 1]} : vector<8x32xbf16> to vector<8x8xbf16>
    %183 = vector.shape_cast %179 : vector<8x8xbf16> to vector<1x8x8xbf16>
    %184 = vector.shape_cast %180 : vector<8x8xbf16> to vector<1x8x8xbf16>
    %185 = vector.shape_cast %181 : vector<8x8xbf16> to vector<1x8x8xbf16>
    %186 = vector.shape_cast %182 : vector<8x8xbf16> to vector<1x8x8xbf16>
    %187 = tpu.concatenate %183, %184, %185, %186 in 0 : vector<1x8x8xbf16>, vector<1x8x8xbf16>, vector<1x8x8xbf16>, vector<1x8x8xbf16> -> vector<4x8x8xbf16>
    "tpu.trace_start"() <{level = 10 : i32, message = "htd,hsd->hts"}> : () -> ()
    %cst_30 = arith.constant dense<0.000000e+00> : vector<4x8x8xf32>
    %188 = tpu.matmul %169, %178, %cst_30 {dimension_numbers = #tpu.dot_dimension_numbers<[2], [2], [1], [1], [0, 0, 0, 1, 1, 1], [0], [0]>} : vector<4x8x8xbf16>, vector<4x8x8xbf16>, vector<4x8x8xf32> -> vector<4x8x8xf32>
    "tpu.trace_stop"() : () -> ()
    %189 = vector.extract_strided_slice %36 {offsets = [2, 0], sizes = [1, 8], strides = [1, 1]} : vector<8x8xf32> to vector<1x8xf32>
    %190 = vector.shape_cast %189 : vector<1x8xf32> to vector<1x1x8xf32>
    %191 = vector.broadcast %190 : vector<1x1x8xf32> to vector<4x8x8xf32>
    %192 = arith.addf %188, %191 : vector<4x8x8xf32>
    %cst_31 = arith.constant dense<0xFF800000> : vector<4x8xf32>
    %193 = vector.multi_reduction <maximumf>, %192, %cst_31 [2] : vector<4x8x8xf32> to vector<4x8xf32>
    %194 = vector.shape_cast %193 : vector<4x8xf32> to vector<4x8x1xf32>
    %195 = vector.broadcast %194 : vector<4x8x1xf32> to vector<4x8x8xf32>
    %196 = arith.subf %192, %195 : vector<4x8x8xf32>
    %197 = math.exp %196 : vector<4x8x8xf32>
    %cst_32 = arith.constant dense<0.000000e+00> : vector<4x8xf32>
    %198 = vector.multi_reduction <add>, %197, %cst_32 [2] : vector<4x8x8xf32> to vector<4x8xf32>
    %199 = vector.shape_cast %198 : vector<4x8xf32> to vector<4x8x1xf32>
    %200 = tpu.reciprocal %199 {approx = true} : vector<4x8x1xf32> -> vector<4x8x1xf32>
    %201 = vector.broadcast %200 : vector<4x8x1xf32> to vector<4x8x8xf32>
    %202 = arith.mulf %197, %201 : vector<4x8x8xf32>
    %203 = arith.truncf %202 : vector<4x8x8xf32> to vector<4x8x8xbf16>
    "tpu.trace_start"() <{level = 10 : i32, message = "hts,hsd->htd"}> : () -> ()
    %cst_33 = arith.constant dense<0.000000e+00> : vector<4x8x8xf32>
    %204 = tpu.matmul %203, %187, %cst_33 {dimension_numbers = #tpu.dot_dimension_numbers<[2], [1], [1], [2], [0, 0, 0, 1, 1, 2], [0], [0]>} : vector<4x8x8xbf16>, vector<4x8x8xbf16>, vector<4x8x8xf32> -> vector<4x8x8xf32>
    "tpu.trace_stop"() : () -> ()
    %205 = vector.extract_strided_slice %204 {offsets = [0, 0, 0], sizes = [1, 8, 8], strides = [1, 1, 1]} : vector<4x8x8xf32> to vector<1x8x8xf32>
    %206 = vector.shape_cast %205 : vector<1x8x8xf32> to vector<8x8xf32>
    %207 = vector.extract_strided_slice %204 {offsets = [1, 0, 0], sizes = [1, 8, 8], strides = [1, 1, 1]} : vector<4x8x8xf32> to vector<1x8x8xf32>
    %208 = vector.shape_cast %207 : vector<1x8x8xf32> to vector<8x8xf32>
    %209 = vector.extract_strided_slice %204 {offsets = [2, 0, 0], sizes = [1, 8, 8], strides = [1, 1, 1]} : vector<4x8x8xf32> to vector<1x8x8xf32>
    %210 = vector.shape_cast %209 : vector<1x8x8xf32> to vector<8x8xf32>
    %211 = vector.extract_strided_slice %204 {offsets = [3, 0, 0], sizes = [1, 8, 8], strides = [1, 1, 1]} : vector<4x8x8xf32> to vector<1x8x8xf32>
    %212 = vector.shape_cast %211 : vector<1x8x8xf32> to vector<8x8xf32>
    %213 = tpu.concatenate %206, %208, %210, %212 in 1 : vector<8x8xf32>, vector<8x8xf32>, vector<8x8xf32>, vector<8x8xf32> -> vector<8x32xf32>
    %214 = vector.extract_strided_slice %26 {offsets = [0, 3, 0], sizes = [8, 1, 32], strides = [1, 1, 1]} : vector<8x8x32xbf16> to vector<8x1x32xbf16>
    %215 = vector.shape_cast %214 : vector<8x1x32xbf16> to vector<8x32xbf16>
    %216 = vector.extract_strided_slice %28 {offsets = [0, 3, 0], sizes = [8, 1, 32], strides = [1, 1, 1]} : vector<8x8x32xbf16> to vector<8x1x32xbf16>
    %217 = vector.shape_cast %216 : vector<8x1x32xbf16> to vector<8x32xbf16>
    %218 = vector.extract_strided_slice %30 {offsets = [0, 3, 0], sizes = [8, 1, 32], strides = [1, 1, 1]} : vector<8x8x32xbf16> to vector<8x1x32xbf16>
    %219 = vector.shape_cast %218 : vector<8x1x32xbf16> to vector<8x32xbf16>
    %220 = vector.extract_strided_slice %215 {offsets = [0, 0], sizes = [8, 8], strides = [1, 1]} : vector<8x32xbf16> to vector<8x8xbf16>
    %221 = vector.extract_strided_slice %215 {offsets = [0, 8], sizes = [8, 8], strides = [1, 1]} : vector<8x32xbf16> to vector<8x8xbf16>
    %222 = vector.extract_strided_slice %215 {offsets = [0, 16], sizes = [8, 8], strides = [1, 1]} : vector<8x32xbf16> to vector<8x8xbf16>
    %223 = vector.extract_strided_slice %215 {offsets = [0, 24], sizes = [8, 8], strides = [1, 1]} : vector<8x32xbf16> to vector<8x8xbf16>
    %224 = vector.shape_cast %220 : vector<8x8xbf16> to vector<1x8x8xbf16>
    %225 = vector.shape_cast %221 : vector<8x8xbf16> to vector<1x8x8xbf16>
    %226 = vector.shape_cast %222 : vector<8x8xbf16> to vector<1x8x8xbf16>
    %227 = vector.shape_cast %223 : vector<8x8xbf16> to vector<1x8x8xbf16>
    %228 = tpu.concatenate %224, %225, %226, %227 in 0 : vector<1x8x8xbf16>, vector<1x8x8xbf16>, vector<1x8x8xbf16>, vector<1x8x8xbf16> -> vector<4x8x8xbf16>
    %229 = vector.extract_strided_slice %217 {offsets = [0, 0], sizes = [8, 8], strides = [1, 1]} : vector<8x32xbf16> to vector<8x8xbf16>
    %230 = vector.extract_strided_slice %217 {offsets = [0, 8], sizes = [8, 8], strides = [1, 1]} : vector<8x32xbf16> to vector<8x8xbf16>
    %231 = vector.extract_strided_slice %217 {offsets = [0, 16], sizes = [8, 8], strides = [1, 1]} : vector<8x32xbf16> to vector<8x8xbf16>
    %232 = vector.extract_strided_slice %217 {offsets = [0, 24], sizes = [8, 8], strides = [1, 1]} : vector<8x32xbf16> to vector<8x8xbf16>
    %233 = vector.shape_cast %229 : vector<8x8xbf16> to vector<1x8x8xbf16>
    %234 = vector.shape_cast %230 : vector<8x8xbf16> to vector<1x8x8xbf16>
    %235 = vector.shape_cast %231 : vector<8x8xbf16> to vector<1x8x8xbf16>
    %236 = vector.shape_cast %232 : vector<8x8xbf16> to vector<1x8x8xbf16>
    %237 = tpu.concatenate %233, %234, %235, %236 in 0 : vector<1x8x8xbf16>, vector<1x8x8xbf16>, vector<1x8x8xbf16>, vector<1x8x8xbf16> -> vector<4x8x8xbf16>
    %238 = vector.extract_strided_slice %219 {offsets = [0, 0], sizes = [8, 8], strides = [1, 1]} : vector<8x32xbf16> to vector<8x8xbf16>
    %239 = vector.extract_strided_slice %219 {offsets = [0, 8], sizes = [8, 8], strides = [1, 1]} : vector<8x32xbf16> to vector<8x8xbf16>
    %240 = vector.extract_strided_slice %219 {offsets = [0, 16], sizes = [8, 8], strides = [1, 1]} : vector<8x32xbf16> to vector<8x8xbf16>
    %241 = vector.extract_strided_slice %219 {offsets = [0, 24], sizes = [8, 8], strides = [1, 1]} : vector<8x32xbf16> to vector<8x8xbf16>
    %242 = vector.shape_cast %238 : vector<8x8xbf16> to vector<1x8x8xbf16>
    %243 = vector.shape_cast %239 : vector<8x8xbf16> to vector<1x8x8xbf16>
    %244 = vector.shape_cast %240 : vector<8x8xbf16> to vector<1x8x8xbf16>
    %245 = vector.shape_cast %241 : vector<8x8xbf16> to vector<1x8x8xbf16>
    %246 = tpu.concatenate %242, %243, %244, %245 in 0 : vector<1x8x8xbf16>, vector<1x8x8xbf16>, vector<1x8x8xbf16>, vector<1x8x8xbf16> -> vector<4x8x8xbf16>
    "tpu.trace_start"() <{level = 10 : i32, message = "htd,hsd->hts"}> : () -> ()
    %cst_34 = arith.constant dense<0.000000e+00> : vector<4x8x8xf32>
    %247 = tpu.matmul %228, %237, %cst_34 {dimension_numbers = #tpu.dot_dimension_numbers<[2], [2], [1], [1], [0, 0, 0, 1, 1, 1], [0], [0]>} : vector<4x8x8xbf16>, vector<4x8x8xbf16>, vector<4x8x8xf32> -> vector<4x8x8xf32>
    "tpu.trace_stop"() : () -> ()
    %248 = vector.extract_strided_slice %36 {offsets = [3, 0], sizes = [1, 8], strides = [1, 1]} : vector<8x8xf32> to vector<1x8xf32>
    %249 = vector.shape_cast %248 : vector<1x8xf32> to vector<1x1x8xf32>
    %250 = vector.broadcast %249 : vector<1x1x8xf32> to vector<4x8x8xf32>
    %251 = arith.addf %247, %250 : vector<4x8x8xf32>
    %cst_35 = arith.constant dense<0xFF800000> : vector<4x8xf32>
    %252 = vector.multi_reduction <maximumf>, %251, %cst_35 [2] : vector<4x8x8xf32> to vector<4x8xf32>
    %253 = vector.shape_cast %252 : vector<4x8xf32> to vector<4x8x1xf32>
    %254 = vector.broadcast %253 : vector<4x8x1xf32> to vector<4x8x8xf32>
    %255 = arith.subf %251, %254 : vector<4x8x8xf32>
    %256 = math.exp %255 : vector<4x8x8xf32>
    %cst_36 = arith.constant dense<0.000000e+00> : vector<4x8xf32>
    %257 = vector.multi_reduction <add>, %256, %cst_36 [2] : vector<4x8x8xf32> to vector<4x8xf32>
    %258 = vector.shape_cast %257 : vector<4x8xf32> to vector<4x8x1xf32>
    %259 = tpu.reciprocal %258 {approx = true} : vector<4x8x1xf32> -> vector<4x8x1xf32>
    %260 = vector.broadcast %259 : vector<4x8x1xf32> to vector<4x8x8xf32>
    %261 = arith.mulf %256, %260 : vector<4x8x8xf32>
    %262 = arith.truncf %261 : vector<4x8x8xf32> to vector<4x8x8xbf16>
    "tpu.trace_start"() <{level = 10 : i32, message = "hts,hsd->htd"}> : () -> ()
    %cst_37 = arith.constant dense<0.000000e+00> : vector<4x8x8xf32>
    %263 = tpu.matmul %262, %246, %cst_37 {dimension_numbers = #tpu.dot_dimension_numbers<[2], [1], [1], [2], [0, 0, 0, 1, 1, 2], [0], [0]>} : vector<4x8x8xbf16>, vector<4x8x8xbf16>, vector<4x8x8xf32> -> vector<4x8x8xf32>
    "tpu.trace_stop"() : () -> ()
    %264 = vector.extract_strided_slice %263 {offsets = [0, 0, 0], sizes = [1, 8, 8], strides = [1, 1, 1]} : vector<4x8x8xf32> to vector<1x8x8xf32>
    %265 = vector.shape_cast %264 : vector<1x8x8xf32> to vector<8x8xf32>
    %266 = vector.extract_strided_slice %263 {offsets = [1, 0, 0], sizes = [1, 8, 8], strides = [1, 1, 1]} : vector<4x8x8xf32> to vector<1x8x8xf32>
    %267 = vector.shape_cast %266 : vector<1x8x8xf32> to vector<8x8xf32>
    %268 = vector.extract_strided_slice %263 {offsets = [2, 0, 0], sizes = [1, 8, 8], strides = [1, 1, 1]} : vector<4x8x8xf32> to vector<1x8x8xf32>
    %269 = vector.shape_cast %268 : vector<1x8x8xf32> to vector<8x8xf32>
    %270 = vector.extract_strided_slice %263 {offsets = [3, 0, 0], sizes = [1, 8, 8], strides = [1, 1, 1]} : vector<4x8x8xf32> to vector<1x8x8xf32>
    %271 = vector.shape_cast %270 : vector<1x8x8xf32> to vector<8x8xf32>
    %272 = tpu.concatenate %265, %267, %269, %271 in 1 : vector<8x8xf32>, vector<8x8xf32>, vector<8x8xf32>, vector<8x8xf32> -> vector<8x32xf32>
    %273 = vector.extract_strided_slice %26 {offsets = [0, 4, 0], sizes = [8, 1, 32], strides = [1, 1, 1]} : vector<8x8x32xbf16> to vector<8x1x32xbf16>
    %274 = vector.shape_cast %273 : vector<8x1x32xbf16> to vector<8x32xbf16>
    %275 = vector.extract_strided_slice %28 {offsets = [0, 4, 0], sizes = [8, 1, 32], strides = [1, 1, 1]} : vector<8x8x32xbf16> to vector<8x1x32xbf16>
    %276 = vector.shape_cast %275 : vector<8x1x32xbf16> to vector<8x32xbf16>
    %277 = vector.extract_strided_slice %30 {offsets = [0, 4, 0], sizes = [8, 1, 32], strides = [1, 1, 1]} : vector<8x8x32xbf16> to vector<8x1x32xbf16>
    %278 = vector.shape_cast %277 : vector<8x1x32xbf16> to vector<8x32xbf16>
    %279 = vector.extract_strided_slice %274 {offsets = [0, 0], sizes = [8, 8], strides = [1, 1]} : vector<8x32xbf16> to vector<8x8xbf16>
    %280 = vector.extract_strided_slice %274 {offsets = [0, 8], sizes = [8, 8], strides = [1, 1]} : vector<8x32xbf16> to vector<8x8xbf16>
    %281 = vector.extract_strided_slice %274 {offsets = [0, 16], sizes = [8, 8], strides = [1, 1]} : vector<8x32xbf16> to vector<8x8xbf16>
    %282 = vector.extract_strided_slice %274 {offsets = [0, 24], sizes = [8, 8], strides = [1, 1]} : vector<8x32xbf16> to vector<8x8xbf16>
    %283 = vector.shape_cast %279 : vector<8x8xbf16> to vector<1x8x8xbf16>
    %284 = vector.shape_cast %280 : vector<8x8xbf16> to vector<1x8x8xbf16>
    %285 = vector.shape_cast %281 : vector<8x8xbf16> to vector<1x8x8xbf16>
    %286 = vector.shape_cast %282 : vector<8x8xbf16> to vector<1x8x8xbf16>
    %287 = tpu.concatenate %283, %284, %285, %286 in 0 : vector<1x8x8xbf16>, vector<1x8x8xbf16>, vector<1x8x8xbf16>, vector<1x8x8xbf16> -> vector<4x8x8xbf16>
    %288 = vector.extract_strided_slice %276 {offsets = [0, 0], sizes = [8, 8], strides = [1, 1]} : vector<8x32xbf16> to vector<8x8xbf16>
    %289 = vector.extract_strided_slice %276 {offsets = [0, 8], sizes = [8, 8], strides = [1, 1]} : vector<8x32xbf16> to vector<8x8xbf16>
    %290 = vector.extract_strided_slice %276 {offsets = [0, 16], sizes = [8, 8], strides = [1, 1]} : vector<8x32xbf16> to vector<8x8xbf16>
    %291 = vector.extract_strided_slice %276 {offsets = [0, 24], sizes = [8, 8], strides = [1, 1]} : vector<8x32xbf16> to vector<8x8xbf16>
    %292 = vector.shape_cast %288 : vector<8x8xbf16> to vector<1x8x8xbf16>
    %293 = vector.shape_cast %289 : vector<8x8xbf16> to vector<1x8x8xbf16>
    %294 = vector.shape_cast %290 : vector<8x8xbf16> to vector<1x8x8xbf16>
    %295 = vector.shape_cast %291 : vector<8x8xbf16> to vector<1x8x8xbf16>
    %296 = tpu.concatenate %292, %293, %294, %295 in 0 : vector<1x8x8xbf16>, vector<1x8x8xbf16>, vector<1x8x8xbf16>, vector<1x8x8xbf16> -> vector<4x8x8xbf16>
    %297 = vector.extract_strided_slice %278 {offsets = [0, 0], sizes = [8, 8], strides = [1, 1]} : vector<8x32xbf16> to vector<8x8xbf16>
    %298 = vector.extract_strided_slice %278 {offsets = [0, 8], sizes = [8, 8], strides = [1, 1]} : vector<8x32xbf16> to vector<8x8xbf16>
    %299 = vector.extract_strided_slice %278 {offsets = [0, 16], sizes = [8, 8], strides = [1, 1]} : vector<8x32xbf16> to vector<8x8xbf16>
    %300 = vector.extract_strided_slice %278 {offsets = [0, 24], sizes = [8, 8], strides = [1, 1]} : vector<8x32xbf16> to vector<8x8xbf16>
    %301 = vector.shape_cast %297 : vector<8x8xbf16> to vector<1x8x8xbf16>
    %302 = vector.shape_cast %298 : vector<8x8xbf16> to vector<1x8x8xbf16>
    %303 = vector.shape_cast %299 : vector<8x8xbf16> to vector<1x8x8xbf16>
    %304 = vector.shape_cast %300 : vector<8x8xbf16> to vector<1x8x8xbf16>
    %305 = tpu.concatenate %301, %302, %303, %304 in 0 : vector<1x8x8xbf16>, vector<1x8x8xbf16>, vector<1x8x8xbf16>, vector<1x8x8xbf16> -> vector<4x8x8xbf16>
    "tpu.trace_start"() <{level = 10 : i32, message = "htd,hsd->hts"}> : () -> ()
    %cst_38 = arith.constant dense<0.000000e+00> : vector<4x8x8xf32>
    %306 = tpu.matmul %287, %296, %cst_38 {dimension_numbers = #tpu.dot_dimension_numbers<[2], [2], [1], [1], [0, 0, 0, 1, 1, 1], [0], [0]>} : vector<4x8x8xbf16>, vector<4x8x8xbf16>, vector<4x8x8xf32> -> vector<4x8x8xf32>
    "tpu.trace_stop"() : () -> ()
    %307 = vector.extract_strided_slice %36 {offsets = [4, 0], sizes = [1, 8], strides = [1, 1]} : vector<8x8xf32> to vector<1x8xf32>
    %308 = vector.shape_cast %307 : vector<1x8xf32> to vector<1x1x8xf32>
    %309 = vector.broadcast %308 : vector<1x1x8xf32> to vector<4x8x8xf32>
    %310 = arith.addf %306, %309 : vector<4x8x8xf32>
    %cst_39 = arith.constant dense<0xFF800000> : vector<4x8xf32>
    %311 = vector.multi_reduction <maximumf>, %310, %cst_39 [2] : vector<4x8x8xf32> to vector<4x8xf32>
    %312 = vector.shape_cast %311 : vector<4x8xf32> to vector<4x8x1xf32>
    %313 = vector.broadcast %312 : vector<4x8x1xf32> to vector<4x8x8xf32>
    %314 = arith.subf %310, %313 : vector<4x8x8xf32>
    %315 = math.exp %314 : vector<4x8x8xf32>
    %cst_40 = arith.constant dense<0.000000e+00> : vector<4x8xf32>
    %316 = vector.multi_reduction <add>, %315, %cst_40 [2] : vector<4x8x8xf32> to vector<4x8xf32>
    %317 = vector.shape_cast %316 : vector<4x8xf32> to vector<4x8x1xf32>
    %318 = tpu.reciprocal %317 {approx = true} : vector<4x8x1xf32> -> vector<4x8x1xf32>
    %319 = vector.broadcast %318 : vector<4x8x1xf32> to vector<4x8x8xf32>
    %320 = arith.mulf %315, %319 : vector<4x8x8xf32>
    %321 = arith.truncf %320 : vector<4x8x8xf32> to vector<4x8x8xbf16>
    "tpu.trace_start"() <{level = 10 : i32, message = "hts,hsd->htd"}> : () -> ()
    %cst_41 = arith.constant dense<0.000000e+00> : vector<4x8x8xf32>
    %322 = tpu.matmul %321, %305, %cst_41 {dimension_numbers = #tpu.dot_dimension_numbers<[2], [1], [1], [2], [0, 0, 0, 1, 1, 2], [0], [0]>} : vector<4x8x8xbf16>, vector<4x8x8xbf16>, vector<4x8x8xf32> -> vector<4x8x8xf32>
    "tpu.trace_stop"() : () -> ()
    %323 = vector.extract_strided_slice %322 {offsets = [0, 0, 0], sizes = [1, 8, 8], strides = [1, 1, 1]} : vector<4x8x8xf32> to vector<1x8x8xf32>
    %324 = vector.shape_cast %323 : vector<1x8x8xf32> to vector<8x8xf32>
    %325 = vector.extract_strided_slice %322 {offsets = [1, 0, 0], sizes = [1, 8, 8], strides = [1, 1, 1]} : vector<4x8x8xf32> to vector<1x8x8xf32>
    %326 = vector.shape_cast %325 : vector<1x8x8xf32> to vector<8x8xf32>
    %327 = vector.extract_strided_slice %322 {offsets = [2, 0, 0], sizes = [1, 8, 8], strides = [1, 1, 1]} : vector<4x8x8xf32> to vector<1x8x8xf32>
    %328 = vector.shape_cast %327 : vector<1x8x8xf32> to vector<8x8xf32>
    %329 = vector.extract_strided_slice %322 {offsets = [3, 0, 0], sizes = [1, 8, 8], strides = [1, 1, 1]} : vector<4x8x8xf32> to vector<1x8x8xf32>
    %330 = vector.shape_cast %329 : vector<1x8x8xf32> to vector<8x8xf32>
    %331 = tpu.concatenate %324, %326, %328, %330 in 1 : vector<8x8xf32>, vector<8x8xf32>, vector<8x8xf32>, vector<8x8xf32> -> vector<8x32xf32>
    %332 = vector.extract_strided_slice %26 {offsets = [0, 5, 0], sizes = [8, 1, 32], strides = [1, 1, 1]} : vector<8x8x32xbf16> to vector<8x1x32xbf16>
    %333 = vector.shape_cast %332 : vector<8x1x32xbf16> to vector<8x32xbf16>
    %334 = vector.extract_strided_slice %28 {offsets = [0, 5, 0], sizes = [8, 1, 32], strides = [1, 1, 1]} : vector<8x8x32xbf16> to vector<8x1x32xbf16>
    %335 = vector.shape_cast %334 : vector<8x1x32xbf16> to vector<8x32xbf16>
    %336 = vector.extract_strided_slice %30 {offsets = [0, 5, 0], sizes = [8, 1, 32], strides = [1, 1, 1]} : vector<8x8x32xbf16> to vector<8x1x32xbf16>
    %337 = vector.shape_cast %336 : vector<8x1x32xbf16> to vector<8x32xbf16>
    %338 = vector.extract_strided_slice %333 {offsets = [0, 0], sizes = [8, 8], strides = [1, 1]} : vector<8x32xbf16> to vector<8x8xbf16>
    %339 = vector.extract_strided_slice %333 {offsets = [0, 8], sizes = [8, 8], strides = [1, 1]} : vector<8x32xbf16> to vector<8x8xbf16>
    %340 = vector.extract_strided_slice %333 {offsets = [0, 16], sizes = [8, 8], strides = [1, 1]} : vector<8x32xbf16> to vector<8x8xbf16>
    %341 = vector.extract_strided_slice %333 {offsets = [0, 24], sizes = [8, 8], strides = [1, 1]} : vector<8x32xbf16> to vector<8x8xbf16>
    %342 = vector.shape_cast %338 : vector<8x8xbf16> to vector<1x8x8xbf16>
    %343 = vector.shape_cast %339 : vector<8x8xbf16> to vector<1x8x8xbf16>
    %344 = vector.shape_cast %340 : vector<8x8xbf16> to vector<1x8x8xbf16>
    %345 = vector.shape_cast %341 : vector<8x8xbf16> to vector<1x8x8xbf16>
    %346 = tpu.concatenate %342, %343, %344, %345 in 0 : vector<1x8x8xbf16>, vector<1x8x8xbf16>, vector<1x8x8xbf16>, vector<1x8x8xbf16> -> vector<4x8x8xbf16>
    %347 = vector.extract_strided_slice %335 {offsets = [0, 0], sizes = [8, 8], strides = [1, 1]} : vector<8x32xbf16> to vector<8x8xbf16>
    %348 = vector.extract_strided_slice %335 {offsets = [0, 8], sizes = [8, 8], strides = [1, 1]} : vector<8x32xbf16> to vector<8x8xbf16>
    %349 = vector.extract_strided_slice %335 {offsets = [0, 16], sizes = [8, 8], strides = [1, 1]} : vector<8x32xbf16> to vector<8x8xbf16>
    %350 = vector.extract_strided_slice %335 {offsets = [0, 24], sizes = [8, 8], strides = [1, 1]} : vector<8x32xbf16> to vector<8x8xbf16>
    %351 = vector.shape_cast %347 : vector<8x8xbf16> to vector<1x8x8xbf16>
    %352 = vector.shape_cast %348 : vector<8x8xbf16> to vector<1x8x8xbf16>
    %353 = vector.shape_cast %349 : vector<8x8xbf16> to vector<1x8x8xbf16>
    %354 = vector.shape_cast %350 : vector<8x8xbf16> to vector<1x8x8xbf16>
    %355 = tpu.concatenate %351, %352, %353, %354 in 0 : vector<1x8x8xbf16>, vector<1x8x8xbf16>, vector<1x8x8xbf16>, vector<1x8x8xbf16> -> vector<4x8x8xbf16>
    %356 = vector.extract_strided_slice %337 {offsets = [0, 0], sizes = [8, 8], strides = [1, 1]} : vector<8x32xbf16> to vector<8x8xbf16>
    %357 = vector.extract_strided_slice %337 {offsets = [0, 8], sizes = [8, 8], strides = [1, 1]} : vector<8x32xbf16> to vector<8x8xbf16>
    %358 = vector.extract_strided_slice %337 {offsets = [0, 16], sizes = [8, 8], strides = [1, 1]} : vector<8x32xbf16> to vector<8x8xbf16>
    %359 = vector.extract_strided_slice %337 {offsets = [0, 24], sizes = [8, 8], strides = [1, 1]} : vector<8x32xbf16> to vector<8x8xbf16>
    %360 = vector.shape_cast %356 : vector<8x8xbf16> to vector<1x8x8xbf16>
    %361 = vector.shape_cast %357 : vector<8x8xbf16> to vector<1x8x8xbf16>
    %362 = vector.shape_cast %358 : vector<8x8xbf16> to vector<1x8x8xbf16>
    %363 = vector.shape_cast %359 : vector<8x8xbf16> to vector<1x8x8xbf16>
    %364 = tpu.concatenate %360, %361, %362, %363 in 0 : vector<1x8x8xbf16>, vector<1x8x8xbf16>, vector<1x8x8xbf16>, vector<1x8x8xbf16> -> vector<4x8x8xbf16>
    "tpu.trace_start"() <{level = 10 : i32, message = "htd,hsd->hts"}> : () -> ()
    %cst_42 = arith.constant dense<0.000000e+00> : vector<4x8x8xf32>
    %365 = tpu.matmul %346, %355, %cst_42 {dimension_numbers = #tpu.dot_dimension_numbers<[2], [2], [1], [1], [0, 0, 0, 1, 1, 1], [0], [0]>} : vector<4x8x8xbf16>, vector<4x8x8xbf16>, vector<4x8x8xf32> -> vector<4x8x8xf32>
    "tpu.trace_stop"() : () -> ()
    %366 = vector.extract_strided_slice %36 {offsets = [5, 0], sizes = [1, 8], strides = [1, 1]} : vector<8x8xf32> to vector<1x8xf32>
    %367 = vector.shape_cast %366 : vector<1x8xf32> to vector<1x1x8xf32>
    %368 = vector.broadcast %367 : vector<1x1x8xf32> to vector<4x8x8xf32>
    %369 = arith.addf %365, %368 : vector<4x8x8xf32>
    %cst_43 = arith.constant dense<0xFF800000> : vector<4x8xf32>
    %370 = vector.multi_reduction <maximumf>, %369, %cst_43 [2] : vector<4x8x8xf32> to vector<4x8xf32>
    %371 = vector.shape_cast %370 : vector<4x8xf32> to vector<4x8x1xf32>
    %372 = vector.broadcast %371 : vector<4x8x1xf32> to vector<4x8x8xf32>
    %373 = arith.subf %369, %372 : vector<4x8x8xf32>
    %374 = math.exp %373 : vector<4x8x8xf32>
    %cst_44 = arith.constant dense<0.000000e+00> : vector<4x8xf32>
    %375 = vector.multi_reduction <add>, %374, %cst_44 [2] : vector<4x8x8xf32> to vector<4x8xf32>
    %376 = vector.shape_cast %375 : vector<4x8xf32> to vector<4x8x1xf32>
    %377 = tpu.reciprocal %376 {approx = true} : vector<4x8x1xf32> -> vector<4x8x1xf32>
    %378 = vector.broadcast %377 : vector<4x8x1xf32> to vector<4x8x8xf32>
    %379 = arith.mulf %374, %378 : vector<4x8x8xf32>
    %380 = arith.truncf %379 : vector<4x8x8xf32> to vector<4x8x8xbf16>
    "tpu.trace_start"() <{level = 10 : i32, message = "hts,hsd->htd"}> : () -> ()
    %cst_45 = arith.constant dense<0.000000e+00> : vector<4x8x8xf32>
    %381 = tpu.matmul %380, %364, %cst_45 {dimension_numbers = #tpu.dot_dimension_numbers<[2], [1], [1], [2], [0, 0, 0, 1, 1, 2], [0], [0]>} : vector<4x8x8xbf16>, vector<4x8x8xbf16>, vector<4x8x8xf32> -> vector<4x8x8xf32>
    "tpu.trace_stop"() : () -> ()
    %382 = vector.extract_strided_slice %381 {offsets = [0, 0, 0], sizes = [1, 8, 8], strides = [1, 1, 1]} : vector<4x8x8xf32> to vector<1x8x8xf32>
    %383 = vector.shape_cast %382 : vector<1x8x8xf32> to vector<8x8xf32>
    %384 = vector.extract_strided_slice %381 {offsets = [1, 0, 0], sizes = [1, 8, 8], strides = [1, 1, 1]} : vector<4x8x8xf32> to vector<1x8x8xf32>
    %385 = vector.shape_cast %384 : vector<1x8x8xf32> to vector<8x8xf32>
    %386 = vector.extract_strided_slice %381 {offsets = [2, 0, 0], sizes = [1, 8, 8], strides = [1, 1, 1]} : vector<4x8x8xf32> to vector<1x8x8xf32>
    %387 = vector.shape_cast %386 : vector<1x8x8xf32> to vector<8x8xf32>
    %388 = vector.extract_strided_slice %381 {offsets = [3, 0, 0], sizes = [1, 8, 8], strides = [1, 1, 1]} : vector<4x8x8xf32> to vector<1x8x8xf32>
    %389 = vector.shape_cast %388 : vector<1x8x8xf32> to vector<8x8xf32>
    %390 = tpu.concatenate %383, %385, %387, %389 in 1 : vector<8x8xf32>, vector<8x8xf32>, vector<8x8xf32>, vector<8x8xf32> -> vector<8x32xf32>
    %391 = vector.extract_strided_slice %26 {offsets = [0, 6, 0], sizes = [8, 1, 32], strides = [1, 1, 1]} : vector<8x8x32xbf16> to vector<8x1x32xbf16>
    %392 = vector.shape_cast %391 : vector<8x1x32xbf16> to vector<8x32xbf16>
    %393 = vector.extract_strided_slice %28 {offsets = [0, 6, 0], sizes = [8, 1, 32], strides = [1, 1, 1]} : vector<8x8x32xbf16> to vector<8x1x32xbf16>
    %394 = vector.shape_cast %393 : vector<8x1x32xbf16> to vector<8x32xbf16>
    %395 = vector.extract_strided_slice %30 {offsets = [0, 6, 0], sizes = [8, 1, 32], strides = [1, 1, 1]} : vector<8x8x32xbf16> to vector<8x1x32xbf16>
    %396 = vector.shape_cast %395 : vector<8x1x32xbf16> to vector<8x32xbf16>
    %397 = vector.extract_strided_slice %392 {offsets = [0, 0], sizes = [8, 8], strides = [1, 1]} : vector<8x32xbf16> to vector<8x8xbf16>
    %398 = vector.extract_strided_slice %392 {offsets = [0, 8], sizes = [8, 8], strides = [1, 1]} : vector<8x32xbf16> to vector<8x8xbf16>
    %399 = vector.extract_strided_slice %392 {offsets = [0, 16], sizes = [8, 8], strides = [1, 1]} : vector<8x32xbf16> to vector<8x8xbf16>
    %400 = vector.extract_strided_slice %392 {offsets = [0, 24], sizes = [8, 8], strides = [1, 1]} : vector<8x32xbf16> to vector<8x8xbf16>
    %401 = vector.shape_cast %397 : vector<8x8xbf16> to vector<1x8x8xbf16>
    %402 = vector.shape_cast %398 : vector<8x8xbf16> to vector<1x8x8xbf16>
    %403 = vector.shape_cast %399 : vector<8x8xbf16> to vector<1x8x8xbf16>
    %404 = vector.shape_cast %400 : vector<8x8xbf16> to vector<1x8x8xbf16>
    %405 = tpu.concatenate %401, %402, %403, %404 in 0 : vector<1x8x8xbf16>, vector<1x8x8xbf16>, vector<1x8x8xbf16>, vector<1x8x8xbf16> -> vector<4x8x8xbf16>
    %406 = vector.extract_strided_slice %394 {offsets = [0, 0], sizes = [8, 8], strides = [1, 1]} : vector<8x32xbf16> to vector<8x8xbf16>
    %407 = vector.extract_strided_slice %394 {offsets = [0, 8], sizes = [8, 8], strides = [1, 1]} : vector<8x32xbf16> to vector<8x8xbf16>
    %408 = vector.extract_strided_slice %394 {offsets = [0, 16], sizes = [8, 8], strides = [1, 1]} : vector<8x32xbf16> to vector<8x8xbf16>
    %409 = vector.extract_strided_slice %394 {offsets = [0, 24], sizes = [8, 8], strides = [1, 1]} : vector<8x32xbf16> to vector<8x8xbf16>
    %410 = vector.shape_cast %406 : vector<8x8xbf16> to vector<1x8x8xbf16>
    %411 = vector.shape_cast %407 : vector<8x8xbf16> to vector<1x8x8xbf16>
    %412 = vector.shape_cast %408 : vector<8x8xbf16> to vector<1x8x8xbf16>
    %413 = vector.shape_cast %409 : vector<8x8xbf16> to vector<1x8x8xbf16>
    %414 = tpu.concatenate %410, %411, %412, %413 in 0 : vector<1x8x8xbf16>, vector<1x8x8xbf16>, vector<1x8x8xbf16>, vector<1x8x8xbf16> -> vector<4x8x8xbf16>
    %415 = vector.extract_strided_slice %396 {offsets = [0, 0], sizes = [8, 8], strides = [1, 1]} : vector<8x32xbf16> to vector<8x8xbf16>
    %416 = vector.extract_strided_slice %396 {offsets = [0, 8], sizes = [8, 8], strides = [1, 1]} : vector<8x32xbf16> to vector<8x8xbf16>
    %417 = vector.extract_strided_slice %396 {offsets = [0, 16], sizes = [8, 8], strides = [1, 1]} : vector<8x32xbf16> to vector<8x8xbf16>
    %418 = vector.extract_strided_slice %396 {offsets = [0, 24], sizes = [8, 8], strides = [1, 1]} : vector<8x32xbf16> to vector<8x8xbf16>
    %419 = vector.shape_cast %415 : vector<8x8xbf16> to vector<1x8x8xbf16>
    %420 = vector.shape_cast %416 : vector<8x8xbf16> to vector<1x8x8xbf16>
    %421 = vector.shape_cast %417 : vector<8x8xbf16> to vector<1x8x8xbf16>
    %422 = vector.shape_cast %418 : vector<8x8xbf16> to vector<1x8x8xbf16>
    %423 = tpu.concatenate %419, %420, %421, %422 in 0 : vector<1x8x8xbf16>, vector<1x8x8xbf16>, vector<1x8x8xbf16>, vector<1x8x8xbf16> -> vector<4x8x8xbf16>
    "tpu.trace_start"() <{level = 10 : i32, message = "htd,hsd->hts"}> : () -> ()
    %cst_46 = arith.constant dense<0.000000e+00> : vector<4x8x8xf32>
    %424 = tpu.matmul %405, %414, %cst_46 {dimension_numbers = #tpu.dot_dimension_numbers<[2], [2], [1], [1], [0, 0, 0, 1, 1, 1], [0], [0]>} : vector<4x8x8xbf16>, vector<4x8x8xbf16>, vector<4x8x8xf32> -> vector<4x8x8xf32>
    "tpu.trace_stop"() : () -> ()
    %425 = vector.extract_strided_slice %36 {offsets = [6, 0], sizes = [1, 8], strides = [1, 1]} : vector<8x8xf32> to vector<1x8xf32>
    %426 = vector.shape_cast %425 : vector<1x8xf32> to vector<1x1x8xf32>
    %427 = vector.broadcast %426 : vector<1x1x8xf32> to vector<4x8x8xf32>
    %428 = arith.addf %424, %427 : vector<4x8x8xf32>
    %cst_47 = arith.constant dense<0xFF800000> : vector<4x8xf32>
    %429 = vector.multi_reduction <maximumf>, %428, %cst_47 [2] : vector<4x8x8xf32> to vector<4x8xf32>
    %430 = vector.shape_cast %429 : vector<4x8xf32> to vector<4x8x1xf32>
    %431 = vector.broadcast %430 : vector<4x8x1xf32> to vector<4x8x8xf32>
    %432 = arith.subf %428, %431 : vector<4x8x8xf32>
    %433 = math.exp %432 : vector<4x8x8xf32>
    %cst_48 = arith.constant dense<0.000000e+00> : vector<4x8xf32>
    %434 = vector.multi_reduction <add>, %433, %cst_48 [2] : vector<4x8x8xf32> to vector<4x8xf32>
    %435 = vector.shape_cast %434 : vector<4x8xf32> to vector<4x8x1xf32>
    %436 = tpu.reciprocal %435 {approx = true} : vector<4x8x1xf32> -> vector<4x8x1xf32>
    %437 = vector.broadcast %436 : vector<4x8x1xf32> to vector<4x8x8xf32>
    %438 = arith.mulf %433, %437 : vector<4x8x8xf32>
    %439 = arith.truncf %438 : vector<4x8x8xf32> to vector<4x8x8xbf16>
    "tpu.trace_start"() <{level = 10 : i32, message = "hts,hsd->htd"}> : () -> ()
    %cst_49 = arith.constant dense<0.000000e+00> : vector<4x8x8xf32>
    %440 = tpu.matmul %439, %423, %cst_49 {dimension_numbers = #tpu.dot_dimension_numbers<[2], [1], [1], [2], [0, 0, 0, 1, 1, 2], [0], [0]>} : vector<4x8x8xbf16>, vector<4x8x8xbf16>, vector<4x8x8xf32> -> vector<4x8x8xf32>
    "tpu.trace_stop"() : () -> ()
    %441 = vector.extract_strided_slice %440 {offsets = [0, 0, 0], sizes = [1, 8, 8], strides = [1, 1, 1]} : vector<4x8x8xf32> to vector<1x8x8xf32>
    %442 = vector.shape_cast %441 : vector<1x8x8xf32> to vector<8x8xf32>
    %443 = vector.extract_strided_slice %440 {offsets = [1, 0, 0], sizes = [1, 8, 8], strides = [1, 1, 1]} : vector<4x8x8xf32> to vector<1x8x8xf32>
    %444 = vector.shape_cast %443 : vector<1x8x8xf32> to vector<8x8xf32>
    %445 = vector.extract_strided_slice %440 {offsets = [2, 0, 0], sizes = [1, 8, 8], strides = [1, 1, 1]} : vector<4x8x8xf32> to vector<1x8x8xf32>
    %446 = vector.shape_cast %445 : vector<1x8x8xf32> to vector<8x8xf32>
    %447 = vector.extract_strided_slice %440 {offsets = [3, 0, 0], sizes = [1, 8, 8], strides = [1, 1, 1]} : vector<4x8x8xf32> to vector<1x8x8xf32>
    %448 = vector.shape_cast %447 : vector<1x8x8xf32> to vector<8x8xf32>
    %449 = tpu.concatenate %442, %444, %446, %448 in 1 : vector<8x8xf32>, vector<8x8xf32>, vector<8x8xf32>, vector<8x8xf32> -> vector<8x32xf32>
    %450 = vector.extract_strided_slice %26 {offsets = [0, 7, 0], sizes = [8, 1, 32], strides = [1, 1, 1]} : vector<8x8x32xbf16> to vector<8x1x32xbf16>
    %451 = vector.shape_cast %450 : vector<8x1x32xbf16> to vector<8x32xbf16>
    %452 = vector.extract_strided_slice %28 {offsets = [0, 7, 0], sizes = [8, 1, 32], strides = [1, 1, 1]} : vector<8x8x32xbf16> to vector<8x1x32xbf16>
    %453 = vector.shape_cast %452 : vector<8x1x32xbf16> to vector<8x32xbf16>
    %454 = vector.extract_strided_slice %30 {offsets = [0, 7, 0], sizes = [8, 1, 32], strides = [1, 1, 1]} : vector<8x8x32xbf16> to vector<8x1x32xbf16>
    %455 = vector.shape_cast %454 : vector<8x1x32xbf16> to vector<8x32xbf16>
    %456 = vector.extract_strided_slice %451 {offsets = [0, 0], sizes = [8, 8], strides = [1, 1]} : vector<8x32xbf16> to vector<8x8xbf16>
    %457 = vector.extract_strided_slice %451 {offsets = [0, 8], sizes = [8, 8], strides = [1, 1]} : vector<8x32xbf16> to vector<8x8xbf16>
    %458 = vector.extract_strided_slice %451 {offsets = [0, 16], sizes = [8, 8], strides = [1, 1]} : vector<8x32xbf16> to vector<8x8xbf16>
    %459 = vector.extract_strided_slice %451 {offsets = [0, 24], sizes = [8, 8], strides = [1, 1]} : vector<8x32xbf16> to vector<8x8xbf16>
    %460 = vector.shape_cast %456 : vector<8x8xbf16> to vector<1x8x8xbf16>
    %461 = vector.shape_cast %457 : vector<8x8xbf16> to vector<1x8x8xbf16>
    %462 = vector.shape_cast %458 : vector<8x8xbf16> to vector<1x8x8xbf16>
    %463 = vector.shape_cast %459 : vector<8x8xbf16> to vector<1x8x8xbf16>
    %464 = tpu.concatenate %460, %461, %462, %463 in 0 : vector<1x8x8xbf16>, vector<1x8x8xbf16>, vector<1x8x8xbf16>, vector<1x8x8xbf16> -> vector<4x8x8xbf16>
    %465 = vector.extract_strided_slice %453 {offsets = [0, 0], sizes = [8, 8], strides = [1, 1]} : vector<8x32xbf16> to vector<8x8xbf16>
    %466 = vector.extract_strided_slice %453 {offsets = [0, 8], sizes = [8, 8], strides = [1, 1]} : vector<8x32xbf16> to vector<8x8xbf16>
    %467 = vector.extract_strided_slice %453 {offsets = [0, 16], sizes = [8, 8], strides = [1, 1]} : vector<8x32xbf16> to vector<8x8xbf16>
    %468 = vector.extract_strided_slice %453 {offsets = [0, 24], sizes = [8, 8], strides = [1, 1]} : vector<8x32xbf16> to vector<8x8xbf16>
    %469 = vector.shape_cast %465 : vector<8x8xbf16> to vector<1x8x8xbf16>
    %470 = vector.shape_cast %466 : vector<8x8xbf16> to vector<1x8x8xbf16>
    %471 = vector.shape_cast %467 : vector<8x8xbf16> to vector<1x8x8xbf16>
    %472 = vector.shape_cast %468 : vector<8x8xbf16> to vector<1x8x8xbf16>
    %473 = tpu.concatenate %469, %470, %471, %472 in 0 : vector<1x8x8xbf16>, vector<1x8x8xbf16>, vector<1x8x8xbf16>, vector<1x8x8xbf16> -> vector<4x8x8xbf16>
    %474 = vector.extract_strided_slice %455 {offsets = [0, 0], sizes = [8, 8], strides = [1, 1]} : vector<8x32xbf16> to vector<8x8xbf16>
    %475 = vector.extract_strided_slice %455 {offsets = [0, 8], sizes = [8, 8], strides = [1, 1]} : vector<8x32xbf16> to vector<8x8xbf16>
    %476 = vector.extract_strided_slice %455 {offsets = [0, 16], sizes = [8, 8], strides = [1, 1]} : vector<8x32xbf16> to vector<8x8xbf16>
    %477 = vector.extract_strided_slice %455 {offsets = [0, 24], sizes = [8, 8], strides = [1, 1]} : vector<8x32xbf16> to vector<8x8xbf16>
    %478 = vector.shape_cast %474 : vector<8x8xbf16> to vector<1x8x8xbf16>
    %479 = vector.shape_cast %475 : vector<8x8xbf16> to vector<1x8x8xbf16>
    %480 = vector.shape_cast %476 : vector<8x8xbf16> to vector<1x8x8xbf16>
    %481 = vector.shape_cast %477 : vector<8x8xbf16> to vector<1x8x8xbf16>
    %482 = tpu.concatenate %478, %479, %480, %481 in 0 : vector<1x8x8xbf16>, vector<1x8x8xbf16>, vector<1x8x8xbf16>, vector<1x8x8xbf16> -> vector<4x8x8xbf16>
    "tpu.trace_start"() <{level = 10 : i32, message = "htd,hsd->hts"}> : () -> ()
    %cst_50 = arith.constant dense<0.000000e+00> : vector<4x8x8xf32>
    %483 = tpu.matmul %464, %473, %cst_50 {dimension_numbers = #tpu.dot_dimension_numbers<[2], [2], [1], [1], [0, 0, 0, 1, 1, 1], [0], [0]>} : vector<4x8x8xbf16>, vector<4x8x8xbf16>, vector<4x8x8xf32> -> vector<4x8x8xf32>
    "tpu.trace_stop"() : () -> ()
    %484 = vector.extract_strided_slice %36 {offsets = [7, 0], sizes = [1, 8], strides = [1, 1]} : vector<8x8xf32> to vector<1x8xf32>
    %485 = vector.shape_cast %484 : vector<1x8xf32> to vector<1x1x8xf32>
    %486 = vector.broadcast %485 : vector<1x1x8xf32> to vector<4x8x8xf32>
    %487 = arith.addf %483, %486 : vector<4x8x8xf32>
    %cst_51 = arith.constant dense<0xFF800000> : vector<4x8xf32>
    %488 = vector.multi_reduction <maximumf>, %487, %cst_51 [2] : vector<4x8x8xf32> to vector<4x8xf32>
    %489 = vector.shape_cast %488 : vector<4x8xf32> to vector<4x8x1xf32>
    %490 = vector.broadcast %489 : vector<4x8x1xf32> to vector<4x8x8xf32>
    %491 = arith.subf %487, %490 : vector<4x8x8xf32>
    %492 = math.exp %491 : vector<4x8x8xf32>
    %cst_52 = arith.constant dense<0.000000e+00> : vector<4x8xf32>
    %493 = vector.multi_reduction <add>, %492, %cst_52 [2] : vector<4x8x8xf32> to vector<4x8xf32>
    %494 = vector.shape_cast %493 : vector<4x8xf32> to vector<4x8x1xf32>
    %495 = tpu.reciprocal %494 {approx = true} : vector<4x8x1xf32> -> vector<4x8x1xf32>
    %496 = vector.broadcast %495 : vector<4x8x1xf32> to vector<4x8x8xf32>
    %497 = arith.mulf %492, %496 : vector<4x8x8xf32>
    %498 = arith.truncf %497 : vector<4x8x8xf32> to vector<4x8x8xbf16>
    "tpu.trace_start"() <{level = 10 : i32, message = "hts,hsd->htd"}> : () -> ()
    %cst_53 = arith.constant dense<0.000000e+00> : vector<4x8x8xf32>
    %499 = tpu.matmul %498, %482, %cst_53 {dimension_numbers = #tpu.dot_dimension_numbers<[2], [1], [1], [2], [0, 0, 0, 1, 1, 2], [0], [0]>} : vector<4x8x8xbf16>, vector<4x8x8xbf16>, vector<4x8x8xf32> -> vector<4x8x8xf32>
    "tpu.trace_stop"() : () -> ()
    %500 = vector.extract_strided_slice %499 {offsets = [0, 0, 0], sizes = [1, 8, 8], strides = [1, 1, 1]} : vector<4x8x8xf32> to vector<1x8x8xf32>
    %501 = vector.shape_cast %500 : vector<1x8x8xf32> to vector<8x8xf32>
    %502 = vector.extract_strided_slice %499 {offsets = [1, 0, 0], sizes = [1, 8, 8], strides = [1, 1, 1]} : vector<4x8x8xf32> to vector<1x8x8xf32>
    %503 = vector.shape_cast %502 : vector<1x8x8xf32> to vector<8x8xf32>
    %504 = vector.extract_strided_slice %499 {offsets = [2, 0, 0], sizes = [1, 8, 8], strides = [1, 1, 1]} : vector<4x8x8xf32> to vector<1x8x8xf32>
    %505 = vector.shape_cast %504 : vector<1x8x8xf32> to vector<8x8xf32>
    %506 = vector.extract_strided_slice %499 {offsets = [3, 0, 0], sizes = [1, 8, 8], strides = [1, 1, 1]} : vector<4x8x8xf32> to vector<1x8x8xf32>
    %507 = vector.shape_cast %506 : vector<1x8x8xf32> to vector<8x8xf32>
    %508 = tpu.concatenate %501, %503, %505, %507 in 1 : vector<8x8xf32>, vector<8x8xf32>, vector<8x8xf32>, vector<8x8xf32> -> vector<8x32xf32>
    %509 = vector.shape_cast %95 : vector<8x32xf32> to vector<1x8x32xf32>
    %510 = vector.shape_cast %154 : vector<8x32xf32> to vector<1x8x32xf32>
    %511 = vector.shape_cast %213 : vector<8x32xf32> to vector<1x8x32xf32>
    %512 = vector.shape_cast %272 : vector<8x32xf32> to vector<1x8x32xf32>
    %513 = vector.shape_cast %331 : vector<8x32xf32> to vector<1x8x32xf32>
    %514 = vector.shape_cast %390 : vector<8x32xf32> to vector<1x8x32xf32>
    %515 = vector.shape_cast %449 : vector<8x32xf32> to vector<1x8x32xf32>
    %516 = vector.shape_cast %508 : vector<8x32xf32> to vector<1x8x32xf32>
    %517 = tpu.concatenate %509, %510, %511, %512, %513, %514, %515, %516 in 0 : vector<1x8x32xf32>, vector<1x8x32xf32>, vector<1x8x32xf32>, vector<1x8x32xf32>, vector<1x8x32xf32>, vector<1x8x32xf32>, vector<1x8x32xf32>, vector<1x8x32xf32> -> vector<8x8x32xf32>
    %518 = vector.shape_cast %517 : vector<8x8x32xf32> to vector<64x32xf32>
    %519 = arith.truncf %518 : vector<64x32xf32> to vector<64x32xbf16>
    %c0_54 = arith.constant 0 : index
    %c0_55 = arith.constant 0 : index
    %520 = vector.load %arg7[%c0_54, %c0_55] : memref<32x32xbf16, #tpu.memory_space<vmem>>, vector<32x32xbf16>
    %cst_56 = arith.constant dense<0.000000e+00> : vector<64x32xf32>
    %521 = tpu.matmul %519, %520, %cst_56 {dimension_numbers = #tpu.dot_dimension_numbers<[1], [0], [0], [1], [0, 0, 1, 1], [], []>} : vector<64x32xbf16>, vector<32x32xbf16>, vector<64x32xf32> -> vector<64x32xf32>
    %c0_57 = arith.constant 0 : index
    %c0_58 = arith.constant 0 : index
    %522 = vector.load %arg8[%c0_57, %c0_58] : memref<1x32xf32, #tpu.memory_space<vmem>>, vector<1x32xf32>
    %523 = vector.broadcast %522 : vector<1x32xf32> to vector<64x32xf32>
    %524 = arith.addf %521, %523 : vector<64x32xf32>
    %525 = vector.extract_strided_slice %524 {offsets = [0, 0], sizes = [8, 32], strides = [1, 1]} : vector<64x32xf32> to vector<8x32xf32>
    %526 = vector.extract_strided_slice %24 {offsets = [0, 0, 0], sizes = [8, 1, 32], strides = [1, 1, 1]} : vector<8x8x32xf32> to vector<8x1x32xf32>
    %527 = vector.shape_cast %526 : vector<8x1x32xf32> to vector<8x32xf32>
    %528 = arith.addf %525, %527 : vector<8x32xf32>
    %529 = vector.extract_strided_slice %0 {offsets = [0, 0, 0], sizes = [8, 1, 32], strides = [1, 1, 1]} : vector<8x8x32xf32> to vector<8x1x32xf32>
    %530 = vector.shape_cast %529 : vector<8x1x32xf32> to vector<8x32xf32>
    %531 = arith.addf %528, %530 : vector<8x32xf32>
    %cst_59 = arith.constant dense<0.000000e+00> : vector<8xf32>
    %532 = vector.multi_reduction <add>, %531, %cst_59 [1] : vector<8x32xf32> to vector<8xf32>
    %533 = vector.shape_cast %532 : vector<8xf32> to vector<8x1xf32>
    %cst_60 = arith.constant 3.200000e+01 : f32
    %534 = vector.broadcast %cst_60 : f32 to vector<8x1xf32>
    %535 = arith.divf %533, %534 : vector<8x1xf32>
    %536 = vector.broadcast %535 : vector<8x1xf32> to vector<8x32xf32>
    %537 = arith.subf %531, %536 : vector<8x32xf32>
    %538 = arith.mulf %537, %537 : vector<8x32xf32>
    %cst_61 = arith.constant dense<0.000000e+00> : vector<8xf32>
    %539 = vector.multi_reduction <add>, %538, %cst_61 [1] : vector<8x32xf32> to vector<8xf32>
    %540 = vector.shape_cast %539 : vector<8xf32> to vector<8x1xf32>
    %cst_62 = arith.constant 3.200000e+01 : f32
    %541 = vector.broadcast %cst_62 : f32 to vector<8x1xf32>
    %542 = arith.divf %540, %541 : vector<8x1xf32>
    %543 = vector.broadcast %535 : vector<8x1xf32> to vector<8x32xf32>
    %544 = arith.subf %531, %543 : vector<8x32xf32>
    %cst_63 = arith.constant 9.99999974E-6 : f32
    %545 = vector.broadcast %cst_63 : f32 to vector<8x1xf32>
    %546 = arith.addf %542, %545 : vector<8x1xf32>
    %547 = math.rsqrt %546 : vector<8x1xf32>
    %548 = vector.broadcast %547 : vector<8x1xf32> to vector<8x32xf32>
    %549 = arith.mulf %544, %548 : vector<8x32xf32>
    %550 = vector.broadcast %2 : vector<1x32xf32> to vector<8x32xf32>
    %551 = arith.mulf %549, %550 : vector<8x32xf32>
    %552 = vector.broadcast %3 : vector<1x32xf32> to vector<8x32xf32>
    %553 = arith.addf %551, %552 : vector<8x32xf32>
    %554 = vector.shape_cast %553 : vector<8x32xf32> to vector<8x1x32xf32>
    %c0_64 = arith.constant 0 : index
    %c0_65 = arith.constant 0 : index
    %c0_66 = arith.constant 0 : index
    %555 = vector.load %arg11[%c0_64, %c0_65, %c0_66] : memref<8x8x32xf32, #tpu.memory_space<vmem>>, vector<8x1x32xf32>
    tpu.vector_store %arg11[%c0_64, %c0_65, %c0_66], %554 {strides = array<i32>} : memref<8x8x32xf32, #tpu.memory_space<vmem>>, vector<8x1x32xf32>,
    %556 = vector.extract_strided_slice %524 {offsets = [8, 0], sizes = [8, 32], strides = [1, 1]} : vector<64x32xf32> to vector<8x32xf32>
    %557 = vector.extract_strided_slice %24 {offsets = [0, 1, 0], sizes = [8, 1, 32], strides = [1, 1, 1]} : vector<8x8x32xf32> to vector<8x1x32xf32>
    %558 = vector.shape_cast %557 : vector<8x1x32xf32> to vector<8x32xf32>
    %559 = arith.addf %556, %558 : vector<8x32xf32>
    %560 = vector.extract_strided_slice %0 {offsets = [0, 1, 0], sizes = [8, 1, 32], strides = [1, 1, 1]} : vector<8x8x32xf32> to vector<8x1x32xf32>
    %561 = vector.shape_cast %560 : vector<8x1x32xf32> to vector<8x32xf32>
    %562 = arith.addf %559, %561 : vector<8x32xf32>
    %cst_67 = arith.constant dense<0.000000e+00> : vector<8xf32>
    %563 = vector.multi_reduction <add>, %562, %cst_67 [1] : vector<8x32xf32> to vector<8xf32>
    %564 = vector.shape_cast %563 : vector<8xf32> to vector<8x1xf32>
    %cst_68 = arith.constant 3.200000e+01 : f32
    %565 = vector.broadcast %cst_68 : f32 to vector<8x1xf32>
    %566 = arith.divf %564, %565 : vector<8x1xf32>
    %567 = vector.broadcast %566 : vector<8x1xf32> to vector<8x32xf32>
    %568 = arith.subf %562, %567 : vector<8x32xf32>
    %569 = arith.mulf %568, %568 : vector<8x32xf32>
    %cst_69 = arith.constant dense<0.000000e+00> : vector<8xf32>
    %570 = vector.multi_reduction <add>, %569, %cst_69 [1] : vector<8x32xf32> to vector<8xf32>
    %571 = vector.shape_cast %570 : vector<8xf32> to vector<8x1xf32>
    %cst_70 = arith.constant 3.200000e+01 : f32
    %572 = vector.broadcast %cst_70 : f32 to vector<8x1xf32>
    %573 = arith.divf %571, %572 : vector<8x1xf32>
    %574 = vector.broadcast %566 : vector<8x1xf32> to vector<8x32xf32>
    %575 = arith.subf %562, %574 : vector<8x32xf32>
    %cst_71 = arith.constant 9.99999974E-6 : f32
    %576 = vector.broadcast %cst_71 : f32 to vector<8x1xf32>
    %577 = arith.addf %573, %576 : vector<8x1xf32>
    %578 = math.rsqrt %577 : vector<8x1xf32>
    %579 = vector.broadcast %578 : vector<8x1xf32> to vector<8x32xf32>
    %580 = arith.mulf %575, %579 : vector<8x32xf32>
    %581 = vector.broadcast %2 : vector<1x32xf32> to vector<8x32xf32>
    %582 = arith.mulf %580, %581 : vector<8x32xf32>
    %583 = vector.broadcast %3 : vector<1x32xf32> to vector<8x32xf32>
    %584 = arith.addf %582, %583 : vector<8x32xf32>
    %585 = vector.shape_cast %584 : vector<8x32xf32> to vector<8x1x32xf32>
    %c0_72 = arith.constant 0 : index
    %c1 = arith.constant 1 : index
    %c0_73 = arith.constant 0 : index
    %586 = vector.load %arg11[%c0_72, %c1, %c0_73] : memref<8x8x32xf32, #tpu.memory_space<vmem>>, vector<8x1x32xf32>
    tpu.vector_store %arg11[%c0_72, %c1, %c0_73], %585 {strides = array<i32>} : memref<8x8x32xf32, #tpu.memory_space<vmem>>, vector<8x1x32xf32>,
    %587 = vector.extract_strided_slice %524 {offsets = [16, 0], sizes = [8, 32], strides = [1, 1]} : vector<64x32xf32> to vector<8x32xf32>
    %588 = vector.extract_strided_slice %24 {offsets = [0, 2, 0], sizes = [8, 1, 32], strides = [1, 1, 1]} : vector<8x8x32xf32> to vector<8x1x32xf32>
    %589 = vector.shape_cast %588 : vector<8x1x32xf32> to vector<8x32xf32>
    %590 = arith.addf %587, %589 : vector<8x32xf32>
    %591 = vector.extract_strided_slice %0 {offsets = [0, 2, 0], sizes = [8, 1, 32], strides = [1, 1, 1]} : vector<8x8x32xf32> to vector<8x1x32xf32>
    %592 = vector.shape_cast %591 : vector<8x1x32xf32> to vector<8x32xf32>
    %593 = arith.addf %590, %592 : vector<8x32xf32>
    %cst_74 = arith.constant dense<0.000000e+00> : vector<8xf32>
    %594 = vector.multi_reduction <add>, %593, %cst_74 [1] : vector<8x32xf32> to vector<8xf32>
    %595 = vector.shape_cast %594 : vector<8xf32> to vector<8x1xf32>
    %cst_75 = arith.constant 3.200000e+01 : f32
    %596 = vector.broadcast %cst_75 : f32 to vector<8x1xf32>
    %597 = arith.divf %595, %596 : vector<8x1xf32>
    %598 = vector.broadcast %597 : vector<8x1xf32> to vector<8x32xf32>
    %599 = arith.subf %593, %598 : vector<8x32xf32>
    %600 = arith.mulf %599, %599 : vector<8x32xf32>
    %cst_76 = arith.constant dense<0.000000e+00> : vector<8xf32>
    %601 = vector.multi_reduction <add>, %600, %cst_76 [1] : vector<8x32xf32> to vector<8xf32>
    %602 = vector.shape_cast %601 : vector<8xf32> to vector<8x1xf32>
    %cst_77 = arith.constant 3.200000e+01 : f32
    %603 = vector.broadcast %cst_77 : f32 to vector<8x1xf32>
    %604 = arith.divf %602, %603 : vector<8x1xf32>
    %605 = vector.broadcast %597 : vector<8x1xf32> to vector<8x32xf32>
    %606 = arith.subf %593, %605 : vector<8x32xf32>
    %cst_78 = arith.constant 9.99999974E-6 : f32
    %607 = vector.broadcast %cst_78 : f32 to vector<8x1xf32>
    %608 = arith.addf %604, %607 : vector<8x1xf32>
    %609 = math.rsqrt %608 : vector<8x1xf32>
    %610 = vector.broadcast %609 : vector<8x1xf32> to vector<8x32xf32>
    %611 = arith.mulf %606, %610 : vector<8x32xf32>
    %612 = vector.broadcast %2 : vector<1x32xf32> to vector<8x32xf32>
    %613 = arith.mulf %611, %612 : vector<8x32xf32>
    %614 = vector.broadcast %3 : vector<1x32xf32> to vector<8x32xf32>
    %615 = arith.addf %613, %614 : vector<8x32xf32>
    %616 = vector.shape_cast %615 : vector<8x32xf32> to vector<8x1x32xf32>
    %c0_79 = arith.constant 0 : index
    %c2 = arith.constant 2 : index
    %c0_80 = arith.constant 0 : index
    %617 = vector.load %arg11[%c0_79, %c2, %c0_80] : memref<8x8x32xf32, #tpu.memory_space<vmem>>, vector<8x1x32xf32>
    tpu.vector_store %arg11[%c0_79, %c2, %c0_80], %616 {strides = array<i32>} : memref<8x8x32xf32, #tpu.memory_space<vmem>>, vector<8x1x32xf32>,
    %618 = vector.extract_strided_slice %524 {offsets = [24, 0], sizes = [8, 32], strides = [1, 1]} : vector<64x32xf32> to vector<8x32xf32>
    %619 = vector.extract_strided_slice %24 {offsets = [0, 3, 0], sizes = [8, 1, 32], strides = [1, 1, 1]} : vector<8x8x32xf32> to vector<8x1x32xf32>
    %620 = vector.shape_cast %619 : vector<8x1x32xf32> to vector<8x32xf32>
    %621 = arith.addf %618, %620 : vector<8x32xf32>
    %622 = vector.extract_strided_slice %0 {offsets = [0, 3, 0], sizes = [8, 1, 32], strides = [1, 1, 1]} : vector<8x8x32xf32> to vector<8x1x32xf32>
    %623 = vector.shape_cast %622 : vector<8x1x32xf32> to vector<8x32xf32>
    %624 = arith.addf %621, %623 : vector<8x32xf32>
    %cst_81 = arith.constant dense<0.000000e+00> : vector<8xf32>
    %625 = vector.multi_reduction <add>, %624, %cst_81 [1] : vector<8x32xf32> to vector<8xf32>
    %626 = vector.shape_cast %625 : vector<8xf32> to vector<8x1xf32>
    %cst_82 = arith.constant 3.200000e+01 : f32
    %627 = vector.broadcast %cst_82 : f32 to vector<8x1xf32>
    %628 = arith.divf %626, %627 : vector<8x1xf32>
    %629 = vector.broadcast %628 : vector<8x1xf32> to vector<8x32xf32>
    %630 = arith.subf %624, %629 : vector<8x32xf32>
    %631 = arith.mulf %630, %630 : vector<8x32xf32>
    %cst_83 = arith.constant dense<0.000000e+00> : vector<8xf32>
    %632 = vector.multi_reduction <add>, %631, %cst_83 [1] : vector<8x32xf32> to vector<8xf32>
    %633 = vector.shape_cast %632 : vector<8xf32> to vector<8x1xf32>
    %cst_84 = arith.constant 3.200000e+01 : f32
    %634 = vector.broadcast %cst_84 : f32 to vector<8x1xf32>
    %635 = arith.divf %633, %634 : vector<8x1xf32>
    %636 = vector.broadcast %628 : vector<8x1xf32> to vector<8x32xf32>
    %637 = arith.subf %624, %636 : vector<8x32xf32>
    %cst_85 = arith.constant 9.99999974E-6 : f32
    %638 = vector.broadcast %cst_85 : f32 to vector<8x1xf32>
    %639 = arith.addf %635, %638 : vector<8x1xf32>
    %640 = math.rsqrt %639 : vector<8x1xf32>
    %641 = vector.broadcast %640 : vector<8x1xf32> to vector<8x32xf32>
    %642 = arith.mulf %637, %641 : vector<8x32xf32>
    %643 = vector.broadcast %2 : vector<1x32xf32> to vector<8x32xf32>
    %644 = arith.mulf %642, %643 : vector<8x32xf32>
    %645 = vector.broadcast %3 : vector<1x32xf32> to vector<8x32xf32>
    %646 = arith.addf %644, %645 : vector<8x32xf32>
    %647 = vector.shape_cast %646 : vector<8x32xf32> to vector<8x1x32xf32>
    %c0_86 = arith.constant 0 : index
    %c3 = arith.constant 3 : index
    %c0_87 = arith.constant 0 : index
    %648 = vector.load %arg11[%c0_86, %c3, %c0_87] : memref<8x8x32xf32, #tpu.memory_space<vmem>>, vector<8x1x32xf32>
    tpu.vector_store %arg11[%c0_86, %c3, %c0_87], %647 {strides = array<i32>} : memref<8x8x32xf32, #tpu.memory_space<vmem>>, vector<8x1x32xf32>,
    %649 = vector.extract_strided_slice %524 {offsets = [32, 0], sizes = [8, 32], strides = [1, 1]} : vector<64x32xf32> to vector<8x32xf32>
    %650 = vector.extract_strided_slice %24 {offsets = [0, 4, 0], sizes = [8, 1, 32], strides = [1, 1, 1]} : vector<8x8x32xf32> to vector<8x1x32xf32>
    %651 = vector.shape_cast %650 : vector<8x1x32xf32> to vector<8x32xf32>
    %652 = arith.addf %649, %651 : vector<8x32xf32>
    %653 = vector.extract_strided_slice %0 {offsets = [0, 4, 0], sizes = [8, 1, 32], strides = [1, 1, 1]} : vector<8x8x32xf32> to vector<8x1x32xf32>
    %654 = vector.shape_cast %653 : vector<8x1x32xf32> to vector<8x32xf32>
    %655 = arith.addf %652, %654 : vector<8x32xf32>
    %cst_88 = arith.constant dense<0.000000e+00> : vector<8xf32>
    %656 = vector.multi_reduction <add>, %655, %cst_88 [1] : vector<8x32xf32> to vector<8xf32>
    %657 = vector.shape_cast %656 : vector<8xf32> to vector<8x1xf32>
    %cst_89 = arith.constant 3.200000e+01 : f32
    %658 = vector.broadcast %cst_89 : f32 to vector<8x1xf32>
    %659 = arith.divf %657, %658 : vector<8x1xf32>
    %660 = vector.broadcast %659 : vector<8x1xf32> to vector<8x32xf32>
    %661 = arith.subf %655, %660 : vector<8x32xf32>
    %662 = arith.mulf %661, %661 : vector<8x32xf32>
    %cst_90 = arith.constant dense<0.000000e+00> : vector<8xf32>
    %663 = vector.multi_reduction <add>, %662, %cst_90 [1] : vector<8x32xf32> to vector<8xf32>
    %664 = vector.shape_cast %663 : vector<8xf32> to vector<8x1xf32>
    %cst_91 = arith.constant 3.200000e+01 : f32
    %665 = vector.broadcast %cst_91 : f32 to vector<8x1xf32>
    %666 = arith.divf %664, %665 : vector<8x1xf32>
    %667 = vector.broadcast %659 : vector<8x1xf32> to vector<8x32xf32>
    %668 = arith.subf %655, %667 : vector<8x32xf32>
    %cst_92 = arith.constant 9.99999974E-6 : f32
    %669 = vector.broadcast %cst_92 : f32 to vector<8x1xf32>
    %670 = arith.addf %666, %669 : vector<8x1xf32>
    %671 = math.rsqrt %670 : vector<8x1xf32>
    %672 = vector.broadcast %671 : vector<8x1xf32> to vector<8x32xf32>
    %673 = arith.mulf %668, %672 : vector<8x32xf32>
    %674 = vector.broadcast %2 : vector<1x32xf32> to vector<8x32xf32>
    %675 = arith.mulf %673, %674 : vector<8x32xf32>
    %676 = vector.broadcast %3 : vector<1x32xf32> to vector<8x32xf32>
    %677 = arith.addf %675, %676 : vector<8x32xf32>
    %678 = vector.shape_cast %677 : vector<8x32xf32> to vector<8x1x32xf32>
    %c0_93 = arith.constant 0 : index
    %c4 = arith.constant 4 : index
    %c0_94 = arith.constant 0 : index
    %679 = vector.load %arg11[%c0_93, %c4, %c0_94] : memref<8x8x32xf32, #tpu.memory_space<vmem>>, vector<8x1x32xf32>
    tpu.vector_store %arg11[%c0_93, %c4, %c0_94], %678 {strides = array<i32>} : memref<8x8x32xf32, #tpu.memory_space<vmem>>, vector<8x1x32xf32>,
    %680 = vector.extract_strided_slice %524 {offsets = [40, 0], sizes = [8, 32], strides = [1, 1]} : vector<64x32xf32> to vector<8x32xf32>
    %681 = vector.extract_strided_slice %24 {offsets = [0, 5, 0], sizes = [8, 1, 32], strides = [1, 1, 1]} : vector<8x8x32xf32> to vector<8x1x32xf32>
    %682 = vector.shape_cast %681 : vector<8x1x32xf32> to vector<8x32xf32>
    %683 = arith.addf %680, %682 : vector<8x32xf32>
    %684 = vector.extract_strided_slice %0 {offsets = [0, 5, 0], sizes = [8, 1, 32], strides = [1, 1, 1]} : vector<8x8x32xf32> to vector<8x1x32xf32>
    %685 = vector.shape_cast %684 : vector<8x1x32xf32> to vector<8x32xf32>
    %686 = arith.addf %683, %685 : vector<8x32xf32>
    %cst_95 = arith.constant dense<0.000000e+00> : vector<8xf32>
    %687 = vector.multi_reduction <add>, %686, %cst_95 [1] : vector<8x32xf32> to vector<8xf32>
    %688 = vector.shape_cast %687 : vector<8xf32> to vector<8x1xf32>
    %cst_96 = arith.constant 3.200000e+01 : f32
    %689 = vector.broadcast %cst_96 : f32 to vector<8x1xf32>
    %690 = arith.divf %688, %689 : vector<8x1xf32>
    %691 = vector.broadcast %690 : vector<8x1xf32> to vector<8x32xf32>
    %692 = arith.subf %686, %691 : vector<8x32xf32>
    %693 = arith.mulf %692, %692 : vector<8x32xf32>
    %cst_97 = arith.constant dense<0.000000e+00> : vector<8xf32>
    %694 = vector.multi_reduction <add>, %693, %cst_97 [1] : vector<8x32xf32> to vector<8xf32>
    %695 = vector.shape_cast %694 : vector<8xf32> to vector<8x1xf32>
    %cst_98 = arith.constant 3.200000e+01 : f32
    %696 = vector.broadcast %cst_98 : f32 to vector<8x1xf32>
    %697 = arith.divf %695, %696 : vector<8x1xf32>
    %698 = vector.broadcast %690 : vector<8x1xf32> to vector<8x32xf32>
    %699 = arith.subf %686, %698 : vector<8x32xf32>
    %cst_99 = arith.constant 9.99999974E-6 : f32
    %700 = vector.broadcast %cst_99 : f32 to vector<8x1xf32>
    %701 = arith.addf %697, %700 : vector<8x1xf32>
    %702 = math.rsqrt %701 : vector<8x1xf32>
    %703 = vector.broadcast %702 : vector<8x1xf32> to vector<8x32xf32>
    %704 = arith.mulf %699, %703 : vector<8x32xf32>
    %705 = vector.broadcast %2 : vector<1x32xf32> to vector<8x32xf32>
    %706 = arith.mulf %704, %705 : vector<8x32xf32>
    %707 = vector.broadcast %3 : vector<1x32xf32> to vector<8x32xf32>
    %708 = arith.addf %706, %707 : vector<8x32xf32>
    %709 = vector.shape_cast %708 : vector<8x32xf32> to vector<8x1x32xf32>
    %c0_100 = arith.constant 0 : index
    %c5 = arith.constant 5 : index
    %c0_101 = arith.constant 0 : index
    %710 = vector.load %arg11[%c0_100, %c5, %c0_101] : memref<8x8x32xf32, #tpu.memory_space<vmem>>, vector<8x1x32xf32>
    tpu.vector_store %arg11[%c0_100, %c5, %c0_101], %709 {strides = array<i32>} : memref<8x8x32xf32, #tpu.memory_space<vmem>>, vector<8x1x32xf32>,
    %711 = vector.extract_strided_slice %524 {offsets = [48, 0], sizes = [8, 32], strides = [1, 1]} : vector<64x32xf32> to vector<8x32xf32>
    %712 = vector.extract_strided_slice %24 {offsets = [0, 6, 0], sizes = [8, 1, 32], strides = [1, 1, 1]} : vector<8x8x32xf32> to vector<8x1x32xf32>
    %713 = vector.shape_cast %712 : vector<8x1x32xf32> to vector<8x32xf32>
    %714 = arith.addf %711, %713 : vector<8x32xf32>
    %715 = vector.extract_strided_slice %0 {offsets = [0, 6, 0], sizes = [8, 1, 32], strides = [1, 1, 1]} : vector<8x8x32xf32> to vector<8x1x32xf32>
    %716 = vector.shape_cast %715 : vector<8x1x32xf32> to vector<8x32xf32>
    %717 = arith.addf %714, %716 : vector<8x32xf32>
    %cst_102 = arith.constant dense<0.000000e+00> : vector<8xf32>
    %718 = vector.multi_reduction <add>, %717, %cst_102 [1] : vector<8x32xf32> to vector<8xf32>
    %719 = vector.shape_cast %718 : vector<8xf32> to vector<8x1xf32>
    %cst_103 = arith.constant 3.200000e+01 : f32
    %720 = vector.broadcast %cst_103 : f32 to vector<8x1xf32>
    %721 = arith.divf %719, %720 : vector<8x1xf32>
    %722 = vector.broadcast %721 : vector<8x1xf32> to vector<8x32xf32>
    %723 = arith.subf %717, %722 : vector<8x32xf32>
    %724 = arith.mulf %723, %723 : vector<8x32xf32>
    %cst_104 = arith.constant dense<0.000000e+00> : vector<8xf32>
    %725 = vector.multi_reduction <add>, %724, %cst_104 [1] : vector<8x32xf32> to vector<8xf32>
    %726 = vector.shape_cast %725 : vector<8xf32> to vector<8x1xf32>
    %cst_105 = arith.constant 3.200000e+01 : f32
    %727 = vector.broadcast %cst_105 : f32 to vector<8x1xf32>
    %728 = arith.divf %726, %727 : vector<8x1xf32>
    %729 = vector.broadcast %721 : vector<8x1xf32> to vector<8x32xf32>
    %730 = arith.subf %717, %729 : vector<8x32xf32>
    %cst_106 = arith.constant 9.99999974E-6 : f32
    %731 = vector.broadcast %cst_106 : f32 to vector<8x1xf32>
    %732 = arith.addf %728, %731 : vector<8x1xf32>
    %733 = math.rsqrt %732 : vector<8x1xf32>
    %734 = vector.broadcast %733 : vector<8x1xf32> to vector<8x32xf32>
    %735 = arith.mulf %730, %734 : vector<8x32xf32>
    %736 = vector.broadcast %2 : vector<1x32xf32> to vector<8x32xf32>
    %737 = arith.mulf %735, %736 : vector<8x32xf32>
    %738 = vector.broadcast %3 : vector<1x32xf32> to vector<8x32xf32>
    %739 = arith.addf %737, %738 : vector<8x32xf32>
    %740 = vector.shape_cast %739 : vector<8x32xf32> to vector<8x1x32xf32>
    %c0_107 = arith.constant 0 : index
    %c6 = arith.constant 6 : index
    %c0_108 = arith.constant 0 : index
    %741 = vector.load %arg11[%c0_107, %c6, %c0_108] : memref<8x8x32xf32, #tpu.memory_space<vmem>>, vector<8x1x32xf32>
    tpu.vector_store %arg11[%c0_107, %c6, %c0_108], %740 {strides = array<i32>} : memref<8x8x32xf32, #tpu.memory_space<vmem>>, vector<8x1x32xf32>,
    %742 = vector.extract_strided_slice %524 {offsets = [56, 0], sizes = [8, 32], strides = [1, 1]} : vector<64x32xf32> to vector<8x32xf32>
    %743 = vector.extract_strided_slice %24 {offsets = [0, 7, 0], sizes = [8, 1, 32], strides = [1, 1, 1]} : vector<8x8x32xf32> to vector<8x1x32xf32>
    %744 = vector.shape_cast %743 : vector<8x1x32xf32> to vector<8x32xf32>
    %745 = arith.addf %742, %744 : vector<8x32xf32>
    %746 = vector.extract_strided_slice %0 {offsets = [0, 7, 0], sizes = [8, 1, 32], strides = [1, 1, 1]} : vector<8x8x32xf32> to vector<8x1x32xf32>
    %747 = vector.shape_cast %746 : vector<8x1x32xf32> to vector<8x32xf32>
    %748 = arith.addf %745, %747 : vector<8x32xf32>
    %cst_109 = arith.constant dense<0.000000e+00> : vector<8xf32>
    %749 = vector.multi_reduction <add>, %748, %cst_109 [1] : vector<8x32xf32> to vector<8xf32>
    %750 = vector.shape_cast %749 : vector<8xf32> to vector<8x1xf32>
    %cst_110 = arith.constant 3.200000e+01 : f32
    %751 = vector.broadcast %cst_110 : f32 to vector<8x1xf32>
    %752 = arith.divf %750, %751 : vector<8x1xf32>
    %753 = vector.broadcast %752 : vector<8x1xf32> to vector<8x32xf32>
    %754 = arith.subf %748, %753 : vector<8x32xf32>
    %755 = arith.mulf %754, %754 : vector<8x32xf32>
    %cst_111 = arith.constant dense<0.000000e+00> : vector<8xf32>
    %756 = vector.multi_reduction <add>, %755, %cst_111 [1] : vector<8x32xf32> to vector<8xf32>
    %757 = vector.shape_cast %756 : vector<8xf32> to vector<8x1xf32>
    %cst_112 = arith.constant 3.200000e+01 : f32
    %758 = vector.broadcast %cst_112 : f32 to vector<8x1xf32>
    %759 = arith.divf %757, %758 : vector<8x1xf32>
    %760 = vector.broadcast %752 : vector<8x1xf32> to vector<8x32xf32>
    %761 = arith.subf %748, %760 : vector<8x32xf32>
    %cst_113 = arith.constant 9.99999974E-6 : f32
    %762 = vector.broadcast %cst_113 : f32 to vector<8x1xf32>
    %763 = arith.addf %759, %762 : vector<8x1xf32>
    %764 = math.rsqrt %763 : vector<8x1xf32>
    %765 = vector.broadcast %764 : vector<8x1xf32> to vector<8x32xf32>
    %766 = arith.mulf %761, %765 : vector<8x32xf32>
    %767 = vector.broadcast %2 : vector<1x32xf32> to vector<8x32xf32>
    %768 = arith.mulf %766, %767 : vector<8x32xf32>
    %769 = vector.broadcast %3 : vector<1x32xf32> to vector<8x32xf32>
    %770 = arith.addf %768, %769 : vector<8x32xf32>
    %771 = vector.shape_cast %770 : vector<8x32xf32> to vector<8x1x32xf32>
    %c0_114 = arith.constant 0 : index
    %c7 = arith.constant 7 : index
    %c0_115 = arith.constant 0 : index
    %772 = vector.load %arg11[%c0_114, %c7, %c0_115] : memref<8x8x32xf32, #tpu.memory_space<vmem>>, vector<8x1x32xf32>
    tpu.vector_store %arg11[%c0_114, %c7, %c0_115], %771 {strides = array<i32>} : memref<8x8x32xf32, #tpu.memory_space<vmem>>, vector<8x1x32xf32>,
    return
  }
  func.func @transform_0(%arg0: i32) -> (i32, i32, i32) {
    %c0_i32 = arith.constant 0 : i32
    %c0_i32_0 = arith.constant 0 : i32
    %c0_i32_1 = arith.constant 0 : i32
    return %c0_i32, %arg0, %c0_i32_0 : i32, i32, i32
  }
  func.func @transform_1(%arg0: i32) -> (i32, i32) {
    %c0_i32 = arith.constant 0 : i32
    %c0_i32_0 = arith.constant 0 : i32
    return %arg0, %c0_i32 : i32, i32
  }
  func.func @transform_2(%arg0: i32) -> (i32, i32) {
    %c0_i32 = arith.constant 0 : i32
    %c0_i32_0 = arith.constant 0 : i32
    %c0_i32_1 = arith.constant 0 : i32
    return %c0_i32, %c0_i32_0 : i32, i32
  }
  func.func @transform_3(%arg0: i32) -> (i32, i32) {
    %c0_i32 = arith.constant 0 : i32
    %c0_i32_0 = arith.constant 0 : i32
    %c0_i32_1 = arith.constant 0 : i32
    return %c0_i32, %c0_i32_0 : i32, i32
  }
  func.func @transform_4(%arg0: i32) -> (i32, i32) {
    %c0_i32 = arith.constant 0 : i32
    %c0_i32_0 = arith.constant 0 : i32
    %c0_i32_1 = arith.constant 0 : i32
    return %c0_i32, %c0_i32_0 : i32, i32
  }
  func.func @transform_5(%arg0: i32) -> (i32, i32) {
    %c0_i32 = arith.constant 0 : i32
    %c0_i32_0 = arith.constant 0 : i32
    %c0_i32_1 = arith.constant 0 : i32
    return %c0_i32, %c0_i32_0 : i32, i32
  }
  func.func @transform_6(%arg0: i32) -> (i32, i32) {
    %c0_i32 = arith.constant 0 : i32
    %c0_i32_0 = arith.constant 0 : i32
    %c0_i32_1 = arith.constant 0 : i32
    return %c0_i32, %c0_i32_0 : i32, i32
  }
  func.func @transform_7(%arg0: i32) -> (i32, i32) {
    %c0_i32 = arith.constant 0 : i32
    %c0_i32_0 = arith.constant 0 : i32
    %c0_i32_1 = arith.constant 0 : i32
    return %c0_i32, %c0_i32_0 : i32, i32
  }
  func.func @transform_8(%arg0: i32) -> (i32, i32) {
    %c0_i32 = arith.constant 0 : i32
    %c0_i32_0 = arith.constant 0 : i32
    %c0_i32_1 = arith.constant 0 : i32
    return %c0_i32, %c0_i32_0 : i32, i32
  }
  func.func @transform_9(%arg0: i32) -> (i32, i32) {
    %c0_i32 = arith.constant 0 : i32
    %c0_i32_0 = arith.constant 0 : i32
    %c0_i32_1 = arith.constant 0 : i32
    return %c0_i32, %c0_i32_0 : i32, i32
  }
  func.func @transform_10(%arg0: i32) -> (i32, i32, i32) {
    %c0_i32 = arith.constant 0 : i32
    %c0_i32_0 = arith.constant 0 : i32
    %c0_i32_1 = arith.constant 0 : i32
    return %c0_i32, %arg0, %c0_i32_0 : i32, i32, i32
  }
}

</mosaic_0001>

<bundles_post_ra>
// kernel: tpu_custom_call.1
= control target key start
LH: loop header
LB: loop body
LE: loop exit
PB: predicated region body
PF: predicated region fallthrough
CT: control target
= control target key end

     0   :  { %15 = vsyncpa [#allocation3], 0  ;;  %s10766_s0 = inlined_call_operand.hbm [shape: f32[8,16,32], index: 0, kind: input, shape index: {}]   ;;  %s10767_s1 = inlined_call_operand.vmem [shape: f32[16,8], index: 1, kind: input, shape index: {}]   ;;  %s10768_s2 = inlined_call_operand.vmem [shape: f32[1,32], index: 2, kind: input, shape index: {}]   ;;  %s10769_s3 = inlined_call_operand.vmem [shape: f32[1,32], index: 3, kind: input, shape index: {}]   ;;  %s10770_s4 = inlined_call_operand.vmem [shape: bf16[32,160], index: 4, kind: input, shape index: {}]   ;;  %s10771_s5 = inlined_call_operand.vmem [shape: f32[1,160], index: 5, kind: input, shape index: {}]   ;;  %s10772_s6 = inlined_call_operand.vmem [shape: bf16[32,32], index: 6, kind: input, shape index: {}]   ;;  %s10773_s7 = inlined_call_operand.vmem [shape: f32[1,32], index: 7, kind: input, shape index: {}]   ;;  %s10774_s8 = inlined_call_operand.vmem [shape: bf16[64,32], index: 8, kind: input, shape index: {}]   ;;  %s10775_s9 = inlined_call_operand.vmem [shape: f32[1,32], index: 9, kind: input, shape index: {}]   ;;  %s10776_s10 = inlined_call_operand.hbm [shape: f32[8,16,32], index: 10, kind: output, shape index: {}]  }
   0x1   :  { %17 = vsyncpa [#allocation3 + $0x1], 0 }
   0x2   :  { %18 = vsyncpa [#allocation4], 0 }
   0x3   :  { %20 = vsyncpa [#allocation4 + $0x1], 0  ;;  %s7737_s13 = smov 0   ;;  %s7739_s14 = smov 0  }
   0x4   :  { %s7741_s15 = smov 0   ;;  %s7743_s16 = smov 0  }
   0x5 LB: > { %s7758_s17 = sadd.s32 4294967295, %s7660_s16   ;;  %s6619_s18 = sadd.s32 4294967294, %s7660_s16   ;;  %s7660_s16 = sphi %s7743_s16, %s11128_s16   ;;  %s7656_s15 = sphi %s7741_s15, %s11127_s15   ;;  %s7652_s14 = sphi %s7739_s14, %s11126_s14   ;;  %s7648_s13 = sphi %s7737_s13, %s11125_s13  }
   0x6   : > { %s7762_s19 = sadd.s32 1, %s7660_s16   ;;  %s33_s20 = sadd.s32 1, %s7656_s15 }
   0x7   : > { %s30_s21 = ssub.s32 %s7660_s16, %s7762_s19  ;;  %p40_p0 = scmp.ne.s32.totalorder %s7656_s15, %s7652_s14 }
   0x8   : > { %p31_p1 = scmp.eq.s32.totalorder %s30_s21, 0  ;;  %p41_p2 = scmp.eq.s32.totalorder %s7660_s16, 0 }
   0x9   : > { %p46_p3 = scmp.ne.s32.totalorder %s7652_s14, %s7648_s13  ;;  %p47_p4 = scmp.eq.s32.totalorder %s7758_s17, 0 }
   0xa   : > { %s7774_s22 = scalar_select %p31_p1, %s7656_s15, %s33_s20  }
   0xb   : > { %p7776_p5 = por %p41_p2, %p40_p0  ;;  %p7780_p6 = por %p47_p4, %p46_p3 }
   0xc   : > { %10877 = sst [smem:[#allocation8_spill]] %s7774_s22  ;;  %p264_p7 = scmp.eq.s32.totalorder %s7758_s17, 1 }
   0xd   : > { %p270_p8 = scmp.eq.s32.totalorder %s6619_s18, 1  ;;  %p7288_p10 = scmp.lt.s32.totalorder %s7660_s16, 2 }
   0xe   : > { %p7787_p11 = por %p264_p7, %p40_p0  ;;  %s314_s27 = sand.u32 1, %s7656_s15  }
   0xf   : > { %p7791_p12 = por %p270_p8, %p46_p3  ;;  %s6623_s28 = sshll.u32 %s7660_s16, 7 }
  0x10   : > { %s10880_s25 = scalar_select %p7787_p11, 1, 0 }
  0x11   : > { %s10881_s26 = scalar_select %p7791_p12, 1, 0 }
  0x12   : > { %s6622_s29 = sshll.u32 %s314_s27, 6  ;;  %s7800_s12 = scalar_lea.hbm %s10766_s0, %s6623_s28 }
  0x13   : > { %s318_s18 = scalar_lea.vmem [#allocation2], %s6622_s29  ;;  %p7804_p13 = pnand %p7288_p10, %p7776_p5 }
  0x14   : > { %s324_s20 = sshll.u32 %s318_s18, 4  ;;  %s7811_s22 = scalar_lea.sflag [#allocation3], %s314_s27  ;;  %s7808_s20 = int_to_ptr.vmem [resolvable:$true] %s324_s20 }
  0x15   : > { %s7564_s28 = scalar_lea.hbm %s7800_s12, 1024  ;;  %p7566_p2 = pneg %p7804_p13 }
  0x16   : > { %p7565_p1 = scmp.ne.s32.totalorder %s7800_s12, %s7564_s28  ;;  %s7569_s30 = scalar_lea.hbm %s10766_s0, 2048 }
  0x17   : > { %p7570_p5 = scmp.lt.u32.totalorder %s7800_s12, %s10766_s0  ;;  %p7571_p7 = scmp.lt.u32.totalorder %s7569_s30, %s7564_s28 }
  0x18   : > { %p7567_p3 = pnand %p7566_p2, %p7565_p1  ;;  %p7573_p10 = scmp.lt.u32.totalorder %s7564_s28, %s7800_s12 }
  0x19   : > { %p7572_p8 = por %p7571_p7, %p7570_p5 }
  0x1a   : > { %p7568_p4 = pneg %p7567_p3 }
  0x1b   : > { %p7574_p9 = por %p7573_p10, %p7572_p8 }
  0x1d   : > { %p7575_p0 = pnand %p7574_p9, %p7568_p4 }
  0x1f   : > { %7578 = shalt.err (!%p7575_p0)
}
  0x20   : > { %s7579_s27 = scalar_lea.vmem %s7808_s20, 1024  ;;  %s7662_s23 = smov [#allocation2]  }
  0x21   : > { %p7580_p1 = scmp.ne.s32.totalorder %s7808_s20, %s7579_s27  ;;  %s7584_s29 = sshll.u32 %s7662_s23, 4  ;;  %s7585_s29 = int_to_ptr.vmem [resolvable:$false] %s7584_s29 }
  0x22   : > { %s7586_s11 = scalar_lea.vmem %s7585_s29, 2048  ;;  %p7587_p11 = scmp.lt.s32.totalorder %s7808_s20, %s7585_s29 }
  0x23   : > { %p7582_p3 = pnand %p7580_p1, %p7566_p2  ;;  %p7588_p5 = scmp.lt.s32.totalorder %s7586_s11, %s7579_s27 }
  0x25   : > { %p7583_p12 = pneg %p7582_p3  ;;  %p7589_p7 = por %p7588_p5, %p7587_p11 }
  0x27   : > { %p7590_p8 = pnand %p7589_p7, %p7583_p12 }
  0x29   : > { %7593 = shalt.err (!%p7590_p8)
}
  0x2a   : > { %s7663_s28 = smov 256   ;;  %s7664_s30 = smov 128  }
  0x2b   : > { %s7665_s18 = smov 8   ;;  %p339_p9 = scmp.lt.s32.totalorder %s7660_s16, 3 }
  0x2c   : > { %7283 = dma.hbm_to_vmem [thread:$0]  (!%p7804_p13), %s7800_s12, 1024, %s7808_s20, %s7811_s22, %s7663_s28, %s7664_s30, %s7665_s18  }
  0x2d   : > { %p10883_p0 = scmp.ge.s32.totalorder %s7660_s16, 1 }
  0x2f   : > { %p340_p2 = pnand %p10883_p0, %p339_p9 }
  0x31   : > { %343 = sbr.rel (%p340_p2) target bundleno = 6170 (0x181a), region = 60 }
  0x38   : > { %s7843_s27 = sand.u32 1, %s7652_s14  }
  0x39   : > { %s6625_s23 = sshll.u32 %s7843_s27, 6  ;;  %s346_s29 = scalar_lea.sflag [#allocation3], %s7843_s27 }
  0x3a   : > { %s7849_s11 = scalar_lea.vmem [#allocation2], %s6625_s23 }
  0x3b   : > { %7639 = dma.done.wait (%p7780_p6), %s346_s29, 1024  }
  0x3c   : > { %7641 = vsyncadd (%p7780_p6), %s346_s29, 4294966272  ;;  %v7666_v0 = vmov 0   ;;  %v7400_v1 = vld [vmem:[%s10770_s4 + $0x4] ss:$8 sps:$4 sm:$0xff]   ;;  %v7402_v2 = vld [vmem:[%s10770_s4] ss:$8 sps:$4 sm:$0xff]   ;;  %v415_v17 = vlaneseq }
  0x3d   : > { %490 = vmatprep.mubr.bf16.mxu0 %v7666_v0  ;;  %458 = vmatprep.subr.bf16.mxu0 %v7400_v1  ;;  %v7403_v3 = vld [vmem:[%s10770_s4 + $0x14] ss:$8 sps:$4 sm:$0xff]   ;;  %v7405_v4 = vld [vmem:[%s10770_s4 + $0x10] ss:$8 sps:$4 sm:$0xff]   ;;  %v395_v5 = vld [vmem:[%s7849_s11] sm:$0xff]  ;;  %vm445_vm0 = vcmask 261120  }
  0x3e   : > { %459 = vmatpush1.bf16.msra.mxu0 %v7402_v2  ;;  %v396_v6 = vld [vmem:[%s7849_s11 + $0x8] sm:$0xff]  ;;  %v397_v8 = vld [vmem:[%s7849_s11 + $0x10] sm:$0xff]  ;;  %v398_v9 = vld [vmem:[%s7849_s11 + $0x18] sm:$0xff]  ;;  %v7879_v18 = vshrl.u32 %v415_v17, 7  ;;  %s7667_s12 = smov 120   ;;  %s7668_s20 = smov 112  }
  0x3f   : > { %460 = vmatprep.subr.bf16.mxu0 %v7403_v3  ;;  %v405_v7 = vpack.c.bf16 %v396_v6, %v395_v5  ;;  %v406_v10 = vpack.c.bf16 %v398_v9, %v397_v8  ;;  %v399_v11 = vld [vmem:[%s7849_s11 + $0x20] sm:$0xff]  ;;  %v400_v12 = vld [vmem:[%s7849_s11 + $0x28] sm:$0xff]  ;;  %v401_v14 = vld [vmem:[%s7849_s11 + $0x30] sm:$0xff]  ;;  %vm853_vm1 = vcmask 1041409   ;;  %s7669_s21 = smov 104   ;;  %vm856_vm2 = vcmask 1042434  }
  0x40   : > { %v407_v13 = vpack.c.bf16 %v400_v12, %v399_v11  ;;  %v402_v15 = vld [vmem:[%s7849_s11 + $0x38] sm:$0xff]  ;;  %10884 = vst [vmem:[#allocation9_spill] sm:$0xff] %v7879_v18  ;;  %v10779_v19 = vsub.s32 0, %v7879_v18  ;;  %v413_v20 = vld [vmem:[%s10771_s5] sm:$0x3]  ;;  %v10778_v21 = vsub.s32 1, %v7879_v18 }
  0x41   : > { %v408_v16 = vpack.c.bf16 %v402_v15, %v401_v14  ;;  %vm859_vm3 = vcmask 1043459   ;;  %vm862_vm4 = vcmask 1044484   ;;  %vm865_vm5 = vcmask 1045509   ;;  %s7670_s29 = smov 32   ;;  %s7673_s18 = smov 96  }
  0x42   : > { %461 = vmatpush1.bf16.msra.mxu0 %v7405_v4  ;;  %v7888_v22 = vrot.slane %v413_v20, %v10779_v19  ;;  %v7892_v23 = vrot.slane %v413_v20, %v10778_v21  ;;  %vm868_vm6 = vcmask 1046534   ;;  %vm871_vm7 = vcmask 1047559   ;;  %p390_p6 = scmp.lt.s32.totalorder %s7758_s17, 1  ;;  %s7674_s24 = smov 64  }
  0x43   : > { %vm7672_vm8 = vmmov 0   ;;  %vm631_vm9 = vcmask 523264   ;;  %vm899_vm10 = vcmask 64512   ;;  %vm1281_vm12 = vcmask 1043456   ;;  %p11121_p12 = scmp.ne.s32.totalorder %s10880_s25, 0 }
  0x44   : > { %vm1482_vm13 = vcmask 130048   ;;  %vm1484_vm14 = vcmask 195584   ;;  %vm5721_vm15 = vcmask 253952  }
  0x45   : > { %6632 = vmatmul.mubr.msk.bf16.vlgmr.msra.gmra.mrb[0].mxu0 %vm445_vm0, %v405_v7 }
  0x46   : > { %500 = vmatprep.mubr.bf16.mxu0 %v7666_v0 }
  0x4d   : > { %6633 = vmatmul.mubr.msk.bf16.gmra.mrb[4].mxu0 %vm445_vm0, %v406_v10 }
  0x4e   : > { %510 = vmatprep.mubr.bf16.mxu0 %v7666_v0 }
  0x55   : > { %6634 = vmatmul.mubr.msk.bf16.gmra.mrb[8].mxu0 %vm445_vm0, %v407_v13 }
  0x56   : > { %520 = vmatprep.mubr.bf16.mxu0 %v7666_v0 }
  0x5d   : > { %6635 = vmatmul.mubr.msk.bf16.gmra.mrb[12].mxu0 %vm445_vm0, %v408_v16 }
 0x118   : > { %v492_v24 = vpop.f32.mrb[0].mxu0 }
 0x119   : > { %v493_v25 = vadd.f32 %v492_v24, %v7888_v22  ;;  %v494_v26 = vpop.f32.mrb[1].mxu0 }
 0x11a   : > { %v495_v27 = vadd.f32 %v494_v26, %v7892_v23  ;;  %v496_v28 = vpop.f32.mrb[2].mxu0 }
 0x11b   : > { %v717_v29 = vpack.c.bf16 %v493_v25, %v493_v25  ;;  %v497_v30 = vadd.f32 %v496_v28, %v7888_v22  ;;  %v498_v31 = vpop.f32.mrb[3].mxu0  ;;  %v531_v33 = vmul.f32 0.35355338, %v493_v25  ;;  %v539_v34 = vmax.f32 %v493_v25, 0.0 }
 0x11c   : > { %v499_v32 = vadd.f32 %v498_v31, %v7892_v23  ;;  %v540_v36 = vmax.f32 %v495_v27, 0.0 }
 0x11d   : > { %v541_v35 = vmax.f32 %v497_v30, 0.0  ;;  %792 = vrot.lane.b32.xlu1 %v717_v29, %s7667_s12  ;;  %v718_v37 = vpack.c.bf16 %v497_v30, %v497_v30  ;;  %v532_v39 = vmul.f32 0.35355338, %v497_v30  ;;  %v7906_v44 = vpack.c.bf16 %v531_v33, %v531_v33 }
 0x11e   : > { %v542_v38 = vmax.f32 %v499_v32, 0.0  ;;  %v7908_v45 = vunpack.c.l.b16 %v717_v29 }
 0x11f   : > { %v7899_v40 = vpack.c.bf16 %v541_v35, %v539_v34  ;;  %v7901_v41 = vunpack.c.l.b16 %v718_v37  ;;  %794 = vrot.lane.b32.xlu0 %v718_v37, %s7667_s12  ;;  %v7913_v50 = vpack.c.bf16 %v532_v39, %v532_v39  ;;  %v7920_v58 = vunpack.c.l.b16 %v7906_v44 }
 0x120   : > { %v7903_v42 = vpack.c.bf16 %v542_v38, %v540_v36  ;;  %v502_v43 = vpop.f32.mrb[4].mxu0  ;;  %v1505_v61 = vrot.slane %v7908_v45, 1 }
 0x121   : > { %v503_v46 = vadd.f32 %v502_v43, %v7888_v22  ;;  %v504_v47 = vpop.f32.mrb[5].mxu0  ;;  %808 = vrot.lane.b32.xlu1 %v717_v29, %s7668_s20  ;;  %v882_v57 = vrot.slane %v7901_v41, 7  ;;  %v7929_v0 = vunpack.c.l.b16 %v7913_v50  ;;  %v1490_v13 = vrot.slane %v7920_v58, 1 }
 0x122   : > { %v505_v48 = vadd.f32 %v504_v47, %v7892_v23  ;;  %v506_v49 = vpop.f32.mrb[6].mxu0  ;;  %v1506_v12 = vsel %vm853_vm1, %v7901_v41, %v1505_v61  ;;  %v2077_v39 = vrot.slane %v7901_v41, 1 }
 0x123   : > { %v543_v51 = vmax.f32 %v503_v46, 0.0  ;;  %v719_v52 = vpack.c.bf16 %v503_v46, %v503_v46  ;;  %v507_v53 = vadd.f32 %v506_v49, %v7888_v22  ;;  %v508_v54 = vpop.f32.mrb[7].mxu0  ;;  %810 = vrot.lane.b32.xlu0 %v718_v37, %s7668_s20  ;;  %v533_v1 = vmul.f32 0.35355338, %v503_v46 }
 0x124   : > { %v544_v55 = vmax.f32 %v505_v48, 0.0  ;;  %v509_v56 = vadd.f32 %v508_v54, %v7892_v23  ;;  %v883_v7 = vsel %vm853_vm1, %v882_v57, %v7908_v45  ;;  %v1491_v48 = vsel %vm853_vm1, %v7929_v0, %v1490_v13 }
 0x125   : > { %v7922_v59 = vunpack.c.l.b16 %v719_v52  ;;  %v545_v60 = vmax.f32 %v507_v53, 0.0  ;;  %824 = vrot.lane.b32.xlu1 %v717_v29, %s7669_s21  ;;  %v7926_v62 = vpack.c.bf16 %v507_v53, %v507_v53  ;;  %v7953_v24 = vpack.c.bf16 %v533_v1, %v533_v1 }
 0x126   : > { %v546_v63 = vmax.f32 %v509_v56, 0.0  ;;  %v534_v32 = vmul.f32 0.35355338, %v507_v53 }
 0x127   : > { %v7931_v2 = vpack.c.bf16 %v545_v60, %v543_v51  ;;  %v884_v3 = vrot.slane %v7922_v59, 6  ;;  %v7935_v4 = vunpack.c.l.b16 %v7926_v62  ;;  %826 = vrot.lane.b32.xlu0 %v718_v37, %s7669_s21  ;;  %v1507_v8 = vrot.slane %v7922_v59, 7 }
 0x128   : > { %v7937_v5 = vpack.c.bf16 %v546_v63, %v544_v55  ;;  %v512_v6 = vpop.f32.mrb[8].mxu0  ;;  %v7970_v43 = vunpack.c.l.b16 %v7953_v24  ;;  %v7985_v55 = vpack.c.bf16 %v534_v32, %v534_v32 }
 0x129   : > { %v513_v9 = vadd.f32 %v512_v6, %v7888_v22  ;;  %v514_v10 = vpop.f32.mrb[9].mxu0  ;;  %812 = vrot.lane.b32.xlu1 %v719_v52, %s7668_s20  ;;  %v885_v11 = vsel %vm856_vm2, %v884_v3, %v883_v7  ;;  %v886_v16 = vrot.slane %v7935_v4, 5  ;;  %v1508_v17 = vsel %vm856_vm2, %v1507_v8, %v1506_v12 }
 0x12a   : > { %v515_v14 = vadd.f32 %v514_v10, %v7892_v23  ;;  %v516_v15 = vpop.f32.mrb[10].mxu0  ;;  %v1509_v20 = vrot.slane %v7935_v4, 6 }
 0x12b   : > { %v547_v25 = vmax.f32 %v513_v9, 0.0  ;;  %v7955_v26 = vpack.c.bf16 %v513_v9, %v513_v9  ;;  %v517_v27 = vadd.f32 %v516_v15, %v7888_v22  ;;  %v518_v28 = vpop.f32.mrb[11].mxu0  ;;  %796 = vrot.lane.b32.xlu0 %v719_v52, %s7667_s12  ;;  %v887_v31 = vsel %vm859_vm3, %v886_v16, %v885_v11 }
 0x12c   : > { %v548_v29 = vmax.f32 %v515_v14, 0.0  ;;  %v519_v30 = vadd.f32 %v518_v28, %v7892_v23  ;;  %v535_v33 = vmul.f32 0.35355338, %v513_v9  ;;  %v1510_v38 = vsel %vm859_vm3, %v1509_v20, %v1508_v17 }
 0x12d   : > { %v7962_v34 = vunpack.c.l.b16 %v7955_v26  ;;  %v549_v35 = vmax.f32 %v517_v27, 0.0  ;;  %828 = vrot.lane.b32.xlu1 %v719_v52, %s7669_s21  ;;  %v7965_v36 = vpack.c.bf16 %v517_v27, %v517_v27  ;;  %v536_v49 = vmul.f32 0.35355338, %v517_v27 }
 0x12e   : > { %v550_v37 = vmax.f32 %v519_v30, 0.0  ;;  %v7987_v56 = vpack.c.bf16 %v535_v33, %v535_v33 }
 0x12f   : > { %v7972_v46 = vpack.c.bf16 %v549_v35, %v547_v25  ;;  %v888_v47 = vrot.slane %v7962_v34, 4  ;;  %v7978_v51 = vunpack.c.l.b16 %v7965_v36  ;;  %814 = vrot.lane.b32.xlu0 %v7926_v62, %s7668_s20  ;;  %v1511_v54 = vrot.slane %v7962_v34, 5 }
 0x130   : > { %v7980_v52 = vpack.c.bf16 %v550_v37, %v548_v29  ;;  %v522_v53 = vpop.f32.mrb[12].mxu0  ;;  %v8000_v13 = vpack.c.bf16 %v536_v49, %v536_v49  ;;  %v8023_v30 = vunpack.c.l.b16 %v7987_v56 }
 0x131   : > { %v523_v57 = vadd.f32 %v522_v53, %v7888_v22  ;;  %v524_v60 = vpop.f32.mrb[13].mxu0  ;;  %798 = vrot.lane.b32.xlu1 %v7926_v62, %s7667_s12  ;;  %v889_v61 = vsel %vm862_vm4, %v888_v47, %v887_v31  ;;  %v890_v3 = vrot.slane %v7978_v51, 3  ;;  %v1512_v6 = vsel %vm862_vm4, %v1511_v54, %v1510_v38 }
 0x132   : > { %v525_v63 = vadd.f32 %v524_v60, %v7892_v23  ;;  %v526_v1 = vpop.f32.mrb[14].mxu0  ;;  %v1513_v7 = vrot.slane %v7978_v51, 4  ;;  %v8031_v35 = vunpack.c.l.b16 %v8000_v13 }
 0x133   : > { %v537_v8 = vmul.f32 0.35355338, %v523_v57  ;;  %v551_v9 = vmax.f32 %v523_v57, 0.0  ;;  %v7997_v10 = vpack.c.bf16 %v523_v57, %v523_v57  ;;  %v527_v11 = vadd.f32 %v526_v1, %v7888_v22  ;;  %v528_v12 = vpop.f32.mrb[15].mxu0  ;;  %830 = vrot.lane.b32.xlu0 %v7926_v62, %s7669_s21 }
 0x134   : > { %v552_v14 = vmax.f32 %v525_v63, 0.0  ;;  %v529_v15 = vadd.f32 %v528_v12, %v7892_v23  ;;  %v891_v16 = vsel %vm865_vm5, %v890_v3, %v889_v61  ;;  %v8014_v22 = vunpack.c.l.b16 %v7985_v55  ;;  %v7406_v23 = vld [vmem:[%s10774_s8] sm:$0xff]   ;;  %v7407_v61 = vld [vmem:[%s10774_s8 + $0x8] sm:$0xff]  }
 0x135   : > { %v8006_v17 = vpack.c.bf16 %v537_v8, %v537_v8  ;;  %v8009_v20 = vunpack.c.l.b16 %v7997_v10  ;;  %v538_v25 = vmul.f32 0.35355338, %v527_v11  ;;  %v553_v27 = vmax.f32 %v527_v11, 0.0  ;;  %802 = vrot.lane.b32.xlu1 %v7965_v36, %s7667_s12  ;;  %6864 = vmatprep.subr.bf16.mxu1 %v7406_v23 }
 0x136   : > { %v8016_v28 = vpack.c.bf16 %v527_v11, %v527_v11  ;;  %v554_v62 = vmax.f32 %v529_v15, 0.0  ;;  %v1514_v29 = vsel %vm865_vm5, %v1513_v7, %v1512_v6  ;;  %6865 = vmatpush3.bf16.msra.mxu1 %v7406_v23  ;;  %v1492_v57 = vrot.slane %v7970_v43, 7 }
 0x137   : > { %v8025_v31 = vpack.c.bf16 %v538_v25, %v538_v25  ;;  %v8027_v32 = vpack.c.bf16 %v553_v27, %v551_v9  ;;  %v892_v33 = vrot.slane %v8009_v20, 2  ;;  %800 = vrot.lane.b32.xlu0 %v7955_v26, %s7667_s12  ;;  %v1515_v47 = vrot.slane %v8009_v20, 3  ;;  %6866 = vmatprep.subr.bf16.mxu1 %v7407_v61 }
 0x138   : > { %v8034_v37 = vunpack.c.l.b16 %v8016_v28  ;;  %v8038_v38 = vpack.c.bf16 %v554_v62, %v552_v14  ;;  %v8042_v49 = vunpack.c.l.b16 %v8006_v17  ;;  %v1494_v3 = vrot.slane %v8014_v22, 6 }
 0x139   : > { %v8045_v53 = vunpack.c.l.b16 %v8025_v31  ;;  %818 = vrot.lane.b32.xlu1 %v7965_v36, %s7668_s20  ;;  %v893_v54 = vsel %vm868_vm6, %v892_v33, %v891_v16  ;;  %v1516_v63 = vsel %vm868_vm6, %v1515_v47, %v1514_v29  ;;  %v1493_v6 = vsel %vm856_vm2, %v1492_v57, %v1491_v48  ;;  %v7408_v16 = vld [vmem:[%s10774_s8 + $0x10] sm:$0xff]  }
 0x13a   : > { %v894_v60 = vrot.slane %v8034_v37, 1  ;;  %v1517_v1 = vrot.slane %v8034_v37, 2  ;;  %v1496_v7 = vrot.slane %v8023_v30, 5  ;;  %v2076_v8 = vrot.slane %v7908_v45, 2  ;;  %6867 = vmatpush3.bf16.msra.mxu1 %v7407_v61 }
 0x13b   : > { %816 = vrot.lane.b32.xlu0 %v7955_v26, %s7668_s20  ;;  %v1495_v12 = vsel %vm859_vm3, %v1494_v3, %v1493_v6  ;;  %v1498_v14 = vrot.slane %v8031_v35, 4  ;;  %v1500_v48 = vrot.slane %v8042_v49, 3  ;;  %v1502_v27 = vrot.slane %v8045_v53, 2  ;;  %6868 = vmatprep.subr.bf16.mxu1 %v7408_v16 }
 0x13c   : > { %v8064_v9 = vsel %vm871_vm7, %v894_v60, %v893_v54  ;;  %v8067_v11 = vsel %vm871_vm7, %v1517_v1, %v1516_v63  ;;  %v2078_v15 = vsel %vm853_vm1, %v2077_v39, %v2076_v8  ;;  %v1497_v25 = vsel %vm862_vm4, %v1496_v7, %v1495_v12  ;;  %v7409_v1 = vld [vmem:[%s10774_s8 + $0x18] sm:$0xff]  }
 0x13d   : > { %10885 = vst [vmem:[#allocation10_spill] sm:$0xff] %v8067_v11  ;;  %588 = vrot.lane.b32.xlu1 %v7903_v42, %s7670_s29  ;;  %v2079_v62 = vsel %vm856_vm2, %v7922_v59, %v2078_v15  ;;  %v1499_v42 = vsel %vm865_vm5, %v1498_v14, %v1497_v25  ;;  %v2080_v23 = vrot.slane %v7935_v4, 7  ;;  %v2082_v29 = vrot.slane %v7962_v34, 6 }
 0x13e   : > { %v2061_v33 = vrot.slane %v7920_v58, 2  ;;  %v1501_v39 = vsel %vm868_vm6, %v1500_v48, %v1499_v42  ;;  %v2084_v47 = vrot.slane %v7978_v51, 5  ;;  %v2086_v54 = vrot.slane %v8009_v20, 4  ;;  %6869 = vmatpush3.bf16.msra.mxu1 %v7408_v16 }
 0x13f   : > { %832 = vrot.lane.b32.xlu0 %v7955_v26, %s7669_s21  ;;  %v2088_v57 = vrot.slane %v8034_v37, 3  ;;  %v8097_v60 = vsel %vm871_vm7, %v1502_v27, %v1501_v39  ;;  %v2081_v61 = vsel %vm859_vm3, %v2080_v23, %v2079_v62  ;;  %v2062_v26 = vrot.slane %v7929_v0, 1  ;;  %6870 = vmatprep.subr.bf16.mxu1 %v7409_v1 }
 0x140   : > { %10886 = vst [vmem:[#allocation11_spill] sm:$0xff] %v8097_v60  ;;  %v2065_v63 = vrot.slane %v8014_v22, 7  ;;  %v2083_v3 = vsel %vm862_vm4, %v2082_v29, %v2081_v61  ;;  %v2067_v6 = vrot.slane %v8023_v30, 6  ;;  %v2647_v7 = vrot.slane %v7908_v45, 3 }
 0x141   : > { %820 = vrot.lane.b32.xlu1 %v7997_v10, %s7668_s20  ;;  %v2085_v8 = vsel %vm865_vm5, %v2084_v47, %v2083_v3  ;;  %v2063_v12 = vsel %vm853_vm1, %v2062_v26, %v2061_v33  ;;  %v2069_v14 = vrot.slane %v8031_v35, 5  ;;  %v2071_v48 = vrot.slane %v8042_v49, 4 }
 0x142   : > { %v2087_v15 = vsel %vm868_vm6, %v2086_v54, %v2085_v8  ;;  %v2064_v16 = vsel %vm856_vm2, %v7970_v43, %v2063_v12  ;;  %v2648_v25 = vrot.slane %v7901_v41, 2  ;;  %v2650_v27 = vrot.slane %v7922_v59, 1  ;;  %6871 = vmatpush3.bf16.msra.mxu1 %v7409_v1 }
 0x143   : > { %834 = vrot.lane.b32.xlu0 %v7965_v36, %s7669_s21  ;;  %v8122_v62 = vsel %vm871_vm7, %v2088_v57, %v2087_v15  ;;  %v2066_v42 = vsel %vm859_vm3, %v2065_v63, %v2064_v16  ;;  %v2073_v36 = vrot.slane %v8045_v53, 3  ;;  %v2653_v23 = vrot.slane %v7962_v34, 7 }
 0x144   : > { %10887 = vst [vmem:[#allocation12_spill] sm:$0xff] %v8122_v62  ;;  %v2068_v29 = vsel %vm862_vm4, %v2067_v6, %v2066_v42  ;;  %v2649_v33 = vsel %vm853_vm1, %v2648_v25, %v2647_v7  ;;  %v2655_v39 = vrot.slane %v7978_v51, 6  ;;  %v2657_v47 = vrot.slane %v8009_v20, 5 }
 0x145   : > { %806 = vrot.lane.b32.xlu1 %v8016_v28, %s7667_s12  ;;  %v2070_v54 = vsel %vm865_vm5, %v2069_v14, %v2068_v29  ;;  %v2651_v61 = vsel %vm856_vm2, %v2650_v27, %v2649_v33  ;;  %v2659_v57 = vrot.slane %v8034_v37, 4  ;;  %v2632_v26 = vrot.slane %v7920_v58, 3 }
 0x146   : > { %v2072_v63 = vsel %vm868_vm6, %v2071_v48, %v2070_v54  ;;  %v2652_v1 = vsel %vm859_vm3, %v7935_v4, %v2651_v61  ;;  %v2633_v3 = vrot.slane %v7929_v0, 2  ;;  %v2635_v6 = vrot.slane %v7970_v43, 1 }
 0x147   : > { %804 = vrot.lane.b32.xlu0 %v7997_v10, %s7667_s12  ;;  %v8145_v7 = vsel %vm871_vm7, %v2073_v36, %v2072_v63  ;;  %v2654_v8 = vsel %vm862_vm4, %v2653_v23, %v2652_v1  ;;  %v2638_v12 = vrot.slane %v8023_v30, 7  ;;  %v2640_v15 = vrot.slane %v8031_v35, 6 }
 0x148   : > { %10888 = vst [vmem:[#allocation13_spill] sm:$0xff] %v8145_v7  ;;  %v2656_v14 = vsel %vm865_vm5, %v2655_v39, %v2654_v8  ;;  %v2634_v48 = vsel %vm853_vm1, %v2633_v3, %v2632_v26  ;;  %v2642_v16 = vrot.slane %v8042_v49, 5  ;;  %v2644_v42 = vrot.slane %v8045_v53, 4 }
 0x149   : > { %822 = vrot.lane.b32.xlu1 %v8016_v28, %s7668_s20  ;;  %v2658_v25 = vsel %vm868_vm6, %v2657_v47, %v2656_v14  ;;  %v2636_v27 = vsel %vm856_vm2, %v2635_v6, %v2634_v48  ;;  %v3218_v36 = vrot.slane %v7908_v45, 4  ;;  %v3219_v33 = vrot.slane %v7901_v41, 3 }
 0x14a   : > { %v8160_v23 = vsel %vm871_vm7, %v2659_v57, %v2658_v25  ;;  %v2637_v29 = vsel %vm859_vm3, %v8014_v22, %v2636_v27  ;;  %v3221_v39 = vrot.slane %v7922_v59, 2  ;;  %v3223_v54 = vrot.slane %v7935_v4, 1 }
 0x14b   : > { %586 = vrot.lane.b32.xlu0 %v7899_v40, %s7670_s29  ;;  %10889 = vst [vmem:[#allocation14_spill] sm:$0xff] %v8160_v23  ;;  %v2639_v47 = vsel %vm862_vm4, %v2638_v12, %v2637_v29  ;;  %v3226_v61 = vrot.slane %v7978_v51, 7  ;;  %v3220_v57 = vsel %vm853_vm1, %v3219_v33, %v3218_v36  ;;  %v3228_v26 = vrot.slane %v8009_v20, 6 }
 0x14c   : > { %v2641_v40 = vsel %vm865_vm5, %v2640_v15, %v2639_v47  ;;  %v3230_v63 = vrot.slane %v8034_v37, 5  ;;  %v3222_v3 = vsel %vm856_vm2, %v3221_v39, %v3220_v57  ;;  %v3204_v6 = vrot.slane %v7929_v0, 3 }
 0x14d   : > { %838 = vrot.lane.b32.xlu1 %v8016_v28, %s7669_s21  ;;  %v2643_v1 = vsel %vm868_vm6, %v2642_v16, %v2641_v40  ;;  %v3203_v28 = vrot.slane %v7920_v58, 4  ;;  %v3224_v12 = vsel %vm859_vm3, %v3223_v54, %v3222_v3  ;;  %v3206_v14 = vrot.slane %v7970_v43, 2 }
 0x14e   : > { %v8182_v8 = vsel %vm871_vm7, %v2644_v42, %v2643_v1  ;;  %v3208_v48 = vrot.slane %v8014_v22, 1  ;;  %v3225_v15 = vsel %vm862_vm4, %v7962_v34, %v3224_v12  ;;  %v3211_v25 = vrot.slane %v8031_v35, 7 }
 0x14f   : > { %836 = vrot.lane.b32.xlu0 %v7997_v10, %s7669_s21  ;;  %10890 = vst [vmem:[#allocation15_spill] sm:$0xff] %v8182_v8  ;;  %v3205_v16 = vsel %vm853_vm1, %v3204_v6, %v3203_v28  ;;  %v3227_v10 = vsel %vm865_vm5, %v3226_v61, %v3225_v15  ;;  %v3213_v42 = vrot.slane %v8042_v49, 6  ;;  %v3215_v36 = vrot.slane %v8045_v53, 5 }
 0x150   : > { %v3207_v27 = vsel %vm856_vm2, %v3206_v14, %v3205_v16  ;;  %v3229_v29 = vsel %vm868_vm6, %v3228_v26, %v3227_v10  ;;  %v3790_v39 = vrot.slane %v7901_v41, 4  ;;  %v3792_v61 = vrot.slane %v7922_v59, 3 }
 0x151   : > { %592 = vrot.lane.b32.xlu1 %v7937_v5, %s7670_s29  ;;  %v3209_v33 = vsel %vm859_vm3, %v3208_v48, %v3207_v27  ;;  %v3789_v5 = vrot.slane %v7908_v45, 5  ;;  %v8204_v47 = vsel %vm871_vm7, %v3230_v63, %v3229_v29  ;;  %v3794_v40 = vrot.slane %v7935_v4, 2 }
 0x152   : > { %10891 = vst [vmem:[#allocation16_spill] sm:$0xff] %v8204_v47  ;;  %v3210_v54 = vsel %vm862_vm4, %v8023_v30, %v3209_v33  ;;  %v3796_v1 = vrot.slane %v7962_v34, 1  ;;  %v3799_v3 = vrot.slane %v8009_v20, 7  ;;  %v3801_v28 = vrot.slane %v8034_v37, 6 }
 0x153   : > { %590 = vrot.lane.b32.xlu0 %v7931_v2, %s7670_s29  ;;  %v3212_v57 = vsel %vm865_vm5, %v3211_v25, %v3210_v54  ;;  %v3791_v26 = vsel %vm853_vm1, %v3790_v39, %v3789_v5  ;;  %v3774_v14 = vrot.slane %v7920_v58, 5  ;;  %v3775_v48 = vrot.slane %v7929_v0, 4 }
 0x154   : > { %v3214_v2 = vsel %vm868_vm6, %v3213_v42, %v3212_v57  ;;  %v3793_v63 = vsel %vm856_vm2, %v3792_v61, %v3791_v26  ;;  %v3777_v16 = vrot.slane %v7970_v43, 3  ;;  %v3779_v25 = vrot.slane %v8014_v22, 2 }
 0x155   : > { %740 = vrot.lane.b32.xlu1 %v7953_v24, %s7667_s12  ;;  %v8220_v6 = vsel %vm871_vm7, %v3215_v36, %v3214_v2  ;;  %v3795_v12 = vsel %vm859_vm3, %v3794_v40, %v3793_v63  ;;  %v3776_v27 = vsel %vm853_vm1, %v3775_v48, %v3774_v14  ;;  %v3781_v42 = vrot.slane %v8023_v30, 1 }
 0x156   : > { %10892 = vst [vmem:[#allocation17_spill] sm:$0xff] %v8220_v6  ;;  %v3797_v15 = vsel %vm862_vm4, %v3796_v1, %v3795_v12  ;;  %v3784_v36 = vrot.slane %v8042_v49, 7  ;;  %v3778_v33 = vsel %vm856_vm2, %v3777_v16, %v3776_v27  ;;  %v3786_v5 = vrot.slane %v8045_v53, 6 }
 0x157   : > { %738 = vrot.lane.b32.xlu0 %v7913_v50, %s7667_s12  ;;  %v3798_v10 = vsel %vm865_vm5, %v7978_v51, %v3797_v15  ;;  %v4360_v39 = vrot.slane %v7908_v45, 6  ;;  %v4361_v61 = vrot.slane %v7901_v41, 5  ;;  %v4363_v40 = vrot.slane %v7922_v59, 4 }
 0x158   : > { %v3800_v29 = vsel %vm868_vm6, %v3799_v3, %v3798_v10  ;;  %v4365_v26 = vrot.slane %v7935_v4, 3  ;;  %v4367_v1 = vrot.slane %v7962_v34, 2  ;;  %v4369_v3 = vrot.slane %v7978_v51, 1 }
 0x159   : > { %596 = vrot.lane.b32.xlu1 %v7980_v52, %s7670_s29  ;;  %v8242_v54 = vsel %vm871_vm7, %v3801_v28, %v3800_v29  ;;  %v3780_v52 = vsel %vm859_vm3, %v3779_v25, %v3778_v33  ;;  %v4362_v63 = vsel %vm853_vm1, %v4361_v61, %v4360_v39  ;;  %v4372_v28 = vrot.slane %v8034_v37, 7 }
 0x15a   : > { %10893 = vst [vmem:[#allocation18_spill] sm:$0xff] %v8242_v54  ;;  %v3782_v57 = vsel %vm862_vm4, %v3781_v42, %v3780_v52  ;;  %v4364_v12 = vsel %vm856_vm2, %v4363_v40, %v4362_v63  ;;  %v4345_v14 = vrot.slane %v7920_v58, 6  ;;  %v4346_v48 = vrot.slane %v7929_v0, 5 }
 0x15b   : > { %594 = vrot.lane.b32.xlu0 %v7972_v46, %s7670_s29  ;;  %v3783_v2 = vsel %vm865_vm5, %v8031_v35, %v3782_v57  ;;  %v4366_v16 = vsel %vm859_vm3, %v4365_v26, %v4364_v12  ;;  %v4348_v25 = vrot.slane %v7970_v43, 4  ;;  %v4350_v10 = vrot.slane %v8014_v22, 3 }
 0x15c   : > { %v3785_v46 = vsel %vm868_vm6, %v3784_v36, %v3783_v2  ;;  %v4368_v27 = vsel %vm862_vm4, %v4367_v1, %v4366_v16  ;;  %v4347_v42 = vsel %vm853_vm1, %v4346_v48, %v4345_v14  ;;  %v4352_v36 = vrot.slane %v8023_v30, 2 }
 0x15d   : > { %742 = vrot.lane.b32.xlu1 %v7985_v55, %s7667_s12  ;;  %v8264_v15 = vsel %vm871_vm7, %v3786_v5, %v3785_v46  ;;  %v4370_v29 = vsel %vm865_vm5, %v4369_v3, %v4368_v27  ;;  %v4349_v33 = vsel %vm856_vm2, %v4348_v25, %v4347_v42  ;;  %v4354_v5 = vrot.slane %v8031_v35, 1 }
 0x15e   : > { %10894 = vst [vmem:[#allocation19_spill] sm:$0xff] %v8264_v15  ;;  %v4357_v39 = vrot.slane %v8045_v53, 7  ;;  %v4371_v52 = vsel %vm868_vm6, %v8009_v20, %v4370_v29  ;;  %v4351_v61 = vsel %vm859_vm3, %v4350_v10, %v4349_v33  ;;  %v4931_v40 = vrot.slane %v7908_v45, 7 }
 0x15f   : > { %736 = vrot.lane.b32.xlu0 %v7906_v44, %s7667_s12  ;;  %v4932_v57 = vrot.slane %v7901_v41, 6  ;;  %v8286_v26 = vsel %vm871_vm7, %v4372_v28, %v4371_v52  ;;  %v4353_v1 = vsel %vm862_vm4, %v4352_v36, %v4351_v61  ;;  %v4934_v2 = vrot.slane %v7922_v59, 5 }
 0x160   : > { %10895 = vst [vmem:[#allocation20_spill] sm:$0xff] %v8286_v26  ;;  %v4936_v63 = vrot.slane %v7935_v4, 4  ;;  %v4355_v3 = vsel %vm865_vm5, %v4354_v5, %v4353_v1  ;;  %v4938_v45 = vrot.slane %v7962_v34, 3  ;;  %v4940_v59 = vrot.slane %v7978_v51, 2 }
 0x161   : > { %746 = vrot.lane.b32.xlu1 %v8000_v13, %s7667_s12  ;;  %v4933_v46 = vsel %vm853_vm1, %v4932_v57, %v4931_v40  ;;  %v4356_v41 = vsel %vm868_vm6, %v8042_v49, %v4355_v3  ;;  %v4942_v4 = vrot.slane %v8009_v20, 1  ;;  %v4916_v48 = vrot.slane %v7920_v58, 7 }
 0x162   : > { %v4935_v28 = vsel %vm856_vm2, %v4934_v2, %v4933_v46  ;;  %v8304_v12 = vsel %vm871_vm7, %v4357_v39, %v4356_v41  ;;  %v4917_v34 = vrot.slane %v7929_v0, 6  ;;  %v4919_v25 = vrot.slane %v7970_v43, 5 }
 0x163   : > { %744 = vrot.lane.b32.xlu0 %v7987_v56, %s7667_s12  ;;  %10896 = vst [vmem:[#allocation21_spill] sm:$0xff] %v8304_v12  ;;  %v4937_v14 = vsel %vm859_vm3, %v4936_v63, %v4935_v28  ;;  %v4921_v10 = vrot.slane %v8014_v22, 4  ;;  %v4923_v27 = vrot.slane %v8023_v30, 3  ;;  %v4925_v42 = vrot.slane %v8031_v35, 2 }
 0x164   : > { %v4939_v16 = vsel %vm862_vm4, %v4938_v45, %v4937_v14  ;;  %v4918_v20 = vsel %vm853_vm1, %v4917_v34, %v4916_v48  ;;  %v4927_v33 = vrot.slane %v8042_v49, 1  ;;  %v855_v47 = vrot.slane %v7970_v43, 6 }
 0x165   : > { %756 = vrot.lane.b32.xlu1 %v7953_v24, %s7668_s20  ;;  %v4941_v51 = vsel %vm865_vm5, %v4940_v59, %v4939_v16  ;;  %v4920_v29 = vsel %vm856_vm2, %v4919_v25, %v4918_v20  ;;  %v858_v7 = vrot.slane %v8014_v22, 5  ;;  %v861_v11 = vrot.slane %v8023_v30, 4 }
 0x166   : > { %v4943_v36 = vsel %vm868_vm6, %v4942_v4, %v4941_v51  ;;  %v4922_v39 = vsel %vm859_vm3, %v4921_v10, %v4920_v29  ;;  %v10905_v22 = vmov 0.0  }
 0x167   : > { %754 = vrot.lane.b32.xlu0 %v7913_v50, %s7668_s20  ;;  %v8325_v5 = vsel %vm871_vm7, %v8034_v37, %v4943_v36  ;;  %v4924_v52 = vsel %vm862_vm4, %v4923_v27, %v4922_v39 }
 0x168   : > { %10897 = vst [vmem:[#allocation22_spill] sm:$0xff] %v8325_v5  ;;  %v4926_v61 = vsel %vm865_vm5, %v4925_v42, %v4924_v52 }
 0x169   : > { %752 = vrot.lane.b32.xlu1 %v7906_v44, %s7668_s20  ;;  %v4928_v40 = vsel %vm868_vm6, %v4927_v33, %v4926_v61 }
 0x16a   : > { %v8337_v57 = vsel %vm871_vm7, %v8045_v53, %v4928_v40 }
 0x16b   : > { %770 = vrot.lane.b32.xlu0 %v7913_v50, %s7669_s21  ;;  %10898 = vst [vmem:[#allocation23_spill] sm:$0xff] %v8337_v57  ;;  %v10780_v50 = vmov 0.0  }
 0x16c   : > { %6880 = vmatprep.subr.bf16.mxu1 %v10780_v50  ;;  %6886 = vmatprep.subr.bf16.mxu0 %v10780_v50 }
 0x16d   : > { %772 = vrot.lane.b32.xlu1 %v7953_v24, %s7669_s21  ;;  %6888 = vmatprep.mubr.msk.bf16.mxu0 %vm7672_vm8, %v10780_v50 }
 0x16f   : > { %758 = vrot.lane.b32.xlu0 %v7985_v55, %s7668_s20 }
 0x171   : > { %768 = vrot.lane.b32.xlu1 %v7906_v44, %s7669_s21  ;;  %v8369_v44 = vpack.c.b16 %v8064_v9, %v8064_v9 }
 0x173   : > { %760 = vrot.lane.b32.xlu0 %v7987_v56, %s7668_s20 }
 0x175   : > { %762 = vrot.lane.b32.xlu1 %v8000_v13, %s7668_s20 }
 0x177   : > { %774 = vrot.lane.b32.xlu0 %v7985_v55, %s7669_s21 }
 0x179   : > { %748 = vrot.lane.b32.xlu1 %v8006_v17, %s7667_s12 }
 0x17b   : > { %776 = vrot.lane.b32.xlu0 %v7987_v56, %s7669_s21 }
 0x17d   : > { %764 = vrot.lane.b32.xlu1 %v8006_v17, %s7668_s20 }
 0x17f   : > { %778 = vrot.lane.b32.xlu0 %v8000_v13, %s7669_s21 }
 0x181   : > { %750 = vrot.lane.b32.xlu1 %v8025_v31, %s7667_s12  ;;  %s7676_s12 = smov 24  }
 0x183   : > { %598 = vrot.lane.b32.xlu0 %v8027_v32, %s7670_s29 }
 0x185   : > { %600 = vrot.lane.b32.xlu1 %v8038_v38, %s7670_s29 }
 0x187   : > { %897 = vrot.lane.b32.xlu0 %v8369_v44, %s7673_s18 }
 0x189   : > { %780 = vrot.lane.b32.xlu1 %v8006_v17, %s7669_s21 }
 0x18f   : > { %v793_v24 = vpop.permute.xlu1 %792 }
 0x190   : > { %v8396_v29 = vunpack.c.l.b16 %v793_v24 }
 0x191   : > { %v795_v55 = vpop.permute.xlu0 %794 }
 0x192   : > { %v8377_v59 = vunpack.c.l.b16 %v795_v55 }
 0x193   : > { %v809_v56 = vpop.permute.xlu1 %808 }
 0x194   : > { %v977_v27 = vrot.slane %v8377_v59, 7  ;;  %v8400_v52 = vunpack.c.l.b16 %v809_v56 }
 0x195   : > { %v811_v13 = vpop.permute.xlu0 %810 }
 0x196   : > { %v8379_v4 = vunpack.c.l.b16 %v811_v13  ;;  %v978_v24 = vsel %vm853_vm1, %v977_v27, %v8396_v29 }
 0x197   : > { %v8375_v37 = vpop.permute.xlu1 %824 }
 0x198   : > { %10899 = vst [vmem:[#allocation24_spill] sm:$0xff] %v8379_v4  ;;  %v1071_v36 = vrot.slane %v8379_v4, 7  ;;  %v867_v4 = vrot.slane %v8042_v49, 2 }
 0x199   : > { %v827_v32 = vpop.permute.xlu0 %826 }
 0x19b   : > { %v813_v1 = vpop.permute.xlu1 %812 }
 0x19c   : > { %v8383_v48 = vunpack.c.l.b16 %v813_v1 }
 0x19d   : > { %v797_v38 = vpop.permute.xlu0 %796 }
 0x19e   : > { %v8381_v14 = vunpack.c.l.b16 %v797_v38  ;;  %v1073_v39 = vrot.slane %v8383_v48, 6 }
 0x19f   : > { %v829_v2 = vpop.permute.xlu1 %828 }
 0x1a0   : > { %v979_v42 = vrot.slane %v8381_v14, 6  ;;  %v8420_v21 = vunpack.c.l.b16 %v829_v2 }
 0x1a1   : > { %v815_v63 = vpop.permute.xlu0 %814 }
 0x1a2   : > { %v8387_v16 = vunpack.c.l.b16 %v815_v63  ;;  %v980_v56 = vsel %vm856_vm2, %v979_v42, %v978_v24 }
 0x1a3   : > { %v799_v9 = vpop.permute.xlu1 %798 }
 0x1a4   : > { %v8385_v34 = vunpack.c.l.b16 %v799_v9  ;;  %v1075_v55 = vrot.slane %v8387_v16, 5 }
 0x1a5   : > { %v831_v3 = vpop.permute.xlu0 %830 }
 0x1a6   : > { %v981_v33 = vrot.slane %v8385_v34, 5  ;;  %v8431_v24 = vunpack.c.l.b16 %v831_v3 }
 0x1a7   : > { %v803_v46 = vpop.permute.xlu1 %802 }
 0x1a8   : > { %v8404_v13 = vunpack.c.l.b16 %v803_v46  ;;  %v982_v46 = vsel %vm859_vm3, %v981_v33, %v980_v56 }
 0x1a9   : > { %v801_v45 = vpop.permute.xlu0 %800 }
 0x1aa   : > { %v8389_v25 = vunpack.c.l.b16 %v801_v45  ;;  %v1072_v45 = vsel %vm853_vm1, %v1071_v36, %v8400_v52  ;;  %v985_v36 = vrot.slane %v8404_v13, 3 }
 0x1ab   : > { %v819_v41 = vpop.permute.xlu1 %818 }
 0x1ac   : > { %v983_v40 = vrot.slane %v8389_v25, 4  ;;  %v8411_v9 = vunpack.c.l.b16 %v819_v41 }
 0x1ad   : > { %v817_v28 = vpop.permute.xlu0 %816 }
 0x1ae   : > { %v8391_v51 = vunpack.c.l.b16 %v817_v28  ;;  %10902 = vst [vmem:[#allocation27_spill] sm:$0xff] %v8411_v9  ;;  %v8416_v28 = vunpack.c.l.b16 %v827_v32  ;;  %v984_v50 = vsel %vm862_vm4, %v983_v40, %v982_v46 }
 0x1af   : > { %v589_v17 = vpop.permute.xlu1 %588  ;;  %v986_v40 = vsel %vm865_vm5, %v985_v36, %v984_v50  ;;  %v8451_v36 = vunpack.c.l.b16 %v8375_v37 }
 0x1b0   : > { %10900 = vst [vmem:[#allocation25_spill] sm:$0xff] %v8391_v51  ;;  %v1077_v63 = vrot.slane %v8391_v51, 4  ;;  %v1165_v56 = vrot.slane %v8416_v28, 7 }
 0x1b1   : > { %v833_v10 = vpop.permute.xlu0 %832 }
 0x1b2   : > { %v1166_v37 = vsel %vm853_vm1, %v1165_v56, %v8451_v36 }
 0x1b3   : > { %v821_v20 = vpop.permute.xlu1 %820 }
 0x1b4   : > { %v8406_v1 = vunpack.c.l.b16 %v821_v20  ;;  %v1074_v20 = vsel %vm856_vm2, %v1073_v39, %v1072_v45  ;;  %v1079_v39 = vrot.slane %v8411_v9, 3 }
 0x1b5   : > { %v835_v61 = vpop.permute.xlu0 %834  ;;  %v1076_v41 = vsel %vm859_vm3, %v1075_v55, %v1074_v20 }
 0x1b6   : > { %10901 = vst [vmem:[#allocation26_spill] sm:$0xff] %v8406_v1  ;;  %v1078_v32 = vsel %vm862_vm4, %v1077_v63, %v1076_v41  ;;  %v1081_v33 = vrot.slane %v8406_v1, 2  ;;  %v8441_v45 = vunpack.c.l.b16 %v835_v61 }
 0x1b7   : > { %v807_v38 = vpop.permute.xlu1 %806  ;;  %v1080_v3 = vsel %vm865_vm5, %v1079_v39, %v1078_v32  ;;  %v1169_v39 = vrot.slane %v8431_v24, 5 }
 0x1b8   : > { %v8422_v19 = vunpack.c.l.b16 %v807_v38  ;;  %v8436_v38 = vunpack.c.l.b16 %v833_v10  ;;  %v1082_v50 = vsel %vm868_vm6, %v1081_v33, %v1080_v3 }
 0x1b9   : > { %v805_v27 = vpop.permute.xlu0 %804 }
 0x1ba   : > { %10903 = vst [vmem:[#allocation28_spill] sm:$0xff] %v8422_v19  ;;  %v8426_v57 = vunpack.c.l.b16 %v805_v27  ;;  %v989_v46 = vrot.slane %v8422_v19, 1 }
 0x1bb   : > { %v823_v42 = vpop.permute.xlu1 %822 }
 0x1bc   : > { %v8433_v2 = vunpack.c.l.b16 %v823_v42  ;;  %v987_v55 = vrot.slane %v8426_v57, 2  ;;  %v1167_v42 = vrot.slane %v8420_v21, 6 }
 0x1bd   : > { %v587_v63 = vpop.permute.xlu0 %586 }
 0x1be   : > { %10904 = vst [vmem:[#allocation29_spill] sm:$0xff] %v8433_v2  ;;  %v1083_v20 = vrot.slane %v8433_v2, 1  ;;  %v603_v41 = vsel %vm445_vm0, %v587_v63, %v589_v17  ;;  %v988_v10 = vsel %vm868_vm6, %v987_v55, %v986_v40  ;;  %v1171_v40 = vrot.slane %v8436_v38, 4 }
 0x1bf   : > { %v839_v27 = vpop.permute.xlu1 %838  ;;  %6872 = vmatprep.mubr.msk.bf16.mxu1 %vm631_vm9, %v603_v41  ;;  %v990_v61 = vsel %vm871_vm7, %v989_v46, %v988_v10  ;;  %v1173_v63 = vrot.slane %v8441_v45, 3 }
 0x1c0   : > { %v1084_v32 = vsel %vm871_vm7, %v1083_v20, %v1082_v50  ;;  %v8457_v5 = vpack.c.b16 %v990_v61, %v990_v61  ;;  %v8462_v33 = vunpack.c.l.b16 %v839_v27  ;;  %v1168_v20 = vsel %vm856_vm2, %v1167_v42, %v1166_v37 }
 0x1c1   : > { %v8459_v17 = vpack.c.b16 %v1084_v32, %v1084_v32  ;;  %v837_v55 = vpop.permute.xlu0 %836  ;;  %v1170_v27 = vsel %vm859_vm3, %v1169_v39, %v1168_v20 }
 0x1c2   : > { %v8467_v3 = vunpack.c.l.b16 %v837_v55  ;;  %992 = vrot.lane.b32.xlu0 %v8457_v5, %s7673_s18  ;;  %v1172_v41 = vsel %vm862_vm4, %v1171_v40, %v1170_v27  ;;  %v1177_v61 = vrot.slane %v8462_v33, 1 }
 0x1c3   : > { %v593_v46 = vpop.permute.xlu1 %592  ;;  %1086 = vrot.lane.b32.xlu1 %v8459_v17, %s7673_s18  ;;  %v1174_v50 = vsel %vm865_vm5, %v1173_v63, %v1172_v41 }
 0x1c4   : > { %v1175_v10 = vrot.slane %v8467_v3, 2 }
 0x1c5   : > { %v591_v56 = vpop.permute.xlu0 %590 }
 0x1c6   : > { %v604_v32 = vsel %vm445_vm0, %v591_v56, %v593_v46  ;;  %766 = vrot.lane.b32.xlu0 %v8025_v31, %s7668_s20  ;;  %v1176_v42 = vsel %vm868_vm6, %v1175_v10, %v1174_v50  ;;  %s7677_s20 = smov 8  }
 0x1c7   : > { %v741_v55 = vpop.permute.xlu1 %740  ;;  %782 = vrot.lane.b32.xlu1 %v8025_v31, %s7669_s21  ;;  %6873 = vmatmul.mubr.msk.bf16.vlgmr.msra.gmra.mrb[0].mxu1 %vm631_vm9, %v604_v32  ;;  %v1178_v39 = vsel %vm871_vm7, %v1177_v61, %v1176_v42  ;;  %s8648_s21 = scalar_select %p390_p6, %s7758_s17, 1 }
 0x1c8   : > { %v8487_v40 = vpack.c.b16 %v1178_v39, %v1178_v39 }
 0x1c9   : > { %v739_v37 = vpop.permute.xlu0 %738  ;;  %s6627_s29 = sshll.u32 %s8648_s21, 3 }
 0x1ca   : > { %1180 = vrot.lane.b32.xlu0 %v8487_v40, %s7673_s18  ;;  %s393_s30 = scalar_lea.vmem %s10767_s1, %s6627_s29  ;;  %s10529_s29 = scalar_lea.vmem [#allocation5], %s6625_s23 }
 0x1cb   : > { %v597_v63 = vpop.permute.xlu1 %596  ;;  %s6719_s23 = sshll.u32 %s7758_s17, 7  ;;  %s6534_s22 = sshll.u32 %s10529_s29, 4  ;;  %s10713_s22 = int_to_ptr.vmem [resolvable:$true] %s6534_s22 }
 0x1cc   : > { %s6522_s17 = scalar_lea.sflag [#allocation4], %s7843_s27 }
 0x1cd   : > { %v595_v46 = vpop.permute.xlu0 %594 }
 0x1ce   : > { %v605_v20 = vsel %vm445_vm0, %v595_v46, %v597_v63  ;;  %v852_v46 = vrot.slane %v7929_v0, 7  ;;  %v864_v0 = vrot.slane %v8031_v35, 3 }
 0x1cf   : > { %v743_v27 = vpop.permute.xlu1 %742  ;;  %6876 = vmatprep.mubr.msk.bf16.mxu1 %vm631_vm9, %v605_v20 }
 0x1d0   : > { %v854_v23 = vsel %vm853_vm1, %v852_v46, %v7920_v58 }
 0x1d1   : > { %v737_v31 = vpop.permute.xlu0 %736  ;;  %v857_v60 = vsel %vm856_vm2, %v855_v47, %v854_v23  ;;  %v8525_v23 = vunpack.c.l.b16 %v739_v37 }
 0x1d2   : > { %v860_v9 = vsel %vm859_vm3, %v858_v7, %v857_v60  ;;  %v870_v60 = vrot.slane %v8045_v53, 1  ;;  %v8527_v47 = vunpack.c.l.b16 %v737_v31  ;;  %v8529_v53 = vunpack.c.l.b16 %v741_v55 }
 0x1d3   : > { %v747_v41 = vpop.permute.xlu1 %746  ;;  %v863_v43 = vsel %vm862_vm4, %v861_v11, %v860_v9  ;;  %10906 = vst [vmem:[#allocation30_spill] sm:$0xff] %v8525_v23  ;;  %v8536_v9 = vunpack.c.l.b16 %v743_v27 }
 0x1d4   : > { %v866_v30 = vsel %vm865_vm5, %v864_v0, %v863_v43  ;;  %10907 = vst [vmem:[#allocation31_spill] sm:$0xff] %v8529_v53  ;;  %v956_v46 = vrot.slane %v8529_v53, 6  ;;  %v8541_v0 = vunpack.c.l.b16 %v747_v41 }
 0x1d5   : > { %v745_v10 = vpop.permute.xlu0 %744  ;;  %v869_v7 = vsel %vm868_vm6, %v867_v4, %v866_v30  ;;  %10910 = vst [vmem:[#allocation34_spill] sm:$0xff] %v8536_v9  ;;  %v958_v30 = vrot.slane %v8536_v9, 5 }
 0x1d6   : > { %v872_v49 = vsel %vm871_vm7, %v870_v60, %v869_v7  ;;  %v8532_v4 = vunpack.c.l.b16 %v745_v10  ;;  %10911 = vst [vmem:[#allocation35_spill] sm:$0xff] %v8541_v0 }
 0x1d7   : > { %v757_v56 = vpop.permute.xlu1 %756  ;;  %v873_v11 = vpack.c.b16 %v872_v49, %v872_v49 }
 0x1d8   : > { %10908 = vst [vmem:[#allocation32_spill] sm:$0xff] %v8532_v4  ;;  %v8543_v37 = vunpack.c.l.b16 %v757_v56  ;;  %v960_v10 = vrot.slane %v8532_v4, 4 }
 0x1d9   : > { %v755_v50 = vpop.permute.xlu0 %754 }
 0x1da   : > { %10912 = vst [vmem:[#allocation36_spill] sm:$0xff] %v8543_v37  ;;  %v1050_v7 = vrot.slane %v8543_v37, 6 }
 0x1db   : > { %v753_v32 = vpop.permute.xlu1 %752 }
 0x1dc   : > { %v8545_v31 = vunpack.c.l.b16 %v753_v32 }
 0x1dd   : > { %v771_v61 = vpop.permute.xlu0 %770 }
 0x1de   : > { %10913 = vst [vmem:[#allocation37_spill] sm:$0xff] %v8545_v31  ;;  %v8550_v43 = vunpack.c.l.b16 %v771_v61 }
 0x1df   : > { %v773_v42 = vpop.permute.xlu1 %772 }
 0x1e0   : > { %10914 = vst [vmem:[#allocation38_spill] sm:$0xff] %v8550_v43  ;;  %v8564_v49 = vunpack.c.l.b16 %v773_v42 }
 0x1e1   : > { %v759_v39 = vpop.permute.xlu0 %758 }
 0x1e2   : > { %v8552_v27 = vunpack.c.l.b16 %v759_v39  ;;  %10919 = vst [vmem:[#allocation43_spill] sm:$0xff] %v8564_v49 }
 0x1e3   : > { %v769_v12 = vpop.permute.xlu1 %768 }
 0x1e4   : > { %10915 = vst [vmem:[#allocation39_spill] sm:$0xff] %v8552_v27  ;;  %v8566_v61 = vunpack.c.l.b16 %v769_v12 }
 0x1e5   : > { %v761_v26 = vpop.permute.xlu0 %760 }
 0x1e6   : > { %v8557_v41 = vunpack.c.l.b16 %v761_v26  ;;  %10920 = vst [vmem:[#allocation44_spill] sm:$0xff] %v8566_v61 }
 0x1e7   : > { %v8493_v15 = vpop.permute.xlu1 %762 }
 0x1e8   : > { %10917 = vst [vmem:[#allocation41_spill] sm:$0xff] %v8557_v41  ;;  %v8572_v26 = vunpack.c.l.b16 %v8493_v15 }
 0x1e9   : > { %v8495_v54 = vpop.permute.xlu0 %774 }
 0x1ea   : > { %10921 = vst [vmem:[#allocation45_spill] sm:$0xff] %v8572_v26 }
 0x1eb   : > { %v749_v6 = vpop.permute.xlu1 %748 }
 0x1ed   : > { %v8497_v63 = vpop.permute.xlu0 %776 }
 0x1ee   : > { %v8585_v15 = vunpack.c.l.b16 %v8497_v63 }
 0x1ef   : > { %v765_v20 = vpop.permute.xlu1 %764 }
 0x1f0   : > { %v8580_v42 = vunpack.c.l.b16 %v765_v20  ;;  %10924 = vst [vmem:[#allocation48_spill] sm:$0xff] %v8585_v15 }
 0x1f1   : > { %v8501_v8 = vpop.permute.xlu0 %778 }
 0x1f2   : > { %10923 = vst [vmem:[#allocation47_spill] sm:$0xff] %v8580_v42 }
 0x1f3   : > { %v751_v62 = vpop.permute.xlu1 %750 }
 0x1f4   : > { %v8559_v56 = vunpack.c.l.b16 %v751_v62 }
 0x1f5   : > { %v599_v2 = vpop.permute.xlu0 %598 }
 0x1f6   : > { %10918 = vst [vmem:[#allocation42_spill] sm:$0xff] %v8559_v56 }
 0x1f7   : > { %v601_v1 = vpop.permute.xlu1 %600 }
 0x1f8   : > { %v606_v51 = vsel %vm445_vm0, %v599_v2, %v601_v1  ;;  %v8534_v1 = vunpack.c.l.b16 %v755_v50 }
 0x1f9   : > { %6877 = vmatmul.mubr.msk.bf16.gmra.mrb[4].mxu1 %vm631_vm9, %v606_v51  ;;  %v898_v58 = vpop.permute.xlu0 %897  ;;  %v954_v51 = vrot.slane %v8525_v23, 7 }
 0x1fa   : > { %6882 = vmatprep.mubr.msk.bf16.mxu1 %vm7672_vm8, %v10905_v22  ;;  %v904_v35 = vsel %vm899_vm10, %v898_v58, 0  ;;  %10909 = vst [vmem:[#allocation33_spill] sm:$0xff] %v8534_v1  ;;  %v1048_v50 = vrot.slane %v8534_v1, 7  ;;  %v8554_v58 = vunpack.c.l.b16 %v749_v6 }
 0x1fb   : > { %6881 = vmatpush3.bf16.xpose.msra.mxu1 %v904_v35  ;;  %v955_v2 = vsel %vm853_vm1, %v954_v51, %v8527_v47  ;;  %v781_v32 = vpop.permute.xlu1 %780  ;;  %v962_v35 = vrot.slane %v8541_v0, 3  ;;  %v1142_v51 = vrot.slane %v8550_v43, 7 }
 0x1fc   : > { %6892 = vmatprep.subr.bf16.mxu1 %v10905_v22  ;;  %v957_v55 = vsel %vm856_vm2, %v956_v46, %v955_v2  ;;  %10916 = vst [vmem:[#allocation40_spill] sm:$0xff] %v8554_v58  ;;  %v1049_v39 = vsel %vm853_vm1, %v1048_v50, %v8545_v31  ;;  %v964_v62 = vrot.slane %v8554_v58, 2  ;;  %v8578_v2 = vunpack.c.l.b16 %v8495_v54 }
 0x1fd   : > { %v959_v60 = vsel %vm859_vm3, %v958_v30, %v957_v55  ;;  %v966_v55 = vrot.slane %v8559_v56, 1  ;;  %v8591_v54 = vunpack.c.l.b16 %v8501_v8  ;;  %v1051_v20 = vsel %vm856_vm2, %v1050_v7, %v1049_v39 }
 0x1fe   : > { %v961_v6 = vsel %vm862_vm4, %v960_v10, %v959_v60  ;;  %10922 = vst [vmem:[#allocation46_spill] sm:$0xff] %v8578_v2  ;;  %v1054_v10 = vrot.slane %v8557_v41, 4  ;;  %v1143_v43 = vsel %vm853_vm1, %v1142_v51, %v8566_v61  ;;  %v1144_v56 = vrot.slane %v8564_v49, 6 }
 0x1ff   : > { %v963_v60 = vsel %vm865_vm5, %v962_v35, %v961_v6  ;;  %10925 = vst [vmem:[#allocation49_spill] sm:$0xff] %v8591_v54  ;;  %v8597_v63 = vunpack.c.l.b16 %v781_v32  ;;  %v1056_v8 = vrot.slane %v8572_v26, 3  ;;  %v1058_v51 = vrot.slane %v8580_v42, 2 }
 0x200   : > { %v1146_v32 = vrot.slane %v8578_v2, 5 }
 0x201   : > { %10926 = vst [vmem:[#allocation50_spill] sm:$0xff] %v8597_v63 }
 0x202   : > { %6883 = vmatmul.mubr.msk.bf16.vlgmr.msra.gmra.mrb[8].mxu1 %vm899_vm10, %v873_v11  ;;  %v1052_v11 = vrot.slane %v8552_v27, 5 }
 0x203   : > { %6894 = vmatprep.mubr.msk.bf16.mxu1 %vm7672_vm8, %v10905_v22 }
 0x204   : > { %v1053_v35 = vsel %vm859_vm3, %v1052_v11, %v1051_v20  ;;  %v1148_v11 = vrot.slane %v8585_v15, 4 }
 0x205   : > { %v1055_v39 = vsel %vm862_vm4, %v1054_v10, %v1053_v35  ;;  %v1152_v10 = vrot.slane %v8597_v63, 2 }
 0x206   : > { %v1057_v49 = vsel %vm865_vm5, %v1056_v8, %v1055_v39 }
 0x207   : > { %v1059_v35 = vsel %vm868_vm6, %v1058_v51, %v1057_v49 }
 0x234   : > { %v993_v12 = vpop.permute.xlu0 %992 }
 0x235   : > { %v1087_v46 = vpop.permute.xlu1 %1086  ;;  %v998_v50 = vsel %vm899_vm10, %v993_v12, 0  ;;  %v965_v12 = vsel %vm868_vm6, %v964_v62, %v963_v60  ;;  %v1150_v60 = vrot.slane %v8591_v54, 3 }
 0x236   : > { %v1092_v30 = vsel %vm899_vm10, %v1087_v46, 0  ;;  %6887 = vmatpush3.bf16.xpose.msra.mxu0 %v998_v50  ;;  %v967_v7 = vsel %vm871_vm7, %v966_v55, %v965_v12 }
 0x237   : > { %6893 = vmatpush3.bf16.xpose.msra.mxu1 %v1092_v30  ;;  %6898 = vmatprep.subr.bf16.mxu0 %v10905_v22  ;;  %v1145_v30 = vsel %vm856_vm2, %v1144_v56, %v1143_v43  ;;  %v968_v20 = vpack.c.b16 %v967_v7, %v967_v7 }
 0x238   : > { %6904 = vmatprep.subr.bf16.mxu1 %v10905_v22  ;;  %v767_v6 = vpop.permute.xlu0 %766 }
 0x239   : > { %v783_v46 = vpop.permute.xlu1 %782  ;;  %v8608_v50 = vunpack.c.l.b16 %v767_v6  ;;  %v1147_v6 = vsel %vm859_vm3, %v1146_v32, %v1145_v30 }
 0x23a   : > { %v8610_v62 = vunpack.c.l.b16 %v783_v46  ;;  %v1149_v56 = vsel %vm862_vm4, %v1148_v11, %v1147_v6 }
 0x23b   : > { %10927 = vst [vmem:[#allocation51_spill] sm:$0xff] %v8608_v50  ;;  %v1060_v55 = vrot.slane %v8608_v50, 1  ;;  %v1151_v7 = vsel %vm865_vm5, %v1150_v60, %v1149_v56  ;;  %v8640_v60 = vld [vmem:[%s10775_s9] ss:$0 sm:$0xff] }
 0x23c   : > { %10928 = vst [vmem:[#allocation52_spill] sm:$0xff] %v8610_v62  ;;  %v1181_v12 = vpop.permute.xlu0 %1180  ;;  %v1154_v46 = vrot.slane %v8610_v62, 1  ;;  %v1153_v49 = vsel %vm868_vm6, %v1152_v10, %v1151_v7 }
 0x23d   : > { %v1186_v15 = vsel %vm899_vm10, %v1181_v12, 0  ;;  %6889 = vmatmul.mubr.msk.bf16.vlgmr.msra.gmra.mrb[16].mxu0 %vm899_vm10, %v968_v20  ;;  %v1061_v43 = vsel %vm871_vm7, %v1060_v55, %v1059_v35 }
 0x23e   : > { %6899 = vmatpush3.bf16.xpose.msra.mxu0 %v1186_v15  ;;  %v1062_v8 = vpack.c.b16 %v1061_v43, %v1061_v43  ;;  %6900 = vmatprep.mubr.msk.bf16.mxu0 %vm7672_vm8, %v10905_v22  ;;  %v1155_v39 = vsel %vm871_vm7, %v1154_v46, %v1153_v49 }
 0x23f   : > { %6910 = vmatprep.subr.bf16.mxu0 %v10905_v22  ;;  %v1156_v51 = vpack.c.b16 %v1155_v39, %v1155_v39 }
 0x240   : > { %6895 = vmatmul.mubr.msk.bf16.vlgmr.msra.gmra.mrb[12].mxu1 %vm899_vm10, %v1062_v8 }
 0x241   : > { %6906 = vmatprep.mubr.msk.bf16.mxu1 %vm7672_vm8, %v10905_v22 }
 0x245   : > { %6901 = vmatmul.mubr.msk.bf16.vlgmr.msra.gmra.mrb[20].mxu0 %vm899_vm10, %v1156_v51 }
 0x246   : > { %6912 = vmatprep.mubr.msk.bf16.mxu0 %vm7672_vm8, %v10905_v22 }
 0x29a   : > { %v6874_v15 = vpop.f32.mrb[0].mxu1 }
 0x29b   : > { %v678_v32 = vpop.f32.mrb[1].mxu1  ;;  %v687_v20 = vadd.f32 %v6874_v15, %v8640_v60 }
 0x29c   : > { %v6875_v11 = vpop.f32.mrb[2].mxu1  ;;  %v679_v55 = vadd.f32 %v8640_v60, %v678_v32 }
 0x29d   : > { %v681_v30 = vpop.f32.mrb[3].mxu1  ;;  %v690_v10 = vadd.f32 %v6875_v11, %v8640_v60  ;;  %v5597_v35 = vrot.slane %v687_v20, 6  ;;  %v5959_v6 = vrot.slane %v687_v20, 1  ;;  %v5732_v46 = vrot.slane %v687_v20, 7 }
 0x29e   : > { %v682_v12 = vadd.f32 %v8640_v60, %v681_v30  ;;  %v6298_v43 = vrot.slane %v687_v20, 4  ;;  %v5843_v56 = vrot.slane %v679_v55, 2  ;;  %v5956_v8 = vrot.slane %v679_v55, 3 }
 0x29f   : > { %v5730_v7 = vrot.slane %v679_v55, 1  ;;  %v6295_v49 = vrot.slane %v679_v55, 6  ;;  %v5847_v39 = vrot.slane %v690_v10, 7  ;;  %v5599_v51 = vrot.slane %v690_v10, 5 }
 0x2a0   : > { %v5734_v15 = vrot.slane %v690_v10, 6  ;;  %v6300_v32 = vrot.slane %v690_v10, 3  ;;  %v5844_v62 = vrot.slane %v682_v12, 1  ;;  %v5595_v63 = vrot.slane %v682_v12, 7 }
 0x2a1   : > { %v5957_v11 = vrot.slane %v682_v12, 2  ;;  %v5731_v30 = vsel %vm853_vm1, %v682_v12, %v5730_v7  ;;  %v6296_v2 = vrot.slane %v682_v12, 5  ;;  %v6069_v61 = vrot.slane %v679_v55, 4 }
 0x2a2   : > { %v5733_v54 = vsel %vm856_vm2, %v5732_v46, %v5731_v30  ;;  %v6070_v0 = vrot.slane %v682_v12, 3  ;;  %v5845_v58 = vsel %vm853_vm1, %v5844_v62, %v5843_v56  ;;  %v5596_v50 = vsel %vm853_vm1, %v5595_v63, %v679_v55 }
 0x2a3   : > { %v5958_v42 = vsel %vm853_vm1, %v5957_v11, %v5956_v8  ;;  %v8657_v4 = vsel %vm859_vm3, %v5734_v15, %v5733_v54  ;;  %v5846_v26 = vsel %vm856_vm2, %v687_v20, %v5845_v58  ;;  %v5598_v9 = vsel %vm856_vm2, %v5597_v35, %v5596_v50  ;;  %v725_v8 = vld [vmem:[%s393_s30] sm:$0xff] }
 0x2a4   : > { %v5960_v7 = vsel %vm856_vm2, %v5959_v6, %v5958_v42  ;;  %v6297_v46 = vsel %vm853_vm1, %v6296_v2, %v6295_v49  ;;  %v5848_v30 = vsel %vm859_vm3, %v5847_v39, %v5846_v26  ;;  %v5600_v41 = vsel %vm859_vm3, %v5599_v51, %v5598_v9 }
 0x2a5   : > { %v5961_v62 = vsel %vm859_vm3, %v690_v10, %v5960_v7  ;;  %v6299_v63 = vsel %vm856_vm2, %v6298_v43, %v6297_v46  ;;  %v6071_v54 = vsel %vm853_vm1, %v6070_v0, %v6069_v61  ;;  %v6072_v42 = vrot.slane %v687_v20, 2 }
 0x2a6   : > { %v8671_v58 = vsel %vm859_vm3, %v6300_v32, %v6299_v63  ;;  %v6074_v50 = vrot.slane %v690_v10, 1  ;;  %v6408_v2 = vrot.slane %v679_v55, 7  ;;  %v6409_v35 = vrot.slane %v682_v12, 6 }
 0x2a7   : > { %v6073_v26 = vsel %vm856_vm2, %v6072_v42, %v6071_v54  ;;  %v6411_v9 = vrot.slane %v687_v20, 5  ;;  %v6182_v6 = vrot.slane %v679_v55, 5  ;;  %v6183_v56 = vrot.slane %v682_v12, 4 }
 0x2a8   : > { %v8676_v43 = vsel %vm859_vm3, %v6074_v50, %v6073_v26  ;;  %v6410_v49 = vsel %vm853_vm1, %v6409_v35, %v6408_v2  ;;  %v6413_v39 = vrot.slane %v690_v10, 4  ;;  %v6185_v51 = vrot.slane %v687_v20, 3 }
 0x2a9   : > { %v6412_v15 = vsel %vm856_vm2, %v6411_v9, %v6410_v49  ;;  %v6184_v0 = vsel %vm853_vm1, %v6183_v56, %v6182_v6  ;;  %v6187_v61 = vrot.slane %v690_v10, 2  ;;  %vm726_vm11 = vcmp.gt.f32.partialorder %v725_v8, 0.0 }
 0x2aa   : > { %v8682_v11 = vsel %vm859_vm3, %v6413_v39, %v6412_v15  ;;  %v6186_v55 = vsel %vm856_vm2, %v6185_v51, %v6184_v0  ;;  %v8689_v20 = vsel %vm726_vm11, -1e+30, %v10905_v22  ;;  %v10930_v54 = vsub.s32 0, %v7879_v18 }
 0x2ab   : > { %v8686_v7 = vsel %vm859_vm3, %v6187_v61, %v6186_v55  ;;  %10929 = vst [vmem:[#allocation53_spill] sm:$0xff] %v8689_v20 }
 0x2ac   : > { %v8694_v10 = vrot.slane %v8689_v20, %v10930_v54 }
 0x2cc   : > { %v6878_v32 = vpop.f32.mrb[4].mxu1 }
 0x2cd   : > { %v694_v12 = vpop.f32.mrb[5].mxu1  ;;  %v8702_v6 = vadd.f32 %v6878_v32, %v8640_v60 }
 0x2ce   : > { %v6879_v46 = vpop.f32.mrb[6].mxu1  ;;  %v695_v56 = vadd.f32 %v8640_v60, %v694_v12 }
 0x2cf   : > { %v697_v63 = vpop.f32.mrb[7].mxu1  ;;  %v8706_v8 = vadd.f32 %v6879_v46, %v8640_v60  ;;  %v5853_v39 = vrot.slane %v8702_v6, 4  ;;  %v5605_v51 = vrot.slane %v8702_v6, 2  ;;  %v5966_v15 = vrot.slane %v8702_v6, 5 }
 0x2d0   : > { %v698_v49 = vadd.f32 %v8640_v60, %v697_v63  ;;  %v5740_v0 = vrot.slane %v8702_v6, 3  ;;  %v5849_v61 = vrot.slane %v695_v56, 6  ;;  %v5601_v55 = vrot.slane %v695_v56, 4 }
 0x2d1   : > { %v5962_v54 = vrot.slane %v695_v56, 7  ;;  %v5736_v32 = vrot.slane %v695_v56, 5  ;;  %v5607_v12 = vrot.slane %v8706_v8, 1  ;;  %v5968_v46 = vrot.slane %v8706_v8, 4 }
 0x2d2   : > { %v5742_v60 = vrot.slane %v8706_v8, 2  ;;  %v5850_v63 = vsel %vm862_vm4, %v5849_v61, %v5848_v30  ;;  %v5964_v20 = vrot.slane %v698_v49, 6  ;;  %v5738_v37 = vrot.slane %v698_v49, 4 }
 0x2d3   : > { %v5737_v18 = vsel %vm862_vm4, %v5736_v32, %v8657_v4  ;;  %v6302_v1 = vrot.slane %v695_v56, 2  ;;  %v6304_v23 = vrot.slane %v698_v49, 1 }
 0x2d4   : > { %v5739_v61 = vsel %vm865_vm5, %v5738_v37, %v5737_v18  ;;  %v6307_v37 = vrot.slane %v8706_v8, 7 }
 0x2d5   : > { %v940_v42 = vpop.f32.mrb[8].mxu1 }
 0x2d6   : > { %v8697_v50 = vadd.f32 %v940_v42, %v8694_v10  ;;  %v6884_v2 = vpop.f32.mrb[9].mxu1  ;;  %v5855_v42 = vrot.slane %v8706_v8, 3 }
 0x2d7   : > { %v943_v35 = vpop.f32.mrb[10].mxu1  ;;  %v5851_v2 = vrot.slane %v698_v49, 5 }
 0x2d8   : > { %v6885_v26 = vpop.f32.mrb[11].mxu1  ;;  %v1228_v9 = vsel %vm899_vm10, %v8697_v50, -inf  ;;  %v5602_v35 = vsel %vm862_vm4, %v5601_v55, %v5600_v41 }
 0x2d9   : > { %1229 = vmax.xlane.f32.xlu0 %v1228_v9  ;;  %v5603_v26 = vrot.slane %v698_v49, 3  ;;  %v5963_v9 = vsel %vm862_vm4, %v5962_v54, %v5961_v62  ;;  %v5852_v53 = vsel %vm865_vm5, %v5851_v2, %v5850_v63  ;;  %v5741_v54 = vsel %vm868_vm6, %v5740_v0, %v5739_v61 }
 0x2da   : > { %v5854_v31 = vsel %vm868_vm6, %v5853_v39, %v5852_v53  ;;  %v5965_v41 = vsel %vm865_vm5, %v5964_v20, %v5963_v9  ;;  %v8740_v53 = vsel %vm871_vm7, %v5742_v60, %v5741_v54  ;;  %v6077_v20 = vrot.slane %v698_v49, 7 }
 0x2db   : > { %v5604_v27 = vsel %vm865_vm5, %v5603_v26, %v5602_v35  ;;  %v8729_v62 = vsel %vm871_vm7, %v5855_v42, %v5854_v31  ;;  %v5967_v55 = vsel %vm868_vm6, %v5966_v15, %v5965_v41  ;;  %10934 = vst [vmem:[#allocation57_spill] sm:$0xff] %v8740_v53  ;;  %v6076_v31 = vsel %vm862_vm4, %v695_v56, %v8676_v43 }
 0x2dc   : > { %v5606_v30 = vsel %vm868_vm6, %v5605_v51, %v5604_v27  ;;  %10931 = vst [vmem:[#allocation54_spill] sm:$0xff] %v8729_v62  ;;  %v8737_v32 = vsel %vm871_vm7, %v5968_v46, %v5967_v55  ;;  %v6303_v27 = vsel %vm862_vm4, %v6302_v1, %v8671_v58  ;;  %v6079_v51 = vrot.slane %v8702_v6, 6 }
 0x2dd   : > { %v8732_v4 = vsel %vm871_vm7, %v5607_v12, %v5606_v30  ;;  %10933 = vst [vmem:[#allocation56_spill] sm:$0xff] %v8737_v32  ;;  %v6305_v18 = vsel %vm865_vm5, %v6304_v23, %v6303_v27  ;;  %v6415_v15 = vrot.slane %v695_v56, 3  ;;  %v6417_v0 = vrot.slane %v698_v49, 2  ;;  %v10960_v32 = vld [vmem:[#allocation42_spill] sm:$0xff] }
 0x2de   : > { %10932 = vst [vmem:[#allocation55_spill] sm:$0xff] %v8732_v4  ;;  %v6306_v39 = vsel %vm868_vm6, %v8702_v6, %v6305_v18  ;;  %v6078_v1 = vsel %vm865_vm5, %v6077_v20, %v6076_v31  ;;  %v6081_v23 = vrot.slane %v8706_v8, 5  ;;  %v6189_v58 = vrot.slane %v695_v56, 1 }
 0x2df   : > { %v8752_v42 = vsel %vm871_vm7, %v6307_v37, %v6306_v39  ;;  %v6080_v12 = vsel %vm868_vm6, %v6079_v51, %v6078_v1  ;;  %v6416_v43 = vsel %vm862_vm4, %v6415_v15, %v8682_v11  ;;  %v6419_v46 = vrot.slane %v8702_v6, 1 }
 0x2e0   : > { %10935 = vst [vmem:[#allocation58_spill] sm:$0xff] %v8752_v42  ;;  %v8761_v60 = vsel %vm871_vm7, %v6081_v23, %v6080_v12  ;;  %v6418_v63 = vsel %vm865_vm5, %v6417_v0, %v6416_v43  ;;  %v6190_v2 = vsel %vm862_vm4, %v6189_v58, %v8686_v7  ;;  %v6192_v35 = vrot.slane %v8702_v6, 7 }
 0x2e1   : > { %10936 = vst [vmem:[#allocation59_spill] sm:$0xff] %v8761_v60  ;;  %v6420_v26 = vsel %vm868_vm6, %v6419_v46, %v6418_v63  ;;  %v6191_v56 = vsel %vm865_vm5, %v698_v49, %v6190_v2  ;;  %v6194_v9 = vrot.slane %v8706_v8, 6  ;;  %v10956_v60 = vld [vmem:[#allocation47_spill] sm:$0xff]  ;;  %v1580_v4 = vrot.slane %v10960_v32, 2 }
 0x2e2   : > { %v8772_v11 = vsel %vm871_vm7, %v8706_v8, %v6420_v26  ;;  %v6193_v30 = vsel %vm868_vm6, %v6192_v35, %v6191_v56  ;;  %v1656_v42 = vrot.slane %v10956_v60, 3 }
 0x2e3   : > { %10937 = vst [vmem:[#allocation60_spill] sm:$0xff] %v8772_v11  ;;  %v8776_v41 = vsel %vm871_vm7, %v6194_v9, %v6193_v30 }
 0x2e4   : > { %10938 = vst [vmem:[#allocation61_spill] sm:$0xff] %v8776_v41 }
 0x310   : > { %v1034_v61 = vpop.f32.mrb[16].mxu0 }
 0x311   : > { %v1035_v7 = vadd.f32 %v1034_v61, %v8694_v10  ;;  %v6890_v55 = vpop.f32.mrb[17].mxu0  ;;  %v1583_v61 = vrot.slane %v8396_v29, 1 }
 0x312   : > { %v1037_v6 = vpop.f32.mrb[18].mxu0  ;;  %v1585_v55 = vrot.slane %v8381_v14, 7 }
 0x313   : > { %v6891_v54 = vpop.f32.mrb[19].mxu0  ;;  %v1128_v27 = vpop.f32.mrb[12].mxu1  ;;  %v1231_v49 = vsel %vm899_vm10, %v1035_v7, -inf  ;;  %v1587_v6 = vrot.slane %v8385_v34, 6 }
 0x314   : > { %v1129_v18 = vadd.f32 %v1128_v27, %v8694_v10  ;;  %1232 = vmax.xlane.f32.xlu1 %v1231_v49  ;;  %v6896_v37 = vpop.f32.mrb[13].mxu1  ;;  %v1589_v54 = vrot.slane %v8389_v25, 5  ;;  %v1584_v27 = vsel %vm853_vm1, %v8377_v59, %v1583_v61 }
 0x315   : > { %v1131_v8 = vpop.f32.mrb[14].mxu1  ;;  %v1586_v49 = vsel %vm856_vm2, %v1585_v55, %v1584_v27  ;;  %v1739_v37 = vrot.slane %v8451_v36, 1 }
 0x316   : > { %v6897_v31 = vpop.f32.mrb[15].mxu1  ;;  %v1234_v20 = vsel %vm899_vm10, %v1129_v18, -inf }
 0x317   : > { %1235 = vmax.xlane.f32.xlu0 %v1234_v20  ;;  %v1593_v31 = vrot.slane %v8426_v57, 3  ;;  %v1741_v20 = vrot.slane %v8420_v21, 7 }
 0x318   : > { %v1222_v39 = vpop.f32.mrb[20].mxu0 }
 0x319   : > { %v8783_v51 = vadd.f32 %v1222_v39, %v8694_v10  ;;  %v6902_v15 = vpop.f32.mrb[21].mxu0  ;;  %v1591_v39 = vrot.slane %v8404_v13, 4 }
 0x31a   : > { %v1225_v0 = vpop.f32.mrb[22].mxu0  ;;  %v1743_v15 = vrot.slane %v8431_v24, 6 }
 0x31b   : > { %v6903_v1 = vpop.f32.mrb[23].mxu0  ;;  %v1237_v23 = vsel %vm899_vm10, %v8783_v51, -inf  ;;  %v1745_v0 = vrot.slane %v8436_v38, 5 }
 0x31c   : > { %1238 = vmax.xlane.f32.xlu0 %v1237_v23  ;;  %v1740_v23 = vsel %vm853_vm1, %v8416_v28, %v1739_v37  ;;  %v10939_v37 = vld [vmem:[#allocation25_spill] sm:$0xff] }
 0x325   : > { %1276 = vrot.lane.b32.xlu1 %v8369_v44, %s7674_s24 }
 0x366   : > { %v1230_v58 = vpop.xlane.xlu0 %1229 }
 0x367   : > { %v1240_v12 = vsub.f32 %v8697_v50, %v1230_v58  ;;  %v1747_v58 = vrot.slane %v8441_v45, 4 }
 0x369   : > { %v1244_v43 = vmul.f32 1.442695, %v1240_v12 }
 0x36b   : > { %7412 = vpow2.f32 %v1244_v43  ;;  %v1742_v43 = vsel %vm856_vm2, %v1741_v20, %v1740_v23  ;;  %v10942_v23 = vld [vmem:[#allocation27_spill] sm:$0xff] }
 0x375   : > { %v8790_v46 = vpop.eup %7412 }
 0x376   : > { %v1252_v10 = vsel %vm899_vm10, %v8790_v46, 0.0 }
 0x377   : > { %1253 = vadd.xlane.f32.xlu1 %v1252_v10  ;;  %v1749_v10 = vrot.slane %v8467_v3, 3 }
 0x388   : > { %1373 = vrot.lane.b32.xlu1 %v8459_v17, %s7674_s24 }
 0x38c   : > { %1421 = vrot.lane.b32.xlu1 %v8487_v40, %s7674_s24 }
 0x3a1   : > { %v1233_v63 = vpop.xlane.xlu1 %1232 }
 0x3a2   : > { %v1241_v2 = vsub.f32 %v1035_v7, %v1233_v63  ;;  %v1595_v63 = vrot.slane %v8422_v19, 2 }
 0x3a4   : > { %v1246_v44 = vmul.f32 1.442695, %v1241_v2  ;;  %v1236_v35 = vpop.xlane.xlu0 %1235  ;;  %v1744_v2 = vsel %vm859_vm3, %v1743_v15, %v1742_v43 }
 0x3a5   : > { %v1242_v50 = vsub.f32 %v1129_v18, %v1236_v35  ;;  %v1277_v26 = vpop.permute.xlu1 %1276  ;;  %v1588_v18 = vsel %vm859_vm3, %v1587_v6, %v1586_v49  ;;  %v1661_v49 = vrot.slane %v8400_v52, 1 }
 0x3a6   : > { %7414 = vpow2.f32 %v1246_v44  ;;  %v1283_v56 = vsel %vm1281_vm12, %v1277_v26, 0  ;;  %v1590_v8 = vsel %vm862_vm4, %v1589_v54, %v1588_v18  ;;  %v1746_v44 = vsel %vm862_vm4, %v1745_v0, %v1744_v2  ;;  %v10941_v0 = vld [vmem:[#allocation26_spill] sm:$0xff] }
 0x3a7   : > { %v1248_v9 = vmul.f32 1.442695, %v1242_v50  ;;  %6905 = vmatpush3.bf16.msra.mxu1 %v1283_v56  ;;  %v1592_v1 = vsel %vm865_vm5, %v1591_v39, %v1590_v8  ;;  %v1748_v50 = vsel %vm865_vm5, %v1747_v58, %v1746_v44  ;;  %v1751_v56 = vrot.slane %v8462_v33, 2 }
 0x3a8   : > { %6916 = vmatprep.subr.bf16.mxu1 %v10905_v22  ;;  %v1594_v12 = vsel %vm868_vm6, %v1593_v31, %v1592_v1  ;;  %v1750_v26 = vsel %vm868_vm6, %v1749_v10, %v1748_v50  ;;  %v1665_v18 = vrot.slane %v8387_v16, 6  ;;  %v1667_v8 = vrot.slane %v10939_v37, 5  ;;  %v10940_v31 = vld [vmem:[#allocation24_spill] sm:$0xff] }
 0x3a9   : > { %7416 = vpow2.f32 %v1248_v9  ;;  %v1596_v35 = vsel %vm871_vm7, %v1595_v63, %v1594_v12  ;;  %v1662_v20 = vsel %vm853_vm1, %v10940_v31, %v1661_v49  ;;  %v1671_v1 = vrot.slane %v10941_v0, 3  ;;  %v10943_v12 = vld [vmem:[#allocation29_spill] sm:$0xff]  ;;  %v10944_v63 = vld [vmem:[#allocation10_spill] sm:$0xff] }
 0x3aa   : > { %v8837_v9 = vpack.c.b16 %v1596_v35, %v1596_v35  ;;  %v1669_v58 = vrot.slane %v10942_v23, 4  ;;  %v1673_v43 = vrot.slane %v10943_v12, 2  ;;  %v8868_v2 = vpack.c.b16 %v10944_v63, %v10944_v63 }
 0x3b0   : > { %v8800_v30 = vpop.eup %7414 }
 0x3b1   : > { %v1255_v17 = vsel %vm899_vm10, %v8800_v30, 0.0 }
 0x3b2   : > { %1256 = vadd.xlane.f32.xlu0 %v1255_v17  ;;  %v1752_v17 = vsel %vm871_vm7, %v1751_v56, %v1750_v26 }
 0x3b3   : > { %v8804_v40 = vpop.eup %7416  ;;  %v8844_v61 = vpack.c.b16 %v1752_v17, %v1752_v17 }
 0x3b4   : > { %v1258_v7 = vsel %vm899_vm10, %v8804_v40, 0.0 }
 0x3b5   : > { %1259 = vadd.xlane.f32.xlu1 %v1258_v7  ;;  %v1239_v7 = vpop.xlane.xlu0 %1238 }
 0x3b6   : > { %v1243_v55 = vsub.f32 %v8783_v51, %v1239_v7 }
 0x3b8   : > { %v1250_v6 = vmul.f32 1.442695, %v1243_v55 }
 0x3ba   : > { %7418 = vpow2.f32 %v1250_v6 }
 0x3c4   : > { %v8849_v54 = vpop.eup %7418 }
 0x3c5   : > { %v1261_v27 = vsel %vm899_vm10, %v8849_v54, 0.0 }
 0x3c6   : > { %1598 = vrot.lane.b32.xlu1 %v8837_v9, %s7673_s18 }
 0x3c8   : > { %1325 = vrot.lane.b32.xlu0 %v8457_v5, %s7674_s24  ;;  %v1663_v5 = vrot.slane %v8383_v48, 7 }
 0x3ca   : > { %1754 = vrot.lane.b32.xlu1 %v8844_v61, %s7673_s18  ;;  %v1664_v51 = vsel %vm856_vm2, %v1663_v5, %v1662_v20 }
 0x3cb   : > { %v1666_v39 = vsel %vm859_vm3, %v1665_v18, %v1664_v51 }
 0x3cc   : > { %v1668_v15 = vsel %vm862_vm4, %v1667_v8, %v1666_v39 }
 0x3cd   : > { %v1670_v10 = vsel %vm865_vm5, %v1669_v58, %v1668_v15 }
 0x3ce   : > { %v1672_v44 = vsel %vm868_vm6, %v1671_v1, %v1670_v10 }
 0x3cf   : > { %v1674_v35 = vsel %vm871_vm7, %v1673_v43, %v1672_v44  ;;  %v10945_v43 = vld [vmem:[#allocation37_spill] sm:$0xff] }
 0x3d0   : > { %v8874_v50 = vpack.c.b16 %v1674_v35, %v1674_v35  ;;  %v1646_v10 = vrot.slane %v10945_v43, 1  ;;  %v10946_v35 = vld [vmem:[#allocation30_spill] sm:$0xff] }
 0x3e7   : > { %1262 = vadd.xlane.f32.xlu0 %v1261_v27 }
 0x3fd   : > { %1520 = vrot.lane.b32.xlu0 %v8868_v2, %s7673_s18 }
 0x401   : > { %1676 = vrot.lane.b32.xlu0 %v8874_v50, %s7673_s18 }
 0x404   : > { %v1254_v26 = vpop.xlane.xlu1 %1253 }
 0x405   : > { %7420 = vrcp.f32 %v1254_v26 }
 0x408   : > { %v1374_v7 = vpop.permute.xlu1 %1373 }
 0x409   : > { %v1379_v6 = vsel %vm1281_vm12, %v1374_v7, 0  ;;  %v10948_v7 = vld [vmem:[#allocation39_spill] sm:$0xff] }
 0x40c   : > { %v1422_v27 = vpop.permute.xlu1 %1421 }
 0x40d   : > { %v1427_v1 = vsel %vm1281_vm12, %v1422_v27, 0 }
 0x40f   : > { %v7421_v56 = vpop.eup %7420 }
 0x410   : > { %v1268_v17 = vmul.f32 %v7421_v56, %v8790_v46  ;;  %v10947_v56 = vld [vmem:[#allocation33_spill] sm:$0xff] }
 0x412   : > { %v1272_v55 = vpack.c.bf16 %v1268_v17, %v1268_v17  ;;  %v1647_v17 = vsel %vm853_vm1, %v10947_v56, %v1646_v10 }
 0x414   : > { %6907 = vmatmul.mubr.msk.bf16.vlgmr.msra.gmra.mrb[16].mxu1 %vm899_vm10, %v1272_v55  ;;  %v1650_v55 = vrot.slane %v10948_v7, 6 }
 0x415   : > { %6917 = vmatpush3.bf16.msra.mxu1 %v1379_v6  ;;  %6918 = vmatprep.mubr.msk.bf16.mxu1 %vm7672_vm8, %v10905_v22  ;;  %v10949_v6 = vld [vmem:[#allocation31_spill] sm:$0xff] }
 0x416   : > { %6928 = vmatprep.subr.bf16.mxu1 %v10905_v22  ;;  %v1570_v27 = vrot.slane %v10949_v6, 7 }
 0x43f   : > { %v1257_v49 = vpop.xlane.xlu0 %1256 }
 0x440   : > { %7422 = vrcp.f32 %v1257_v49  ;;  %v10950_v49 = vld [vmem:[#allocation36_spill] sm:$0xff] }
 0x442   : > { %v1260_v5 = vpop.xlane.xlu1 %1259 }
 0x443   : > { %7424 = vrcp.f32 %v1260_v5  ;;  %v1326_v18 = vpop.permute.xlu0 %1325  ;;  %v1648_v5 = vrot.slane %v10950_v49, 7 }
 0x444   : > { %v1331_v46 = vsel %vm1281_vm12, %v1326_v18, 0  ;;  %v10951_v18 = vld [vmem:[#allocation41_spill] sm:$0xff] }
 0x445   : > { %6911 = vmatpush3.bf16.msra.mxu0 %v1331_v46  ;;  %v1652_v46 = vrot.slane %v10951_v18, 5 }
 0x446   : > { %6922 = vmatprep.subr.bf16.mxu0 %v10905_v22  ;;  %v1599_v53 = vpop.permute.xlu1 %1598 }
 0x44a   : > { %v7423_v8 = vpop.eup %7422 }
 0x44b   : > { %v1269_v20 = vmul.f32 %v7423_v8, %v8800_v30 }
 0x44d   : > { %v7425_v51 = vpop.eup %7424  ;;  %v1273_v39 = vpack.c.bf16 %v1269_v20, %v1269_v20  ;;  %v1649_v20 = vsel %vm856_vm2, %v1648_v5, %v1647_v17 }
 0x44e   : > { %v1270_v15 = vmul.f32 %v7425_v51, %v8804_v40  ;;  %v1568_v40 = vrot.slane %v8527_v47, 1  ;;  %v10952_v51 = vld [vmem:[#allocation34_spill] sm:$0xff] }
 0x44f   : > { %6913 = vmatmul.mubr.msk.bf16.vlgmr.msra.gmra.mrb[24].mxu0 %vm899_vm10, %v1273_v39  ;;  %v1572_v39 = vrot.slane %v10952_v51, 6 }
 0x450   : > { %6923 = vmatpush3.bf16.msra.mxu0 %v1427_v1  ;;  %v1274_v58 = vpack.c.bf16 %v1270_v15, %v1270_v15  ;;  %6924 = vmatprep.mubr.msk.bf16.mxu0 %vm7672_vm8, %v10905_v22  ;;  %v1569_v26 = vsel %vm853_vm1, %v10946_v35, %v1568_v40  ;;  %v1651_v1 = vsel %vm859_vm3, %v1650_v55, %v1649_v20  ;;  %v10954_v40 = vld [vmem:[#allocation32_spill] sm:$0xff] }
 0x451   : > { %6934 = vmatprep.subr.bf16.mxu0 %v10905_v22  ;;  %v1571_v8 = vsel %vm856_vm2, %v1570_v27, %v1569_v26  ;;  %v1574_v10 = vrot.slane %v10954_v40, 5  ;;  %v1653_v11 = vsel %vm862_vm4, %v1652_v46, %v1651_v1  ;;  %v10957_v27 = vld [vmem:[#allocation51_spill] sm:$0xff] }
 0x452   : > { %6919 = vmatmul.mubr.msk.bf16.vlgmr.msra.gmra.mrb[20].mxu1 %vm899_vm10, %v1274_v58  ;;  %v10953_v58 = vld [vmem:[#allocation45_spill] sm:$0xff]  ;;  %v1573_v26 = vsel %vm859_vm3, %v1572_v39, %v1571_v8  ;;  %v1658_v5 = vrot.slane %v10957_v27, 2  ;;  %v10959_v39 = vld [vmem:[#allocation35_spill] sm:$0xff]  ;;  %v1755_v27 = vpop.permute.xlu1 %1754 }
 0x453   : > { %6930 = vmatprep.mubr.msk.bf16.mxu1 %vm7672_vm8, %v10905_v22  ;;  %v1575_v1 = vsel %vm862_vm4, %v1574_v10, %v1573_v26 }
 0x474   : > { %v1263_v30 = vpop.xlane.xlu0 %1262 }
 0x475   : > { %7426 = vrcp.f32 %v1263_v30  ;;  %v1654_v30 = vrot.slane %v10953_v58, 4 }
 0x477   : > { %v1655_v46 = vsel %vm865_vm5, %v1654_v30, %v1653_v11 }
 0x478   : > { %v1521_v63 = vpop.permute.xlu0 %1520 }
 0x479   : > { %v1526_v44 = vsel %vm899_vm10, %v1521_v63, 0 }
 0x47a   : > { %6929 = vmatpush3.bf16.xpose.msra.mxu1 %v1526_v44  ;;  %v10955_v44 = vld [vmem:[#allocation11_spill] sm:$0xff] }
 0x47b   : > { %6940 = vmatprep.subr.bf16.mxu1 %v10905_v22  ;;  %v1504_v41 = vpack.c.b16 %v10955_v44, %v10955_v44  ;;  %v10958_v44 = vld [vmem:[#allocation40_spill] sm:$0xff] }
 0x47c   : > { %v1677_v15 = vpop.permute.xlu0 %1676  ;;  %v1578_v8 = vrot.slane %v10958_v44, 3 }
 0x47d   : > { %v1682_v55 = vsel %vm899_vm10, %v1677_v15, 0  ;;  %v10961_v15 = vld [vmem:[#allocation44_spill] sm:$0xff] }
 0x47e   : > { %v1724_v62 = vrot.slane %v10961_v15, 1 }
 0x47f   : > { %v7427_v63 = vpop.eup %7426 }
 0x480   : > { %v1271_v17 = vmul.f32 %v7427_v63, %v8849_v54  ;;  %v1657_v54 = vsel %vm868_vm6, %v1656_v42, %v1655_v46  ;;  %v1576_v63 = vrot.slane %v10959_v39, 4  ;;  %v10964_v46 = vld [vmem:[#allocation43_spill] sm:$0xff] }
 0x481   : > { %6931 = vmatmul.mubr.msk.bf16.vlgmr.msra.gmra.mrb[24].mxu1 %vm899_vm10, %v1504_v41  ;;  %v1604_v41 = vsel %vm899_vm10, %v1599_v53, 0  ;;  %v1659_v11 = vsel %vm871_vm7, %v1658_v5, %v1657_v54  ;;  %v1726_v5 = vrot.slane %v10964_v46, 7  ;;  %v10965_v54 = vld [vmem:[#allocation48_spill] sm:$0xff]  ;;  %v1760_v46 = vsel %vm899_vm10, %v1755_v27, 0 }
 0x482   : > { %6941 = vmatpush3.bf16.xpose.msra.mxu1 %v1682_v55  ;;  %v1275_v20 = vpack.c.bf16 %v1271_v17, %v1271_v17  ;;  %6942 = vmatprep.mubr.msk.bf16.mxu1 %vm7672_vm8, %v10905_v22  ;;  %v1577_v42 = vsel %vm865_vm5, %v1576_v63, %v1575_v1  ;;  %v1660_v10 = vpack.c.b16 %v1659_v11, %v1659_v11  ;;  %v10962_v17 = vld [vmem:[#allocation38_spill] sm:$0xff]  ;;  %v10966_v1 = vld [vmem:[#allocation49_spill] sm:$0xff] }
 0x483   : > { %6952 = vmatprep.subr.bf16.mxu1 %v10905_v22  ;;  %v1579_v30 = vsel %vm868_vm6, %v1578_v8, %v1577_v42  ;;  %v1725_v53 = vsel %vm853_vm1, %v10962_v17, %v1724_v62  ;;  %v10963_v55 = vld [vmem:[#allocation46_spill] sm:$0xff]  ;;  %v1732_v63 = vrot.slane %v10966_v1, 4 }
 0x484   : > { %6925 = vmatmul.mubr.msk.bf16.vlgmr.msra.gmra.mrb[28].mxu0 %vm899_vm10, %v1275_v20  ;;  %v1581_v26 = vsel %vm871_vm7, %v1580_v4, %v1579_v30  ;;  %v1728_v20 = vrot.slane %v10963_v55, 6  ;;  %v1727_v8 = vsel %vm856_vm2, %v1726_v5, %v1725_v53  ;;  %v10967_v11 = vld [vmem:[#allocation50_spill] sm:$0xff]  ;;  %v10968_v4 = vld [vmem:[#allocation52_spill] sm:$0xff] }
 0x485   : > { %6935 = vmatpush3.bf16.xpose.msra.mxu0 %v1604_v41  ;;  %6936 = vmatprep.mubr.msk.bf16.mxu0 %vm7672_vm8, %v10905_v22  ;;  %v1730_v41 = vrot.slane %v10965_v54, 5  ;;  %v1582_v15 = vpack.c.b16 %v1581_v26, %v1581_v26  ;;  %v1734_v42 = vrot.slane %v10967_v11, 3  ;;  %v1736_v30 = vrot.slane %v10968_v4, 2  ;;  %v10974_v4 = vld [vmem:[#allocation53_spill] sm:$0xff] }
 0x486   : > { %6946 = vmatprep.subr.bf16.mxu0 %v10905_v22  ;;  %v1729_v62 = vsel %vm859_vm3, %v1728_v20, %v1727_v8 }
 0x489   : > { %6943 = vmatmul.mubr.msk.bf16.vlgmr.msra.gmra.mrb[28].mxu1 %vm899_vm10, %v1660_v10  ;;  %v1731_v10 = vsel %vm862_vm4, %v1730_v41, %v1729_v62 }
 0x48a   : > { %6954 = vmatprep.mubr.msk.bf16.mxu1 %vm7672_vm8, %v10905_v22  ;;  %v1733_v26 = vsel %vm865_vm5, %v1732_v63, %v1731_v10 }
 0x48b   : > { %v1735_v53 = vsel %vm868_vm6, %v1734_v42, %v1733_v26 }
 0x48c   : > { %6937 = vmatmul.mubr.msk.bf16.vlgmr.msra.gmra.mrb[32].mxu0 %vm899_vm10, %v1582_v15  ;;  %v1737_v20 = vsel %vm871_vm7, %v1736_v30, %v1735_v53 }
 0x48d   : > { %6947 = vmatpush3.bf16.xpose.msra.mxu0 %v1760_v46  ;;  %6948 = vmatprep.mubr.msk.bf16.mxu0 %vm7672_vm8, %v10905_v22  ;;  %v1738_v5 = vpack.c.b16 %v1737_v20, %v1737_v20  ;;  %v10972_v20 = vld [vmem:[#allocation9_spill] sm:$0xff] }
 0x48e   : > { %6958 = vmatprep.subr.bf16.mxu0 %v10905_v22 }
 0x494   : > { %6949 = vmatmul.mubr.msk.bf16.vlgmr.msra.gmra.mrb[36].mxu0 %vm899_vm10, %v1738_v5  ;;  %v10973_v5 = vsub.s32 1, %v10972_v20 }
 0x495   : > { %6960 = vmatprep.mubr.msk.bf16.mxu0 %vm7672_vm8, %v10905_v22 }
 0x496   : > { %v1489_v11 = vrot.slane %v10974_v4, %v10973_v5 }
 0x4e7   : > { %v8967_v27 = vpop.f32.mrb[16].mxu1 }
 0x4e8   : > { %10969 = vst [vmem:[#allocation25_spill] sm:$0xff] %v8967_v27  ;;  %v6908_v15 = vpop.f32.mrb[17].mxu1 }
 0x4e9   : > { %v1322_v46 = vpop.f32.mrb[18].mxu1 }
 0x4ea   : > { %v6909_v41 = vpop.f32.mrb[19].mxu1 }
 0x522   : > { %v8969_v8 = vpop.f32.mrb[24].mxu0 }
 0x523   : > { %10970 = vst [vmem:[#allocation24_spill] sm:$0xff] %v8969_v8  ;;  %v6914_v63 = vpop.f32.mrb[25].mxu0 }
 0x524   : > { %v1370_v62 = vpop.f32.mrb[26].mxu0 }
 0x525   : > { %v6915_v42 = vpop.f32.mrb[27].mxu0  ;;  %v8971_v10 = vpop.f32.mrb[20].mxu1 }
 0x526   : > { %10971 = vst [vmem:[#allocation26_spill] sm:$0xff] %v8971_v10  ;;  %v6920_v26 = vpop.f32.mrb[21].mxu1 }
 0x527   : > { %v1418_v30 = vpop.f32.mrb[22].mxu1 }
 0x528   : > { %v6921_v53 = vpop.f32.mrb[23].mxu1 }
 0x554   : > { %v1562_v1 = vpop.f32.mrb[24].mxu1 }
 0x555   : > { %v1563_v54 = vadd.f32 %v1562_v1, %v1489_v11  ;;  %v6932_v27 = vpop.f32.mrb[25].mxu1 }
 0x556   : > { %v1565_v15 = vpop.f32.mrb[26].mxu1 }
 0x557   : > { %v8976_v46 = vpop.f32.mrb[28].mxu0  ;;  %v6933_v41 = vpop.f32.mrb[27].mxu1  ;;  %v1802_v63 = vsel %vm899_vm10, %v1563_v54, -inf }
 0x558   : > { %10975 = vst [vmem:[#allocation27_spill] sm:$0xff] %v8976_v46  ;;  %v6926_v62 = vpop.f32.mrb[29].mxu0  ;;  %1803 = vmax.xlane.f32.xlu0 %v1802_v63 }
 0x559   : > { %v1466_v42 = vpop.f32.mrb[30].mxu0 }
 0x55a   : > { %v6927_v10 = vpop.f32.mrb[31].mxu0 }
 0x55c   : > { %v1718_v26 = vpop.f32.mrb[28].mxu1 }
 0x55d   : > { %v1719_v30 = vadd.f32 %v1718_v26, %v1489_v11  ;;  %v6944_v53 = vpop.f32.mrb[29].mxu1 }
 0x55e   : > { %v1721_v8 = vpop.f32.mrb[30].mxu1 }
 0x55f   : > { %v1640_v20 = vpop.f32.mrb[32].mxu0  ;;  %v6945_v55 = vpop.f32.mrb[31].mxu1  ;;  %v1808_v5 = vsel %vm899_vm10, %v1719_v30, -inf }
 0x560   : > { %v1641_v1 = vadd.f32 %v1640_v20, %v1489_v11  ;;  %v6938_v27 = vpop.f32.mrb[33].mxu0  ;;  %1809 = vmax.xlane.f32.xlu0 %v1808_v5 }
 0x561   : > { %v1643_v15 = vpop.f32.mrb[34].mxu0 }
 0x562   : > { %v6939_v46 = vpop.f32.mrb[35].mxu0  ;;  %v1805_v41 = vsel %vm899_vm10, %v1641_v1, -inf }
 0x563   : > { %1806 = vmax.xlane.f32.xlu1 %v1805_v41 }
 0x567   : > { %v1796_v62 = vpop.f32.mrb[36].mxu0 }
 0x568   : > { %v1797_v63 = vadd.f32 %v1796_v62, %v1489_v11  ;;  %v6950_v42 = vpop.f32.mrb[37].mxu0 }
 0x569   : > { %v1799_v10 = vpop.f32.mrb[38].mxu0 }
 0x56a   : > { %v6951_v4 = vpop.f32.mrb[39].mxu0  ;;  %v1811_v26 = vsel %vm899_vm10, %v1797_v63, -inf }
 0x56b   : > { %1812 = vmax.xlane.f32.xlu0 %v1811_v26 }
 0x574   : > { %1850 = vrot.lane.b32.xlu1 %v8868_v2, %s7674_s24 }
 0x5e5   : > { %v1804_v55 = vpop.xlane.xlu0 %1803 }
 0x5e6   : > { %v1814_v8 = vsub.f32 %v1563_v54, %v1804_v55 }
 0x5e8   : > { %v1818_v20 = vmul.f32 1.442695, %v1814_v8  ;;  %v2155_v8 = vrot.slane %v8377_v59, 1 }
 0x5ea   : > { %7428 = vpow2.f32 %v1818_v20  ;;  %v2158_v20 = vrot.slane %v8385_v34, 7 }
 0x5f0   : > { %v1807_v53 = vpop.xlane.xlu1 %1806 }
 0x5f1   : > { %v1815_v46 = vsub.f32 %v1641_v1, %v1807_v53  ;;  %v1810_v1 = vpop.xlane.xlu0 %1809 }
 0x5f2   : > { %v1816_v41 = vsub.f32 %v1719_v30, %v1810_v1  ;;  %v2310_v1 = vrot.slane %v8451_v36, 2 }
 0x5f3   : > { %v1820_v5 = vmul.f32 1.442695, %v1815_v46 }
 0x5f4   : > { %v8984_v27 = vpop.eup %7428  ;;  %v1851_v15 = vpop.permute.xlu1 %1850  ;;  %v1822_v62 = vmul.f32 1.442695, %v1816_v41  ;;  %v2314_v41 = vrot.slane %v8431_v24, 7 }
 0x5f5   : > { %7430 = vpow2.f32 %v1820_v5  ;;  %v1856_v11 = vsel %vm1281_vm12, %v1851_v15, 0  ;;  %v1826_v4 = vsel %vm899_vm10, %v8984_v27, 0.0  ;;  %v2311_v5 = vrot.slane %v8416_v28, 1 }
 0x5f6   : > { %6953 = vmatpush3.bf16.msra.mxu1 %v1856_v11  ;;  %1827 = vadd.xlane.f32.xlu1 %v1826_v4  ;;  %7432 = vpow2.f32 %v1822_v62  ;;  %v2164_v11 = vrot.slane %v8426_v57, 4  ;;  %v2316_v62 = vrot.slane %v8436_v38, 6 }
 0x5f7   : > { %6964 = vmatprep.subr.bf16.mxu1 %v10905_v22 }
 0x5f8   : > { %v1813_v42 = vpop.xlane.xlu0 %1812 }
 0x5f9   : > { %v1817_v10 = vsub.f32 %v1797_v63, %v1813_v42 }
 0x5fb   : > { %v1824_v26 = vmul.f32 1.442695, %v1817_v10  ;;  %v2312_v10 = vsel %vm853_vm1, %v2311_v5, %v2310_v1  ;;  %v2232_v1 = vrot.slane %v8400_v52, 2 }
 0x5fd   : > { %7434 = vpow2.f32 %v1824_v26  ;;  %v2318_v26 = vrot.slane %v8441_v45, 5 }
 0x5ff   : > { %v8990_v2 = vpop.eup %7430 }
 0x600   : > { %v1829_v54 = vsel %vm899_vm10, %v8990_v2, 0.0  ;;  %v9000_v55 = vpop.eup %7432 }
 0x601   : > { %1830 = vadd.xlane.f32.xlu0 %v1829_v54  ;;  %v2162_v54 = vrot.slane %v8404_v13, 5 }
 0x607   : > { %1946 = vrot.lane.b32.xlu1 %v8874_v50, %s7674_s24  ;;  %v1832_v50 = vsel %vm899_vm10, %v9000_v55, 0.0  ;;  %v9009_v63 = vpop.eup %7434 }
 0x608   : > { %v1835_v4 = vsel %vm899_vm10, %v9009_v63, 0.0 }
 0x60b   : > { %1994 = vrot.lane.b32.xlu1 %v8844_v61, %s7674_s24  ;;  %v2154_v61 = vrot.slane %v8396_v29, 2 }
 0x60d   : > { %v2156_v30 = vsel %vm853_vm1, %v2155_v8, %v2154_v61  ;;  %v2320_v61 = vrot.slane %v8467_v3, 4 }
 0x60e   : > { %v2157_v53 = vsel %vm856_vm2, %v8381_v14, %v2156_v30 }
 0x60f   : > { %v2159_v46 = vsel %vm859_vm3, %v2158_v20, %v2157_v53  ;;  %v2166_v20 = vrot.slane %v8422_v19, 3 }
 0x617   : > { %1898 = vrot.lane.b32.xlu0 %v8837_v9, %s7674_s24  ;;  %v2160_v9 = vrot.slane %v8389_v25, 6 }
 0x619   : > { %v2161_v15 = vsel %vm862_vm4, %v2160_v9, %v2159_v46 }
 0x61a   : > { %v2163_v42 = vsel %vm865_vm5, %v2162_v54, %v2161_v15  ;;  %v2322_v15 = vrot.slane %v8462_v33, 3  ;;  %v2233_v54 = vrot.slane %v10940_v31, 1 }
 0x61b   : > { %v2165_v8 = vsel %vm868_vm6, %v2164_v11, %v2163_v42  ;;  %v2238_v42 = vrot.slane %v10939_v37, 6 }
 0x61c   : > { %v2167_v53 = vsel %vm871_vm7, %v2166_v20, %v2165_v8  ;;  %v2240_v20 = vrot.slane %v10942_v23, 5 }
 0x61d   : > { %v9037_v11 = vpack.c.b16 %v2167_v53, %v2167_v53  ;;  %v10976_v53 = vld [vmem:[#allocation12_spill] sm:$0xff] }
 0x62f   : > { %1833 = vadd.xlane.f32.xlu1 %v1832_v50  ;;  %v2313_v50 = vsel %vm856_vm2, %v8420_v21, %v2312_v10  ;;  %v2234_v10 = vsel %vm853_vm1, %v2233_v54, %v2232_v1 }
 0x630   : > { %v2315_v9 = vsel %vm859_vm3, %v2314_v41, %v2313_v50  ;;  %v2236_v41 = vrot.slane %v8387_v16, 7 }
 0x631   : > { %v2317_v30 = vsel %vm862_vm4, %v2316_v62, %v2315_v9  ;;  %v2244_v9 = vrot.slane %v10943_v12, 3 }
 0x632   : > { %v2319_v46 = vsel %vm865_vm5, %v2318_v26, %v2317_v30  ;;  %v2235_v26 = vsel %vm856_vm2, %v8383_v48, %v2234_v10 }
 0x633   : > { %v2321_v5 = vsel %vm868_vm6, %v2320_v61, %v2319_v46  ;;  %v2237_v8 = vsel %vm859_vm3, %v2236_v41, %v2235_v26  ;;  %v2242_v61 = vrot.slane %v10941_v0, 4  ;;  %v9061_v46 = vpack.c.b16 %v10976_v53, %v10976_v53 }
 0x634   : > { %v2239_v50 = vsel %vm862_vm4, %v2238_v42, %v2237_v8 }
 0x635   : > { %v2241_v30 = vsel %vm865_vm5, %v2240_v20, %v2239_v50 }
 0x636   : > { %1836 = vadd.xlane.f32.xlu0 %v1835_v4  ;;  %v2323_v4 = vsel %vm871_vm7, %v2322_v15, %v2321_v5  ;;  %v2243_v5 = vsel %vm868_vm6, %v2242_v61, %v2241_v30 }
 0x637   : > { %v9045_v62 = vpack.c.b16 %v2323_v4, %v2323_v4  ;;  %v2245_v15 = vsel %vm871_vm7, %v2244_v9, %v2243_v5 }
 0x638   : > { %v9067_v4 = vpack.c.b16 %v2245_v15, %v2245_v15 }
 0x640   : > { %2169 = vrot.lane.b32.xlu1 %v9037_v11, %s7673_s18 }
 0x644   : > { %2325 = vrot.lane.b32.xlu1 %v9045_v62, %s7673_s18 }
 0x64c   : > { %2091 = vrot.lane.b32.xlu0 %v9061_v46, %s7673_s18 }
 0x650   : > { %2247 = vrot.lane.b32.xlu0 %v9067_v4, %s7673_s18 }
 0x683   : > { %v1828_v54 = vpop.xlane.xlu1 %1827 }
 0x684   : > { %7436 = vrcp.f32 %v1828_v54  ;;  %v2139_v54 = vrot.slane %v8527_v47, 2 }
 0x687   : > { %v1947_v10 = vpop.permute.xlu1 %1946 }
 0x688   : > { %v1952_v50 = vsel %vm1281_vm12, %v1947_v10, 0 }
 0x68b   : > { %v1995_v9 = vpop.permute.xlu1 %1994 }
 0x68c   : > { %v2000_v53 = vsel %vm1281_vm12, %v1995_v9, 0  ;;  %v2145_v9 = vrot.slane %v10954_v40, 6 }
 0x68e   : > { %v7437_v1 = vpop.eup %7436  ;;  %v1831_v41 = vpop.xlane.xlu0 %1830 }
 0x68f   : > { %7438 = vrcp.f32 %v1831_v41  ;;  %v1842_v42 = vmul.f32 %v7437_v1, %v8984_v27 }
 0x691   : > { %v1846_v26 = vpack.c.bf16 %v1842_v42, %v1842_v42 }
 0x692   : > { %v1899_v8 = vpop.permute.xlu0 %1898 }
 0x693   : > { %v1904_v61 = vsel %vm1281_vm12, %v1899_v8, 0  ;;  %6955 = vmatmul.mubr.msk.bf16.vlgmr.msra.gmra.mrb[32].mxu1 %vm899_vm10, %v1846_v26  ;;  %v2217_v26 = vrot.slane %v10945_v43, 2 }
 0x694   : > { %6965 = vmatpush3.bf16.msra.mxu1 %v1952_v50  ;;  %6959 = vmatpush3.bf16.msra.mxu0 %v1904_v61  ;;  %v2143_v61 = vrot.slane %v10952_v51, 7 }
 0x695   : > { %6970 = vmatprep.subr.bf16.mxu0 %v10905_v22  ;;  %6966 = vmatprep.mubr.msk.bf16.mxu1 %vm7672_vm8, %v10905_v22 }
 0x696   : > { %6976 = vmatprep.subr.bf16.mxu1 %v10905_v22 }
 0x699   : > { %v7439_v20 = vpop.eup %7438 }
 0x69a   : > { %v1843_v27 = vmul.f32 %v7439_v20, %v8990_v2  ;;  %v2140_v2 = vrot.slane %v10946_v35, 1  ;;  %v2218_v20 = vrot.slane %v10947_v56, 1 }
 0x69c   : > { %v1847_v30 = vpack.c.bf16 %v1843_v27, %v1843_v27  ;;  %v2141_v41 = vsel %vm853_vm1, %v2140_v2, %v2139_v54 }
 0x69d   : > { %v2142_v50 = vsel %vm856_vm2, %v10949_v6, %v2141_v41 }
 0x69e   : > { %6961 = vmatmul.mubr.msk.bf16.vlgmr.msra.gmra.mrb[40].mxu0 %vm899_vm10, %v1847_v30  ;;  %v2219_v30 = vsel %vm853_vm1, %v2218_v20, %v2217_v26 }
 0x69f   : > { %6971 = vmatpush3.bf16.msra.mxu0 %v2000_v53  ;;  %6972 = vmatprep.mubr.msk.bf16.mxu0 %vm7672_vm8, %v10905_v22  ;;  %v2221_v53 = vrot.slane %v10948_v7, 7  ;;  %v2220_v26 = vsel %vm856_vm2, %v10950_v49, %v2219_v30  ;;  %v10979_v30 = vld [vmem:[#allocation51_spill] sm:$0xff] }
 0x6a0   : > { %6982 = vmatprep.subr.bf16.mxu0 %v10905_v22 }
 0x6a1   : > { %v2222_v20 = vsel %vm859_vm3, %v2221_v53, %v2220_v26  ;;  %v2296_v26 = vrot.slane %v10962_v17, 1 }
 0x6bc   : > { %v1834_v5 = vpop.xlane.xlu1 %1833 }
 0x6bd   : > { %7440 = vrcp.f32 %v1834_v5 }
 0x6c0   : > { %v2170_v2 = vpop.permute.xlu1 %2169 }
 0x6c1   : > { %v2175_v7 = vsel %vm899_vm10, %v2170_v2, 0 }
 0x6c3   : > { %v1837_v15 = vpop.xlane.xlu0 %1836 }
 0x6c4   : > { %7442 = vrcp.f32 %v1837_v15  ;;  %v2223_v15 = vrot.slane %v10951_v18, 6 }
 0x6c7   : > { %v7441_v1 = vpop.eup %7440  ;;  %v2092_v10 = vpop.permute.xlu0 %2091 }
 0x6c8   : > { %v1844_v42 = vmul.f32 %v7441_v1, %v9000_v55  ;;  %v2097_v27 = vsel %vm899_vm10, %v2092_v10, 0  ;;  %v2144_v55 = vsel %vm859_vm3, %v2143_v61, %v2142_v50  ;;  %v10977_v1 = vld [vmem:[#allocation13_spill] sm:$0xff]  ;;  %v2147_v10 = vrot.slane %v10959_v39, 5 }
 0x6c9   : > { %v2075_v41 = vpack.c.b16 %v10977_v1, %v10977_v1  ;;  %v2149_v61 = vrot.slane %v10958_v44, 4  ;;  %v2227_v1 = vrot.slane %v10956_v60, 4 }
 0x6ca   : > { %v1848_v8 = vpack.c.bf16 %v1844_v42, %v1844_v42  ;;  %v2146_v42 = vsel %vm862_vm4, %v2145_v9, %v2144_v55  ;;  %v10978_v9 = vld [vmem:[#allocation44_spill] sm:$0xff] }
 0x6cb   : > { %v2295_v55 = vrot.slane %v10978_v9, 2  ;;  %v2148_v53 = vsel %vm865_vm5, %v2147_v10, %v2146_v42  ;;  %v10980_v42 = vld [vmem:[#allocation46_spill] sm:$0xff] }
 0x6cc   : > { %6967 = vmatmul.mubr.msk.bf16.vlgmr.msra.gmra.mrb[36].mxu1 %vm899_vm10, %v1848_v8  ;;  %v2248_v8 = vpop.permute.xlu0 %2247 }
 0x6cd   : > { %6977 = vmatpush3.bf16.xpose.msra.mxu1 %v2097_v27  ;;  %6978 = vmatprep.mubr.msk.bf16.mxu1 %vm7672_vm8, %v10905_v22  ;;  %v2225_v27 = vrot.slane %v10953_v58, 5  ;;  %v2253_v18 = vsel %vm899_vm10, %v2248_v8, 0  ;;  %v10981_v8 = vld [vmem:[#allocation48_spill] sm:$0xff] }
 0x6ce   : > { %v7443_v5 = vpop.eup %7442  ;;  %6988 = vmatprep.subr.bf16.mxu1 %v10905_v22 }
 0x6cf   : > { %v1845_v54 = vmul.f32 %v7443_v5, %v9009_v63  ;;  %v2151_v63 = vrot.slane %v10960_v32, 3  ;;  %v2224_v5 = vsel %vm862_vm4, %v2223_v15, %v2222_v20  ;;  %v2150_v15 = vsel %vm868_vm6, %v2149_v61, %v2148_v53  ;;  %v2326_v61 = vpop.permute.xlu1 %2325 }
 0x6d0   : > { %v2226_v2 = vsel %vm865_vm5, %v2225_v27, %v2224_v5  ;;  %v2301_v20 = vrot.slane %v10981_v8, 6  ;;  %v10982_v27 = vld [vmem:[#allocation49_spill] sm:$0xff] }
 0x6d1   : > { %v1849_v50 = vpack.c.bf16 %v1845_v54, %v1845_v54  ;;  %v2229_v54 = vrot.slane %v10979_v30, 3  ;;  %v2303_v5 = vrot.slane %v10982_v27, 5  ;;  %v10984_v30 = vld [vmem:[#allocation50_spill] sm:$0xff] }
 0x6d2   : > { %v2305_v60 = vrot.slane %v10984_v30, 4 }
 0x6d3   : > { %6973 = vmatmul.mubr.msk.bf16.vlgmr.msra.gmra.mrb[44].mxu0 %vm899_vm10, %v1849_v50  ;;  %v2152_v50 = vsel %vm871_vm7, %v2151_v63, %v2150_v15  ;;  %v10983_v63 = vld [vmem:[#allocation43_spill] sm:$0xff] }
 0x6d4   : > { %6983 = vmatpush3.bf16.xpose.msra.mxu0 %v2175_v7  ;;  %6979 = vmatmul.mubr.msk.bf16.vlgmr.msra.gmra.mrb[40].mxu1 %vm899_vm10, %v2075_v41  ;;  %v2228_v7 = vsel %vm868_vm6, %v2227_v1, %v2226_v2  ;;  %v2297_v41 = vsel %vm853_vm1, %v2296_v26, %v2295_v55  ;;  %v2153_v53 = vpack.c.b16 %v2152_v50, %v2152_v50  ;;  %v10985_v26 = vld [vmem:[#allocation52_spill] sm:$0xff] }
 0x6d5   : > { %6989 = vmatpush3.bf16.xpose.msra.mxu1 %v2253_v18  ;;  %6984 = vmatprep.mubr.msk.bf16.mxu0 %vm7672_vm8, %v10905_v22  ;;  %v2299_v18 = vrot.slane %v10980_v42, 7  ;;  %v2230_v10 = vsel %vm871_vm7, %v2229_v54, %v2228_v7  ;;  %v2298_v15 = vsel %vm856_vm2, %v10983_v63, %v2297_v41  ;;  %v2307_v2 = vrot.slane %v10985_v26, 3 }
 0x6d6   : > { %6994 = vmatprep.subr.bf16.mxu0 %v10905_v22  ;;  %6990 = vmatprep.mubr.msk.bf16.mxu1 %vm7672_vm8, %v10905_v22  ;;  %v2231_v1 = vpack.c.b16 %v2230_v10, %v2230_v10  ;;  %v2331_v54 = vsel %vm899_vm10, %v2326_v61, 0 }
 0x6d7   : > { %7000 = vmatprep.subr.bf16.mxu1 %v10905_v22  ;;  %v2300_v55 = vsel %vm859_vm3, %v2299_v18, %v2298_v15 }
 0x6d8   : > { %v2302_v7 = vsel %vm862_vm4, %v2301_v20, %v2300_v55 }
 0x6d9   : > { %v2304_v50 = vsel %vm865_vm5, %v2303_v5, %v2302_v7 }
 0x6da   : > { %v2306_v41 = vsel %vm868_vm6, %v2305_v60, %v2304_v50 }
 0x6db   : > { %6985 = vmatmul.mubr.msk.bf16.vlgmr.msra.gmra.mrb[48].mxu0 %vm899_vm10, %v2153_v53  ;;  %v2308_v18 = vsel %vm871_vm7, %v2307_v2, %v2306_v41 }
 0x6dc   : > { %6995 = vmatpush3.bf16.xpose.msra.mxu0 %v2331_v54  ;;  %6991 = vmatmul.mubr.msk.bf16.vlgmr.msra.gmra.mrb[44].mxu1 %vm899_vm10, %v2231_v1  ;;  %v2309_v10 = vpack.c.b16 %v2308_v18, %v2308_v18 }
 0x6dd   : > { %6996 = vmatprep.mubr.msk.bf16.mxu0 %vm7672_vm8, %v10905_v22  ;;  %7006 = vmatprep.subr.bf16.mxu0 %v10905_v22 }
 0x6de   : > { %7002 = vmatprep.mubr.msk.bf16.mxu1 %vm7672_vm8, %v10905_v22 }
 0x6e3   : > { %6997 = vmatmul.mubr.msk.bf16.vlgmr.msra.gmra.mrb[52].mxu0 %vm899_vm10, %v2309_v10  ;;  %v10991_v10 = vld [vmem:[#allocation9_spill] sm:$0xff] }
 0x6e4   : > { %7008 = vmatprep.mubr.msk.bf16.mxu0 %vm7672_vm8, %v10905_v22  ;;  %v2059_v26 = vsub.s32 2, %v10991_v10 }
 0x766   : > { %v9160_v20 = vpop.f32.mrb[32].mxu1 }
 0x767   : > { %10986 = vst [vmem:[#allocation29_spill] sm:$0xff] %v9160_v20  ;;  %v6956_v61 = vpop.f32.mrb[33].mxu1 }
 0x768   : > { %v1895_v5 = vpop.f32.mrb[34].mxu1 }
 0x769   : > { %v6957_v53 = vpop.f32.mrb[35].mxu1  ;;  %v10992_v5 = vld [vmem:[#allocation53_spill] sm:$0xff] }
 0x76a   : > { %v2060_v53 = vrot.slane %v10992_v5, %v2059_v26 }
 0x771   : > { %v9162_v15 = vpop.f32.mrb[40].mxu0 }
 0x772   : > { %10987 = vst [vmem:[#allocation10_spill] sm:$0xff] %v9162_v15  ;;  %v6962_v55 = vpop.f32.mrb[41].mxu0 }
 0x773   : > { %v1943_v2 = vpop.f32.mrb[42].mxu0 }
 0x774   : > { %v6963_v54 = vpop.f32.mrb[43].mxu0 }
 0x79f   : > { %v9166_v7 = vpop.f32.mrb[36].mxu1 }
 0x7a0   : > { %10989 = vst [vmem:[#allocation30_spill] sm:$0xff] %v9166_v7  ;;  %v6968_v18 = vpop.f32.mrb[37].mxu1 }
 0x7a1   : > { %v1991_v20 = vpop.f32.mrb[38].mxu1 }
 0x7a2   : > { %v6969_v61 = vpop.f32.mrb[39].mxu1 }
 0x7a6   : > { %v9172_v42 = vpop.f32.mrb[44].mxu0 }
 0x7a7   : > { %10993 = vst [vmem:[#allocation31_spill] sm:$0xff] %v9172_v42  ;;  %v6974_v55 = vpop.f32.mrb[45].mxu0  ;;  %v2133_v2 = vpop.f32.mrb[40].mxu1  ;;  %v11000_v42 = vld [vmem:[#allocation51_spill] sm:$0xff] }
 0x7a8   : > { %v2134_v54 = vadd.f32 %v2133_v2, %v2060_v53  ;;  %v2039_v60 = vpop.f32.mrb[46].mxu0  ;;  %v6980_v15 = vpop.f32.mrb[41].mxu1 }
 0x7a9   : > { %v6975_v27 = vpop.f32.mrb[47].mxu0  ;;  %v2136_v8 = vpop.f32.mrb[42].mxu1 }
 0x7aa   : > { %v6981_v41 = vpop.f32.mrb[43].mxu1  ;;  %v2373_v18 = vsel %vm899_vm10, %v2134_v54, -inf }
 0x7ab   : > { %2374 = vmax.xlane.f32.xlu0 %v2373_v18 }
 0x7ae   : > { %v2211_v20 = vpop.f32.mrb[48].mxu0 }
 0x7af   : > { %v2212_v61 = vadd.f32 %v2211_v20, %v2060_v53  ;;  %v6986_v50 = vpop.f32.mrb[49].mxu0  ;;  %v2289_v26 = vpop.f32.mrb[44].mxu1 }
 0x7b0   : > { %v2290_v7 = vadd.f32 %v2289_v26, %v2060_v53  ;;  %v2214_v5 = vpop.f32.mrb[50].mxu0  ;;  %v6992_v10 = vpop.f32.mrb[45].mxu1 }
 0x7b1   : > { %v6987_v63 = vpop.f32.mrb[51].mxu0  ;;  %v2292_v1 = vpop.f32.mrb[46].mxu1  ;;  %v2376_v55 = vsel %vm899_vm10, %v2212_v61, -inf }
 0x7b2   : > { %2377 = vmax.xlane.f32.xlu1 %v2376_v55  ;;  %v6993_v60 = vpop.f32.mrb[47].mxu1  ;;  %v2379_v27 = vsel %vm899_vm10, %v2290_v7, -inf }
 0x7b3   : > { %2380 = vmax.xlane.f32.xlu0 %v2379_v27 }
 0x7b6   : > { %v2367_v8 = vpop.f32.mrb[52].mxu0 }
 0x7b7   : > { %v2368_v15 = vadd.f32 %v2367_v8, %v2060_v53  ;;  %v6998_v41 = vpop.f32.mrb[53].mxu0 }
 0x7b8   : > { %v2370_v2 = vpop.f32.mrb[54].mxu0 }
 0x7b9   : > { %v6999_v18 = vpop.f32.mrb[55].mxu0  ;;  %v2382_v50 = vsel %vm899_vm10, %v2368_v15, -inf }
 0x7ba   : > { %2383 = vmax.xlane.f32.xlu0 %v2382_v50 }
 0x7c3   : > { %2421 = vrot.lane.b32.xlu1 %v9061_v46, %s7674_s24 }
 0x838   : > { %v2375_v63 = vpop.xlane.xlu0 %2374 }
 0x839   : > { %v2385_v1 = vsub.f32 %v2134_v54, %v2375_v63 }
 0x83b   : > { %v2389_v10 = vmul.f32 1.442695, %v2385_v1  ;;  %v2726_v1 = vrot.slane %v8377_v59, 2 }
 0x83d   : > { %7444 = vpow2.f32 %v2389_v10 }
 0x83f   : > { %v2378_v5 = vpop.xlane.xlu1 %2377 }
 0x840   : > { %v2386_v20 = vsub.f32 %v2212_v61, %v2378_v5  ;;  %v2381_v61 = vpop.xlane.xlu0 %2380 }
 0x841   : > { %v2387_v8 = vsub.f32 %v2290_v7, %v2381_v61  ;;  %v2731_v7 = vrot.slane %v8389_v25, 7  ;;  %v2733_v61 = vrot.slane %v8404_v13, 6 }
 0x842   : > { %v2391_v26 = vmul.f32 1.442695, %v2386_v20 }
 0x843   : > { %v2422_v55 = vpop.permute.xlu1 %2421  ;;  %v2393_v18 = vmul.f32 1.442695, %v2387_v8  ;;  %v2881_v8 = vrot.slane %v8451_v36, 3 }
 0x844   : > { %7446 = vpow2.f32 %v2391_v26  ;;  %v2427_v53 = vsel %vm1281_vm12, %v2422_v55, 0  ;;  %v2882_v55 = vrot.slane %v8416_v28, 2 }
 0x845   : > { %7001 = vmatpush3.bf16.msra.mxu1 %v2427_v53  ;;  %7448 = vpow2.f32 %v2393_v18 }
 0x846   : > { %7012 = vmatprep.subr.bf16.mxu1 %v10905_v22  ;;  %v2883_v18 = vsel %vm853_vm1, %v2882_v55, %v2881_v8  ;;  %v2809_v8 = vrot.slane %v10939_v37, 7 }
 0x847   : > { %v9184_v60 = vpop.eup %7444  ;;  %v2384_v41 = vpop.xlane.xlu0 %2383 }
 0x848   : > { %v2397_v27 = vsel %vm899_vm10, %v9184_v60, 0.0  ;;  %v2388_v2 = vsub.f32 %v2368_v15, %v2384_v41  ;;  %v2887_v41 = vrot.slane %v8436_v38, 7 }
 0x849   : > { %2398 = vadd.xlane.f32.xlu1 %v2397_v27  ;;  %v2735_v27 = vrot.slane %v8426_v57, 5 }
 0x84a   : > { %v2395_v50 = vmul.f32 1.442695, %v2388_v2 }
 0x84c   : > { %7450 = vpow2.f32 %v2395_v50  ;;  %v2889_v50 = vrot.slane %v8441_v45, 6 }
 0x84e   : > { %v9188_v46 = vpop.eup %7446 }
 0x84f   : > { %v2400_v54 = vsel %vm899_vm10, %v9188_v46, 0.0  ;;  %v9198_v63 = vpop.eup %7448 }
 0x850   : > { %2401 = vadd.xlane.f32.xlu0 %v2400_v54  ;;  %v2884_v54 = vrot.slane %v8420_v21, 1 }
 0x856   : > { %v9201_v10 = vpop.eup %7450 }
 0x857   : > { %v2406_v15 = vsel %vm899_vm10, %v9201_v10, 0.0 }
 0x85a   : > { %2517 = vrot.lane.b32.xlu1 %v9067_v4, %s7674_s24  ;;  %v2728_v4 = vrot.slane %v8381_v14, 1 }
 0x85e   : > { %2565 = vrot.lane.b32.xlu1 %v9045_v62, %s7674_s24  ;;  %v2403_v62 = vsel %vm899_vm10, %v9198_v63, 0.0 }
 0x866   : > { %2469 = vrot.lane.b32.xlu0 %v9037_v11, %s7674_s24  ;;  %v2725_v11 = vrot.slane %v8396_v29, 3 }
 0x868   : > { %v2727_v5 = vsel %vm853_vm1, %v2726_v1, %v2725_v11  ;;  %v2737_v11 = vrot.slane %v8422_v19, 4 }
 0x869   : > { %v2729_v20 = vsel %vm856_vm2, %v2728_v4, %v2727_v5  ;;  %v2891_v4 = vrot.slane %v8467_v3, 5 }
 0x86a   : > { %v2730_v26 = vsel %vm859_vm3, %v8385_v34, %v2729_v20 }
 0x86b   : > { %v2732_v53 = vsel %vm862_vm4, %v2731_v7, %v2730_v26  ;;  %v2804_v26 = vrot.slane %v10940_v31, 2 }
 0x86c   : > { %v2734_v2 = vsel %vm865_vm5, %v2733_v61, %v2732_v53  ;;  %v2806_v53 = vrot.slane %v8383_v48, 1 }
 0x86d   : > { %v2736_v1 = vsel %vm868_vm6, %v2735_v27, %v2734_v2  ;;  %v2893_v27 = vrot.slane %v8462_v33, 4 }
 0x86e   : > { %v2738_v5 = vsel %vm871_vm7, %v2737_v11, %v2736_v1  ;;  %v2811_v11 = vrot.slane %v10942_v23, 6 }
 0x86f   : > { %v9238_v61 = vpack.c.b16 %v2738_v5, %v2738_v5  ;;  %v10995_v5 = vld [vmem:[#allocation14_spill] sm:$0xff] }
 0x882   : > { %2404 = vadd.xlane.f32.xlu1 %v2403_v62  ;;  %v2885_v62 = vsel %vm856_vm2, %v2884_v54, %v2883_v18  ;;  %v2803_v54 = vrot.slane %v8400_v52, 3 }
 0x883   : > { %v2886_v7 = vsel %vm859_vm3, %v8431_v24, %v2885_v62 }
 0x884   : > { %v2805_v2 = vsel %vm853_vm1, %v2804_v26, %v2803_v54 }
 0x885   : > { %2407 = vadd.xlane.f32.xlu0 %v2406_v15  ;;  %v2888_v15 = vsel %vm862_vm4, %v2887_v41, %v2886_v7  ;;  %v2807_v18 = vsel %vm856_vm2, %v2806_v53, %v2805_v2  ;;  %v2815_v7 = vrot.slane %v10943_v12, 4 }
 0x886   : > { %v2890_v20 = vsel %vm865_vm5, %v2889_v50, %v2888_v15  ;;  %v2808_v50 = vsel %vm859_vm3, %v8387_v16, %v2807_v18 }
 0x887   : > { %v2892_v55 = vsel %vm868_vm6, %v2891_v4, %v2890_v20  ;;  %v2810_v62 = vsel %vm862_vm4, %v2809_v8, %v2808_v50  ;;  %v2813_v4 = vrot.slane %v10941_v0, 5  ;;  %v9259_v20 = vpack.c.b16 %v10995_v5, %v10995_v5 }
 0x888   : > { %v2894_v41 = vsel %vm871_vm7, %v2893_v27, %v2892_v55  ;;  %v2812_v15 = vsel %vm865_vm5, %v2811_v11, %v2810_v62 }
 0x889   : > { %v9248_v1 = vpack.c.b16 %v2894_v41, %v2894_v41  ;;  %v2814_v26 = vsel %vm868_vm6, %v2813_v4, %v2812_v15 }
 0x88a   : > { %v2816_v55 = vsel %vm871_vm7, %v2815_v7, %v2814_v26 }
 0x88b   : > { %v9265_v53 = vpack.c.b16 %v2816_v55, %v2816_v55 }
 0x893   : > { %2740 = vrot.lane.b32.xlu1 %v9238_v61, %s7673_s18 }
 0x897   : > { %2896 = vrot.lane.b32.xlu1 %v9248_v1, %s7673_s18 }
 0x89b   : > { %2662 = vrot.lane.b32.xlu0 %v9259_v20, %s7673_s18 }
 0x89f   : > { %2818 = vrot.lane.b32.xlu0 %v9265_v53, %s7673_s18 }
 0x8d6   : > { %v2399_v27 = vpop.xlane.xlu1 %2398 }
 0x8d7   : > { %7452 = vrcp.f32 %v2399_v27  ;;  %v2710_v27 = vrot.slane %v8527_v47, 3 }
 0x8da   : > { %v2518_v50 = vpop.permute.xlu1 %2517 }
 0x8db   : > { %v2523_v4 = vsel %vm1281_vm12, %v2518_v50, 0 }
 0x8dd   : > { %v2402_v54 = vpop.xlane.xlu0 %2401 }
 0x8de   : > { %7454 = vrcp.f32 %v2402_v54  ;;  %v2566_v15 = vpop.permute.xlu1 %2565 }
 0x8df   : > { %v2571_v5 = vsel %vm1281_vm12, %v2566_v15, 0 }
 0x8e1   : > { %v7453_v8 = vpop.eup %7452  ;;  %v2470_v41 = vpop.permute.xlu0 %2469 }
 0x8e2   : > { %v2475_v2 = vsel %vm1281_vm12, %v2470_v41, 0  ;;  %v2413_v18 = vmul.f32 %v7453_v8, %v9184_v60  ;;  %v2713_v8 = vrot.slane %v10949_v6, 1 }
 0x8e3   : > { %7007 = vmatpush3.bf16.msra.mxu0 %v2475_v2 }
 0x8e4   : > { %v2417_v62 = vpack.c.bf16 %v2413_v18, %v2413_v18  ;;  %7018 = vmatprep.subr.bf16.mxu0 %v10905_v22 }
 0x8e6   : > { %7003 = vmatmul.mubr.msk.bf16.vlgmr.msra.gmra.mrb[48].mxu1 %vm899_vm10, %v2417_v62  ;;  %v2716_v62 = vrot.slane %v10954_v40, 7 }
 0x8e7   : > { %7013 = vmatpush3.bf16.msra.mxu1 %v2523_v4  ;;  %7014 = vmatprep.mubr.msk.bf16.mxu1 %vm7672_vm8, %v10905_v22  ;;  %v2788_v4 = vrot.slane %v10945_v43, 3 }
 0x8e8   : > { %v7455_v11 = vpop.eup %7454  ;;  %7024 = vmatprep.subr.bf16.mxu1 %v10905_v22 }
 0x8e9   : > { %v2414_v7 = vmul.f32 %v7455_v11, %v9188_v46  ;;  %v2711_v46 = vrot.slane %v10946_v35, 2 }
 0x8eb   : > { %v2418_v60 = vpack.c.bf16 %v2414_v7, %v2414_v7  ;;  %v2712_v54 = vsel %vm853_vm1, %v2711_v46, %v2710_v27 }
 0x8ec   : > { %v2714_v2 = vsel %vm856_vm2, %v2713_v8, %v2712_v54  ;;  %v2720_v54 = vrot.slane %v10958_v44, 5  ;;  %v2722_v8 = vrot.slane %v10960_v32, 4 }
 0x8ed   : > { %7009 = vmatmul.mubr.msk.bf16.vlgmr.msra.gmra.mrb[56].mxu0 %vm899_vm10, %v2418_v60  ;;  %v2715_v15 = vsel %vm859_vm3, %v10952_v51, %v2714_v2  ;;  %v10996_v2 = vld [vmem:[#allocation41_spill] sm:$0xff] }
 0x8ee   : > { %7019 = vmatpush3.bf16.msra.mxu0 %v2571_v5  ;;  %7020 = vmatprep.mubr.msk.bf16.mxu0 %vm7672_vm8, %v10905_v22  ;;  %v2789_v5 = vrot.slane %v10947_v56, 2  ;;  %v2717_v46 = vsel %vm862_vm4, %v2716_v62, %v2715_v15  ;;  %v11002_v56 = vld [vmem:[#allocation48_spill] sm:$0xff] }
 0x8ef   : > { %7030 = vmatprep.subr.bf16.mxu0 %v10905_v22 }
 0x90f   : > { %v2405_v26 = vpop.xlane.xlu1 %2404 }
 0x910   : > { %7456 = vrcp.f32 %v2405_v26 }
 0x912   : > { %v2408_v55 = vpop.xlane.xlu0 %2407 }
 0x913   : > { %7458 = vrcp.f32 %v2408_v55  ;;  %v2741_v26 = vpop.permute.xlu1 %2740 }
 0x916   : > { %v2663_v50 = vpop.permute.xlu0 %2662 }
 0x917   : > { %v2668_v55 = vsel %vm899_vm10, %v2663_v50, 0  ;;  %v2866_v50 = vrot.slane %v10978_v9, 3 }
 0x91a   : > { %v7457_v41 = vpop.eup %7456  ;;  %v2819_v15 = vpop.permute.xlu0 %2818 }
 0x91b   : > { %v2415_v18 = vmul.f32 %v7457_v41, %v9198_v63  ;;  %v2718_v63 = vrot.slane %v10959_v39, 6  ;;  %v2791_v41 = vrot.slane %v10950_v49, 1 }
 0x91d   : > { %v7459_v11 = vpop.eup %7458  ;;  %v2419_v7 = vpack.c.bf16 %v2415_v18, %v2415_v18  ;;  %v2794_v18 = vrot.slane %v10996_v2, 7  ;;  %v2719_v62 = vsel %vm865_vm5, %v2718_v63, %v2717_v46  ;;  %v10999_v46 = vld [vmem:[#allocation47_spill] sm:$0xff]  ;;  %v2800_v2 = vrot.slane %v11000_v42, 4  ;;  %v11005_v42 = vld [vmem:[#allocation46_spill] sm:$0xff] }
 0x91e   : > { %v2416_v60 = vmul.f32 %v7459_v11, %v9201_v10  ;;  %v2790_v10 = vsel %vm853_vm1, %v2789_v5, %v2788_v4  ;;  %v2746_v11 = vsel %vm899_vm10, %v2741_v26, 0  ;;  %v2721_v26 = vsel %vm868_vm6, %v2720_v54, %v2719_v62  ;;  %v2897_v54 = vpop.permute.xlu1 %2896 }
 0x91f   : > { %7015 = vmatmul.mubr.msk.bf16.vlgmr.msra.gmra.mrb[52].mxu1 %vm899_vm10, %v2419_v7  ;;  %v2792_v4 = vsel %vm856_vm2, %v2791_v41, %v2790_v10  ;;  %v2867_v7 = vrot.slane %v10962_v17, 2  ;;  %v2723_v30 = vsel %vm871_vm7, %v2722_v8, %v2721_v26  ;;  %v2798_v10 = vrot.slane %v10999_v46, 5 }
 0x920   : > { %7025 = vmatpush3.bf16.xpose.msra.mxu1 %v2668_v55  ;;  %v2420_v27 = vpack.c.bf16 %v2416_v60, %v2416_v60  ;;  %7026 = vmatprep.mubr.msk.bf16.mxu1 %vm7672_vm8, %v10905_v22  ;;  %v10997_v60 = vld [vmem:[#allocation15_spill] sm:$0xff]  ;;  %v2872_v17 = vrot.slane %v11002_v56, 7  ;;  %v2824_v62 = vsel %vm899_vm10, %v2819_v15, 0  ;;  %v2724_v8 = vpack.c.b16 %v2723_v30, %v2723_v30  ;;  %v11006_v56 = vld [vmem:[#allocation52_spill] sm:$0xff] }
 0x921   : > { %7036 = vmatprep.subr.bf16.mxu1 %v10905_v22  ;;  %v2646_v5 = vpack.c.b16 %v10997_v60, %v10997_v60  ;;  %v10998_v55 = vld [vmem:[#allocation39_spill] sm:$0xff]  ;;  %v2868_v41 = vsel %vm853_vm1, %v2867_v7, %v2866_v50  ;;  %v11004_v7 = vld [vmem:[#allocation50_spill] sm:$0xff]  ;;  %v2902_v30 = vsel %vm899_vm10, %v2897_v54, 0 }
 0x922   : > { %7021 = vmatmul.mubr.msk.bf16.vlgmr.msra.gmra.mrb[60].mxu0 %vm899_vm10, %v2420_v27  ;;  %v2793_v27 = vsel %vm859_vm3, %v10998_v55, %v2792_v4  ;;  %v11001_v60 = vld [vmem:[#allocation43_spill] sm:$0xff]  ;;  %v11003_v4 = vld [vmem:[#allocation49_spill] sm:$0xff]  ;;  %v2876_v26 = vrot.slane %v11004_v7, 5 }
 0x923   : > { %7031 = vmatpush3.bf16.xpose.msra.mxu0 %v2746_v11  ;;  %7032 = vmatprep.mubr.msk.bf16.mxu0 %vm7672_vm8, %v10905_v22  ;;  %v2796_v11 = vrot.slane %v10953_v58, 6  ;;  %v2795_v63 = vsel %vm862_vm4, %v2794_v18, %v2793_v27  ;;  %v2869_v49 = vrot.slane %v11001_v60, 1  ;;  %v2874_v58 = vrot.slane %v11003_v4, 6 }
 0x924   : > { %7042 = vmatprep.subr.bf16.mxu0 %v10905_v22 }
 0x925   : > { %v2797_v18 = vsel %vm865_vm5, %v2796_v11, %v2795_v63  ;;  %v2870_v50 = vsel %vm856_vm2, %v2869_v49, %v2868_v41 }
 0x926   : > { %v2799_v27 = vsel %vm868_vm6, %v2798_v10, %v2797_v18  ;;  %v2871_v15 = vsel %vm859_vm3, %v11005_v42, %v2870_v50 }
 0x927   : > { %7027 = vmatmul.mubr.msk.bf16.vlgmr.msra.gmra.mrb[56].mxu1 %vm899_vm10, %v2646_v5  ;;  %v2878_v5 = vrot.slane %v11006_v56, 4  ;;  %v2873_v11 = vsel %vm862_vm4, %v2872_v17, %v2871_v15 }
 0x928   : > { %7037 = vmatpush3.bf16.xpose.msra.mxu1 %v2824_v62  ;;  %7038 = vmatprep.mubr.msk.bf16.mxu1 %vm7672_vm8, %v10905_v22  ;;  %v2801_v62 = vsel %vm871_vm7, %v2800_v2, %v2799_v27  ;;  %v2875_v49 = vsel %vm865_vm5, %v2874_v58, %v2873_v11 }
 0x929   : > { %7048 = vmatprep.subr.bf16.mxu1 %v10905_v22  ;;  %v2877_v63 = vsel %vm868_vm6, %v2876_v26, %v2875_v49  ;;  %v2802_v10 = vpack.c.b16 %v2801_v62, %v2801_v62 }
 0x92a   : > { %7033 = vmatmul.mubr.msk.bf16.vlgmr.msra.gmra.mrb[64].mxu0 %vm899_vm10, %v2724_v8  ;;  %v2879_v41 = vsel %vm871_vm7, %v2878_v5, %v2877_v63 }
 0x92b   : > { %7043 = vmatpush3.bf16.xpose.msra.mxu0 %v2902_v30  ;;  %7044 = vmatprep.mubr.msk.bf16.mxu0 %vm7672_vm8, %v10905_v22  ;;  %v2880_v54 = vpack.c.b16 %v2879_v41, %v2879_v41  ;;  %v11010_v30 = vld [vmem:[#allocation9_spill] sm:$0xff] }
 0x92c   : > { %7054 = vmatprep.subr.bf16.mxu0 %v10905_v22  ;;  %v2630_v62 = vsub.s32 3, %v11010_v30 }
 0x92f   : > { %7039 = vmatmul.mubr.msk.bf16.vlgmr.msra.gmra.mrb[60].mxu1 %vm899_vm10, %v2802_v10 }
 0x930   : > { %7050 = vmatprep.mubr.msk.bf16.mxu1 %vm7672_vm8, %v10905_v22 }
 0x932   : > { %7045 = vmatmul.mubr.msk.bf16.vlgmr.msra.gmra.mrb[68].mxu0 %vm899_vm10, %v2880_v54  ;;  %v11012_v54 = vld [vmem:[#allocation53_spill] sm:$0xff] }
 0x933   : > { %7056 = vmatprep.mubr.msk.bf16.mxu0 %vm7672_vm8, %v10905_v22 }
 0x9b9   : > { %v9358_v17 = vpop.f32.mrb[48].mxu1 }
 0x9ba   : > { %11007 = vst [vmem:[#allocation34_spill] sm:$0xff] %v9358_v17  ;;  %v7004_v58 = vpop.f32.mrb[49].mxu1 }
 0x9bb   : > { %v2466_v2 = vpop.f32.mrb[50].mxu1  ;;  %v2631_v58 = vrot.slane %v11012_v54, %v2630_v62 }
 0x9bc   : > { %v7005_v8 = vpop.f32.mrb[51].mxu1 }
 0x9c0   : > { %v9360_v18 = vpop.f32.mrb[56].mxu0 }
 0x9c1   : > { %11008 = vst [vmem:[#allocation32_spill] sm:$0xff] %v9360_v18  ;;  %v7010_v50 = vpop.f32.mrb[57].mxu0 }
 0x9c2   : > { %v2514_v26 = vpop.f32.mrb[58].mxu0 }
 0x9c3   : > { %v7011_v27 = vpop.f32.mrb[59].mxu0 }
 0x9f2   : > { %v9362_v15 = vpop.f32.mrb[52].mxu1 }
 0x9f3   : > { %11009 = vst [vmem:[#allocation11_spill] sm:$0xff] %v9362_v15  ;;  %v7016_v5 = vpop.f32.mrb[53].mxu1 }
 0x9f4   : > { %v2562_v11 = vpop.f32.mrb[54].mxu1 }
 0x9f5   : > { %v7017_v49 = vpop.f32.mrb[55].mxu1  ;;  %v9365_v63 = vpop.f32.mrb[60].mxu0 }
 0x9f6   : > { %11011 = vst [vmem:[#allocation40_spill] sm:$0xff] %v9365_v63  ;;  %v7022_v10 = vpop.f32.mrb[61].mxu0 }
 0x9f7   : > { %v2610_v41 = vpop.f32.mrb[62].mxu0 }
 0x9f8   : > { %v7023_v2 = vpop.f32.mrb[63].mxu0 }
 0x9fa   : > { %v2704_v8 = vpop.f32.mrb[56].mxu1 }
 0x9fb   : > { %v2705_v17 = vadd.f32 %v2704_v8, %v2631_v58  ;;  %v7028_v18 = vpop.f32.mrb[57].mxu1 }
 0x9fc   : > { %v2707_v50 = vpop.f32.mrb[58].mxu1 }
 0x9fd   : > { %v7029_v26 = vpop.f32.mrb[59].mxu1  ;;  %v2782_v27 = vpop.f32.mrb[64].mxu0  ;;  %v2944_v15 = vsel %vm899_vm10, %v2705_v17, -inf }
 0x9fe   : > { %v2783_v5 = vadd.f32 %v2782_v27, %v2631_v58  ;;  %v7034_v46 = vpop.f32.mrb[65].mxu0  ;;  %2945 = vmax.xlane.f32.xlu0 %v2944_v15 }
 0x9ff   : > { %v2785_v11 = vpop.f32.mrb[66].mxu0 }
 0xa00   : > { %v7035_v49 = vpop.f32.mrb[67].mxu0  ;;  %v2947_v30 = vsel %vm899_vm10, %v2783_v5, -inf }
 0xa01   : > { %2948 = vmax.xlane.f32.xlu1 %v2947_v30 }
 0xa02   : > { %v2860_v10 = vpop.f32.mrb[60].mxu1 }
 0xa03   : > { %v2861_v41 = vadd.f32 %v2860_v10, %v2631_v58  ;;  %v7040_v62 = vpop.f32.mrb[61].mxu1 }
 0xa04   : > { %v2863_v2 = vpop.f32.mrb[62].mxu1 }
 0xa05   : > { %v7041_v54 = vpop.f32.mrb[63].mxu1  ;;  %v2938_v8 = vpop.f32.mrb[68].mxu0  ;;  %v2950_v18 = vsel %vm899_vm10, %v2861_v41, -inf }
 0xa06   : > { %v2939_v50 = vadd.f32 %v2938_v8, %v2631_v58  ;;  %v7046_v26 = vpop.f32.mrb[69].mxu0  ;;  %2951 = vmax.xlane.f32.xlu0 %v2950_v18 }
 0xa07   : > { %v2941_v63 = vpop.f32.mrb[70].mxu0 }
 0xa08   : > { %v7047_v27 = vpop.f32.mrb[71].mxu0  ;;  %v2953_v46 = vsel %vm899_vm10, %v2939_v50, -inf }
 0xa0a   : > { %2954 = vmax.xlane.f32.xlu0 %v2953_v46 }
 0xa12   : > { %2992 = vrot.lane.b32.xlu1 %v9259_v20, %s7674_s24 }
 0xa8b   : > { %v2946_v15 = vpop.xlane.xlu0 %2945 }
 0xa8c   : > { %v2956_v30 = vsub.f32 %v2705_v17, %v2946_v15 }
 0xa8e   : > { %v2960_v11 = vmul.f32 1.442695, %v2956_v30  ;;  %v2949_v49 = vpop.xlane.xlu1 %2948 }
 0xa8f   : > { %v2957_v10 = vsub.f32 %v2783_v5, %v2949_v49 }
 0xa90   : > { %7460 = vpow2.f32 %v2960_v11  ;;  %v3301_v11 = vrot.slane %v8385_v34, 1 }
 0xa91   : > { %v2962_v54 = vmul.f32 1.442695, %v2957_v10 }
 0xa92   : > { %v2993_v62 = vpop.permute.xlu1 %2992 }
 0xa93   : > { %7462 = vpow2.f32 %v2962_v54  ;;  %v2998_v58 = vsel %vm1281_vm12, %v2993_v62, 0  ;;  %v2952_v5 = vpop.xlane.xlu0 %2951  ;;  %v3304_v62 = vrot.slane %v8404_v13, 7 }
 0xa94   : > { %7049 = vmatpush3.bf16.msra.mxu1 %v2998_v58  ;;  %v2958_v26 = vsub.f32 %v2861_v41, %v2952_v5  ;;  %v3296_v41 = vrot.slane %v8396_v29, 4  ;;  %v3453_v58 = vrot.slane %v8416_v28, 3  ;;  %v3455_v5 = vrot.slane %v8420_v21, 2 }
 0xa95   : > { %7060 = vmatprep.subr.bf16.mxu1 %v10905_v22 }
 0xa96   : > { %v2964_v46 = vmul.f32 1.442695, %v2958_v26 }
 0xa97   : > { %v2955_v8 = vpop.xlane.xlu0 %2954 }
 0xa98   : > { %v2959_v18 = vsub.f32 %v2939_v50, %v2955_v8  ;;  %v3299_v50 = vrot.slane %v8381_v14, 2  ;;  %v3452_v8 = vrot.slane %v8451_v36, 4 }
 0xa9a   : > { %v9376_v63 = vpop.eup %7460  ;;  %v2966_v27 = vmul.f32 1.442695, %v2959_v18  ;;  %v3457_v18 = vrot.slane %v8431_v24, 1 }
 0xa9b   : > { %v2968_v2 = vsel %vm899_vm10, %v9376_v63, 0.0 }
 0xa9c   : > { %2969 = vadd.xlane.f32.xlu1 %v2968_v2  ;;  %7464 = vpow2.f32 %v2966_v27  ;;  %v3454_v27 = vsel %vm853_vm1, %v3453_v58, %v3452_v8 }
 0xa9d   : > { %v9380_v20 = vpop.eup %7462  ;;  %7466 = vpow2.f32 %v2964_v46  ;;  %v3460_v46 = vrot.slane %v8441_v45, 7 }
 0xa9e   : > { %v2971_v17 = vsel %vm899_vm10, %v9380_v20, 0.0 }
 0xa9f   : > { %2972 = vadd.xlane.f32.xlu0 %v2971_v17  ;;  %v3306_v17 = vrot.slane %v8426_v57, 6 }
 0xaa6   : > { %v9390_v15 = vpop.eup %7464 }
 0xaa7   : > { %v9392_v30 = vpop.eup %7466 }
 0xaad   : > { %3088 = vrot.lane.b32.xlu1 %v9265_v53, %s7674_s24  ;;  %v2977_v53 = vsel %vm899_vm10, %v9390_v15, 0.0 }
 0xab1   : > { %3136 = vrot.lane.b32.xlu1 %v9248_v1, %s7674_s24  ;;  %v3297_v1 = vrot.slane %v8377_v59, 3 }
 0xab3   : > { %v3298_v49 = vsel %vm853_vm1, %v3297_v1, %v3296_v41  ;;  %v3377_v41 = vrot.slane %v8383_v48, 2 }
 0xab4   : > { %v3300_v10 = vsel %vm856_vm2, %v3299_v50, %v3298_v49  ;;  %v3462_v50 = vrot.slane %v8467_v3, 6 }
 0xab5   : > { %3040 = vrot.lane.b32.xlu0 %v9238_v61, %s7674_s24  ;;  %v2974_v61 = vsel %vm899_vm10, %v9392_v30, 0.0  ;;  %v3302_v54 = vsel %vm859_vm3, %v3301_v11, %v3300_v10  ;;  %v3308_v11 = vrot.slane %v8422_v19, 5  ;;  %v3374_v10 = vrot.slane %v8400_v52, 4 }
 0xab6   : > { %v3303_v2 = vsel %vm862_vm4, %v8389_v25, %v3302_v54  ;;  %v3379_v54 = vrot.slane %v8387_v16, 1 }
 0xab7   : > { %v3305_v26 = vsel %vm865_vm5, %v3304_v62, %v3303_v2 }
 0xab8   : > { %v3307_v1 = vsel %vm868_vm6, %v3306_v17, %v3305_v26  ;;  %v3464_v26 = vrot.slane %v8462_v33, 5 }
 0xab9   : > { %v3309_v58 = vsel %vm871_vm7, %v3308_v11, %v3307_v1  ;;  %v3384_v1 = vrot.slane %v10941_v0, 6  ;;  %v11013_v11 = vld [vmem:[#allocation16_spill] sm:$0xff] }
 0xad4   : > { %2978 = vadd.xlane.f32.xlu0 %v2977_v53  ;;  %v3375_v53 = vrot.slane %v10940_v31, 3 }
 0xad5   : > { %2975 = vadd.xlane.f32.xlu1 %v2974_v61  ;;  %v3456_v61 = vsel %vm856_vm2, %v3455_v5, %v3454_v27  ;;  %v3382_v27 = vrot.slane %v10942_v23, 7 }
 0xad6   : > { %v3458_v49 = vsel %vm859_vm3, %v3457_v18, %v3456_v61  ;;  %v3376_v17 = vsel %vm853_vm1, %v3375_v53, %v3374_v10  ;;  %v9435_v61 = vpack.c.b16 %v3309_v58, %v3309_v58  ;;  %v3386_v53 = vrot.slane %v10943_v12, 5 }
 0xad7   : > { %v3459_v62 = vsel %vm862_vm4, %v8436_v38, %v3458_v49  ;;  %v3378_v8 = vsel %vm856_vm2, %v3377_v41, %v3376_v17  ;;  %v9449_v10 = vpack.c.b16 %v11013_v11, %v11013_v11 }
 0xad8   : > { %v3461_v2 = vsel %vm865_vm5, %v3460_v46, %v3459_v62  ;;  %v3380_v18 = vsel %vm859_vm3, %v3379_v54, %v3378_v8 }
 0xad9   : > { %v3463_v5 = vsel %vm868_vm6, %v3462_v50, %v3461_v2  ;;  %v3381_v49 = vsel %vm862_vm4, %v10939_v37, %v3380_v18 }
 0xada   : > { %v3465_v46 = vsel %vm871_vm7, %v3464_v26, %v3463_v5  ;;  %v3383_v50 = vsel %vm865_vm5, %v3382_v27, %v3381_v49 }
 0xadb   : > { %v9445_v41 = vpack.c.b16 %v3465_v46, %v3465_v46  ;;  %v3385_v54 = vsel %vm868_vm6, %v3384_v1, %v3383_v50 }
 0xadc   : > { %v3387_v62 = vsel %vm871_vm7, %v3386_v53, %v3385_v54 }
 0xadd   : > { %v9457_v58 = vpack.c.b16 %v3387_v62, %v3387_v62  ;;  %v3281_v62 = vrot.slane %v8527_v47, 4 }
 0xae6   : > { %3311 = vrot.lane.b32.xlu1 %v9435_v61, %s7673_s18 }
 0xaea   : > { %3467 = vrot.lane.b32.xlu1 %v9445_v41, %s7673_s18  ;;  %3233 = vrot.lane.b32.xlu0 %v9449_v10, %s7673_s18 }
 0xaee   : > { %3389 = vrot.lane.b32.xlu0 %v9457_v58, %s7673_s18 }
 0xb29   : > { %v2970_v2 = vpop.xlane.xlu1 %2969 }
 0xb2a   : > { %7468 = vrcp.f32 %v2970_v2  ;;  %v3282_v2 = vrot.slane %v10946_v35, 3 }
 0xb2c   : > { %v2973_v17 = vpop.xlane.xlu0 %2972 }
 0xb2d   : > { %7470 = vrcp.f32 %v2973_v17  ;;  %v3089_v26 = vpop.permute.xlu1 %3088  ;;  %v3283_v17 = vsel %vm853_vm1, %v3282_v2, %v3281_v62  ;;  %v3359_v62 = vrot.slane %v10945_v43, 4 }
 0xb2e   : > { %v3094_v53 = vsel %vm1281_vm12, %v3089_v26, 0  ;;  %v3286_v26 = vrot.slane %v10952_v51, 1 }
 0xb30   : > { %v3041_v5 = vpop.permute.xlu0 %3040 }
 0xb31   : > { %v3046_v8 = vsel %vm1281_vm12, %v3041_v5, 0  ;;  %v3137_v50 = vpop.permute.xlu1 %3136  ;;  %v3284_v5 = vrot.slane %v10949_v6, 2 }
 0xb32   : > { %7055 = vmatpush3.bf16.msra.mxu0 %v3046_v8  ;;  %v3142_v54 = vsel %vm1281_vm12, %v3137_v50, 0  ;;  %v3437_v50 = vrot.slane %v10978_v9, 4 }
 0xb33   : > { %7066 = vmatprep.subr.bf16.mxu0 %v10905_v22  ;;  %v3285_v8 = vsel %vm856_vm2, %v3284_v5, %v3283_v17  ;;  %v3289_v17 = vrot.slane %v10959_v39, 7  ;;  %v3293_v5 = vrot.slane %v10960_v32, 5 }
 0xb34   : > { %v7469_v18 = vpop.eup %7468 }
 0xb35   : > { %v2984_v27 = vmul.f32 %v7469_v18, %v9376_v63 }
 0xb37   : > { %v7471_v49 = vpop.eup %7470  ;;  %v2988_v1 = vpack.c.bf16 %v2984_v27, %v2984_v27  ;;  %v3287_v27 = vsel %vm859_vm3, %v3286_v26, %v3285_v8  ;;  %v11015_v26 = vld [vmem:[#allocation33_spill] sm:$0xff] }
 0xb38   : > { %v2985_v46 = vmul.f32 %v7471_v49, %v9380_v20 }
 0xb39   : > { %7051 = vmatmul.mubr.msk.bf16.vlgmr.msra.gmra.mrb[64].mxu1 %vm899_vm10, %v2988_v1 }
 0xb3a   : > { %7061 = vmatpush3.bf16.msra.mxu1 %v3094_v53  ;;  %v2989_v11 = vpack.c.bf16 %v2985_v46, %v2985_v46  ;;  %7062 = vmatprep.mubr.msk.bf16.mxu1 %vm7672_vm8, %v10905_v22 }
 0xb3b   : > { %7072 = vmatprep.subr.bf16.mxu1 %v10905_v22 }
 0xb3c   : > { %7057 = vmatmul.mubr.msk.bf16.vlgmr.msra.gmra.mrb[72].mxu0 %vm899_vm10, %v2989_v11 }
 0xb3d   : > { %7067 = vmatpush3.bf16.msra.mxu0 %v3142_v54  ;;  %7068 = vmatprep.mubr.msk.bf16.mxu0 %vm7672_vm8, %v10905_v22 }
 0xb3e   : > { %7078 = vmatprep.subr.bf16.mxu0 %v10905_v22 }
 0xb61   : > { %v2979_v63 = vpop.xlane.xlu0 %2978 }
 0xb62   : > { %7472 = vrcp.f32 %v2979_v63  ;;  %v2976_v20 = vpop.xlane.xlu1 %2975  ;;  %v3288_v63 = vsel %vm862_vm4, %v10954_v40, %v3287_v27 }
 0xb63   : > { %7474 = vrcp.f32 %v2976_v20  ;;  %v3291_v20 = vrot.slane %v10958_v44, 6  ;;  %v3290_v27 = vsel %vm865_vm5, %v3289_v17, %v3288_v63  ;;  %v11016_v63 = vld [vmem:[#allocation36_spill] sm:$0xff] }
 0xb65   : > { %v3234_v11 = vpop.permute.xlu0 %3233 }
 0xb66   : > { %v3312_v53 = vpop.permute.xlu1 %3311 }
 0xb6c   : > { %v7473_v18 = vpop.eup %7472 }
 0xb6d   : > { %v7475_v49 = vpop.eup %7474  ;;  %v2987_v1 = vmul.f32 %v7473_v18, %v9390_v15  ;;  %v11014_v15 = vld [vmem:[#allocation38_spill] sm:$0xff]  ;;  %v3360_v18 = vrot.slane %v11015_v26, 3 }
 0xb6e   : > { %v2986_v46 = vmul.f32 %v7475_v49, %v9392_v30  ;;  %v3438_v8 = vrot.slane %v11014_v15, 3  ;;  %v3317_v30 = vsel %vm899_vm10, %v3312_v53, 0  ;;  %v3239_v49 = vsel %vm899_vm10, %v3234_v11, 0 }
 0xb6f   : > { %v2991_v54 = vpack.c.bf16 %v2987_v1, %v2987_v1  ;;  %v3292_v53 = vsel %vm868_vm6, %v3291_v20, %v3290_v27  ;;  %v3361_v26 = vsel %vm853_vm1, %v3360_v18, %v3359_v62  ;;  %v3364_v11 = vrot.slane %v10998_v55, 1  ;;  %v3468_v20 = vpop.permute.xlu1 %3467  ;;  %v3390_v18 = vpop.permute.xlu0 %3389 }
 0xb70   : > { %v2990_v2 = vpack.c.bf16 %v2986_v46, %v2986_v46  ;;  %v3439_v1 = vsel %vm853_vm1, %v3438_v8, %v3437_v50  ;;  %v3442_v46 = vrot.slane %v11005_v42, 1  ;;  %v3294_v50 = vsel %vm871_vm7, %v3293_v5, %v3292_v53  ;;  %v11017_v5 = vld [vmem:[#allocation45_spill] sm:$0xff] }
 0xb71   : > { %7069 = vmatmul.mubr.msk.bf16.vlgmr.msra.gmra.mrb[76].mxu0 %vm899_vm10, %v2991_v54  ;;  %v3440_v54 = vrot.slane %v11001_v60, 2  ;;  %v3445_v62 = vrot.slane %v11003_v4, 7  ;;  %v3447_v27 = vrot.slane %v11004_v7, 6  ;;  %v3367_v53 = vrot.slane %v11017_v5, 7 }
 0xb72   : > { %7079 = vmatpush3.bf16.xpose.msra.mxu0 %v3317_v30  ;;  %7063 = vmatmul.mubr.msk.bf16.vlgmr.msra.gmra.mrb[68].mxu1 %vm899_vm10, %v2990_v2  ;;  %v3362_v2 = vrot.slane %v11016_v63, 2  ;;  %v11018_v63 = vld [vmem:[#allocation17_spill] sm:$0xff] }
 0xb73   : > { %7073 = vmatpush3.bf16.xpose.msra.mxu1 %v3239_v49  ;;  %7080 = vmatprep.mubr.msk.bf16.mxu0 %vm7672_vm8, %v10905_v22  ;;  %v3441_v17 = vsel %vm856_vm2, %v3440_v54, %v3439_v1  ;;  %v3295_v49 = vpack.c.b16 %v3294_v50, %v3294_v50  ;;  %v3217_v43 = vpack.c.b16 %v11018_v63, %v11018_v63  ;;  %v3449_v1 = vrot.slane %v11006_v56, 5  ;;  %v11019_v54 = vld [vmem:[#allocation47_spill] sm:$0xff] }
 0xb74   : > { %7090 = vmatprep.subr.bf16.mxu0 %v10905_v22  ;;  %7074 = vmatprep.mubr.msk.bf16.mxu1 %vm7672_vm8, %v10905_v22  ;;  %v3443_v8 = vsel %vm859_vm3, %v3442_v46, %v3441_v17  ;;  %v3363_v30 = vsel %vm856_vm2, %v3362_v2, %v3361_v26  ;;  %v3369_v60 = vrot.slane %v11019_v54, 6  ;;  %v3473_v46 = vsel %vm899_vm10, %v3468_v20, 0  ;;  %v11020_v26 = vld [vmem:[#allocation48_spill] sm:$0xff]  ;;  %v11021_v2 = vld [vmem:[#allocation51_spill] sm:$0xff] }
 0xb75   : > { %7084 = vmatprep.subr.bf16.mxu1 %v10905_v22  ;;  %v3365_v55 = vsel %vm859_vm3, %v3364_v11, %v3363_v30  ;;  %v3444_v50 = vsel %vm862_vm4, %v11020_v26, %v3443_v8  ;;  %v3371_v17 = vrot.slane %v11021_v2, 5  ;;  %v3395_v11 = vsel %vm899_vm10, %v3390_v18, 0  ;;  %v11022_v30 = vld [vmem:[#allocation41_spill] sm:$0xff] }
 0xb76   : > { %v3446_v63 = vsel %vm865_vm5, %v3445_v62, %v3444_v50  ;;  %v3366_v5 = vsel %vm862_vm4, %v11022_v30, %v3365_v55 }
 0xb77   : > { %v3448_v20 = vsel %vm868_vm6, %v3447_v27, %v3446_v63  ;;  %v3368_v8 = vsel %vm865_vm5, %v3367_v53, %v3366_v5 }
 0xb78   : > { %v3450_v18 = vsel %vm871_vm7, %v3449_v1, %v3448_v20 }
 0xb79   : > { %7081 = vmatmul.mubr.msk.bf16.vlgmr.msra.gmra.mrb[80].mxu0 %vm899_vm10, %v3295_v49  ;;  %v3451_v55 = vpack.c.b16 %v3450_v18, %v3450_v18 }
 0xb7a   : > { %7091 = vmatpush3.bf16.xpose.msra.mxu0 %v3473_v46  ;;  %7075 = vmatmul.mubr.msk.bf16.vlgmr.msra.gmra.mrb[72].mxu1 %vm899_vm10, %v3217_v43  ;;  %v3370_v43 = vsel %vm868_vm6, %v3369_v60, %v3368_v8 }
 0xb7b   : > { %7085 = vmatpush3.bf16.xpose.msra.mxu1 %v3395_v11  ;;  %7092 = vmatprep.mubr.msk.bf16.mxu0 %vm7672_vm8, %v10905_v22  ;;  %v3372_v62 = vsel %vm871_vm7, %v3371_v17, %v3370_v43 }
 0xb7c   : > { %7086 = vmatprep.mubr.msk.bf16.mxu1 %vm7672_vm8, %v10905_v22  ;;  %7096 = vmatprep.subr.bf16.mxu1 %v10905_v22  ;;  %v3373_v49 = vpack.c.b16 %v3372_v62, %v3372_v62 }
 0xb7d   : > { %7102 = vmatprep.subr.bf16.mxu0 %v10905_v22 }
 0xb81   : > { %7093 = vmatmul.mubr.msk.bf16.vlgmr.msra.gmra.mrb[84].mxu0 %vm899_vm10, %v3451_v55  ;;  %v11029_v55 = vld [vmem:[#allocation9_spill] sm:$0xff] }
 0xb82   : > { %7087 = vmatmul.mubr.msk.bf16.vlgmr.msra.gmra.mrb[76].mxu1 %vm899_vm10, %v3373_v49  ;;  %7104 = vmatprep.mubr.msk.bf16.mxu0 %vm7672_vm8, %v10905_v22  ;;  %v3201_v49 = vsub.s32 4, %v11029_v55 }
 0xb83   : > { %7098 = vmatprep.mubr.msk.bf16.mxu1 %vm7672_vm8, %v10905_v22 }
 0xc0c   : > { %v9550_v27 = vpop.f32.mrb[64].mxu1 }
 0xc0d   : > { %11023 = vst [vmem:[#allocation35_spill] sm:$0xff] %v9550_v27  ;;  %v7052_v60 = vpop.f32.mrb[65].mxu1 }
 0xc0e   : > { %v3037_v5 = vpop.f32.mrb[66].mxu1 }
 0xc0f   : > { %v7053_v53 = vpop.f32.mrb[67].mxu1  ;;  %v9552_v1 = vpop.f32.mrb[72].mxu0 }
 0xc10   : > { %11024 = vst [vmem:[#allocation42_spill] sm:$0xff] %v9552_v1  ;;  %v7058_v17 = vpop.f32.mrb[73].mxu0 }
 0xc11   : > { %v3085_v11 = vpop.f32.mrb[74].mxu0 }
 0xc12   : > { %v7059_v63 = vpop.f32.mrb[75].mxu0  ;;  %v11031_v11 = vld [vmem:[#allocation53_spill] sm:$0xff] }
 0xc13   : > { %v3202_v63 = vrot.slane %v11031_v11, %v3201_v49 }
 0xc44   : > { %v9556_v20 = vpop.f32.mrb[76].mxu0 }
 0xc45   : > { %11026 = vst [vmem:[#allocation12_spill] sm:$0xff] %v9556_v20  ;;  %v9560_v43 = vpop.f32.mrb[68].mxu1  ;;  %v7070_v62 = vpop.f32.mrb[77].mxu0 }
 0xc46   : > { %11028 = vst [vmem:[#allocation13_spill] sm:$0xff] %v9560_v43  ;;  %v7064_v53 = vpop.f32.mrb[69].mxu1  ;;  %v3181_v27 = vpop.f32.mrb[78].mxu0  ;;  %v3879_v43 = vrot.slane %v8422_v19, 6 }
 0xc47   : > { %v3133_v2 = vpop.f32.mrb[70].mxu1  ;;  %v7071_v50 = vpop.f32.mrb[79].mxu0 }
 0xc48   : > { %v7065_v17 = vpop.f32.mrb[71].mxu1 }
 0xc4c   : > { %v3353_v46 = vpop.f32.mrb[80].mxu0 }
 0xc4d   : > { %v3354_v1 = vadd.f32 %v3353_v46, %v3202_v63  ;;  %v3275_v54 = vpop.f32.mrb[72].mxu1  ;;  %v7082_v4 = vpop.f32.mrb[81].mxu0 }
 0xc4e   : > { %v3276_v18 = vadd.f32 %v3275_v54, %v3202_v63  ;;  %v7076_v8 = vpop.f32.mrb[73].mxu1  ;;  %v3356_v20 = vpop.f32.mrb[82].mxu0 }
 0xc4f   : > { %v3278_v62 = vpop.f32.mrb[74].mxu1  ;;  %v7083_v30 = vpop.f32.mrb[83].mxu0  ;;  %v3518_v55 = vsel %vm899_vm10, %v3354_v1, -inf }
 0xc50   : > { %3519 = vmax.xlane.f32.xlu1 %v3518_v55  ;;  %v7077_v5 = vpop.f32.mrb[75].mxu1  ;;  %v3515_v27 = vsel %vm899_vm10, %v3276_v18, -inf }
 0xc51   : > { %3516 = vmax.xlane.f32.xlu0 %v3515_v27 }
 0xc54   : > { %v3509_v2 = vpop.f32.mrb[84].mxu0 }
 0xc55   : > { %v3431_v50 = vpop.f32.mrb[76].mxu1  ;;  %v7094_v53 = vpop.f32.mrb[85].mxu0  ;;  %v3510_v54 = vadd.f32 %v3509_v2, %v3202_v63 }
 0xc56   : > { %v3432_v49 = vadd.f32 %v3431_v50, %v3202_v63  ;;  %v7088_v17 = vpop.f32.mrb[77].mxu1  ;;  %v3512_v46 = vpop.f32.mrb[86].mxu0 }
 0xc57   : > { %v3434_v60 = vpop.f32.mrb[78].mxu1  ;;  %v7095_v4 = vpop.f32.mrb[87].mxu0  ;;  %v3524_v30 = vsel %vm899_vm10, %v3510_v54, -inf }
 0xc58   : > { %v7089_v8 = vpop.f32.mrb[79].mxu1  ;;  %v3521_v20 = vsel %vm899_vm10, %v3432_v49, -inf }
 0xc59   : > { %3522 = vmax.xlane.f32.xlu0 %v3521_v20 }
 0xc5d   : > { %3525 = vmax.xlane.f32.xlu0 %v3524_v30 }
 0xc61   : > { %3563 = vrot.lane.b32.xlu1 %v9449_v10, %s7674_s24 }
 0xcdd   : > { %v3520_v55 = vpop.xlane.xlu1 %3519 }
 0xcde   : > { %v3528_v5 = vsub.f32 %v3354_v1, %v3520_v55  ;;  %v3517_v62 = vpop.xlane.xlu0 %3516 }
 0xcdf   : > { %v3527_v27 = vsub.f32 %v3276_v18, %v3517_v62  ;;  %v3872_v62 = vrot.slane %v8385_v34, 2 }
 0xce0   : > { %v3533_v50 = vmul.f32 1.442695, %v3528_v5 }
 0xce1   : > { %v3531_v53 = vmul.f32 1.442695, %v3527_v27  ;;  %v3564_v17 = vpop.permute.xlu1 %3563  ;;  %v3874_v27 = vrot.slane %v8389_v25, 1 }
 0xce2   : > { %7476 = vpow2.f32 %v3533_v50  ;;  %v3569_v60 = vsel %vm1281_vm12, %v3564_v17, 0 }
 0xce3   : > { %7478 = vpow2.f32 %v3531_v53  ;;  %7097 = vmatpush3.bf16.msra.mxu1 %v3569_v60  ;;  %v4024_v53 = vrot.slane %v8416_v28, 4  ;;  %v4026_v60 = vrot.slane %v8420_v21, 3 }
 0xce4   : > { %7108 = vmatprep.subr.bf16.mxu1 %v10905_v22 }
 0xce6   : > { %v3523_v18 = vpop.xlane.xlu0 %3522 }
 0xce7   : > { %v3529_v20 = vsub.f32 %v3432_v49, %v3523_v18  ;;  %v3867_v49 = vrot.slane %v8396_v29, 5  ;;  %v4028_v18 = vrot.slane %v8431_v24, 2 }
 0xce9   : > { %v3535_v30 = vmul.f32 1.442695, %v3529_v20  ;;  %v4030_v20 = vrot.slane %v8436_v38, 1 }
 0xcea   : > { %v3526_v46 = vpop.xlane.xlu0 %3525 }
 0xceb   : > { %v3530_v4 = vsub.f32 %v3510_v54, %v3526_v46  ;;  %v3870_v54 = vrot.slane %v8381_v14, 3  ;;  %v3946_v46 = vrot.slane %v10940_v31, 4 }
 0xcec   : > { %v9574_v63 = vpop.eup %7476 }
 0xced   : > { %v9576_v2 = vpop.eup %7478  ;;  %v3542_v10 = vsel %vm899_vm10, %v9574_v63, 0.0  ;;  %v3537_v8 = vmul.f32 1.442695, %v3530_v4 }
 0xcee   : > { %3543 = vadd.xlane.f32.xlu0 %v3542_v10  ;;  %v3539_v1 = vsel %vm899_vm10, %v9576_v2, 0.0 }
 0xcef   : > { %3540 = vadd.xlane.f32.xlu1 %v3539_v1  ;;  %7480 = vpow2.f32 %v3537_v8  ;;  %v4023_v1 = vrot.slane %v8451_v36, 5  ;;  %v3877_v8 = vrot.slane %v8426_v57, 7 }
 0xcf0   : > { %7482 = vpow2.f32 %v3535_v30  ;;  %v3948_v30 = vrot.slane %v8383_v48, 3 }
 0xcf9   : > { %v9588_v55 = vpop.eup %7480 }
 0xcfa   : > { %v3548_v5 = vsel %vm899_vm10, %v9588_v55, 0.0 }
 0xd00   : > { %3659 = vrot.lane.b32.xlu1 %v9457_v58, %s7674_s24  ;;  %v9592_v58 = vpop.eup %7482 }
 0xd04   : > { %3707 = vrot.lane.b32.xlu1 %v9445_v41, %s7674_s24  ;;  %3611 = vrot.lane.b32.xlu0 %v9435_v61, %s7674_s24  ;;  %v3868_v41 = vrot.slane %v8377_v59, 4  ;;  %v3545_v61 = vsel %vm899_vm10, %v9592_v58, 0.0 }
 0xd06   : > { %v3869_v50 = vsel %vm853_vm1, %v3868_v41, %v3867_v49  ;;  %v3945_v41 = vrot.slane %v8400_v52, 5  ;;  %v3952_v49 = vrot.slane %v10939_v37, 1 }
 0xd07   : > { %v3871_v17 = vsel %vm856_vm2, %v3870_v54, %v3869_v50 }
 0xd08   : > { %v3873_v10 = vsel %vm859_vm3, %v3872_v62, %v3871_v17  ;;  %v3947_v50 = vsel %vm853_vm1, %v3946_v46, %v3945_v41  ;;  %v4035_v41 = vrot.slane %v8462_v33, 6 }
 0xd09   : > { %v3875_v4 = vsel %vm862_vm4, %v3874_v27, %v3873_v10 }
 0xd0a   : > { %v3876_v62 = vsel %vm865_vm5, %v8404_v13, %v3875_v4  ;;  %v3955_v4 = vrot.slane %v10941_v0, 7 }
 0xd0b   : > { %v3878_v17 = vsel %vm868_vm6, %v3877_v8, %v3876_v62  ;;  %v3957_v8 = vrot.slane %v10943_v12, 6 }
 0xd23   : > { %3549 = vadd.xlane.f32.xlu0 %v3548_v5  ;;  %v4025_v5 = vsel %vm853_vm1, %v4024_v53, %v4023_v1  ;;  %v4033_v53 = vrot.slane %v8467_v3, 7  ;;  %v3949_v1 = vsel %vm856_vm2, %v3948_v30, %v3947_v50 }
 0xd24   : > { %v4027_v54 = vsel %vm856_vm2, %v4026_v60, %v4025_v5 }
 0xd25   : > { %v4029_v27 = vsel %vm859_vm3, %v4028_v18, %v4027_v54  ;;  %v3880_v18 = vsel %vm871_vm7, %v3879_v43, %v3878_v17 }
 0xd26   : > { %v4031_v10 = vsel %vm862_vm4, %v4030_v20, %v4029_v27  ;;  %v9638_v54 = vpack.c.b16 %v3880_v18, %v3880_v18 }
 0xd27   : > { %v4032_v46 = vsel %vm865_vm5, %v8441_v45, %v4031_v10 }
 0xd28   : > { %3546 = vadd.xlane.f32.xlu1 %v3545_v61  ;;  %v3950_v61 = vrot.slane %v8387_v16, 2  ;;  %v4034_v20 = vsel %vm868_vm6, %v4033_v53, %v4032_v46 }
 0xd29   : > { %v4036_v62 = vsel %vm871_vm7, %v4035_v41, %v4034_v20 }
 0xd2a   : > { %v3951_v60 = vsel %vm859_vm3, %v3950_v61, %v3949_v1  ;;  %v11032_v61 = vld [vmem:[#allocation18_spill] sm:$0xff]  ;;  %v9651_v50 = vpack.c.b16 %v4036_v62, %v4036_v62  ;;  %v3853_v62 = vrot.slane %v10946_v35, 4 }
 0xd2b   : > { %v3953_v5 = vsel %vm862_vm4, %v3952_v49, %v3951_v60  ;;  %v9642_v49 = vpack.c.b16 %v11032_v61, %v11032_v61 }
 0xd2c   : > { %v3954_v30 = vsel %vm865_vm5, %v10942_v23, %v3953_v5 }
 0xd2d   : > { %v3956_v43 = vsel %vm868_vm6, %v3955_v4, %v3954_v30 }
 0xd2e   : > { %v3958_v27 = vsel %vm871_vm7, %v3957_v8, %v3956_v43 }
 0xd2f   : > { %v9653_v17 = vpack.c.b16 %v3958_v27, %v3958_v27 }
 0xd39   : > { %3882 = vrot.lane.b32.xlu1 %v9638_v54, %s7673_s18  ;;  %3804 = vrot.lane.b32.xlu0 %v9642_v49, %s7673_s18 }
 0xd3d   : > { %4038 = vrot.lane.b32.xlu1 %v9651_v50, %s7673_s18  ;;  %3960 = vrot.lane.b32.xlu0 %v9653_v17, %s7673_s18 }
 0xd7b   : > { %v3544_v10 = vpop.xlane.xlu0 %3543 }
 0xd7c   : > { %7484 = vrcp.f32 %v3544_v10  ;;  %v3541_v53 = vpop.xlane.xlu1 %3540 }
 0xd7d   : > { %7486 = vrcp.f32 %v3541_v53  ;;  %v3855_v53 = vrot.slane %v10949_v6, 3 }
 0xd7f   : > { %v3612_v1 = vpop.permute.xlu0 %3611 }
 0xd80   : > { %v3617_v60 = vsel %vm1281_vm12, %v3612_v1, 0  ;;  %v3660_v5 = vpop.permute.xlu1 %3659 }
 0xd81   : > { %7103 = vmatpush3.bf16.msra.mxu0 %v3617_v60  ;;  %v3665_v43 = vsel %vm1281_vm12, %v3660_v5, 0  ;;  %v3857_v60 = vrot.slane %v10952_v51, 2  ;;  %v3859_v5 = vrot.slane %v10954_v40, 1 }
 0xd82   : > { %7114 = vmatprep.subr.bf16.mxu0 %v10905_v22 }
 0xd84   : > { %v3708_v20 = vpop.permute.xlu1 %3707 }
 0xd85   : > { %v3713_v61 = vsel %vm1281_vm12, %v3708_v20, 0  ;;  %v4008_v20 = vrot.slane %v10978_v9, 5 }
 0xd86   : > { %v7485_v4 = vpop.eup %7484 }
 0xd87   : > { %v7487_v18 = vpop.eup %7486  ;;  %v3556_v46 = vmul.f32 %v7485_v4, %v9574_v63 }
 0xd88   : > { %v3555_v8 = vmul.f32 %v7487_v18, %v9576_v2  ;;  %v3852_v2 = vrot.slane %v8527_v47, 5 }
 0xd89   : > { %v3560_v41 = vpack.c.bf16 %v3556_v46, %v3556_v46 }
 0xd8a   : > { %v3559_v30 = vpack.c.bf16 %v3555_v8, %v3555_v8  ;;  %v3854_v10 = vsel %vm853_vm1, %v3853_v62, %v3852_v2 }
 0xd8b   : > { %7105 = vmatmul.mubr.msk.bf16.vlgmr.msra.gmra.mrb[88].mxu0 %vm899_vm10, %v3560_v41  ;;  %v3856_v1 = vsel %vm856_vm2, %v3855_v53, %v3854_v10  ;;  %v4013_v53 = vrot.slane %v11005_v42, 2 }
 0xd8c   : > { %7115 = vmatpush3.bf16.msra.mxu0 %v3713_v61  ;;  %7099 = vmatmul.mubr.msk.bf16.vlgmr.msra.gmra.mrb[80].mxu1 %vm899_vm10, %v3559_v30  ;;  %v3858_v18 = vsel %vm859_vm3, %v3857_v60, %v3856_v1  ;;  %v3862_v61 = vrot.slane %v10958_v44, 7 }
 0xd8d   : > { %7109 = vmatpush3.bf16.msra.mxu1 %v3665_v43  ;;  %7116 = vmatprep.mubr.msk.bf16.mxu0 %vm7672_vm8, %v10905_v22  ;;  %v3860_v30 = vsel %vm862_vm4, %v3859_v5, %v3858_v18  ;;  %v3864_v43 = vrot.slane %v10960_v32, 6  ;;  %v11033_v5 = vld [vmem:[#allocation43_spill] sm:$0xff]  ;;  %v11034_v18 = vld [vmem:[#allocation37_spill] sm:$0xff] }
 0xd8e   : > { %7126 = vmatprep.subr.bf16.mxu0 %v10905_v22  ;;  %7110 = vmatprep.mubr.msk.bf16.mxu1 %vm7672_vm8, %v10905_v22 }
 0xd8f   : > { %7120 = vmatprep.subr.bf16.mxu1 %v10905_v22 }
 0xdb0   : > { %v3550_v63 = vpop.xlane.xlu0 %3549 }
 0xdb1   : > { %7488 = vrcp.f32 %v3550_v63  ;;  %v4009_v63 = vrot.slane %v11014_v15, 4 }
 0xdb3   : > { %v4010_v10 = vsel %vm853_vm1, %v4009_v63, %v4008_v20 }
 0xdb4   : > { %v3805_v1 = vpop.permute.xlu0 %3804 }
 0xdb5   : > { %v3547_v27 = vpop.xlane.xlu1 %3546  ;;  %v3810_v63 = vsel %vm899_vm10, %v3805_v1, 0  ;;  %v4020_v1 = vrot.slane %v11006_v56, 6 }
 0xdb6   : > { %7490 = vrcp.f32 %v3547_v27 }
 0xdb9   : > { %v3883_v8 = vpop.permute.xlu1 %3882 }
 0xdba   : > { %v3888_v62 = vsel %vm899_vm10, %v3883_v8, 0 }
 0xdbb   : > { %v7489_v4 = vpop.eup %7488 }
 0xdbc   : > { %v3558_v46 = vmul.f32 %v7489_v4, %v9588_v55  ;;  %v3861_v55 = vsel %vm865_vm5, %v10959_v39, %v3860_v30  ;;  %v4011_v4 = vrot.slane %v11033_v5, 3 }
 0xdbd   : > { %v3863_v60 = vsel %vm868_vm6, %v3862_v61, %v3861_v55  ;;  %v4018_v55 = vrot.slane %v11004_v7, 7 }
 0xdbe   : > { %v3562_v41 = vpack.c.bf16 %v3558_v46, %v3558_v46  ;;  %v3930_v46 = vrot.slane %v11034_v18, 5  ;;  %v4012_v30 = vsel %vm856_vm2, %v4011_v4, %v4010_v10  ;;  %v11036_v10 = vld [vmem:[#allocation39_spill] sm:$0xff]  ;;  %v11037_v4 = vld [vmem:[#allocation36_spill] sm:$0xff] }
 0xdbf   : > { %v4014_v61 = vsel %vm859_vm3, %v4013_v53, %v4012_v30  ;;  %v11038_v53 = vld [vmem:[#allocation41_spill] sm:$0xff] }
 0xdc0   : > { %v7491_v2 = vpop.eup %7490  ;;  %7117 = vmatmul.mubr.msk.bf16.vlgmr.msra.gmra.mrb[92].mxu0 %vm899_vm10, %v3562_v41  ;;  %v3865_v41 = vsel %vm871_vm7, %v3864_v43, %v3863_v60  ;;  %v3935_v60 = vrot.slane %v11036_v10, 2  ;;  %v3937_v30 = vrot.slane %v11038_v53, 1  ;;  %v11040_v53 = vld [vmem:[#allocation19_spill] sm:$0xff] }
 0xdc1   : > { %v3557_v27 = vmul.f32 %v7491_v2, %v9592_v58  ;;  %7127 = vmatpush3.bf16.xpose.msra.mxu0 %v3888_v62  ;;  %7128 = vmatprep.mubr.msk.bf16.mxu0 %vm7672_vm8, %v10905_v22  ;;  %v4015_v58 = vrot.slane %v11020_v26, 1  ;;  %v11035_v2 = vld [vmem:[#allocation33_spill] sm:$0xff]  ;;  %v4039_v62 = vpop.permute.xlu1 %4038  ;;  %v3866_v26 = vpack.c.b16 %v3865_v41, %v3865_v41  ;;  %v11041_v10 = vld [vmem:[#allocation47_spill] sm:$0xff] }
 0xdc2   : > { %7138 = vmatprep.subr.bf16.mxu0 %v10905_v22  ;;  %v3931_v20 = vrot.slane %v11035_v2, 4  ;;  %v3940_v7 = vrot.slane %v11041_v10, 7  ;;  %v11042_v2 = vld [vmem:[#allocation51_spill] sm:$0xff] }
 0xdc3   : > { %v3561_v8 = vpack.c.bf16 %v3557_v27, %v3557_v27  ;;  %v4016_v43 = vsel %vm862_vm4, %v4015_v58, %v4014_v61  ;;  %v11039_v58 = vld [vmem:[#allocation49_spill] sm:$0xff] }
 0xdc4   : > { %v3932_v27 = vsel %vm853_vm1, %v3931_v20, %v3930_v46  ;;  %v4017_v46 = vsel %vm865_vm5, %v11039_v58, %v4016_v43  ;;  %v3961_v20 = vpop.permute.xlu0 %3960  ;;  %v3942_v43 = vrot.slane %v11042_v2, 6 }
 0xdc5   : > { %7111 = vmatmul.mubr.msk.bf16.vlgmr.msra.gmra.mrb[84].mxu1 %vm899_vm10, %v3561_v8  ;;  %v3933_v8 = vrot.slane %v11037_v4, 3  ;;  %v4019_v61 = vsel %vm868_vm6, %v4018_v55, %v4017_v46 }
 0xdc6   : > { %7121 = vmatpush3.bf16.xpose.msra.mxu1 %v3810_v63  ;;  %7122 = vmatprep.mubr.msk.bf16.mxu1 %vm7672_vm8, %v10905_v22  ;;  %v4044_v63 = vsel %vm899_vm10, %v4039_v62, 0  ;;  %v3788_v62 = vpack.c.b16 %v11040_v53, %v11040_v53 }
 0xdc7   : > { %7132 = vmatprep.subr.bf16.mxu1 %v10905_v22  ;;  %v3934_v41 = vsel %vm856_vm2, %v3933_v8, %v3932_v27  ;;  %v3966_v27 = vsel %vm899_vm10, %v3961_v20, 0 }
 0xdc8   : > { %7129 = vmatmul.mubr.msk.bf16.vlgmr.msra.gmra.mrb[96].mxu0 %vm899_vm10, %v3866_v26  ;;  %v3936_v4 = vsel %vm859_vm3, %v3935_v60, %v3934_v41  ;;  %v4021_v26 = vsel %vm871_vm7, %v4020_v1, %v4019_v61  ;;  %v11043_v60 = vld [vmem:[#allocation45_spill] sm:$0xff] }
 0xdc9   : > { %7139 = vmatpush3.bf16.xpose.msra.mxu0 %v4044_v63  ;;  %7140 = vmatprep.mubr.msk.bf16.mxu0 %vm7672_vm8, %v10905_v22  ;;  %v3938_v63 = vsel %vm862_vm4, %v3937_v30, %v3936_v4  ;;  %v4022_v55 = vpack.c.b16 %v4021_v26, %v4021_v26 }
 0xdca   : > { %7150 = vmatprep.subr.bf16.mxu0 %v10905_v22  ;;  %v3939_v8 = vsel %vm865_vm5, %v11043_v60, %v3938_v63 }
 0xdcb   : > { %v3941_v1 = vsel %vm868_vm6, %v3940_v7, %v3939_v8 }
 0xdcc   : > { %v3943_v4 = vsel %vm871_vm7, %v3942_v43, %v3941_v1 }
 0xdcd   : > { %7123 = vmatmul.mubr.msk.bf16.vlgmr.msra.gmra.mrb[88].mxu1 %vm899_vm10, %v3788_v62  ;;  %v3944_v53 = vpack.c.b16 %v3943_v4, %v3943_v4 }
 0xdce   : > { %7133 = vmatpush3.bf16.xpose.msra.mxu1 %v3966_v27  ;;  %7134 = vmatprep.mubr.msk.bf16.mxu1 %vm7672_vm8, %v10905_v22  ;;  %v11047_v27 = vld [vmem:[#allocation9_spill] sm:$0xff] }
 0xdcf   : > { %7144 = vmatprep.subr.bf16.mxu1 %v10905_v22 }
 0xdd0   : > { %7141 = vmatmul.mubr.msk.bf16.vlgmr.msra.gmra.mrb[100].mxu0 %vm899_vm10, %v4022_v55  ;;  %v3772_v55 = vsub.s32 5, %v11047_v27 }
 0xdd1   : > { %7152 = vmatprep.mubr.msk.bf16.mxu0 %vm7672_vm8, %v10905_v22 }
 0xdd5   : > { %7135 = vmatmul.mubr.msk.bf16.vlgmr.msra.gmra.mrb[92].mxu1 %vm899_vm10, %v3944_v53  ;;  %v3773_v53 = vrot.slane %v11031_v11, %v3772_v55 }
 0xdd6   : > { %7146 = vmatprep.mubr.msk.bf16.mxu1 %vm7672_vm8, %v10905_v22 }
 0xe5e   : > { %v9748_v30 = vpop.f32.mrb[88].mxu0 }
 0xe5f   : > { %11044 = vst [vmem:[#allocation44_spill] sm:$0xff] %v9748_v30  ;;  %v9750_v46 = vpop.f32.mrb[80].mxu1  ;;  %v7106_v7 = vpop.f32.mrb[89].mxu0 }
 0xe60   : > { %11045 = vst [vmem:[#allocation14_spill] sm:$0xff] %v9750_v46  ;;  %v7100_v41 = vpop.f32.mrb[81].mxu1  ;;  %v3656_v20 = vpop.f32.mrb[90].mxu0 }
 0xe61   : > { %v3608_v61 = vpop.f32.mrb[82].mxu1  ;;  %v7107_v62 = vpop.f32.mrb[91].mxu0 }
 0xe62   : > { %v7101_v26 = vpop.f32.mrb[83].mxu1 }
 0xe93   : > { %v9752_v63 = vpop.f32.mrb[92].mxu0 }
 0xe94   : > { %11046 = vst [vmem:[#allocation15_spill] sm:$0xff] %v9752_v63  ;;  %v7118_v43 = vpop.f32.mrb[93].mxu0 }
 0xe95   : > { %v3752_v8 = vpop.f32.mrb[94].mxu0 }
 0xe96   : > { %v7119_v1 = vpop.f32.mrb[95].mxu0 }
 0xe98   : > { %v9755_v4 = vpop.f32.mrb[84].mxu1 }
 0xe99   : > { %11048 = vst [vmem:[#allocation46_spill] sm:$0xff] %v9755_v4  ;;  %v7112_v30 = vpop.f32.mrb[85].mxu1 }
 0xe9a   : > { %v3704_v10 = vpop.f32.mrb[86].mxu1 }
 0xe9b   : > { %v7113_v46 = vpop.f32.mrb[87].mxu1  ;;  %v3924_v7 = vpop.f32.mrb[96].mxu0 }
 0xe9c   : > { %v3925_v41 = vadd.f32 %v3924_v7, %v3773_v53  ;;  %v7130_v20 = vpop.f32.mrb[97].mxu0 }
 0xe9d   : > { %v3927_v61 = vpop.f32.mrb[98].mxu0 }
 0xe9e   : > { %v7131_v62 = vpop.f32.mrb[99].mxu0  ;;  %v4089_v26 = vsel %vm899_vm10, %v3925_v41, -inf }
 0xe9f   : > { %4090 = vmax.xlane.f32.xlu1 %v4089_v26 }
 0xea0   : > { %v3846_v43 = vpop.f32.mrb[88].mxu1 }
 0xea1   : > { %v3847_v63 = vadd.f32 %v3846_v43, %v3773_v53  ;;  %v7124_v27 = vpop.f32.mrb[89].mxu1 }
 0xea2   : > { %v3849_v8 = vpop.f32.mrb[90].mxu1 }
 0xea3   : > { %v7125_v1 = vpop.f32.mrb[91].mxu1  ;;  %v4080_v2 = vpop.f32.mrb[100].mxu0  ;;  %v4086_v4 = vsel %vm899_vm10, %v3847_v63, -inf }
 0xea4   : > { %v7142_v55 = vpop.f32.mrb[101].mxu0  ;;  %4087 = vmax.xlane.f32.xlu0 %v4086_v4  ;;  %v4081_v62 = vadd.f32 %v4080_v2, %v3773_v53 }
 0xea5   : > { %v4083_v10 = vpop.f32.mrb[102].mxu0 }
 0xea6   : > { %v7143_v30 = vpop.f32.mrb[103].mxu0  ;;  %v4095_v27 = vsel %vm899_vm10, %v4081_v62, -inf }
 0xea8   : > { %v4002_v46 = vpop.f32.mrb[92].mxu1 }
 0xea9   : > { %v4003_v7 = vadd.f32 %v4002_v46, %v3773_v53  ;;  %v7136_v20 = vpop.f32.mrb[93].mxu1 }
 0xeaa   : > { %v4005_v61 = vpop.f32.mrb[94].mxu1 }
 0xeab   : > { %v7137_v11 = vpop.f32.mrb[95].mxu1  ;;  %v4092_v26 = vsel %vm899_vm10, %v4003_v7, -inf }
 0xeac   : > { %4093 = vmax.xlane.f32.xlu0 %v4092_v26 }
 0xeb0   : > { %4134 = vrot.lane.b32.xlu1 %v9642_v49, %s7674_s24  ;;  %4096 = vmax.xlane.f32.xlu0 %v4095_v27 }
 0xf2c   : > { %v4091_v43 = vpop.xlane.xlu1 %4090 }
 0xf2d   : > { %v4099_v8 = vsub.f32 %v3925_v41, %v4091_v43 }
 0xf2f   : > { %v4104_v4 = vmul.f32 1.442695, %v4099_v8 }
 0xf30   : > { %v4135_v1 = vpop.permute.xlu1 %4134 }
 0xf31   : > { %7492 = vpow2.f32 %v4104_v4  ;;  %v4140_v55 = vsel %vm1281_vm12, %v4135_v1, 0  ;;  %v4088_v10 = vpop.xlane.xlu0 %4087  ;;  %v4443_v4 = vrot.slane %v8385_v34, 3  ;;  %v4517_v1 = vrot.slane %v10940_v31, 5 }
 0xf32   : > { %v4098_v30 = vsub.f32 %v3847_v63, %v4088_v10  ;;  %7145 = vmatpush3.bf16.msra.mxu1 %v4140_v55  ;;  %v4445_v55 = vrot.slane %v8389_v25, 2  ;;  %v4519_v10 = vrot.slane %v8383_v48, 4 }
 0xf33   : > { %7156 = vmatprep.subr.bf16.mxu1 %v10905_v22 }
 0xf34   : > { %v4102_v11 = vmul.f32 1.442695, %v4098_v30 }
 0xf36   : > { %7494 = vpow2.f32 %v4102_v11  ;;  %v4516_v11 = vrot.slane %v8400_v52, 6 }
 0xf39   : > { %v4094_v46 = vpop.xlane.xlu0 %4093 }
 0xf3a   : > { %v4100_v26 = vsub.f32 %v4003_v7, %v4094_v46  ;;  %v4438_v7 = vrot.slane %v8396_v29, 6  ;;  %v4523_v46 = vrot.slane %v10939_v37, 2 }
 0xf3b   : > { %v9766_v2 = vpop.eup %7492 }
 0xf3c   : > { %v4113_v49 = vsel %vm899_vm10, %v9766_v2, 0.0  ;;  %v4106_v27 = vmul.f32 1.442695, %v4100_v26 }
 0xf3d   : > { %4114 = vadd.xlane.f32.xlu0 %v4113_v49  ;;  %v4097_v63 = vpop.xlane.xlu0 %4096  ;;  %v4521_v49 = vrot.slane %v8387_v16, 3 }
 0xf3e   : > { %v4101_v20 = vsub.f32 %v4081_v62, %v4097_v63  ;;  %v4441_v62 = vrot.slane %v8381_v14, 4 }
 0xf40   : > { %v9770_v53 = vpop.eup %7494  ;;  %v4108_v61 = vmul.f32 1.442695, %v4101_v20  ;;  %v4518_v20 = vsel %vm853_vm1, %v4517_v1, %v4516_v11  ;;  %v4528_v11 = vrot.slane %v10943_v12, 7 }
 0xf41   : > { %v4110_v41 = vsel %vm899_vm10, %v9770_v53, 0.0 }
 0xf42   : > { %4111 = vadd.xlane.f32.xlu1 %v4110_v41  ;;  %7496 = vpow2.f32 %v4108_v61  ;;  %v4595_v61 = vrot.slane %v8416_v28, 5 }
 0xf43   : > { %7498 = vpow2.f32 %v4106_v27  ;;  %v4520_v27 = vsel %vm856_vm2, %v4519_v10, %v4518_v20 }
 0xf4c   : > { %v9780_v43 = vpop.eup %7496 }
 0xf4d   : > { %v4119_v8 = vsel %vm899_vm10, %v9780_v43, 0.0 }
 0xf53   : > { %4230 = vrot.lane.b32.xlu1 %v9653_v17, %s7674_s24  ;;  %4182 = vrot.lane.b32.xlu0 %v9638_v54, %s7674_s24  ;;  %v9784_v17 = vpop.eup %7498  ;;  %v4439_v54 = vrot.slane %v8377_v59, 5 }
 0xf55   : > { %v4440_v30 = vsel %vm853_vm1, %v4439_v54, %v4438_v7  ;;  %v4447_v54 = vrot.slane %v8404_v13, 1  ;;  %v4599_v7 = vrot.slane %v8431_v24, 3 }
 0xf56   : > { %v4442_v41 = vsel %vm856_vm2, %v4441_v62, %v4440_v30  ;;  %v4594_v62 = vrot.slane %v8451_v36, 6  ;;  %v4525_v30 = vrot.slane %v10942_v23, 1 }
 0xf57   : > { %4278 = vrot.lane.b32.xlu1 %v9651_v50, %s7674_s24  ;;  %v4116_v50 = vsel %vm899_vm10, %v9784_v17, 0.0  ;;  %v4444_v63 = vsel %vm859_vm3, %v4443_v4, %v4442_v41  ;;  %v4450_v4 = vrot.slane %v8422_v19, 7 }
 0xf58   : > { %v4446_v26 = vsel %vm862_vm4, %v4445_v55, %v4444_v63  ;;  %v4601_v55 = vrot.slane %v8436_v38, 2  ;;  %v4596_v41 = vsel %vm853_vm1, %v4595_v61, %v4594_v62 }
 0xf59   : > { %v4448_v10 = vsel %vm865_vm5, %v4447_v54, %v4446_v26 }
 0xf5a   : > { %v4449_v63 = vsel %vm868_vm6, %v8426_v57, %v4448_v10 }
 0xf5b   : > { %v4451_v54 = vsel %vm871_vm7, %v4450_v4, %v4449_v63 }
 0xf72   : > { %4120 = vadd.xlane.f32.xlu0 %v4119_v8  ;;  %v4597_v8 = vrot.slane %v8420_v21, 4 }
 0xf74   : > { %v4598_v20 = vsel %vm856_vm2, %v4597_v8, %v4596_v41  ;;  %v4606_v8 = vrot.slane %v8462_v33, 7 }
 0xf7b   : > { %4117 = vadd.xlane.f32.xlu1 %v4116_v50  ;;  %v4522_v50 = vsel %vm859_vm3, %v4521_v49, %v4520_v27  ;;  %v4603_v49 = vrot.slane %v8441_v45, 1 }
 0xf7c   : > { %v4524_v1 = vsel %vm862_vm4, %v4523_v46, %v4522_v50  ;;  %v4600_v46 = vsel %vm859_vm3, %v4599_v7, %v4598_v20  ;;  %v11049_v50 = vld [vmem:[#allocation20_spill] sm:$0xff] }
 0xf7d   : > { %v4526_v27 = vsel %vm865_vm5, %v4525_v30, %v4524_v1  ;;  %v9825_v19 = vpack.c.b16 %v11049_v50, %v11049_v50  ;;  %v4602_v61 = vsel %vm862_vm4, %v4601_v55, %v4600_v46  ;;  %v9838_v1 = vpack.c.b16 %v4451_v54, %v4451_v54 }
 0xf7e   : > { %v4527_v26 = vsel %vm868_vm6, %v10941_v0, %v4526_v27  ;;  %v4604_v10 = vsel %vm865_vm5, %v4603_v49, %v4602_v61 }
 0xf7f   : > { %v4529_v62 = vsel %vm871_vm7, %v4528_v11, %v4527_v26  ;;  %v4605_v7 = vsel %vm868_vm6, %v8467_v3, %v4604_v10 }
 0xf80   : > { %v9840_v30 = vpack.c.b16 %v4529_v62, %v4529_v62  ;;  %v4607_v55 = vsel %vm871_vm7, %v4606_v8, %v4605_v7  ;;  %v4424_v7 = vrot.slane %v10946_v35, 5 }
 0xf81   : > { %v9847_v4 = vpack.c.b16 %v4607_v55, %v4607_v55 }
 0xf88   : > { %4375 = vrot.lane.b32.xlu0 %v9825_v19, %s7673_s18 }
 0xf8c   : > { %4453 = vrot.lane.b32.xlu1 %v9838_v1, %s7673_s18  ;;  %4531 = vrot.lane.b32.xlu0 %v9840_v30, %s7673_s18 }
 0xf90   : > { %4609 = vrot.lane.b32.xlu1 %v9847_v4, %s7673_s18 }
 0xfca   : > { %v4115_v11 = vpop.xlane.xlu0 %4114 }
 0xfcb   : > { %7500 = vrcp.f32 %v4115_v11  ;;  %v4426_v11 = vrot.slane %v10949_v6, 4 }
 0xfce   : > { %v4183_v41 = vpop.permute.xlu0 %4182 }
 0xfcf   : > { %v4188_v49 = vsel %vm1281_vm12, %v4183_v41, 0  ;;  %v4112_v63 = vpop.xlane.xlu1 %4111 }
 0xfd0   : > { %7502 = vrcp.f32 %v4112_v63  ;;  %7151 = vmatpush3.bf16.msra.mxu0 %v4188_v49  ;;  %v4428_v63 = vrot.slane %v10952_v51, 3 }
 0xfd1   : > { %7162 = vmatprep.subr.bf16.mxu0 %v10905_v22 }
 0xfd3   : > { %v4231_v20 = vpop.permute.xlu1 %4230 }
 0xfd4   : > { %v4236_v8 = vsel %vm1281_vm12, %v4231_v20, 0  ;;  %v4430_v20 = vrot.slane %v10954_v40, 2 }
 0xfd5   : > { %v7501_v27 = vpop.eup %7500 }
 0xfd6   : > { %v4127_v46 = vmul.f32 %v7501_v27, %v9766_v2 }
 0xfd7   : > { %v4279_v50 = vpop.permute.xlu1 %4278 }
 0xfd8   : > { %v4284_v26 = vsel %vm1281_vm12, %v4279_v50, 0  ;;  %v4131_v61 = vpack.c.bf16 %v4127_v46, %v4127_v46 }
 0xfda   : > { %v7503_v54 = vpop.eup %7502  ;;  %7153 = vmatmul.mubr.msk.bf16.vlgmr.msra.gmra.mrb[104].mxu0 %vm899_vm10, %v4131_v61 }
 0xfdb   : > { %v4126_v62 = vmul.f32 %v7503_v54, %v9770_v53  ;;  %7163 = vmatpush3.bf16.msra.mxu0 %v4284_v26  ;;  %7164 = vmatprep.mubr.msk.bf16.mxu0 %vm7672_vm8, %v10905_v22  ;;  %v4423_v53 = vrot.slane %v8527_v47, 6 }
 0xfdc   : > { %7174 = vmatprep.subr.bf16.mxu0 %v10905_v22 }
 0xfdd   : > { %v4130_v10 = vpack.c.bf16 %v4126_v62, %v4126_v62  ;;  %v4425_v55 = vsel %vm853_vm1, %v4424_v7, %v4423_v53  ;;  %v4580_v53 = vrot.slane %v11014_v15, 5 }
 0xfde   : > { %v4427_v41 = vsel %vm856_vm2, %v4426_v11, %v4425_v55 }
 0xfdf   : > { %7147 = vmatmul.mubr.msk.bf16.vlgmr.msra.gmra.mrb[96].mxu1 %vm899_vm10, %v4130_v10  ;;  %v4429_v46 = vsel %vm859_vm3, %v4428_v63, %v4427_v41  ;;  %v4432_v10 = vrot.slane %v10959_v39, 1  ;;  %v4584_v41 = vrot.slane %v11005_v42, 3  ;;  %v4582_v63 = vrot.slane %v11033_v5, 4 }
 0xfe0   : > { %7157 = vmatpush3.bf16.msra.mxu1 %v4236_v8  ;;  %7158 = vmatprep.mubr.msk.bf16.mxu1 %vm7672_vm8, %v10905_v22  ;;  %v4431_v62 = vsel %vm862_vm4, %v4430_v20, %v4429_v46  ;;  %v4435_v8 = vrot.slane %v10960_v32, 7  ;;  %v11050_v20 = vld [vmem:[#allocation48_spill] sm:$0xff] }
 0xfe1   : > { %7168 = vmatprep.subr.bf16.mxu1 %v10905_v22 }
 0xfff   : > { %v4121_v2 = vpop.xlane.xlu0 %4120 }
0x1000   : > { %7504 = vrcp.f32 %v4121_v2  ;;  %v4579_v2 = vrot.slane %v10978_v9, 6 }
0x1002   : > { %v4581_v11 = vsel %vm853_vm1, %v4580_v53, %v4579_v2 }
0x1008   : > { %v4118_v49 = vpop.xlane.xlu1 %4117 }
0x1009   : > { %7506 = vrcp.f32 %v4118_v49 }
0x100a   : > { %v7505_v27 = vpop.eup %7504 }
0x100b   : > { %v4129_v50 = vmul.f32 %v7505_v27, %v9780_v43  ;;  %v4433_v43 = vsel %vm865_vm5, %v4432_v10, %v4431_v62  ;;  %v4586_v27 = vrot.slane %v11050_v20, 2  ;;  %v4583_v62 = vsel %vm856_vm2, %v4582_v63, %v4581_v11  ;;  %v11052_v11 = vld [vmem:[#allocation50_spill] sm:$0xff] }
0x100c   : > { %v4454_v26 = vpop.permute.xlu1 %4453  ;;  %v4434_v7 = vsel %vm868_vm6, %v10958_v44, %v4433_v43  ;;  %v4501_v10 = vrot.slane %v11034_v18, 6  ;;  %v4585_v2 = vsel %vm859_vm3, %v4584_v41, %v4583_v62  ;;  %v4591_v43 = vrot.slane %v11006_v56, 7 }
0x100d   : > { %v4459_v61 = vsel %vm899_vm10, %v4454_v26, 0  ;;  %v4133_v54 = vpack.c.bf16 %v4129_v50, %v4129_v50  ;;  %v4436_v55 = vsel %vm871_vm7, %v4435_v8, %v4434_v7  ;;  %v4588_v26 = vrot.slane %v11039_v58, 1  ;;  %v11051_v7 = vld [vmem:[#allocation33_spill] sm:$0xff] }
0x100f   : > { %7165 = vmatmul.mubr.msk.bf16.vlgmr.msra.gmra.mrb[108].mxu0 %vm899_vm10, %v4133_v54  ;;  %v4437_v54 = vpack.c.b16 %v4436_v55, %v4436_v55 }
0x1010   : > { %7175 = vmatpush3.bf16.xpose.msra.mxu0 %v4459_v61  ;;  %7176 = vmatprep.mubr.msk.bf16.mxu0 %vm7672_vm8, %v10905_v22  ;;  %v4610_v50 = vpop.permute.xlu1 %4609  ;;  %v4376_v61 = vpop.permute.xlu0 %4375 }
0x1011   : > { %7186 = vmatprep.subr.bf16.mxu0 %v10905_v22  ;;  %v4615_v53 = vsel %vm899_vm10, %v4610_v50, 0  ;;  %v4381_v58 = vsel %vm899_vm10, %v4376_v61, 0  ;;  %v11054_v61 = vld [vmem:[#allocation36_spill] sm:$0xff] }
0x1013   : > { %v7507_v49 = vpop.eup %7506 }
0x1014   : > { %v4128_v46 = vmul.f32 %v7507_v49, %v9784_v17  ;;  %v4587_v17 = vsel %vm862_vm4, %v4586_v27, %v4585_v2  ;;  %v4502_v49 = vrot.slane %v11051_v7, 5 }
0x1015   : > { %v4589_v55 = vsel %vm865_vm5, %v4588_v26, %v4587_v17  ;;  %v4504_v26 = vrot.slane %v11054_v61, 4  ;;  %v11056_v17 = vld [vmem:[#allocation21_spill] sm:$0xff] }
0x1016   : > { %v4132_v8 = vpack.c.bf16 %v4128_v46, %v4128_v46  ;;  %v4590_v41 = vsel %vm868_vm6, %v11052_v11, %v4589_v55  ;;  %v4503_v63 = vsel %vm853_vm1, %v4502_v49, %v4501_v10  ;;  %v11053_v46 = vld [vmem:[#allocation39_spill] sm:$0xff]  ;;  %v4359_v49 = vpack.c.b16 %v11056_v17, %v11056_v17 }
0x1017   : > { %7177 = vmatmul.mubr.msk.bf16.vlgmr.msra.gmra.mrb[112].mxu0 %vm899_vm10, %v4437_v54  ;;  %v4506_v27 = vrot.slane %v11053_v46, 3  ;;  %v4592_v50 = vsel %vm871_vm7, %v4591_v43, %v4590_v41  ;;  %v4505_v62 = vsel %vm856_vm2, %v4504_v26, %v4503_v63  ;;  %v11057_v43 = vld [vmem:[#allocation51_spill] sm:$0xff]  ;;  %v11065_v46 = vld [vmem:[#allocation53_spill] sm:$0xff] }
0x1018   : > { %7187 = vmatpush3.bf16.xpose.msra.mxu0 %v4615_v53  ;;  %7159 = vmatmul.mubr.msk.bf16.vlgmr.msra.gmra.mrb[100].mxu1 %vm899_vm10, %v4132_v8  ;;  %v4532_v8 = vpop.permute.xlu0 %4531  ;;  %v4593_v2 = vpack.c.b16 %v4592_v50, %v4592_v50  ;;  %v4510_v53 = vrot.slane %v11043_v60, 1  ;;  %v4513_v41 = vrot.slane %v11057_v43, 7  ;;  %v11064_v43 = vld [vmem:[#allocation9_spill] sm:$0xff] }
0x1019   : > { %7169 = vmatpush3.bf16.xpose.msra.mxu1 %v4381_v58  ;;  %7188 = vmatprep.mubr.msk.bf16.mxu0 %vm7672_vm8, %v10905_v22  ;;  %v11055_v58 = vld [vmem:[#allocation41_spill] sm:$0xff]  ;;  %v4507_v10 = vsel %vm859_vm3, %v4506_v27, %v4505_v62  ;;  %v11058_v27 = vld [vmem:[#allocation47_spill] sm:$0xff] }
0x101a   : > { %7170 = vmatprep.mubr.msk.bf16.mxu1 %vm7672_vm8, %v10905_v22  ;;  %7180 = vmatprep.subr.bf16.mxu1 %v10905_v22  ;;  %v4508_v54 = vrot.slane %v11055_v58, 2  ;;  %v4537_v58 = vsel %vm899_vm10, %v4532_v8, 0 }
0x101b   : > { %7198 = vmatprep.subr.bf16.mxu0 %v10905_v22 }
0x101c   : > { %v4509_v55 = vsel %vm862_vm4, %v4508_v54, %v4507_v10 }
0x101d   : > { %v4511_v63 = vsel %vm865_vm5, %v4510_v53, %v4509_v55 }
0x101e   : > { %v4512_v50 = vsel %vm868_vm6, %v11058_v27, %v4511_v63  ;;  %v4343_v27 = vsub.s32 6, %v11064_v43 }
0x101f   : > { %7189 = vmatmul.mubr.msk.bf16.vlgmr.msra.gmra.mrb[116].mxu0 %vm899_vm10, %v4593_v2  ;;  %v4514_v26 = vsel %vm871_vm7, %v4513_v41, %v4512_v50 }
0x1020   : > { %7171 = vmatmul.mubr.msk.bf16.vlgmr.msra.gmra.mrb[104].mxu1 %vm899_vm10, %v4359_v49  ;;  %7200 = vmatprep.mubr.msk.bf16.mxu0 %vm7672_vm8, %v10905_v22  ;;  %v4515_v54 = vpack.c.b16 %v4514_v26, %v4514_v26  ;;  %v4344_v8 = vrot.slane %v11065_v46, %v4343_v27 }
0x1021   : > { %7181 = vmatpush3.bf16.xpose.msra.mxu1 %v4537_v58  ;;  %7182 = vmatprep.mubr.msk.bf16.mxu1 %vm7672_vm8, %v10905_v22 }
0x1022   : > { %7192 = vmatprep.subr.bf16.mxu1 %v10905_v22 }
0x1028   : > { %7183 = vmatmul.mubr.msk.bf16.vlgmr.msra.gmra.mrb[108].mxu1 %vm899_vm10, %v4515_v54 }
0x1029   : > { %7194 = vmatprep.mubr.msk.bf16.mxu1 %vm7672_vm8, %v10905_v22 }
0x10ad   : > { %v9940_v62 = vpop.f32.mrb[104].mxu0 }
0x10ae   : > { %11059 = vst [vmem:[#allocation16_spill] sm:$0xff] %v9940_v62  ;;  %v7154_v2 = vpop.f32.mrb[105].mxu0 }
0x10af   : > { %v4227_v10 = vpop.f32.mrb[106].mxu0 }
0x10b0   : > { %v7155_v53 = vpop.f32.mrb[107].mxu0 }
0x10b2   : > { %v9944_v17 = vpop.f32.mrb[96].mxu1 }
0x10b3   : > { %11061 = vst [vmem:[#allocation38_spill] sm:$0xff] %v9944_v17  ;;  %v7148_v49 = vpop.f32.mrb[97].mxu1 }
0x10b4   : > { %v4179_v55 = vpop.f32.mrb[98].mxu1 }
0x10b5   : > { %v7149_v63 = vpop.f32.mrb[99].mxu1 }
0x10e2   : > { %v9946_v41 = vpop.f32.mrb[108].mxu0 }
0x10e3   : > { %11062 = vst [vmem:[#allocation17_spill] sm:$0xff] %v9946_v41  ;;  %v7166_v54 = vpop.f32.mrb[109].mxu0 }
0x10e4   : > { %v4323_v60 = vpop.f32.mrb[110].mxu0 }
0x10e5   : > { %v7167_v61 = vpop.f32.mrb[111].mxu0 }
0x10ea   : > { %v4495_v2 = vpop.f32.mrb[112].mxu0 }
0x10eb   : > { %v4496_v10 = vadd.f32 %v4495_v2, %v4344_v8  ;;  %v9952_v53 = vpop.f32.mrb[100].mxu1  ;;  %v7178_v17 = vpop.f32.mrb[113].mxu0 }
0x10ec   : > { %v7160_v63 = vpop.f32.mrb[101].mxu1  ;;  %v4498_v58 = vpop.f32.mrb[114].mxu0 }
0x10ed   : > { %v4275_v62 = vpop.f32.mrb[102].mxu1  ;;  %v7179_v56 = vpop.f32.mrb[115].mxu0  ;;  %v4660_v54 = vsel %vm899_vm10, %v4496_v10, -inf }
0x10ee   : > { %4661 = vmax.xlane.f32.xlu1 %v4660_v54  ;;  %v7161_v26 = vpop.f32.mrb[103].mxu1 }
0x10f2   : > { %v4651_v60 = vpop.f32.mrb[116].mxu0 }
0x10f3   : > { %v4417_v61 = vpop.f32.mrb[104].mxu1  ;;  %v7190_v50 = vpop.f32.mrb[117].mxu0  ;;  %v4652_v55 = vadd.f32 %v4651_v60, %v4344_v8 }
0x10f4   : > { %v4418_v27 = vadd.f32 %v4417_v61, %v4344_v8  ;;  %v7172_v41 = vpop.f32.mrb[105].mxu1  ;;  %v4654_v2 = vpop.f32.mrb[118].mxu0 }
0x10f5   : > { %v4420_v46 = vpop.f32.mrb[106].mxu1  ;;  %v7191_v43 = vpop.f32.mrb[119].mxu0  ;;  %v4666_v41 = vsel %vm899_vm10, %v4652_v55, -inf }
0x10f6   : > { %v7173_v17 = vpop.f32.mrb[107].mxu1  ;;  %v4657_v7 = vsel %vm899_vm10, %v4418_v27, -inf }
0x10f7   : > { %4658 = vmax.xlane.f32.xlu0 %v4657_v7 }
0x10fb   : > { %v4573_v63 = vpop.f32.mrb[108].mxu1 }
0x10fc   : > { %v4574_v58 = vadd.f32 %v4573_v63, %v4344_v8  ;;  %v7184_v62 = vpop.f32.mrb[109].mxu1 }
0x10fd   : > { %v4576_v56 = vpop.f32.mrb[110].mxu1 }
0x10fe   : > { %v7185_v49 = vpop.f32.mrb[111].mxu1  ;;  %v4663_v26 = vsel %vm899_vm10, %v4574_v58, -inf }
0x10ff   : > { %4705 = vrot.lane.b32.xlu1 %v9825_v19, %s7674_s24  ;;  %4664 = vmax.xlane.f32.xlu0 %v4663_v26 }
0x1103   : > { %4667 = vmax.xlane.f32.xlu0 %v4666_v41 }
0x117b   : > { %v4662_v46 = vpop.xlane.xlu1 %4661 }
0x117c   : > { %v4670_v43 = vsub.f32 %v4496_v10, %v4662_v46 }
0x117e   : > { %v4675_v50 = vmul.f32 1.442695, %v4670_v43  ;;  %v5090_v43 = vrot.slane %v8383_v48, 5  ;;  %v5014_v48 = vrot.slane %v8385_v34, 4  ;;  %v5166_v34 = vrot.slane %v8416_v28, 6 }
0x117f   : > { %v4706_v54 = vpop.permute.xlu1 %4705 }
0x1180   : > { %7508 = vpow2.f32 %v4675_v50  ;;  %v4711_v7 = vsel %vm1281_vm12, %v4706_v54, 0  ;;  %v5094_v54 = vrot.slane %v10939_v37, 3  ;;  %v5098_v37 = vrot.slane %v10941_v0, 1 }
0x1181   : > { %7193 = vmatpush3.bf16.msra.mxu1 %v4711_v7  ;;  %v5012_v7 = vrot.slane %v8381_v14, 5  ;;  %v5165_v0 = vrot.slane %v8451_v36, 7 }
0x1182   : > { %7204 = vmatprep.subr.bf16.mxu1 %v10905_v22 }
0x1184   : > { %v4659_v8 = vpop.xlane.xlu0 %4658 }
0x1185   : > { %v4669_v49 = vsub.f32 %v4418_v27, %v4659_v8 }
0x1187   : > { %v4673_v60 = vmul.f32 1.442695, %v4669_v49 }
0x1189   : > { %7510 = vpow2.f32 %v4673_v60 }
0x118a   : > { %v9964_v61 = vpop.eup %7508 }
0x118b   : > { %v4684_v19 = vsel %vm899_vm10, %v9964_v61, 0.0 }
0x118c   : > { %4685 = vadd.xlane.f32.xlu0 %v4684_v19  ;;  %v4665_v17 = vpop.xlane.xlu0 %4664  ;;  %v5096_v19 = vrot.slane %v10942_v23, 2 }
0x118d   : > { %v4671_v56 = vsub.f32 %v4574_v58, %v4665_v17  ;;  %v5010_v58 = vrot.slane %v8377_v59, 6  ;;  %v5168_v17 = vrot.slane %v8420_v21, 5 }
0x118f   : > { %v4677_v26 = vmul.f32 1.442695, %v4671_v56  ;;  %v11067_v56 = vld [vmem:[#allocation22_spill] sm:$0xff] }
0x1190   : > { %v4668_v27 = vpop.xlane.xlu0 %4667  ;;  %v10015_v23 = vpack.c.b16 %v11067_v56, %v11067_v56 }
0x1191   : > { %v4672_v63 = vsub.f32 %v4652_v55, %v4668_v27  ;;  %v5092_v55 = vrot.slane %v8387_v16, 4  ;;  %v5016_v16 = vrot.slane %v8389_v25, 3  ;;  %v5020_v25 = vrot.slane %v8426_v57, 1 }
0x1193   : > { %v9968_v2 = vpop.eup %7510  ;;  %v4679_v62 = vmul.f32 1.442695, %v4672_v63  ;;  %v5018_v63 = vrot.slane %v8404_v13, 2  ;;  %v5174_v13 = vrot.slane %v8441_v45, 2 }
0x1194   : > { %v4681_v10 = vsel %vm899_vm10, %v9968_v2, 0.0 }
0x1195   : > { %4682 = vadd.xlane.f32.xlu1 %v4681_v10  ;;  %7512 = vpow2.f32 %v4679_v62  ;;  %v5170_v62 = vrot.slane %v8431_v24, 4 }
0x1196   : > { %7514 = vpow2.f32 %v4677_v26  ;;  %v5172_v26 = vrot.slane %v8436_v38, 3 }
0x119f   : > { %v9978_v41 = vpop.eup %7512 }
0x11a0   : > { %v4690_v46 = vsel %vm899_vm10, %v9978_v41, 0.0 }
0x11a2   : > { %4753 = vrot.lane.b32.xlu0 %v9838_v1, %s7674_s24  ;;  %v9982_v1 = vpop.eup %7514 }
0x11a3   : > { %v4687_v50 = vsel %vm899_vm10, %v9982_v1, 0.0 }
0x11a6   : > { %4801 = vrot.lane.b32.xlu1 %v9840_v30, %s7674_s24  ;;  %v5088_v30 = vrot.slane %v10940_v31, 6  ;;  %v5009_v31 = vrot.slane %v8396_v29, 7 }
0x11a8   : > { %v5011_v49 = vsel %vm853_vm1, %v5010_v58, %v5009_v31 }
0x11a9   : > { %v5013_v14 = vsel %vm856_vm2, %v5012_v7, %v5011_v49 }
0x11aa   : > { %4849 = vrot.lane.b32.xlu1 %v9847_v4, %s7674_s24  ;;  %v5087_v4 = vrot.slane %v8400_v52, 7  ;;  %v5015_v29 = vsel %vm859_vm3, %v5014_v48, %v5013_v14 }
0x11ab   : > { %v5017_v10 = vsel %vm862_vm4, %v5016_v16, %v5015_v29 }
0x11ac   : > { %v5089_v8 = vsel %vm853_vm1, %v5088_v30, %v5087_v4  ;;  %v5019_v21 = vsel %vm865_vm5, %v5018_v63, %v5017_v10  ;;  %v5176_v30 = vrot.slane %v8467_v3, 1  ;;  %v11068_v4 = vld [vmem:[#allocation28_spill] sm:$0xff]  ;;  %v4995_v10 = vrot.slane %v10946_v35, 6 }
0x11ad   : > { %v5091_v52 = vsel %vm856_vm2, %v5090_v43, %v5089_v8  ;;  %v5021_v24 = vsel %vm868_vm6, %v5020_v25, %v5019_v21  ;;  %v4999_v63 = vrot.slane %v10952_v51, 4  ;;  %v5003_v51 = vrot.slane %v10959_v39, 2 }
0x11ae   : > { %v5093_v59 = vsel %vm859_vm3, %v5092_v55, %v5091_v52  ;;  %v5022_v55 = vsel %vm871_vm7, %v11068_v4, %v5021_v24  ;;  %v5151_v21 = vrot.slane %v11014_v15, 6  ;;  %v5155_v39 = vrot.slane %v11005_v42, 4 }
0x11af   : > { %v5095_v60 = vsel %vm862_vm4, %v5094_v54, %v5093_v59  ;;  %v5157_v24 = vrot.slane %v11050_v20, 3  ;;  %v5072_v20 = vrot.slane %v11034_v18, 7 }
0x11b0   : > { %v5097_v27 = vsel %vm865_vm5, %v5096_v19, %v5095_v60 }
0x11b1   : > { %v5099_v28 = vsel %vm868_vm6, %v5098_v37, %v5097_v27 }
0x11b2   : > { %v5100_v57 = vsel %vm871_vm7, %v10943_v12, %v5099_v28 }
0x11b3   : > { %v10030_v43 = vpack.c.b16 %v5100_v57, %v5100_v57 }
0x11c1   : > { %4691 = vadd.xlane.f32.xlu0 %v4690_v46  ;;  %v5167_v46 = vsel %vm853_vm1, %v5166_v34, %v5165_v0  ;;  %v4994_v34 = vrot.slane %v8527_v47, 7 }
0x11c2   : > { %v5169_v36 = vsel %vm856_vm2, %v5168_v17, %v5167_v46 }
0x11c3   : > { %v5171_v38 = vsel %vm859_vm3, %v5170_v62, %v5169_v36  ;;  %v4996_v25 = vsel %vm853_vm1, %v4995_v10, %v4994_v34  ;;  %v5001_v62 = vrot.slane %v10954_v40, 3  ;;  %v11075_v34 = vld [vmem:[#allocation45_spill] sm:$0xff] }
0x11c4   : > { %v5173_v12 = vsel %vm862_vm4, %v5172_v26, %v5171_v38  ;;  %v5081_v10 = vrot.slane %v11075_v34, 2 }
0x11c5   : > { %v5175_v45 = vsel %vm865_vm5, %v5174_v13, %v5173_v12 }
0x11c6   : > { %v5177_v58 = vsel %vm868_vm6, %v5176_v30, %v5175_v45  ;;  %v11069_v30 = vld [vmem:[#allocation49_spill] sm:$0xff] }
0x11c7   : > { %v5178_v3 = vsel %vm871_vm7, %v8462_v33, %v5177_v58  ;;  %v5159_v38 = vrot.slane %v11069_v30, 2  ;;  %v11080_v30 = vld [vmem:[#allocation53_spill] sm:$0xff] }
0x11c8   : > { %v10045_v54 = vpack.c.b16 %v5178_v3, %v5178_v3 }
0x11ce   : > { %4688 = vadd.xlane.f32.xlu1 %v4687_v50  ;;  %v10039_v50 = vpack.c.b16 %v5022_v55, %v5022_v55  ;;  %v5161_v55 = vrot.slane %v11052_v11, 1 }
0x11d7   : > { %4946 = vrot.lane.b32.xlu0 %v10015_v23, %s7673_s18 }
0x11db   : > { %5102 = vrot.lane.b32.xlu0 %v10030_v43, %s7673_s18 }
0x11df   : > { %5024 = vrot.lane.b32.xlu1 %v10039_v50, %s7673_s18 }
0x11e3   : > { %5180 = vrot.lane.b32.xlu1 %v10045_v54, %s7673_s18  ;;  %s7675_s18 = smov 16  }
0x1219   : > { %v4686_v7 = vpop.xlane.xlu0 %4685 }
0x121a   : > { %7516 = vrcp.f32 %v4686_v7  ;;  %v11070_v7 = vld [vmem:[#allocation33_spill] sm:$0xff] }
0x121d   : > { %v4754_v8 = vpop.permute.xlu0 %4753 }
0x121e   : > { %v4759_v31 = vsel %vm1281_vm12, %v4754_v8, 0  ;;  %v5073_v8 = vrot.slane %v11070_v7, 6 }
0x121f   : > { %7199 = vmatpush3.bf16.msra.mxu0 %v4759_v31 }
0x1220   : > { %7210 = vmatprep.subr.bf16.mxu0 %v10905_v22 }
0x1222   : > { %v4683_v48 = vpop.xlane.xlu1 %4682 }
0x1223   : > { %7518 = vrcp.f32 %v4683_v48  ;;  %v11071_v48 = vld [vmem:[#allocation52_spill] sm:$0xff] }
0x1224   : > { %v7517_v52 = vpop.eup %7516 }
0x1225   : > { %v4698_v33 = vmul.f32 %v7517_v52, %v9964_v61  ;;  %v5074_v52 = vsel %vm853_vm1, %v5073_v8, %v5072_v20 }
0x1226   : > { %v4802_v16 = vpop.permute.xlu1 %4801 }
0x1227   : > { %v4702_v59 = vpack.c.bf16 %v4698_v33, %v4698_v33  ;;  %v4807_v29 = vsel %vm1281_vm12, %v4802_v16, 0  ;;  %v11072_v33 = vld [vmem:[#allocation39_spill] sm:$0xff] }
0x1228   : > { %v5077_v16 = vrot.slane %v11072_v33, 4 }
0x1229   : > { %7201 = vmatmul.mubr.msk.bf16.vlgmr.msra.gmra.mrb[120].mxu0 %vm899_vm10, %v4702_v59  ;;  %v11073_v59 = vld [vmem:[#allocation36_spill] sm:$0xff] }
0x122a   : > { %v4850_v49 = vpop.permute.xlu1 %4849  ;;  %7212 = vmatprep.mubr.msk.bf16.mxu0 %vm7672_vm8, %v10905_v22 }
0x122b   : > { %v4855_v60 = vsel %vm1281_vm12, %v4850_v49, 0  ;;  %v5075_v49 = vrot.slane %v11073_v59, 5 }
0x122c   : > { %7211 = vmatpush3.bf16.msra.mxu0 %v4855_v60  ;;  %v11074_v60 = vld [vmem:[#allocation41_spill] sm:$0xff] }
0x122d   : > { %v7519_v37 = vpop.eup %7518  ;;  %7222 = vmatprep.subr.bf16.mxu0 %v10905_v22 }
0x122e   : > { %v4697_v14 = vmul.f32 %v7519_v37, %v9968_v2  ;;  %v4997_v2 = vrot.slane %v10949_v6, 5  ;;  %v5005_v6 = vrot.slane %v10958_v44, 1  ;;  %v5079_v37 = vrot.slane %v11074_v60, 3 }
0x1230   : > { %v4701_v19 = vpack.c.bf16 %v4697_v14, %v4697_v14  ;;  %v4998_v17 = vsel %vm856_vm2, %v4997_v2, %v4996_v25  ;;  %v11076_v25 = vld [vmem:[#allocation23_spill] sm:$0xff] }
0x1231   : > { %v5000_v28 = vsel %vm859_vm3, %v4999_v63, %v4998_v17  ;;  %v4930_v2 = vpack.c.b16 %v11076_v25, %v11076_v25 }
0x1232   : > { %7195 = vmatmul.mubr.msk.bf16.vlgmr.msra.gmra.mrb[112].mxu1 %vm899_vm10, %v4701_v19  ;;  %v5002_v35 = vsel %vm862_vm4, %v5001_v62, %v5000_v28  ;;  %v5076_v19 = vsel %vm856_vm2, %v5075_v49, %v5074_v52  ;;  %v11078_v28 = vld [vmem:[#allocation51_spill] sm:$0xff] }
0x1233   : > { %7205 = vmatpush3.bf16.msra.mxu1 %v4807_v29  ;;  %7206 = vmatprep.mubr.msk.bf16.mxu1 %vm7672_vm8, %v10905_v22  ;;  %v5004_v57 = vsel %vm865_vm5, %v5003_v51, %v5002_v35 }
0x1234   : > { %7216 = vmatprep.subr.bf16.mxu1 %v10905_v22  ;;  %v5006_v46 = vsel %vm868_vm6, %v5005_v6, %v5004_v57 }
0x1235   : > { %v5007_v44 = vsel %vm871_vm7, %v10960_v32, %v5006_v46 }
0x1236   : > { %v5008_v15 = vpack.c.b16 %v5007_v44, %v5007_v44 }
0x124e   : > { %v4692_v61 = vpop.xlane.xlu0 %4691 }
0x124f   : > { %7520 = vrcp.f32 %v4692_v61  ;;  %v5078_v61 = vsel %vm859_vm3, %v5077_v16, %v5076_v19 }
0x1250   : > { %v5080_v17 = vsel %vm862_vm4, %v5079_v37, %v5078_v61 }
0x1251   : > { %v5082_v62 = vsel %vm865_vm5, %v5081_v10, %v5080_v17 }
0x1252   : > { %v4947_v58 = vpop.permute.xlu0 %4946 }
0x1253   : > { %v4952_v31 = vsel %vm899_vm10, %v4947_v58, 0 }
0x1256   : > { %v5103_v29 = vpop.permute.xlu0 %5102 }
0x1259   : > { %v7521_v27 = vpop.eup %7520 }
0x125a   : > { %v4700_v0 = vmul.f32 %v7521_v27, %v9978_v41  ;;  %v5150_v41 = vrot.slane %v10978_v9, 7  ;;  %v5153_v9 = vrot.slane %v11033_v5, 5  ;;  %v11077_v27 = vld [vmem:[#allocation47_spill] sm:$0xff] }
0x125b   : > { %v4689_v56 = vpop.xlane.xlu1 %4688  ;;  %v5083_v63 = vrot.slane %v11077_v27, 1 }
0x125c   : > { %7522 = vrcp.f32 %v4689_v56  ;;  %v4704_v47 = vpack.c.bf16 %v4700_v0, %v4700_v0  ;;  %v5152_v13 = vsel %vm853_vm1, %v5151_v21, %v5150_v41  ;;  %v5108_v0 = vsel %vm899_vm10, %v5103_v29, 0 }
0x125d   : > { %v5154_v4 = vsel %vm856_vm2, %v5153_v9, %v5152_v13  ;;  %v5084_v56 = vsel %vm868_vm6, %v5083_v63, %v5082_v62 }
0x125e   : > { %7213 = vmatmul.mubr.msk.bf16.vlgmr.msra.gmra.mrb[124].mxu0 %vm899_vm10, %v4704_v47  ;;  %v5156_v32 = vsel %vm859_vm3, %v5155_v39, %v5154_v4  ;;  %v5085_v47 = vsel %vm871_vm7, %v11078_v28, %v5084_v56 }
0x125f   : > { %v5025_v26 = vpop.permute.xlu1 %5024  ;;  %7224 = vmatprep.mubr.msk.bf16.mxu0 %vm7672_vm8, %v10905_v22  ;;  %v5158_v5 = vsel %vm862_vm4, %v5157_v24, %v5156_v32  ;;  %v5086_v35 = vpack.c.b16 %v5085_v47, %v5085_v47  ;;  %v11079_v24 = vld [vmem:[#allocation9_spill] sm:$0xff] }
0x1260   : > { %v5030_v40 = vsel %vm899_vm10, %v5025_v26, 0  ;;  %v5160_v11 = vsel %vm865_vm5, %v5159_v38, %v5158_v5 }
0x1261   : > { %7223 = vmatpush3.bf16.xpose.msra.mxu0 %v5030_v40 }
0x1262   : > { %7234 = vmatprep.subr.bf16.mxu0 %v10905_v22 }
0x1263   : > { %v5181_v36 = vpop.permute.xlu1 %5180 }
0x1264   : > { %v5186_v42 = vsel %vm899_vm10, %v5181_v36, 0  ;;  %v4914_v36 = vsub.s32 7, %v11079_v24 }
0x1266   : > { %v7523_v12 = vpop.eup %7522  ;;  %v4915_v38 = vrot.slane %v11080_v30, %v4914_v36  ;;  %v11084_v30 = vld [vmem:[#allocation31_spill] sm:$0xff] }
0x1267   : > { %v4699_v45 = vmul.f32 %v7523_v12, %v9982_v1  ;;  %v5162_v1 = vsel %vm868_vm6, %v5161_v55, %v5160_v11 }
0x1268   : > { %7225 = vmatmul.mubr.msk.bf16.vlgmr.msra.gmra.mrb[128].mxu0 %vm899_vm10, %v5008_v15  ;;  %v5163_v18 = vsel %vm871_vm7, %v11071_v48, %v5162_v1 }
0x1269   : > { %7235 = vmatpush3.bf16.xpose.msra.mxu0 %v5186_v42  ;;  %v4703_v3 = vpack.c.bf16 %v4699_v45, %v4699_v45  ;;  %7236 = vmatprep.mubr.msk.bf16.mxu0 %vm7672_vm8, %v10905_v22  ;;  %v5164_v14 = vpack.c.b16 %v5163_v18, %v5163_v18 }
0x126a   : > { %7246 = vmatprep.subr.bf16.mxu0 %v10905_v22 }
0x126b   : > { %7207 = vmatmul.mubr.msk.bf16.vlgmr.msra.gmra.mrb[116].mxu1 %vm899_vm10, %v4703_v3 }
0x126c   : > { %7217 = vmatpush3.bf16.xpose.msra.mxu1 %v4952_v31  ;;  %7218 = vmatprep.mubr.msk.bf16.mxu1 %vm7672_vm8, %v10905_v22 }
0x126d   : > { %7228 = vmatprep.subr.bf16.mxu1 %v10905_v22 }
0x1270   : > { %7237 = vmatmul.mubr.msk.bf16.vlgmr.msra.gmra.mrb[132].mxu0 %vm899_vm10, %v5164_v14 }
0x1271   : > { %7248 = vmatprep.mubr.msk.bf16.mxu0 %vm7672_vm8, %v10905_v22 }
0x1273   : > { %7219 = vmatmul.mubr.msk.bf16.vlgmr.msra.gmra.mrb[120].mxu1 %vm899_vm10, %v4930_v2 }
0x1274   : > { %7229 = vmatpush3.bf16.xpose.msra.mxu1 %v5108_v0  ;;  %7230 = vmatprep.mubr.msk.bf16.mxu1 %vm7672_vm8, %v10905_v22 }
0x1275   : > { %7240 = vmatprep.subr.bf16.mxu1 %v10905_v22 }
0x127b   : > { %7231 = vmatmul.mubr.msk.bf16.vlgmr.msra.gmra.mrb[124].mxu1 %vm899_vm10, %v5086_v35 }
0x127c   : > { %7242 = vmatprep.mubr.msk.bf16.mxu1 %vm7672_vm8, %v10905_v22 }
0x12fc   : > { %v10138_v6 = vpop.f32.mrb[120].mxu0 }
0x12fd   : > { %v7202_v26 = vpop.f32.mrb[121].mxu0 }
0x12fe   : > { %v4798_v51 = vpop.f32.mrb[122].mxu0 }
0x12ff   : > { %v7203_v41 = vpop.f32.mrb[123].mxu0 }
0x1305   : > { %v10140_v40 = vpop.f32.mrb[112].mxu1 }
0x1306   : > { %v7196_v57 = vpop.f32.mrb[113].mxu1 }
0x1307   : > { %v4750_v21 = vpop.f32.mrb[114].mxu1 }
0x1308   : > { %v7197_v46 = vpop.f32.mrb[115].mxu1 }
0x1331   : > { %v10142_v44 = vpop.f32.mrb[124].mxu0 }
0x1332   : > { %v7214_v13 = vpop.f32.mrb[125].mxu0 }
0x1333   : > { %v4894_v39 = vpop.f32.mrb[126].mxu0 }
0x1334   : > { %v7215_v9 = vpop.f32.mrb[127].mxu0  ;;  %v11081_v39 = vld [vmem:[#allocation30_spill] sm:$0xff] }
0x1335   : > { %v11082_v9 = vld [vmem:[#allocation26_spill] sm:$0xff] }
0x1336   : > { %v11083_v36 = vpack.i.bf16 %v11081_v39, %v11082_v9 }
0x133b   : > { %v5066_v12 = vpop.f32.mrb[128].mxu0 }
0x133c   : > { %v5067_v15 = vadd.f32 %v5066_v12, %v4915_v38  ;;  %v7226_v4 = vpop.f32.mrb[129].mxu0 }
0x133d   : > { %v5069_v55 = vpop.f32.mrb[130].mxu0  ;;  %v11090_v4 = vld [vmem:[#allocation12_spill] sm:$0xff] }
0x133e   : > { %v10146_v45 = vpop.f32.mrb[116].mxu1  ;;  %v7227_v32 = vpop.f32.mrb[131].mxu0  ;;  %v5231_v58 = vsel %vm899_vm10, %v5067_v15, -inf  ;;  %v11091_v55 = vld [vmem:[#allocation40_spill] sm:$0xff] }
0x133f   : > { %5232 = vmax.xlane.f32.xlu1 %v5231_v58  ;;  %v7208_v42 = vpop.f32.mrb[117].mxu1  ;;  %v11092_v32 = vpack.i.bf16 %v11090_v4, %v11091_v55  ;;  %v11093_v58 = vld [vmem:[#allocation42_spill] sm:$0xff] }
0x1340   : > { %v4846_v5 = vpop.f32.mrb[118].mxu1 }
0x1341   : > { %v7209_v20 = vpop.f32.mrb[119].mxu1  ;;  %v11096_v5 = vld [vmem:[#allocation46_spill] sm:$0xff] }
0x1342   : > { %v11097_v20 = vpack.i.bf16 %v9952_v53, %v11096_v5 }
0x1343   : > { %v5222_v3 = vpop.f32.mrb[132].mxu0 }
0x1344   : > { %v7238_v11 = vpop.f32.mrb[133].mxu0  ;;  %v5223_v37 = vadd.f32 %v5222_v3, %v4915_v38  ;;  %v11098_v3 = vld [vmem:[#allocation13_spill] sm:$0xff] }
0x1345   : > { %v5225_v1 = vpop.f32.mrb[134].mxu0  ;;  %v11099_v11 = vld [vmem:[#allocation11_spill] sm:$0xff] }
0x1346   : > { %v4988_v7 = vpop.f32.mrb[120].mxu1  ;;  %v7239_v8 = vpop.f32.mrb[135].mxu0  ;;  %v5237_v29 = vsel %vm899_vm10, %v5223_v37, -inf  ;;  %v11100_v1 = vpack.i.bf16 %v11098_v3, %v11099_v11  ;;  %v11109_v11 = vld [vmem:[#allocation35_spill] sm:$0xff] }
0x1347   : > { %v4989_v31 = vadd.f32 %v4988_v7, %v4915_v38  ;;  %v7220_v48 = vpop.f32.mrb[121].mxu1  ;;  %v11101_v7 = vld [vmem:[#allocation17_spill] sm:$0xff]  ;;  %v11102_v8 = vld [vmem:[#allocation15_spill] sm:$0xff] }
0x1348   : > { %v4991_v18 = vpop.f32.mrb[122].mxu1  ;;  %v11104_v48 = vld [vmem:[#allocation16_spill] sm:$0xff] }
0x1349   : > { %v7221_v52 = vpop.f32.mrb[123].mxu1  ;;  %v5228_v33 = vsel %vm899_vm10, %v4989_v31, -inf  ;;  %v11105_v18 = vld [vmem:[#allocation44_spill] sm:$0xff] }
0x134a   : > { %5229 = vmax.xlane.f32.xlu0 %v5228_v33  ;;  %v11106_v52 = vpack.i.bf16 %v11104_v48, %v11105_v18 }
0x134e   : > { %v5144_v16 = vpop.f32.mrb[124].mxu1 }
0x134f   : > { %v5145_v59 = vadd.f32 %v5144_v16, %v4915_v38  ;;  %v7232_v49 = vpop.f32.mrb[125].mxu1  ;;  %v11085_v38 = vld [vmem:[#allocation27_spill] sm:$0xff] }
0x1350   : > { %5276 = vrot.lane.b32.xlu1 %v10015_v23, %s7674_s24  ;;  %v5147_v60 = vpop.f32.mrb[126].mxu1  ;;  %v11086_v12 = vpack.i.bf16 %v11084_v30, %v11085_v38 }
0x1351   : > { %v7233_v14 = vpop.f32.mrb[127].mxu1  ;;  %v5234_v19 = vsel %vm899_vm10, %v5145_v59, -inf }
0x1352   : > { %5235 = vmax.xlane.f32.xlu0 %v5234_v19 }
0x1356   : > { %5238 = vmax.xlane.f32.xlu0 %v5237_v29  ;;  %v7410_v29 = vld [vmem:[%s10772_s6] sm:$0xff]  }
0x13cc   : > { %v5233_v61 = vpop.xlane.xlu1 %5232 }
0x13cd   : > { %v5241_v34 = vsub.f32 %v5067_v15, %v5233_v61  ;;  %v11088_v15 = vld [vmem:[#allocation24_spill] sm:$0xff] }
0x13cf   : > { %v5246_v10 = vmul.f32 1.442695, %v5241_v34 }
0x13d0   : > { %v5277_v25 = vpop.permute.xlu1 %5276 }
0x13d1   : > { %7524 = vpow2.f32 %v5246_v10  ;;  %v5282_v2 = vsel %vm1281_vm12, %v5277_v25, 0 }
0x13d2   : > { %7241 = vmatpush3.bf16.msra.mxu1 %v5282_v2 }
0x13d3   : > { %7252 = vmatprep.subr.bf16.mxu1 %v10905_v22 }
0x13d7   : > { %v5230_v23 = vpop.xlane.xlu0 %5229 }
0x13d8   : > { %v5240_v17 = vsub.f32 %v4989_v31, %v5230_v23  ;;  %v11103_v31 = vpack.i.bf16 %v11101_v7, %v11102_v8  ;;  %v11110_v7 = vld [vmem:[#allocation34_spill] sm:$0xff] }
0x13da   : > { %v5244_v27 = vmul.f32 1.442695, %v5240_v17 }
0x13db   : > { %v7525_v63 = vpop.eup %7524 }
0x13dc   : > { %7526 = vpow2.f32 %v5244_v27  ;;  %v5255_v0 = vsel %vm899_vm10, %v7525_v63, 0.0 }
0x13dd   : > { %5256 = vadd.xlane.f32.xlu0 %v5255_v0 }
0x13df   : > { %v5236_v62 = vpop.xlane.xlu0 %5235 }
0x13e0   : > { %v5242_v56 = vsub.f32 %v5145_v59, %v5236_v62 }
0x13e2   : > { %v5248_v28 = vmul.f32 1.442695, %v5242_v56 }
0x13e3   : > { %v5239_v47 = vpop.xlane.xlu0 %5238 }
0x13e4   : > { %7528 = vpow2.f32 %v5248_v28  ;;  %v5243_v35 = vsub.f32 %v5223_v37, %v5239_v47 }
0x13e6   : > { %v7527_v26 = vpop.eup %7526  ;;  %v5250_v51 = vmul.f32 1.442695, %v5243_v35 }
0x13e7   : > { %v5252_v41 = vsel %vm899_vm10, %v7527_v26, 0.0 }
0x13e8   : > { %7530 = vpow2.f32 %v5250_v51  ;;  %5253 = vadd.xlane.f32.xlu1 %v5252_v41  ;;  %v7411_v51 = vld [vmem:[%s10772_s6 + $0x8] sm:$0xff]  }
0x13ee   : > { %v7529_v57 = vpop.eup %7528 }
0x13ef   : > { %v5258_v21 = vsel %vm899_vm10, %v7529_v57, 0.0 }
0x13f0   : > { %5259 = vadd.xlane.f32.xlu1 %v5258_v21 }
0x13f2   : > { %v10159_v46 = vpop.eup %7530 }
0x13f3   : > { %v5261_v13 = vsel %vm899_vm10, %v10159_v46, 0.0 }
0x13f4   : > { %5262 = vadd.xlane.f32.xlu0 %v5261_v13  ;;  %v11108_v13 = vld [vmem:[#allocation25_spill] sm:$0xff] }
0x1401   : > { %5372 = vrot.lane.b32.xlu1 %v10030_v43, %s7674_s24  ;;  %v11087_v43 = vld [vmem:[#allocation10_spill] sm:$0xff] }
0x1405   : > { %5420 = vrot.lane.b32.xlu1 %v10045_v54, %s7674_s24  ;;  %v11089_v54 = vpack.i.bf16 %v11087_v43, %v11088_v15 }
0x1409   : > { %7346 = vrot.lane.b32.xlu1 %v11083_v36, %s7675_s18 }
0x140a   : > { %5324 = vrot.lane.b32.xlu0 %v10039_v50, %s7674_s24  ;;  %v11094_v50 = vld [vmem:[#allocation32_spill] sm:$0xff]  ;;  %s10711_s24 = scalar_lea.hbm %s10776_s10, %s6719_s23 }
0x140b   : > { %v11095_v42 = vpack.i.bf16 %v11093_v58, %v11094_v50 }
0x140d   : > { %7356 = vrot.lane.b32.xlu1 %v11086_v12, %s7676_s12 }
0x140e   : > { %7341 = vrot.lane.b32.xlu0 %v11089_v54, %s7677_s20 }
0x1411   : > { %7366 = vrot.lane.b32.xlu1 %v11092_v32, %s7676_s12 }
0x1412   : > { %7351 = vrot.lane.b32.xlu0 %v11095_v42, %s7677_s20 }
0x1415   : > { %7376 = vrot.lane.b32.xlu1 %v11097_v20, %s7675_s18 }
0x1416   : > { %7361 = vrot.lane.b32.xlu0 %v11100_v1, %s7675_s18 }
0x1419   : > { %7381 = vrot.lane.b32.xlu1 %v11103_v31, %s7676_s12 }
0x141a   : > { %7371 = vrot.lane.b32.xlu0 %v11106_v52, %s7677_s20 }
0x146a   : > { %v5257_v33 = vpop.xlane.xlu0 %5256 }
0x1475   : > { %v5254_v16 = vpop.xlane.xlu1 %5253 }
0x1476   : > { %7532 = vrcp.f32 %v5254_v16 }
0x1477   : > { %7534 = vrcp.f32 %v5257_v33 }
0x147d   : > { %v5260_v53 = vpop.xlane.xlu1 %5259 }
0x147e   : > { %7536 = vrcp.f32 %v5260_v53 }
0x1480   : > { %v7533_v59 = vpop.eup %7532 }
0x1481   : > { %v7535_v49 = vpop.eup %7534  ;;  %v5268_v60 = vmul.f32 %v7533_v59, %v7527_v26  ;;  %v5373_v37 = vpop.permute.xlu1 %5372 }
0x1482   : > { %v5263_v14 = vpop.xlane.xlu0 %5262  ;;  %v5269_v61 = vmul.f32 %v7535_v49, %v7525_v63  ;;  %v5378_v34 = vsel %vm1281_vm12, %v5373_v37, 0 }
0x1483   : > { %7538 = vrcp.f32 %v5263_v14  ;;  %v5272_v19 = vpack.c.bf16 %v5268_v60, %v5268_v60  ;;  %v11111_v14 = vld [vmem:[#allocation38_spill] sm:$0xff] }
0x1484   : > { %v5273_v17 = vpack.c.bf16 %v5269_v61, %v5269_v61 }
0x1485   : > { %7243 = vmatmul.mubr.msk.bf16.vlgmr.msra.gmra.mrb[128].mxu1 %vm899_vm10, %v5272_v19  ;;  %v5421_v10 = vpop.permute.xlu1 %5420 }
0x1486   : > { %v5325_v25 = vpop.permute.xlu0 %5324  ;;  %7253 = vmatpush3.bf16.msra.mxu1 %v5378_v34  ;;  %7254 = vmatprep.mubr.msk.bf16.mxu1 %vm7672_vm8, %v10905_v22  ;;  %v5426_v62 = vsel %vm1281_vm12, %v5421_v10, 0 }
0x1487   : > { %v5330_v2 = vsel %vm1281_vm12, %v5325_v25, 0  ;;  %7264 = vmatprep.subr.bf16.mxu1 %v7410_v29 }
0x1488   : > { %7247 = vmatpush3.bf16.msra.mxu0 %v5330_v2  ;;  %v7537_v23 = vpop.eup %7536 }
0x1489   : > { %7258 = vmatprep.subr.bf16.mxu0 %v10905_v22  ;;  %v5270_v27 = vmul.f32 %v7537_v23, %v7529_v57  ;;  %v7347_v63 = vpop.permute.xlu1 %7346  ;;  %v11107_v57 = vld [vmem:[#allocation29_spill] sm:$0xff] }
0x148a   : > { %v7342_v0 = vpop.permute.xlu0 %7341  ;;  %v7348_v56 = vunpack.i.l.bf16 %v7347_v63  ;;  %v7349_v35 = vunpack.i.h.bf16 %v7347_v63 }
0x148b   : > { %v7344_v28 = vunpack.i.h.bf16 %v7342_v0  ;;  %v7343_v47 = vunpack.i.l.bf16 %v7342_v0  ;;  %7249 = vmatmul.mubr.msk.bf16.vlgmr.msra.gmra.mrb[136].mxu0 %vm899_vm10, %v5273_v17  ;;  %v5274_v26 = vpack.c.bf16 %v5270_v27, %v5270_v27 }
0x148c   : > { %7259 = vmatpush3.bf16.msra.mxu0 %v5426_v62  ;;  %7260 = vmatprep.mubr.msk.bf16.mxu0 %vm7672_vm8, %v10905_v22 }
0x148d   : > { %v7539_v41 = vpop.eup %7538  ;;  %v2054_v21 = vsel %vm899_vm10, %v11107_v57, %v7344_v28  ;;  %v1481_v39 = vsel %vm899_vm10, %v11108_v13, %v7343_v47  ;;  %7255 = vmatmul.mubr.msk.bf16.vlgmr.msra.gmra.mrb[132].mxu1 %vm899_vm10, %v5274_v26  ;;  %v7357_v36 = vpop.permute.xlu1 %7356 }
0x148e   : > { %v5271_v9 = vmul.f32 %v7539_v41, %v10159_v46  ;;  %v7352_v30 = vpop.permute.xlu0 %7351  ;;  %v7359_v38 = vunpack.i.h.bf16 %v7357_v36  ;;  %v7358_v22 = vunpack.i.l.bf16 %v7357_v36  ;;  %v1483_v12 = vsel %vm1482_vm13, %v1481_v39, %v7348_v56  ;;  %7265 = vmatpush3.bf16.msra.mxu1 %v7410_v29  ;;  %v11112_v29 = vld [vmem:[#allocation14_spill] sm:$0xff] }
0x148f   : > { %v2055_v43 = vsel %vm1482_vm13, %v2054_v21, %v7349_v35  ;;  %v7354_v15 = vunpack.i.h.bf16 %v7352_v30  ;;  %v7353_v54 = vunpack.i.l.bf16 %v7352_v30  ;;  %7266 = vmatprep.subr.bf16.mxu1 %v7411_v51  ;;  %v10258_v30 = vld [vmem:[%s7849_s11] sm:$0xff] }
0x1490   : > { %v5275_v4 = vpack.c.bf16 %v5271_v9, %v5271_v9  ;;  %v1485_v55 = vsel %vm1484_vm14, %v1483_v12, %v7358_v22  ;;  %v2056_v46 = vsel %vm1484_vm14, %v2055_v43, %v7359_v38  ;;  %v5859_v38 = vrot.slane %v10258_v30, 2 }
0x1491   : > { %v5483_v32 = vpack.c.bf16 %v2056_v46, %v1485_v55  ;;  %v7367_v58 = vpop.permute.xlu1 %7366  ;;  %v3196_v1 = vsel %vm899_vm10, %v11109_v11, %v7354_v15  ;;  %v2625_v8 = vsel %vm899_vm10, %v11110_v7, %v7353_v54  ;;  %v10270_v54 = vld [vmem:[%s10773_s7] ss:$0 sm:$0xff]  ;;  %v5972_v7 = vrot.slane %v10258_v30, 3 }
0x1492   : > { %v7362_v50 = vpop.permute.xlu0 %7361  ;;  %v7369_v42 = vunpack.i.h.bf16 %v7367_v58  ;;  %v7368_v5 = vunpack.i.l.bf16 %v7367_v58  ;;  %7267 = vmatpush3.bf16.msra.mxu1 %v7411_v51 }
0x1493   : > { %v7364_v20 = vunpack.i.h.bf16 %v7362_v50  ;;  %v7363_v3 = vunpack.i.l.bf16 %v7362_v50  ;;  %7261 = vmatmul.mubr.msk.bf16.vlgmr.msra.gmra.mrb[140].mxu0 %vm899_vm10, %v5275_v4  ;;  %7268 = vmatprep.mubr.msk.bf16.mxu1 %vm445_vm0, %v5483_v32  ;;  %v10275_v32 = vld [vmem:[%s7849_s11 + $0x18] sm:$0xff] }
0x1495   : > { %v2626_v31 = vsel %vm1482_vm13, %v2625_v8, %v7363_v3  ;;  %v3197_v48 = vsel %vm1482_vm13, %v3196_v1, %v7364_v20  ;;  %v7377_v33 = vpop.permute.xlu1 %7376 }
0x1496   : > { %v2627_v18 = vsel %vm1484_vm14, %v2626_v31, %v7368_v5  ;;  %v3198_v52 = vsel %vm1484_vm14, %v3197_v48, %v7369_v42  ;;  %v7372_v16 = vpop.permute.xlu0 %7371  ;;  %v7379_v49 = vunpack.i.h.bf16 %v7377_v33  ;;  %v7378_v60 = vunpack.i.l.bf16 %v7377_v33  ;;  %v10280_v42 = vld [vmem:[%s7849_s11 + $0x10] sm:$0xff]  ;;  %v11113_v31 = vld [vmem:[#allocation54_spill] sm:$0xff]  ;;  %v10293_v33 = vld [vmem:[%s7849_s11 + $0x20] sm:$0xff] }
0x1497   : > { %v5484_v53 = vpack.c.bf16 %v3198_v52, %v2627_v18  ;;  %v7374_v59 = vunpack.i.h.bf16 %v7372_v16  ;;  %v7373_v37 = vunpack.i.l.bf16 %v7372_v16  ;;  %v5621_v20 = vrot.slane %v10280_v42, 6 }
0x1498   : > { %v5865_v16 = vrot.slane %v10293_v33, 6 }
0x1499   : > { %v4338_v19 = vsel %vm899_vm10, %v11111_v14, %v7374_v59  ;;  %7269 = vmatmul.mubr.msk.bf16.vlgmr.msra.gmra.mrb[136].mxu1 %vm445_vm0, %v5484_v53  ;;  %v3767_v61 = vsel %vm899_vm10, %v11112_v29, %v7373_v37  ;;  %v7382_v34 = vpop.permute.xlu1 %7381  ;;  %v5746_v53 = vrot.slane %v10258_v30, 1  ;;  %v11114_v59 = vld [vmem:[#allocation55_spill] sm:$0xff]  ;;  %v5623_v14 = vrot.slane %v10275_v32, 5 }
0x149a   : > { %v7384_v10 = vunpack.i.h.bf16 %v7382_v34  ;;  %v7383_v25 = vunpack.i.l.bf16 %v7382_v34  ;;  %v3768_v2 = vsel %vm1482_vm13, %v3767_v61, %v7378_v60  ;;  %v4339_v23 = vsel %vm1482_vm13, %v4338_v19, %v7379_v49  ;;  %v11115_v19 = vld [vmem:[#allocation56_spill] sm:$0xff] }
0x149b   : > { %v5975_v34 = vrot.slane %v10280_v42, 1 }
0x149c   : > { %v3769_v17 = vsel %vm1484_vm14, %v3768_v2, %v7383_v25  ;;  %v4340_v27 = vsel %vm1484_vm14, %v4339_v23, %v7384_v10  ;;  %v11116_v10 = vld [vmem:[#allocation57_spill] sm:$0xff]  ;;  %v10306_v2 = vld [vmem:[%s7849_s11 + $0x28] sm:$0xff] }
0x149d   : > { %v5485_v63 = vpack.c.bf16 %v4340_v27, %v3769_v17  ;;  %v5867_v23 = vrot.slane %v10306_v2, 5  ;;  %v5748_v27 = vrot.slane %v10280_v42, 7 }
0x149f   : > { %7272 = vmatprep.mubr.msk.bf16.mxu1 %vm445_vm0, %v5485_v63 }
0x1558   : > { %v10251_v0 = vpop.f32.mrb[128].mxu1 }
0x1559   : > { %v7244_v62 = vpop.f32.mrb[129].mxu1 }
0x155a   : > { %v5321_v56 = vpop.f32.mrb[130].mxu1  ;;  %v5625_v62 = vrot.slane %v10293_v33, 4 }
0x155b   : > { %v7245_v28 = vpop.f32.mrb[131].mxu1 }
0x155e   : > { %v5366_v47 = vpop.f32.mrb[136].mxu0 }
0x155f   : > { %v7385_v35 = vpack.i.bf16 %v5366_v47, %v10138_v6  ;;  %v7250_v26 = vpop.f32.mrb[137].mxu0  ;;  %v10262_v6 = vld [vmem:[%s7849_s11 + $0x8] sm:$0xff]  ;;  %v10317_v47 = vld [vmem:[%s7849_s11 + $0x30] sm:$0xff] }
0x1560   : > { %v5369_v51 = vpop.f32.mrb[138].mxu0  ;;  %v5414_v57 = vpop.f32.mrb[132].mxu1  ;;  %v5860_v22 = vrot.slane %v10262_v6, 1  ;;  %v5619_v55 = vrot.slane %v10262_v6, 7  ;;  %v5973_v8 = vrot.slane %v10262_v6, 2  ;;  %v5747_v56 = vsel %vm853_vm1, %v10262_v6, %v5746_v53 }
0x1561   : > { %7386 = vrot.lane.b32.xlu0 %v7385_v35, %s7677_s20  ;;  %v7251_v41 = vpop.f32.mrb[139].mxu0  ;;  %v7390_v21 = vpack.i.bf16 %v5414_v57, %v10146_v45  ;;  %v7256_v13 = vpop.f32.mrb[133].mxu1  ;;  %v5869_v35 = vrot.slane %v10317_v47, 4  ;;  %v5750_v51 = vrot.slane %v10275_v32, 6  ;;  %v5627_v57 = vrot.slane %v10306_v2, 3 }
0x1562   : > { %v5417_v39 = vpop.f32.mrb[134].mxu1  ;;  %v5861_v4 = vsel %vm853_vm1, %v5860_v22, %v5859_v38  ;;  %v5620_v1 = vsel %vm853_vm1, %v5619_v55, %v10258_v30  ;;  %v5974_v17 = vsel %vm853_vm1, %v5973_v8, %v5972_v7  ;;  %v5752_v22 = vrot.slane %v10293_v33, 5 }
0x1563   : > { %v7257_v9 = vpop.f32.mrb[135].mxu1  ;;  %v5862_v5 = vsel %vm856_vm2, %v10280_v42, %v5861_v4  ;;  %v5622_v61 = vsel %vm856_vm2, %v5621_v20, %v5620_v1  ;;  %v5976_v26 = vsel %vm856_vm2, %v5975_v34, %v5974_v17  ;;  %v5978_v39 = vrot.slane %v10293_v33, 7 }
0x1564   : > { %v5624_v28 = vsel %vm859_vm3, %v5623_v14, %v5622_v61  ;;  %v10328_v9 = vld [vmem:[%s7849_s11 + $0x38] sm:$0xff]  ;;  %v5977_v38 = vsel %vm859_vm3, %v10275_v32, %v5976_v26  ;;  %v5980_v4 = vrot.slane %v10306_v2, 6  ;;  %v5982_v20 = vrot.slane %v10317_v47, 5  ;;  %s7594_s11 = scalar_lea.vmem %s10713_s22, 1024 }
0x1565   : > { %7391 = vrot.lane.b32.xlu0 %v7390_v21, %s7675_s18  ;;  %v5749_v21 = vsel %vm856_vm2, %v5748_v27, %v5747_v56  ;;  %v5626_v13 = vsel %vm862_vm4, %v5625_v62, %v5624_v28  ;;  %v5979_v55 = vsel %vm862_vm4, %v5978_v39, %v5977_v38  ;;  %v6311_v39 = vrot.slane %v10258_v30, 6  ;;  %p7595_p11 = scmp.ne.s32.totalorder %s10713_s22, %s7594_s11  ;;  %s7679_s18 = smov [#allocation5]  }
0x1566   : > { %v5462_v36 = vpop.f32.mrb[140].mxu0  ;;  %v6088_v38 = vrot.slane %v10280_v42, 2 }
0x1567   : > { %v7395_v12 = vpack.i.bf16 %v5462_v36, %v10142_v44  ;;  %v7262_v43 = vpop.f32.mrb[141].mxu0  ;;  %v5863_v44 = vrot.slane %v10275_v32, 7  ;;  %v5871_v36 = vrot.slane %v10328_v9, 3  ;;  %p7596_p13 = pnand %p7595_p11, %p11121_p12 }
0x1568   : > { %v5465_v45 = vpop.f32.mrb[142].mxu0  ;;  %v5629_v43 = vrot.slane %v10317_v47, 2 }
0x1569   : > { %7396 = vrot.lane.b32.xlu1 %v7395_v12, %s7676_s12  ;;  %v7263_v15 = vpop.f32.mrb[143].mxu0  ;;  %v5864_v37 = vsel %vm859_vm3, %v5863_v44, %v5862_v5  ;;  %v5751_v45 = vsel %vm859_vm3, %v5750_v51, %v5749_v21  ;;  %v6085_v21 = vrot.slane %v10258_v30, 4  ;;  %p7597_p4 = pneg %p7596_p13  ;;  %s7598_s12 = sshll.u32 %s7679_s18, 4  ;;  %s7599_s12 = int_to_ptr.vmem [resolvable:$false] %s7598_s12 }
0x156a   : > { %v5866_v63 = vsel %vm862_vm4, %v5865_v16, %v5864_v37  ;;  %v5628_v15 = vsel %vm865_vm5, %v5627_v57, %v5626_v13  ;;  %v6198_v13 = vrot.slane %v10258_v30, 5  ;;  %s7600_s21 = scalar_lea.vmem %s7599_s12, 2048  ;;  %p7601_p10 = scmp.lt.s32.totalorder %s10713_s22, %s7599_s12 }
0x156b   : > { %v5868_v41 = vsel %vm865_vm5, %v5867_v23, %v5866_v63  ;;  %v5630_v5 = vsel %vm868_vm6, %v5629_v43, %v5628_v15  ;;  %v6425_v43 = vrot.slane %v10262_v6, 6  ;;  %v6314_v15 = vrot.slane %v10280_v42, 4  ;;  %p7602_p1 = scmp.lt.s32.totalorder %s7600_s21, %s7594_s11 }
0x156c   : > { %v7270_v46 = vpop.f32.mrb[136].mxu1  ;;  %v5870_v12 = vsel %vm868_vm6, %v5869_v35, %v5868_v41 }
0x156d   : > { %v5565_v58 = vadd.f32 %v7270_v46, %v10270_v54  ;;  %v5556_v50 = vpop.f32.mrb[137].mxu1  ;;  %v5754_v46 = vrot.slane %v10306_v2, 4  ;;  %v5872_v44 = vsel %vm871_vm7, %v5871_v36, %v5870_v12  ;;  %v6312_v36 = vrot.slane %v10262_v6, 5  ;;  %p7603_p3 = por %p7602_p1, %p7601_p10 }
0x156e   : > { %v5557_v3 = vadd.f32 %v10270_v54, %v5556_v50  ;;  %v7271_v11 = vpop.f32.mrb[138].mxu1  ;;  %v5753_v50 = vsel %vm862_vm4, %v5752_v22, %v5751_v45  ;;  %v6424_v12 = vrot.slane %v10258_v30, 7  ;;  %v6201_v45 = vrot.slane %v10280_v42, 3 }
0x156f   : > { %v5858_v48 = vadd.f32 %v11113_v31, %v5565_v58  ;;  %v5568_v18 = vadd.f32 %v7271_v11, %v10270_v54  ;;  %v5559_v52 = vpop.f32.mrb[139].mxu1  ;;  %v5631_v58 = vrot.slane %v10328_v9, 1  ;;  %v5756_v11 = vrot.slane %v10317_v47, 3  ;;  %p7604_p5 = pnand %p7603_p3, %p7597_p4 }
0x1570   : > { %v5610_v49 = vadd.f32 %v11114_v59, %v5557_v3  ;;  %v5560_v60 = vadd.f32 %v10270_v54, %v5559_v52  ;;  %v5981_v3 = vsel %vm865_vm5, %v5980_v4, %v5979_v55  ;;  %v5755_v7 = vsel %vm865_vm5, %v5754_v46, %v5753_v50 }
0x1571   : > { %v5971_v29 = vadd.f32 %v11115_v19, %v5568_v18  ;;  %v10348_v1 = vadd.f32 %v5872_v44, %v5858_v48  ;;  %v5632_v8 = vsel %vm871_vm7, %v5631_v58, %v5630_v5  ;;  %v5984_v31 = vrot.slane %v10328_v9, 4 }
0x1572   : > { %v5745_v25 = vadd.f32 %v11116_v10, %v5560_v60  ;;  %v5983_v18 = vsel %vm868_vm6, %v5982_v20, %v5981_v3  ;;  %v5758_v52 = vrot.slane %v10328_v9, 2  ;;  %v5757_v16 = vsel %vm868_vm6, %v5756_v11, %v5755_v7 }
0x1573   : > { %v5875_v53 = vsel %vm445_vm0, %v10348_v1, 0.0  ;;  %v10358_v59 = vadd.f32 %v5632_v8, %v5610_v49  ;;  %v5985_v48 = vsel %vm871_vm7, %v5984_v31, %v5983_v18  ;;  %v6090_v4 = vrot.slane %v10275_v32, 1 }
0x1574   : > { %v5759_v60 = vsel %vm871_vm7, %v5758_v52, %v5757_v16  ;;  %v10364_v14 = vadd.f32 %v5985_v48, %v5971_v29  ;;  %v6313_v46 = vsel %vm853_vm1, %v6312_v36, %v6311_v39  ;;  %v6427_v58 = vrot.slane %v10280_v42, 5 }
0x1575   : > { %v5635_v37 = vsel %vm445_vm0, %v10358_v59, 0.0  ;;  %v10366_v19 = vadd.f32 %v5759_v60, %v5745_v25  ;;  %v6203_v50 = vrot.slane %v10275_v32, 2  ;;  %v6316_v30 = vrot.slane %v10275_v32, 3 }
0x1576   : > { %v5988_v61 = vsel %vm445_vm0, %v10364_v14, 0.0  ;;  %v6315_v20 = vsel %vm856_vm2, %v6314_v15, %v6313_v46  ;;  %v6429_v11 = vrot.slane %v10275_v32, 4  ;;  %v6205_v7 = vrot.slane %v10293_v33, 1 }
0x1577   : > { %v5762_v49 = vsel %vm445_vm0, %v10366_v19, 0.0  ;;  %v6318_v8 = vrot.slane %v10293_v33, 2  ;;  %v6093_v31 = vrot.slane %v10306_v2, 7  ;;  %v6317_v52 = vsel %vm859_vm3, %v6316_v30, %v6315_v20 }
0x1578   : > { %v6320_v32 = vrot.slane %v10306_v2, 1 }
0x1584   : > { %5876 = vadd.xlane.f32.xlu0 %v5875_v53  ;;  %v6431_v53 = vrot.slane %v10293_v33, 3 }
0x1588   : > { %5636 = vadd.xlane.f32.xlu0 %v5635_v37  ;;  %v6095_v37 = vrot.slane %v10317_v47, 6 }
0x158c   : > { %5989 = vadd.xlane.f32.xlu0 %v5988_v61 }
0x158d   : > { %5763 = vadd.xlane.f32.xlu1 %v5762_v49  ;;  %v6319_v49 = vsel %vm862_vm4, %v6318_v8, %v6317_v52 }
0x15d3   : > { %v7387_v34 = vpop.permute.xlu0 %7386 }
0x15d4   : > { %v7389_v23 = vunpack.i.h.bf16 %v7387_v34  ;;  %v7388_v17 = vunpack.i.l.bf16 %v7387_v34 }
0x15d6   : > { %v4909_v29 = vsel %vm899_vm10, %v10140_v40, %v7388_v17  ;;  %v5480_v25 = vsel %vm899_vm10, %v10251_v0, %v7389_v23  ;;  %v6086_v40 = vrot.slane %v10262_v6, 3  ;;  %v6199_v0 = vrot.slane %v10262_v6, 4 }
0x15d7   : > { %v7392_v10 = vpop.permute.xlu0 %7391  ;;  %v6426_v6 = vsel %vm853_vm1, %v6425_v43, %v6424_v12  ;;  %v6208_v23 = vrot.slane %v10317_v47, 7  ;;  %v11118_v43 = vld [vmem:[#allocation59_spill] sm:$0xff] }
0x15d8   : > { %v7394_v27 = vunpack.i.h.bf16 %v7392_v10  ;;  %v7393_v63 = vunpack.i.l.bf16 %v7392_v10  ;;  %v6087_v22 = vsel %vm853_vm1, %v6086_v40, %v6085_v21  ;;  %v6200_v55 = vsel %vm853_vm1, %v6199_v0, %v6198_v13  ;;  %v11117_v0 = vld [vmem:[#allocation58_spill] sm:$0xff] }
0x15d9   : > { %v6089_v44 = vsel %vm856_vm2, %v6088_v38, %v6087_v22  ;;  %v6202_v5 = vsel %vm856_vm2, %v6201_v45, %v6200_v55  ;;  %v6428_v42 = vsel %vm856_vm2, %v6427_v58, %v6426_v6  ;;  %v6433_v10 = vrot.slane %v10306_v2, 2  ;;  %v11119_v55 = vld [vmem:[#allocation60_spill] sm:$0xff] }
0x15da   : > { %v5481_v35 = vsel %vm1482_vm13, %v5480_v25, %v7394_v27  ;;  %v4910_v26 = vsel %vm1482_vm13, %v4909_v29, %v7393_v63  ;;  %v6091_v3 = vsel %vm859_vm3, %v6090_v4, %v6089_v44  ;;  %v6204_v18 = vsel %vm859_vm3, %v6203_v50, %v6202_v5  ;;  %v11120_v50 = vld [vmem:[#allocation61_spill] sm:$0xff] }
0x15db   : > { %v7397_v62 = vpop.permute.xlu1 %7396  ;;  %v6092_v16 = vsel %vm862_vm4, %v10293_v33, %v6091_v3  ;;  %v6430_v60 = vsel %vm859_vm3, %v6429_v11, %v6428_v42  ;;  %v6206_v61 = vsel %vm862_vm4, %v6205_v7, %v6204_v18  ;;  %v6097_v33 = vrot.slane %v10328_v9, 5 }
0x15dc   : > { %v7399_v56 = vunpack.i.h.bf16 %v7397_v62  ;;  %v7398_v28 = vunpack.i.l.bf16 %v7397_v62  ;;  %v6094_v34 = vsel %vm865_vm5, %v6093_v31, %v6092_v16  ;;  %v6432_v17 = vsel %vm862_vm4, %v6431_v53, %v6430_v60 }
0x15dd   : > { %v6207_v27 = vsel %vm865_vm5, %v10306_v2, %v6206_v61  ;;  %v6321_v63 = vsel %vm865_vm5, %v6320_v32, %v6319_v49  ;;  %v6096_v29 = vsel %vm868_vm6, %v6095_v37, %v6094_v34  ;;  %v6435_v25 = vrot.slane %v10317_v47, 1 }
0x15de   : > { %v4911_v51 = vsel %vm1484_vm14, %v4910_v26, %v7398_v28  ;;  %v5482_v41 = vsel %vm1484_vm14, %v5481_v35, %v7399_v56  ;;  %v6210_v26 = vrot.slane %v10328_v9, 6  ;;  %v6209_v21 = vsel %vm868_vm6, %v6208_v23, %v6207_v27 }
0x15df   : > { %v5486_v57 = vpack.c.bf16 %v5482_v41, %v4911_v51  ;;  %v6323_v51 = vrot.slane %v10328_v9, 7  ;;  %v6434_v41 = vsel %vm865_vm5, %v6433_v10, %v6432_v17  ;;  %v6322_v40 = vsel %vm868_vm6, %v10317_v47, %v6321_v63 }
0x15e0   : > { %v6098_v22 = vsel %vm871_vm7, %v6097_v33, %v6096_v29  ;;  %v6436_v4 = vsel %vm868_vm6, %v6435_v25, %v6434_v41  ;;  %v6211_v44 = vsel %vm871_vm7, %v6210_v26, %v6209_v21 }
0x15e1   : > { %7273 = vmatmul.mubr.msk.bf16.gmra.mrb[140].mxu1 %vm445_vm0, %v5486_v57  ;;  %v6324_v47 = vsel %vm871_vm7, %v6323_v51, %v6322_v40  ;;  %v6437_v3 = vsel %vm871_vm7, %v10328_v9, %v6436_v4 }
0x1611   : > { %v5877_v48 = vpop.xlane.xlu0 %5876 }
0x1612   : > { %v5878_v5 = vmul.f32 0.03125, %v5877_v48 }
0x1614   : > { %v10458_v16 = vsub.f32 %v10348_v1, %v5878_v5 }
0x1615   : > { %v5637_v56 = vpop.xlane.xlu0 %5636 }
0x1616   : > { %v5639_v12 = vmul.f32 0.03125, %v5637_v56  ;;  %v5880_v1 = vmul.f32 %v10458_v16, %v10458_v16 }
0x1618   : > { %v10450_v11 = vsub.f32 %v10358_v59, %v5639_v12 }
0x1619   : > { %v5990_v20 = vpop.xlane.xlu0 %5989 }
0x161a   : > { %v5764_v13 = vpop.xlane.xlu1 %5763  ;;  %v5991_v42 = vmul.f32 0.03125, %v5990_v20  ;;  %v5641_v59 = vmul.f32 %v10450_v11, %v10450_v11 }
0x161b   : > { %v5765_v58 = vmul.f32 0.03125, %v5764_v13 }
0x161c   : > { %v10464_v53 = vsub.f32 %v10364_v14, %v5991_v42  ;;  %v5642_v32 = vsel %vm445_vm0, %v5641_v59, 0.0  ;;  %v5881_v14 = vsel %vm445_vm0, %v5880_v1, 0.0 }
0x161d   : > { %v10454_v31 = vsub.f32 %v10366_v19, %v5765_v58  ;;  %v10500_v58 = vld [vmem:[%s10768_s2] ss:$0 sm:$0xff] }
0x161e   : > { %v5993_v37 = vmul.f32 %v10464_v53, %v10464_v53 }
0x161f   : > { %v5767_v19 = vmul.f32 %v10454_v31, %v10454_v31 }
0x1620   : > { %v5994_v61 = vsel %vm445_vm0, %v5993_v37, 0.0 }
0x1621   : > { %v5768_v60 = vsel %vm445_vm0, %v5767_v19, 0.0 }
0x16b4   : > { %v7274_v62 = vpop.f32.mrb[140].mxu1 }
0x16b5   : > { %v5581_v28 = vadd.f32 %v7274_v62, %v10270_v54  ;;  %v5572_v35 = vpop.f32.mrb[141].mxu1 }
0x16b6   : > { %v5573_v57 = vadd.f32 %v10270_v54, %v5572_v35  ;;  %v7275_v2 = vpop.f32.mrb[142].mxu1 }
0x16b7   : > { %v6310_v39 = vadd.f32 %v11117_v0, %v5581_v28  ;;  %v5584_v36 = vadd.f32 %v7275_v2, %v10270_v54  ;;  %v5575_v38 = vpop.f32.mrb[143].mxu1 }
0x16b8   : > { %v6084_v45 = vadd.f32 %v11118_v43, %v5573_v57  ;;  %v5576_v15 = vadd.f32 %v10270_v54, %v5575_v38 }
0x16b9   : > { %v6423_v46 = vadd.f32 %v11119_v55, %v5584_v36  ;;  %v6326_v8 = vadd.f32 %v6324_v47, %v6310_v39  ;;  %v7678_v55 = vmov 1966171168  }
0x16ba   : > { %v6197_v30 = vadd.f32 %v11120_v50, %v5576_v15  ;;  %v6100_v6 = vadd.f32 %v6098_v22, %v6084_v45 }
0x16bb   : > { %v6439_v52 = vadd.f32 %v6437_v3, %v6423_v46  ;;  %v6327_v9 = vsel %vm445_vm0, %v6326_v8, 0.0  ;;  %v5666_v46 = vunpack.c.l.s4 %v7678_v55 }
0x16bc   : > { %v6101_v54 = vsel %vm445_vm0, %v6100_v6, 0.0  ;;  %v6213_v7 = vadd.f32 %v6211_v44, %v6197_v30 }
0x16bd   : > { %6102 = vadd.xlane.f32.xlu1 %v6101_v54  ;;  %v6440_v48 = vsel %vm445_vm0, %v6439_v52, 0.0  ;;  %v5667_v44 = vunpack.c.0.s8 %v5666_v46 }
0x16be   : > { %v6214_v18 = vsel %vm445_vm0, %v6213_v7, 0.0 }
0x16bf   : > { %6215 = vadd.xlane.f32.xlu0 %v6214_v18  ;;  %v10509_v5 = vsub.s32 %v5667_v44, %v11079_v24 }
0x16c1   : > { %6328 = vadd.xlane.f32.xlu1 %v6327_v9 }
0x16c3   : > { %6441 = vadd.xlane.f32.xlu0 %v6440_v48 }
0x16c5   : > { %5643 = vadd.xlane.f32.xlu1 %v5642_v32 }
0x16c7   : > { %5769 = vadd.xlane.f32.xlu0 %v5768_v60 }
0x16c9   : > { %5882 = vadd.xlane.f32.xlu1 %v5881_v14 }
0x16cb   : > { %5995 = vadd.xlane.f32.xlu0 %v5994_v61 }
0x174a   : > { %v6103_v49 = vpop.xlane.xlu1 %6102 }
0x174b   : > { %v6104_v34 = vmul.f32 0.03125, %v6103_v49 }
0x174c   : > { %v6216_v10 = vpop.xlane.xlu0 %6215 }
0x174d   : > { %v10477_v23 = vsub.f32 %v6100_v6, %v6104_v34  ;;  %v6217_v17 = vmul.f32 0.03125, %v6216_v10  ;;  %v10506_v6 = vld [vmem:[%s10769_s3] ss:$0 sm:$0xff] }
0x174e   : > { %v6329_v33 = vpop.xlane.xlu1 %6328 }
0x174f   : > { %v10479_v27 = vsub.f32 %v6213_v7, %v6217_v17  ;;  %v6330_v63 = vmul.f32 0.03125, %v6329_v33  ;;  %v6106_v62 = vmul.f32 %v10477_v23, %v10477_v23 }
0x1750   : > { %v6442_v29 = vpop.xlane.xlu0 %6441 }
0x1751   : > { %v10483_v25 = vsub.f32 %v6326_v8, %v6330_v63  ;;  %v6443_v56 = vmul.f32 0.03125, %v6442_v29  ;;  %v6107_v28 = vsel %vm445_vm0, %v6106_v62, 0.0  ;;  %v6219_v35 = vmul.f32 %v10479_v27, %v10479_v27 }
0x1752   : > { %6108 = vadd.xlane.f32.xlu1 %v6107_v28  ;;  %v5644_v26 = vpop.xlane.xlu1 %5643 }
0x1753   : > { %v10488_v51 = vsub.f32 %v6439_v52, %v6443_v56  ;;  %v5645_v41 = vmul.f32 0.03125, %v5644_v26  ;;  %v6220_v57 = vsel %vm445_vm0, %v6219_v35, 0.0  ;;  %v6332_v2 = vmul.f32 %v10483_v25, %v10483_v25 }
0x1754   : > { %6221 = vadd.xlane.f32.xlu0 %v6220_v57  ;;  %v5770_v21 = vpop.xlane.xlu0 %5769 }
0x1755   : > { %v5646_v40 = vadd.f32 1e-05, %v5645_v41  ;;  %v5771_v13 = vmul.f32 0.03125, %v5770_v21  ;;  %v6333_v0 = vsel %vm445_vm0, %v6332_v2, 0.0  ;;  %v6445_v39 = vmul.f32 %v10488_v51, %v10488_v51 }
0x1756   : > { %6334 = vadd.xlane.f32.xlu1 %v6333_v0  ;;  %v5883_v36 = vpop.xlane.xlu1 %5882 }
0x1757   : > { %7540 = vrsqrt.f32 %v5646_v40  ;;  %v5772_v38 = vadd.f32 1e-05, %v5771_v13  ;;  %v5884_v22 = vmul.f32 0.03125, %v5883_v36  ;;  %v6446_v12 = vsel %vm445_vm0, %v6445_v39, 0.0 }
0x1758   : > { %6447 = vadd.xlane.f32.xlu0 %v6446_v12  ;;  %v5996_v43 = vpop.xlane.xlu0 %5995 }
0x1759   : > { %7542 = vrsqrt.f32 %v5772_v38  ;;  %v5885_v45 = vadd.f32 1e-05, %v5884_v22  ;;  %v5997_v15 = vmul.f32 0.03125, %v5996_v43 }
0x175b   : > { %7544 = vrsqrt.f32 %v5885_v45  ;;  %v5998_v4 = vadd.f32 1e-05, %v5997_v15 }
0x175d   : > { %7546 = vrsqrt.f32 %v5998_v4 }
0x1761   : > { %v7541_v47 = vpop.eup %7540 }
0x1762   : > { %v5648_v50 = vmul.f32 %v7541_v47, %v10450_v11 }
0x1763   : > { %v7543_v30 = vpop.eup %7542 }
0x1764   : > { %v5655_v20 = vmul.f32 %v10500_v58, %v5648_v50  ;;  %v5774_v3 = vmul.f32 %v7543_v30, %v10454_v31 }
0x1765   : > { %v7545_v54 = vpop.eup %7544 }
0x1766   : > { %v5662_v7 = vadd.f32 %v10506_v6, %v5655_v20  ;;  %v5775_v8 = vmul.f32 %v10500_v58, %v5774_v3  ;;  %v5887_v11 = vmul.f32 %v7545_v54, %v10458_v16 }
0x1767   : > { %v7547_v42 = vpop.eup %7546 }
0x1768   : > { %v5664_v18 = vcombine.high %v5662_v7, %v5662_v7  ;;  %v5671_v52 = vrot.slane %v5662_v7, %v10509_v5  ;;  %v5776_v9 = vadd.f32 %v10506_v6, %v5775_v8  ;;  %v5888_v24 = vmul.f32 %v10500_v58, %v5887_v11 }
0x1769   : > { %v6000_v59 = vmul.f32 %v7547_v42, %v10464_v53 }
0x176a   : > { %v5678_v31 = vrot.slane %v5664_v18, %v10509_v5  ;;  %v5679_v48 = vcombine.high %v5671_v52, %v5671_v52  ;;  %v5687_v19 = vrot.slane %v5671_v52, %v10509_v5  ;;  %v5778_v32 = vcombine.high %v5776_v9, %v5776_v9 }
0x176b   : > { %v5785_v16 = vrot.slane %v5776_v9, %v10509_v5  ;;  %v5889_v1 = vadd.f32 %v10506_v6, %v5888_v24  ;;  %v6001_v60 = vmul.f32 %v10500_v58, %v6000_v59 }
0x176c   : > { %v5680_v37 = vcombine.high %v5678_v31, %v5678_v31  ;;  %v5694_v14 = vrot.slane %v5678_v31, %v10509_v5  ;;  %v5701_v61 = vrot.slane %v5679_v48, %v10509_v5  ;;  %v5709_v49 = vcombine.high %v5687_v19, %v5687_v19  ;;  %5722 = vst.msk [vmem:[%s10529_s29] sm:$0x1] %vm5721_vm15, %v5687_v19 }
0x176d   : > { %v5792_v53 = vrot.slane %v5778_v32, %v10509_v5  ;;  %v5793_v34 = vcombine.high %v5785_v16, %v5785_v16  ;;  %v5801_v10 = vrot.slane %v5785_v16, %v10509_v5  ;;  %v5891_v17 = vcombine.high %v5889_v1, %v5889_v1 }
0x176e   : > { %v5708_v33 = vrot.slane %v5680_v37, %v10509_v5  ;;  %v5710_v63 = vcombine.high %v5694_v14, %v5694_v14  ;;  %v5711_v62 = vcombine.high %v5701_v61, %v5701_v61  ;;  %5723 = vst.msk [vmem:[%s10529_s29 + $0x8] sm:$0x1] %vm5721_vm15, %v5701_v61  ;;  %5724 = vst.msk [vmem:[%s10529_s29 + $0x10] sm:$0x1] %vm5721_vm15, %v5709_v49 }
0x176f   : > { %5726 = vst.msk [vmem:[%s10529_s29 + $0x20] sm:$0x1] %vm5721_vm15, %v5694_v14  ;;  %v5898_v29 = vrot.slane %v5889_v1, %v10509_v5  ;;  %v5794_v56 = vcombine.high %v5792_v53, %v5792_v53  ;;  %v5808_v28 = vrot.slane %v5792_v53, %v10509_v5  ;;  %v5815_v35 = vrot.slane %v5793_v34, %v10509_v5 }
0x1770   : > { %v5823_v26 = vcombine.high %v5801_v10, %v5801_v10  ;;  %5835 = vst.msk [vmem:[%s10529_s29 + $0x1] sm:$0x1] %vm5721_vm15, %v5801_v10  ;;  %v5712_v41 = vcombine.high %v5708_v33, %v5708_v33  ;;  %5725 = vst.msk [vmem:[%s10529_s29 + $0x18] sm:$0x1] %vm5721_vm15, %v5711_v62  ;;  %v5905_v57 = vrot.slane %v5891_v17, %v10509_v5 }
0x1771   : > { %5727 = vst.msk [vmem:[%s10529_s29 + $0x28] sm:$0x1] %vm5721_vm15, %v5708_v33  ;;  %5728 = vst.msk [vmem:[%s10529_s29 + $0x30] sm:$0x1] %vm5721_vm15, %v5710_v63  ;;  %v5906_v2 = vcombine.high %v5898_v29, %v5898_v29  ;;  %v5914_v21 = vrot.slane %v5898_v29, %v10509_v5  ;;  %v5822_v40 = vrot.slane %v5794_v56, %v10509_v5 }
0x1772   : > { %v5824_v13 = vcombine.high %v5808_v28, %v5808_v28  ;;  %v5825_v0 = vcombine.high %v5815_v35, %v5815_v35  ;;  %5836 = vst.msk [vmem:[%s10529_s29 + $0x9] sm:$0x1] %vm5721_vm15, %v5815_v35  ;;  %5837 = vst.msk [vmem:[%s10529_s29 + $0x11] sm:$0x1] %vm5721_vm15, %v5823_v26  ;;  %v6002_v39 = vadd.f32 %v10506_v6, %v6001_v60 }
0x1773   : > { %5839 = vst.msk [vmem:[%s10529_s29 + $0x21] sm:$0x1] %vm5721_vm15, %v5808_v28  ;;  %5729 = vst.msk [vmem:[%s10529_s29 + $0x38] sm:$0x1] %vm5721_vm15, %v5712_v41  ;;  %v5907_v36 = vcombine.high %v5905_v57, %v5905_v57  ;;  %v5921_v38 = vrot.slane %v5905_v57, %v10509_v5  ;;  %v5928_v22 = vrot.slane %v5906_v2, %v10509_v5 }
0x1774   : > { %v5936_v12 = vcombine.high %v5914_v21, %v5914_v21  ;;  %5948 = vst.msk [vmem:[%s10529_s29 + $0x2] sm:$0x1] %vm5721_vm15, %v5914_v21  ;;  %v5826_v43 = vcombine.high %v5822_v40, %v5822_v40  ;;  %5838 = vst.msk [vmem:[%s10529_s29 + $0x19] sm:$0x1] %vm5721_vm15, %v5825_v0  ;;  %v6004_v45 = vcombine.high %v6002_v39, %v6002_v39 }
0x1775   : > { %5840 = vst.msk [vmem:[%s10529_s29 + $0x29] sm:$0x1] %vm5721_vm15, %v5822_v40  ;;  %5841 = vst.msk [vmem:[%s10529_s29 + $0x31] sm:$0x1] %vm5721_vm15, %v5824_v13  ;;  %v6011_v15 = vrot.slane %v6002_v39, %v10509_v5  ;;  %v5935_v4 = vrot.slane %v5907_v36, %v10509_v5  ;;  %v5937_v55 = vcombine.high %v5921_v38, %v5921_v38 }
0x1776   : > { %v5938_v46 = vcombine.high %v5928_v22, %v5928_v22  ;;  %5949 = vst.msk [vmem:[%s10529_s29 + $0xa] sm:$0x1] %vm5721_vm15, %v5928_v22  ;;  %5950 = vst.msk [vmem:[%s10529_s29 + $0x12] sm:$0x1] %vm5721_vm15, %v5936_v12  ;;  %v6018_v44 = vrot.slane %v6004_v45, %v10509_v5 }
0x1777   : > { %5952 = vst.msk [vmem:[%s10529_s29 + $0x22] sm:$0x1] %vm5721_vm15, %v5921_v38  ;;  %5842 = vst.msk [vmem:[%s10529_s29 + $0x39] sm:$0x1] %vm5721_vm15, %v5826_v43  ;;  %v6019_v47 = vcombine.high %v6011_v15, %v6011_v15  ;;  %v6027_v50 = vrot.slane %v6011_v15, %v10509_v5  ;;  %v5939_v30 = vcombine.high %v5935_v4, %v5935_v4 }
0x1778   : > { %5951 = vst.msk [vmem:[%s10529_s29 + $0x1a] sm:$0x1] %vm5721_vm15, %v5938_v46  ;;  %5953 = vst.msk [vmem:[%s10529_s29 + $0x2a] sm:$0x1] %vm5721_vm15, %v5935_v4  ;;  %v6020_v20 = vcombine.high %v6018_v44, %v6018_v44  ;;  %v6034_v3 = vrot.slane %v6018_v44, %v10509_v5 }
0x1779   : > { %5954 = vst.msk [vmem:[%s10529_s29 + $0x32] sm:$0x1] %vm5721_vm15, %v5937_v55  ;;  %v6041_v54 = vrot.slane %v6019_v47, %v10509_v5  ;;  %v6049_v7 = vcombine.high %v6027_v50, %v6027_v50  ;;  %6061 = vst.msk [vmem:[%s10529_s29 + $0x3] sm:$0x1] %vm5721_vm15, %v6027_v50 }
0x177a   : > { %5955 = vst.msk [vmem:[%s10529_s29 + $0x3a] sm:$0x1] %vm5721_vm15, %v5939_v30  ;;  %v6048_v8 = vrot.slane %v6020_v20, %v10509_v5  ;;  %v6050_v11 = vcombine.high %v6034_v3, %v6034_v3  ;;  %6065 = vst.msk [vmem:[%s10529_s29 + $0x23] sm:$0x1] %vm5721_vm15, %v6034_v3 }
0x177b   : > { %v6051_v42 = vcombine.high %v6041_v54, %v6041_v54  ;;  %6062 = vst.msk [vmem:[%s10529_s29 + $0xb] sm:$0x1] %vm5721_vm15, %v6041_v54  ;;  %6063 = vst.msk [vmem:[%s10529_s29 + $0x13] sm:$0x1] %vm5721_vm15, %v6049_v7 }
0x177c   : > { %v6052_v18 = vcombine.high %v6048_v8, %v6048_v8  ;;  %6066 = vst.msk [vmem:[%s10529_s29 + $0x2b] sm:$0x1] %vm5721_vm15, %v6048_v8  ;;  %6067 = vst.msk [vmem:[%s10529_s29 + $0x33] sm:$0x1] %vm5721_vm15, %v6050_v11 }
0x177d   : > { %6064 = vst.msk [vmem:[%s10529_s29 + $0x1b] sm:$0x1] %vm5721_vm15, %v6051_v42 }
0x177e   : > { %6068 = vst.msk [vmem:[%s10529_s29 + $0x3b] sm:$0x1] %vm5721_vm15, %v6052_v18 }
0x17df   : > { %v6109_v52 = vpop.xlane.xlu1 %6108 }
0x17e0   : > { %v6110_v9 = vmul.f32 0.03125, %v6109_v52 }
0x17e1   : > { %v6222_v24 = vpop.xlane.xlu0 %6221 }
0x17e2   : > { %v6111_v59 = vadd.f32 1e-05, %v6110_v9  ;;  %v6223_v31 = vmul.f32 0.03125, %v6222_v24 }
0x17e3   : > { %v6335_v48 = vpop.xlane.xlu1 %6334 }
0x17e4   : > { %7548 = vrsqrt.f32 %v6111_v59  ;;  %v6224_v19 = vadd.f32 1e-05, %v6223_v31  ;;  %v6336_v32 = vmul.f32 0.03125, %v6335_v48 }
0x17e5   : > { %v6448_v16 = vpop.xlane.xlu0 %6447 }
0x17e6   : > { %7550 = vrsqrt.f32 %v6224_v19  ;;  %v6337_v1 = vadd.f32 1e-05, %v6336_v32  ;;  %v6449_v60 = vmul.f32 0.03125, %v6448_v16 }
0x17e8   : > { %7552 = vrsqrt.f32 %v6337_v1  ;;  %v6450_v37 = vadd.f32 1e-05, %v6449_v60 }
0x17ea   : > { %7554 = vrsqrt.f32 %v6450_v37 }
0x17ee   : > { %v7549_v14 = vpop.eup %7548 }
0x17ef   : > { %v6113_v61 = vmul.f32 %v7549_v14, %v10477_v23 }
0x17f0   : > { %v7551_v49 = vpop.eup %7550 }
0x17f1   : > { %v6114_v53 = vmul.f32 %v10500_v58, %v6113_v61  ;;  %v6226_v34 = vmul.f32 %v7551_v49, %v10479_v27 }
0x17f2   : > { %v7553_v10 = vpop.eup %7552 }
0x17f3   : > { %v6115_v17 = vadd.f32 %v10506_v6, %v6114_v53  ;;  %v6227_v33 = vmul.f32 %v10500_v58, %v6226_v34  ;;  %v6339_v63 = vmul.f32 %v7553_v10, %v10483_v25 }
0x17f4   : > { %v7555_v62 = vpop.eup %7554 }
0x17f5   : > { %v6117_v29 = vcombine.high %v6115_v17, %v6115_v17  ;;  %v6124_v56 = vrot.slane %v6115_v17, %v10509_v5  ;;  %v6228_v28 = vadd.f32 %v10506_v6, %v6227_v33  ;;  %v6340_v23 = vmul.f32 %v10500_v58, %v6339_v63 }
0x17f6   : > { %v6452_v35 = vmul.f32 %v7555_v62, %v10488_v51 }
0x17f7   : > { %v6131_v27 = vrot.slane %v6117_v29, %v10509_v5  ;;  %v6132_v26 = vcombine.high %v6124_v56, %v6124_v56  ;;  %v6140_v41 = vrot.slane %v6124_v56, %v10509_v5  ;;  %v6230_v57 = vcombine.high %v6228_v28, %v6228_v28 }
0x17f8   : > { %v6237_v25 = vrot.slane %v6228_v28, %v10509_v5  ;;  %v6341_v2 = vadd.f32 %v10506_v6, %v6340_v23  ;;  %v6453_v21 = vmul.f32 %v10500_v58, %v6452_v35 }
0x17f9   : > { %v6133_v40 = vcombine.high %v6131_v27, %v6131_v27  ;;  %v6147_v13 = vrot.slane %v6131_v27, %v10509_v5  ;;  %v6154_v51 = vrot.slane %v6132_v26, %v10509_v5  ;;  %v6162_v0 = vcombine.high %v6140_v41, %v6140_v41  ;;  %6174 = vst.msk [vmem:[%s10529_s29 + $0x4] sm:$0x1] %vm5721_vm15, %v6140_v41 }
0x17fa   : > { %v6244_v39 = vrot.slane %v6230_v57, %v10509_v5  ;;  %v6245_v36 = vcombine.high %v6237_v25, %v6237_v25  ;;  %v6253_v38 = vrot.slane %v6237_v25, %v10509_v5  ;;  %v6343_v22 = vcombine.high %v6341_v2, %v6341_v2 }
0x17fb   : > { %v6161_v58 = vrot.slane %v6133_v40, %v10509_v5  ;;  %v6163_v12 = vcombine.high %v6147_v13, %v6147_v13  ;;  %v6164_v43 = vcombine.high %v6154_v51, %v6154_v51  ;;  %6175 = vst.msk [vmem:[%s10529_s29 + $0xc] sm:$0x1] %vm5721_vm15, %v6154_v51  ;;  %6176 = vst.msk [vmem:[%s10529_s29 + $0x14] sm:$0x1] %vm5721_vm15, %v6162_v0 }
0x17fc   : > { %6178 = vst.msk [vmem:[%s10529_s29 + $0x24] sm:$0x1] %vm5721_vm15, %v6147_v13  ;;  %v6350_v45 = vrot.slane %v6341_v2, %v10509_v5  ;;  %v6246_v15 = vcombine.high %v6244_v39, %v6244_v39  ;;  %v6260_v4 = vrot.slane %v6244_v39, %v10509_v5  ;;  %v6267_v55 = vrot.slane %v6245_v36, %v10509_v5 }
0x17fd   : > { %v6275_v46 = vcombine.high %v6253_v38, %v6253_v38  ;;  %6287 = vst.msk [vmem:[%s10529_s29 + $0x5] sm:$0x1] %vm5721_vm15, %v6253_v38  ;;  %v6165_v44 = vcombine.high %v6161_v58, %v6161_v58  ;;  %6177 = vst.msk [vmem:[%s10529_s29 + $0x1c] sm:$0x1] %vm5721_vm15, %v6164_v43  ;;  %v6357_v47 = vrot.slane %v6343_v22, %v10509_v5 }
0x17fe   : > { %6179 = vst.msk [vmem:[%s10529_s29 + $0x2c] sm:$0x1] %vm5721_vm15, %v6161_v58  ;;  %6180 = vst.msk [vmem:[%s10529_s29 + $0x34] sm:$0x1] %vm5721_vm15, %v6163_v12  ;;  %v6358_v50 = vcombine.high %v6350_v45, %v6350_v45  ;;  %v6366_v30 = vrot.slane %v6350_v45, %v10509_v5  ;;  %v6274_v20 = vrot.slane %v6246_v15, %v10509_v5 }
0x17ff   : > { %v6276_v3 = vcombine.high %v6260_v4, %v6260_v4  ;;  %v6277_v54 = vcombine.high %v6267_v55, %v6267_v55  ;;  %6288 = vst.msk [vmem:[%s10529_s29 + $0xd] sm:$0x1] %vm5721_vm15, %v6267_v55  ;;  %6289 = vst.msk [vmem:[%s10529_s29 + $0x15] sm:$0x1] %vm5721_vm15, %v6275_v46  ;;  %v6454_v7 = vadd.f32 %v10506_v6, %v6453_v21 }
0x1800   : > { %6291 = vst.msk [vmem:[%s10529_s29 + $0x25] sm:$0x1] %vm5721_vm15, %v6260_v4  ;;  %6181 = vst.msk [vmem:[%s10529_s29 + $0x3c] sm:$0x1] %vm5721_vm15, %v6165_v44  ;;  %v6359_v8 = vcombine.high %v6357_v47, %v6357_v47  ;;  %v6373_v11 = vrot.slane %v6357_v47, %v10509_v5  ;;  %v6380_v42 = vrot.slane %v6358_v50, %v10509_v5 }
0x1801   : > { %v6388_v18 = vcombine.high %v6366_v30, %v6366_v30  ;;  %6400 = vst.msk [vmem:[%s10529_s29 + $0x6] sm:$0x1] %vm5721_vm15, %v6366_v30  ;;  %v6278_v52 = vcombine.high %v6274_v20, %v6274_v20  ;;  %6290 = vst.msk [vmem:[%s10529_s29 + $0x1d] sm:$0x1] %vm5721_vm15, %v6277_v54  ;;  %v6456_v6 = vcombine.high %v6454_v7, %v6454_v7 }
0x1802   : > { %6292 = vst.msk [vmem:[%s10529_s29 + $0x2d] sm:$0x1] %vm5721_vm15, %v6274_v20  ;;  %6293 = vst.msk [vmem:[%s10529_s29 + $0x35] sm:$0x1] %vm5721_vm15, %v6276_v3  ;;  %v6463_v9 = vrot.slane %v6454_v7, %v10509_v5  ;;  %v6387_v24 = vrot.slane %v6359_v8, %v10509_v5  ;;  %v6389_v59 = vcombine.high %v6373_v11, %v6373_v11 }
0x1803   : > { %v6390_v31 = vcombine.high %v6380_v42, %v6380_v42  ;;  %6401 = vst.msk [vmem:[%s10529_s29 + $0xe] sm:$0x1] %vm5721_vm15, %v6380_v42  ;;  %6402 = vst.msk [vmem:[%s10529_s29 + $0x16] sm:$0x1] %vm5721_vm15, %v6388_v18  ;;  %v6470_v48 = vrot.slane %v6456_v6, %v10509_v5 }
0x1804   : > { %6404 = vst.msk [vmem:[%s10529_s29 + $0x26] sm:$0x1] %vm5721_vm15, %v6373_v11  ;;  %6294 = vst.msk [vmem:[%s10529_s29 + $0x3d] sm:$0x1] %vm5721_vm15, %v6278_v52  ;;  %v6471_v19 = vcombine.high %v6463_v9, %v6463_v9  ;;  %v6479_v32 = vrot.slane %v6463_v9, %v10509_v5  ;;  %v6391_v16 = vcombine.high %v6387_v24, %v6387_v24 }
0x1805   : > { %6403 = vst.msk [vmem:[%s10529_s29 + $0x1e] sm:$0x1] %vm5721_vm15, %v6390_v31  ;;  %6405 = vst.msk [vmem:[%s10529_s29 + $0x2e] sm:$0x1] %vm5721_vm15, %v6387_v24  ;;  %v6472_v1 = vcombine.high %v6470_v48, %v6470_v48  ;;  %v6486_v60 = vrot.slane %v6470_v48, %v10509_v5 }
0x1806   : > { %6406 = vst.msk [vmem:[%s10529_s29 + $0x36] sm:$0x1] %vm5721_vm15, %v6389_v59  ;;  %v6493_v37 = vrot.slane %v6471_v19, %v10509_v5  ;;  %v6501_v14 = vcombine.high %v6479_v32, %v6479_v32  ;;  %6513 = vst.msk [vmem:[%s10529_s29 + $0x7] sm:$0x1] %vm5721_vm15, %v6479_v32 }
0x1807   : > { %6407 = vst.msk [vmem:[%s10529_s29 + $0x3e] sm:$0x1] %vm5721_vm15, %v6391_v16  ;;  %v6500_v61 = vrot.slane %v6472_v1, %v10509_v5  ;;  %v6502_v49 = vcombine.high %v6486_v60, %v6486_v60  ;;  %6517 = vst.msk [vmem:[%s10529_s29 + $0x27] sm:$0x1] %vm5721_vm15, %v6486_v60 }
0x1808   : > { %v6503_v53 = vcombine.high %v6493_v37, %v6493_v37  ;;  %6514 = vst.msk [vmem:[%s10529_s29 + $0xf] sm:$0x1] %vm5721_vm15, %v6493_v37  ;;  %6515 = vst.msk [vmem:[%s10529_s29 + $0x17] sm:$0x1] %vm5721_vm15, %v6501_v14 }
0x1809   : > { %v6504_v5 = vcombine.high %v6500_v61, %v6500_v61  ;;  %6518 = vst.msk [vmem:[%s10529_s29 + $0x2f] sm:$0x1] %vm5721_vm15, %v6500_v61  ;;  %6519 = vst.msk [vmem:[%s10529_s29 + $0x37] sm:$0x1] %vm5721_vm15, %v6502_v49 }
0x180a   : > { %6516 = vst.msk [vmem:[%s10529_s29 + $0x1f] sm:$0x1] %vm5721_vm15, %v6503_v53 }
0x180b   : > { %6520 = vst.msk [vmem:[%s10529_s29 + $0x3f] sm:$0x1] %vm5721_vm15, %v6504_v5 }
0x180c   : > { %7607 = shalt.err (!%p7604_p5)
}
0x180d   : > { %s7608_s29 = scalar_lea.hbm %s10711_s24, 1024  ;;  %s7612_s30 = scalar_lea.hbm %s10776_s10, 2048 }
0x180e   : > { %p7609_p7 = scmp.ne.s32.totalorder %s10711_s24, %s7608_s29  ;;  %p7613_p0 = scmp.lt.u32.totalorder %s10711_s24, %s10776_s10 }
0x180f   : > { %p7614_p2 = scmp.lt.u32.totalorder %s7612_s30, %s7608_s29  ;;  %p7616_p11 = scmp.lt.u32.totalorder %s7608_s29, %s10711_s24 }
0x1810   : > { %p7610_p8 = pnand %p7609_p7, %p11121_p12 }
0x1811   : > { %p7615_p6 = por %p7614_p2, %p7613_p0 }
0x1812   : > { %p7611_p9 = pneg %p7610_p8 }
0x1813   : > { %p7617_p13 = por %p7616_p11, %p7615_p6 }
0x1815   : > { %p7618_p4 = pnand %p7617_p13, %p7611_p9 }
0x1817   : > { %7621 = shalt.err (!%p7618_p4)
}
0x1818   : > { %s7680_s11 = smov 128   ;;  %s7681_s21 = smov 256  }
0x1819   : > { %7278 = dma.vmem_to_hbm [thread:$0]  (%p11121_p12), %s10713_s22, 1024, %s10711_s24, %s6522_s17, %s7680_s11, %s7681_s21, %s7677_s20  }
0x181a PF: > { %s6549_s23 = sand.u32 1, %s7648_s13   ;;  %p11122_p10 = scmp.ne.s32.totalorder %s10881_s26, 0 }
0x181b   : > { %p11123_p1 = scmp.ge.s32.totalorder %s7660_s16, 2  ;;  %s6550_s29 = scalar_lea.sflag [#allocation4], %s6549_s23 }
0x181d   : > { %p7285_p3 = pnand %p11123_p1, %p11122_p10 }
0x181f   : > { %7643 = dma.done.wait (!%p7285_p3), %s6550_s29, 1024  }
0x1820   : > { %7645 = vsyncadd (!%p7285_p3), %s6550_s29, 4294966272  ;;  %s11124_s28 = sld [smem:[#allocation8_spill]]  ;;  %p23_p5 = scmp.ge.s32.totalorder %s7762_s19, 4  }
0x1821   : > { %s11125_s13 = smov %s7652_s14  ;;  %s11126_s14 = smov %s7656_s15 }
0x1822   : > { %s11128_s16 = smov %s7762_s19  ;;  %25 = sbr.rel (!%p23_p5) target bundleno = 5 (0x5), region = 108 }
0x1826   : > { %s11127_s15 = smov %s11124_s28 }
0x1829   :  { %6555 = vsyncpa [#allocation3], 1 }
0x182a   :  { %6557 = vsyncpa [#allocation3 + $0x1], 1 }
0x182b   :  { %6558 = vsyncpa [#allocation4], 1 }
0x182c   :  { %6560 = vsyncpa [#allocation4 + $0x1], 1 }

</bundles_post_ra>
